<compile_context>
chip_gen: v7x
topology: tpu7x:2x2x1
jax: 0.10.0
libtpu: 0.0.40
codegen_flags: <defaults>
</compile_context>

<pallas_src>
import jax
import jax.numpy as jnp
from jax.experimental import pallas as pl
from jax.experimental.pallas import tpu as pltpu


# -----------------------------------------------------------------------------
# Kernel 1: fused bidirectional multi-layer LSTM + attention pooling.
# Activations are time-major 2-D: row index = t * B + b.
# Gate order matches PyTorch: i, f, g, o along the 4H axis.
# -----------------------------------------------------------------------------
def make_lstm_attn_kernel(num_layers, T, B, H):
    H4 = 4 * H

    def kernel(*args):
        x0_ref = args[0]                                    # (T*B, D) f32
        layers = [args[1 + 6 * l: 1 + 6 * (l + 1)] for l in range(num_layers)]
        wa_ref = args[1 + 6 * num_layers]                   # (1, 2H) f32
        ba_ref = args[2 + 6 * num_layers]                   # (1, 1)  f32
        pooled_ref = args[3 + 6 * num_layers]               # (B, 2H) f32 out
        ybuf = args[4 + 6 * num_layers]                     # (T*B, 2H) scratch

        def run_dir(x_in, wih_ref, whh_ref, b_ref, reverse, off):
            # Hoisted: one big input->gate matmul for the whole sequence,
            # bias folded in.  (T*B, in_dim) x (in_dim, 4H) -> (T*B, 4H) f32.
            xg = jnp.dot(x_in, wih_ref[...],
                         preferred_element_type=jnp.float32) + b_ref[...]
            whh = whh_ref[...]                              # (H, 4H) bf16, hoisted
            h = jnp.zeros((B, H), jnp.float32)
            c = jnp.zeros((B, H), jnp.float32)
            for s in range(T):                              # unrolled (T static)
                t = (T - 1 - s) if reverse else s
                g = xg[t * B:(t + 1) * B, :] + jnp.dot(
                    h.astype(jnp.bfloat16), whh,
                    preferred_element_type=jnp.float32)     # (B, 4H)
                i_g = jax.nn.sigmoid(g[:, 0:H])
                f_g = jax.nn.sigmoid(g[:, H:2 * H])
                g_g = jnp.tanh(g[:, 2 * H:3 * H])
                o_g = jax.nn.sigmoid(g[:, 3 * H:4 * H])
                c = f_g * c + i_g * g_g
                h = o_g * jnp.tanh(c)
                ybuf[t * B:(t + 1) * B, off:off + H] = h    # aligned full-tile store

        x_in = x0_ref[...].astype(jnp.bfloat16)             # layer-0 input
        for l in range(num_layers):
            wih_f, whh_f, b_f, wih_b, whh_b, b_b = layers[l]
            run_dir(x_in, wih_f, whh_f, b_f, False, 0)      # forward direction
            run_dir(x_in, wih_b, whh_b, b_b, True, H)       # backward direction
            if l + 1 < num_layers:
                x_in = ybuf[...].astype(jnp.bfloat16)       # stays in VMEM

        # Attention: scores = lstm_out @ wa^T + ba, softmax over T per batch,
        # weighted pooling over T.  All static row-block slices, unrolled.
        lstm_out = ybuf[...]                                 # (T*B, 2H) f32
        scores = jnp.sum(lstm_out * wa_ref[...], axis=-1,
                         keepdims=True) + ba_ref[...]        # (T*B, 1)
        m = scores[0:B, :]
        for t in range(1, T):
            m = jnp.maximum(m, scores[t * B:(t + 1) * B, :])
        denom = jnp.zeros((B, 1), jnp.float32)
        pooled = jnp.zeros((B, 2 * H), jnp.float32)
        for t in range(T):
            e_t = jnp.exp(scores[t * B:(t + 1) * B, :] - m)  # (B, 1)
            denom = denom + e_t
            pooled = pooled + e_t * lstm_out[t * B:(t + 1) * B, :]
        pooled_ref[...] = pooled * pl.reciprocal(denom, approx=True)

    return kernel


def run_lstm_attn(x0, lstm_layers, wa, ba, T, B):
    H = lstm_layers[0][1].shape[0]          # whh: (H, 4H)
    num_layers = len(lstm_layers)
    flat = [w for layer in lstm_layers for w in layer]
    n_in = 1 + len(flat) + 2
    kernel = make_lstm_attn_kernel(num_layers, T, B, H)
    return pl.pallas_call(
        kernel,
        out_shape=jax.ShapeDtypeStruct((B, 2 * H), jnp.float32),
        in_specs=[pl.BlockSpec(memory_space=pltpu.MemorySpace.VMEM)] * n_in,
        out_specs=pl.BlockSpec(memory_space=pltpu.MemorySpace.VMEM),
        scratch_shapes=[pltpu.VMEM((T * B, 2 * H), jnp.float32)],
    )(x0, *flat, wa, ba)


# -----------------------------------------------------------------------------
# Kernel 2: final vocab projection, tiled over V (lane-dense output, weight
# tile DMA pipelined under the MXU, "parallel" axis for megacore on v7x).
# -----------------------------------------------------------------------------
def fc_kernel(pooled_ref, wf_ref, bf_ref, out_ref):
    out_ref[...] = (
        jnp.dot(pooled_ref[...].astype(jnp.bfloat16), wf_ref[...],
                preferred_element_type=jnp.float32)
        + bf_ref[...]
    )


def run_fc(pooled, wf, bf, tn=128):
    B, H2 = pooled.shape
    V = wf.shape[1]
    if V % tn != 0:
        tn = V
    return pl.pallas_call(
        fc_kernel,
        out_shape=jax.ShapeDtypeStruct((B, V), jnp.float32),
        grid_spec=pltpu.PrefetchScalarGridSpec(
            num_scalar_prefetch=0,
            grid=(V // tn,),
            in_specs=[pl.BlockSpec((B, H2), lambda j: (0, 0)),
                      pl.BlockSpec((H2, tn), lambda j: (0, j)),
                      pl.BlockSpec((1, tn), lambda j: (0, j))],
            out_specs=pl.BlockSpec((B, tn), lambda j: (0, j))),
        compiler_params=pltpu.CompilerParams(
            dimension_semantics=("parallel",)),
    )(pooled, wf, bf)


# -----------------------------------------------------------------------------
# Parameter init (deterministic, synthetic — shapes follow the PyTorch module;
# LSTM weights stored fused/transposed and in bf16 for the MXU).
# -----------------------------------------------------------------------------
def init_params(key, vocab_size, embed_dim, hidden_dim, num_layers):
    H = hidden_dim
    keys = iter(jax.random.split(key, 5 + 8 * num_layers))
    scale = float(H) ** -0.5

    def uniform(shape, s, dtype=jnp.float32):
        return jax.random.uniform(next(keys), shape, jnp.float32,
                                  -s, s).astype(dtype)

    params = {
        # stand-in for pretrained_model(...).last_hidden_state
        "embed": uniform((vocab_size, embed_dim), 0.1),
        "lstm": [],
        # attention = nn.Linear(2H, 1)
        "wa": uniform((1, 2 * H), scale),
        "ba": uniform((1, 1), scale),
        # fc = nn.Linear(2H, vocab_size), stored transposed (2H, V) in bf16
        "wf": uniform((2 * H, vocab_size), scale, jnp.bfloat16),
        "bf": uniform((1, vocab_size), scale),
    }
    for layer in range(num_layers):
        in_dim = embed_dim if layer == 0 else 2 * H
        layer_params = []
        for _ in ("fwd", "bwd"):
            wih = uniform((in_dim, 4 * H), scale, jnp.bfloat16)   # (in, 4H)
            whh = uniform((H, 4 * H), scale, jnp.bfloat16)        # (H, 4H)
            b = uniform((1, 4 * H), scale) + uniform((1, 4 * H), scale)  # b_ih+b_hh
            layer_params += [wih, whh, b]
        params["lstm"].append(tuple(layer_params))
    return params


# -----------------------------------------------------------------------------
# Full forward (mirrors TextGenerator.forward)
# -----------------------------------------------------------------------------
@jax.jit
def text_generator_forward(params, input_ids):
    B, T = input_ids.shape
    # "pretrained model" stand-in: deterministic embedding lookup (B, T, D)
    emb = jnp.take(params["embed"], input_ids, axis=0)
    # time-major rows (row = t*B + b) for the fused kernel
    x0 = jnp.transpose(emb, (1, 0, 2)).reshape(T * B, emb.shape[-1])
    pooled = run_lstm_attn(x0, params["lstm"], params["wa"], params["ba"], T, B)
    return run_fc(pooled, params["wf"], params["bf"])        # (B, V) logits


if __name__ == "__main__":
    B, T = 8, 8
    vocab_size, embed_dim, hidden_dim, num_layers = 512, 128, 128, 2

    key = jax.random.PRNGKey(0)
    pkey, dkey = jax.random.split(key)
    params = init_params(pkey, vocab_size, embed_dim, hidden_dim, num_layers)
    input_ids = jax.random.randint(dkey, (B, T), 0, vocab_size, dtype=jnp.int32)

    logits = text_generator_forward(params, input_ids)
    jax.block_until_ready(logits)

    assert logits.shape == (B, vocab_size), logits.shape
    assert bool(jnp.all(jnp.isfinite(logits)))
    print("KERNEL_OK")
</pallas_src>

<mosaic_0001>
module attributes {stable_mosaic.version = 11 : i64} {
  func.func @kernel(%arg0: memref<64x128xf32, #tpu.memory_space<vmem>>, %arg1: memref<128x512xbf16, #tpu.memory_space<vmem>>, %arg2: memref<128x512xbf16, #tpu.memory_space<vmem>>, %arg3: memref<1x512xf32, #tpu.memory_space<vmem>>, %arg4: memref<128x512xbf16, #tpu.memory_space<vmem>>, %arg5: memref<128x512xbf16, #tpu.memory_space<vmem>>, %arg6: memref<1x512xf32, #tpu.memory_space<vmem>>, %arg7: memref<256x512xbf16, #tpu.memory_space<vmem>>, %arg8: memref<128x512xbf16, #tpu.memory_space<vmem>>, %arg9: memref<1x512xf32, #tpu.memory_space<vmem>>, %arg10: memref<256x512xbf16, #tpu.memory_space<vmem>>, %arg11: memref<128x512xbf16, #tpu.memory_space<vmem>>, %arg12: memref<1x512xf32, #tpu.memory_space<vmem>>, %arg13: memref<1x256xf32, #tpu.memory_space<vmem>>, %arg14: memref<1x1xf32, #tpu.memory_space<vmem>>, %arg15: memref<8x256xf32, #tpu.memory_space<vmem>>, %arg16: memref<64x256xf32, #tpu.memory_space<vmem>>) attributes {dimension_semantics = [], scalar_prefetch = 0 : i64, scratch_operands = 1 : i64, tpu.core_type = #tpu.core_type<tc>} {
    %c0 = arith.constant 0 : index
    %c0_0 = arith.constant 0 : index
    %0 = vector.load %arg0[%c0, %c0_0] : memref<64x128xf32, #tpu.memory_space<vmem>>, vector<64x128xf32>
    %1 = arith.truncf %0 : vector<64x128xf32> to vector<64x128xbf16>
    %c0_1 = arith.constant 0 : index
    %c0_2 = arith.constant 0 : index
    %2 = vector.load %arg1[%c0_1, %c0_2] : memref<128x512xbf16, #tpu.memory_space<vmem>>, vector<128x512xbf16>
    %cst = arith.constant dense<0.000000e+00> : vector<64x512xf32>
    %3 = tpu.matmul %1, %2, %cst {dimension_numbers = #tpu.dot_dimension_numbers<[1], [0], [0], [1], [0, 0, 1, 1], [], []>} : vector<64x128xbf16>, vector<128x512xbf16>, vector<64x512xf32> -> vector<64x512xf32>
    %c0_3 = arith.constant 0 : index
    %c0_4 = arith.constant 0 : index
    %4 = vector.load %arg3[%c0_3, %c0_4] : memref<1x512xf32, #tpu.memory_space<vmem>>, vector<1x512xf32>
    %5 = vector.broadcast %4 : vector<1x512xf32> to vector<64x512xf32>
    %6 = arith.addf %3, %5 : vector<64x512xf32>
    %c0_5 = arith.constant 0 : index
    %c0_6 = arith.constant 0 : index
    %7 = vector.load %arg2[%c0_5, %c0_6] : memref<128x512xbf16, #tpu.memory_space<vmem>>, vector<128x512xbf16>
    %cst_7 = arith.constant 0.000000e+00 : f32
    %8 = vector.broadcast %cst_7 : f32 to vector<8x128xf32>
    %cst_8 = arith.constant 0.000000e+00 : f32
    %9 = vector.broadcast %cst_8 : f32 to vector<8x128xf32>
    %10 = vector.extract_strided_slice %6 {offsets = [0, 0], sizes = [8, 512], strides = [1, 1]} : vector<64x512xf32> to vector<8x512xf32>
    %11 = arith.truncf %8 : vector<8x128xf32> to vector<8x128xbf16>
    %cst_9 = arith.constant dense<0.000000e+00> : vector<8x512xf32>
    %12 = tpu.matmul %11, %7, %cst_9 {dimension_numbers = #tpu.dot_dimension_numbers<[1], [0], [0], [1], [0, 0, 1, 1], [], []>} : vector<8x128xbf16>, vector<128x512xbf16>, vector<8x512xf32> -> vector<8x512xf32>
    %13 = arith.addf %10, %12 : vector<8x512xf32>
    %14 = vector.extract_strided_slice %13 {offsets = [0, 0], sizes = [8, 128], strides = [1, 1]} : vector<8x512xf32> to vector<8x128xf32>
    %15 = arith.negf %14 : vector<8x128xf32>
    %16 = math.exp %15 : vector<8x128xf32>
    %cst_10 = arith.constant 1.000000e+00 : f32
    %17 = vector.broadcast %cst_10 : f32 to vector<8x128xf32>
    %18 = arith.addf %17, %16 : vector<8x128xf32>
    %19 = arith.divf %17, %18 : vector<8x128xf32>
    %20 = vector.extract_strided_slice %13 {offsets = [0, 128], sizes = [8, 128], strides = [1, 1]} : vector<8x512xf32> to vector<8x128xf32>
    %21 = arith.negf %20 : vector<8x128xf32>
    %22 = math.exp %21 : vector<8x128xf32>
    %cst_11 = arith.constant 1.000000e+00 : f32
    %23 = vector.broadcast %cst_11 : f32 to vector<8x128xf32>
    %24 = arith.addf %23, %22 : vector<8x128xf32>
    %25 = arith.divf %23, %24 : vector<8x128xf32>
    %26 = vector.extract_strided_slice %13 {offsets = [0, 256], sizes = [8, 128], strides = [1, 1]} : vector<8x512xf32> to vector<8x128xf32>
    %27 = math.tanh %26 : vector<8x128xf32>
    %28 = vector.extract_strided_slice %13 {offsets = [0, 384], sizes = [8, 128], strides = [1, 1]} : vector<8x512xf32> to vector<8x128xf32>
    %29 = arith.negf %28 : vector<8x128xf32>
    %30 = math.exp %29 : vector<8x128xf32>
    %cst_12 = arith.constant 1.000000e+00 : f32
    %31 = vector.broadcast %cst_12 : f32 to vector<8x128xf32>
    %32 = arith.addf %31, %30 : vector<8x128xf32>
    %33 = arith.divf %31, %32 : vector<8x128xf32>
    %34 = arith.mulf %25, %9 : vector<8x128xf32>
    %35 = arith.mulf %19, %27 : vector<8x128xf32>
    %36 = arith.addf %34, %35 : vector<8x128xf32>
    %37 = math.tanh %36 : vector<8x128xf32>
    %38 = arith.mulf %33, %37 : vector<8x128xf32>
    %c0_13 = arith.constant 0 : index
    %c0_14 = arith.constant 0 : index
    %39 = vector.load %arg16[%c0_13, %c0_14] : memref<64x256xf32, #tpu.memory_space<vmem>>, vector<8x128xf32>
    tpu.vector_store %arg16[%c0_13, %c0_14], %38 {strides = array<i32>} : memref<64x256xf32, #tpu.memory_space<vmem>>, vector<8x128xf32>,
    %40 = vector.extract_strided_slice %6 {offsets = [8, 0], sizes = [8, 512], strides = [1, 1]} : vector<64x512xf32> to vector<8x512xf32>
    %41 = arith.truncf %38 : vector<8x128xf32> to vector<8x128xbf16>
    %cst_15 = arith.constant dense<0.000000e+00> : vector<8x512xf32>
    %42 = tpu.matmul %41, %7, %cst_15 {dimension_numbers = #tpu.dot_dimension_numbers<[1], [0], [0], [1], [0, 0, 1, 1], [], []>} : vector<8x128xbf16>, vector<128x512xbf16>, vector<8x512xf32> -> vector<8x512xf32>
    %43 = arith.addf %40, %42 : vector<8x512xf32>
    %44 = vector.extract_strided_slice %43 {offsets = [0, 0], sizes = [8, 128], strides = [1, 1]} : vector<8x512xf32> to vector<8x128xf32>
    %45 = arith.negf %44 : vector<8x128xf32>
    %46 = math.exp %45 : vector<8x128xf32>
    %cst_16 = arith.constant 1.000000e+00 : f32
    %47 = vector.broadcast %cst_16 : f32 to vector<8x128xf32>
    %48 = arith.addf %47, %46 : vector<8x128xf32>
    %49 = arith.divf %47, %48 : vector<8x128xf32>
    %50 = vector.extract_strided_slice %43 {offsets = [0, 128], sizes = [8, 128], strides = [1, 1]} : vector<8x512xf32> to vector<8x128xf32>
    %51 = arith.negf %50 : vector<8x128xf32>
    %52 = math.exp %51 : vector<8x128xf32>
    %cst_17 = arith.constant 1.000000e+00 : f32
    %53 = vector.broadcast %cst_17 : f32 to vector<8x128xf32>
    %54 = arith.addf %53, %52 : vector<8x128xf32>
    %55 = arith.divf %53, %54 : vector<8x128xf32>
    %56 = vector.extract_strided_slice %43 {offsets = [0, 256], sizes = [8, 128], strides = [1, 1]} : vector<8x512xf32> to vector<8x128xf32>
    %57 = math.tanh %56 : vector<8x128xf32>
    %58 = vector.extract_strided_slice %43 {offsets = [0, 384], sizes = [8, 128], strides = [1, 1]} : vector<8x512xf32> to vector<8x128xf32>
    %59 = arith.negf %58 : vector<8x128xf32>
    %60 = math.exp %59 : vector<8x128xf32>
    %cst_18 = arith.constant 1.000000e+00 : f32
    %61 = vector.broadcast %cst_18 : f32 to vector<8x128xf32>
    %62 = arith.addf %61, %60 : vector<8x128xf32>
    %63 = arith.divf %61, %62 : vector<8x128xf32>
    %64 = arith.mulf %55, %36 : vector<8x128xf32>
    %65 = arith.mulf %49, %57 : vector<8x128xf32>
    %66 = arith.addf %64, %65 : vector<8x128xf32>
    %67 = math.tanh %66 : vector<8x128xf32>
    %68 = arith.mulf %63, %67 : vector<8x128xf32>
    %c8 = arith.constant 8 : index
    %c0_19 = arith.constant 0 : index
    %69 = vector.load %arg16[%c8, %c0_19] : memref<64x256xf32, #tpu.memory_space<vmem>>, vector<8x128xf32>
    tpu.vector_store %arg16[%c8, %c0_19], %68 {strides = array<i32>} : memref<64x256xf32, #tpu.memory_space<vmem>>, vector<8x128xf32>,
    %70 = vector.extract_strided_slice %6 {offsets = [16, 0], sizes = [8, 512], strides = [1, 1]} : vector<64x512xf32> to vector<8x512xf32>
    %71 = arith.truncf %68 : vector<8x128xf32> to vector<8x128xbf16>
    %cst_20 = arith.constant dense<0.000000e+00> : vector<8x512xf32>
    %72 = tpu.matmul %71, %7, %cst_20 {dimension_numbers = #tpu.dot_dimension_numbers<[1], [0], [0], [1], [0, 0, 1, 1], [], []>} : vector<8x128xbf16>, vector<128x512xbf16>, vector<8x512xf32> -> vector<8x512xf32>
    %73 = arith.addf %70, %72 : vector<8x512xf32>
    %74 = vector.extract_strided_slice %73 {offsets = [0, 0], sizes = [8, 128], strides = [1, 1]} : vector<8x512xf32> to vector<8x128xf32>
    %75 = arith.negf %74 : vector<8x128xf32>
    %76 = math.exp %75 : vector<8x128xf32>
    %cst_21 = arith.constant 1.000000e+00 : f32
    %77 = vector.broadcast %cst_21 : f32 to vector<8x128xf32>
    %78 = arith.addf %77, %76 : vector<8x128xf32>
    %79 = arith.divf %77, %78 : vector<8x128xf32>
    %80 = vector.extract_strided_slice %73 {offsets = [0, 128], sizes = [8, 128], strides = [1, 1]} : vector<8x512xf32> to vector<8x128xf32>
    %81 = arith.negf %80 : vector<8x128xf32>
    %82 = math.exp %81 : vector<8x128xf32>
    %cst_22 = arith.constant 1.000000e+00 : f32
    %83 = vector.broadcast %cst_22 : f32 to vector<8x128xf32>
    %84 = arith.addf %83, %82 : vector<8x128xf32>
    %85 = arith.divf %83, %84 : vector<8x128xf32>
    %86 = vector.extract_strided_slice %73 {offsets = [0, 256], sizes = [8, 128], strides = [1, 1]} : vector<8x512xf32> to vector<8x128xf32>
    %87 = math.tanh %86 : vector<8x128xf32>
    %88 = vector.extract_strided_slice %73 {offsets = [0, 384], sizes = [8, 128], strides = [1, 1]} : vector<8x512xf32> to vector<8x128xf32>
    %89 = arith.negf %88 : vector<8x128xf32>
    %90 = math.exp %89 : vector<8x128xf32>
    %cst_23 = arith.constant 1.000000e+00 : f32
    %91 = vector.broadcast %cst_23 : f32 to vector<8x128xf32>
    %92 = arith.addf %91, %90 : vector<8x128xf32>
    %93 = arith.divf %91, %92 : vector<8x128xf32>
    %94 = arith.mulf %85, %66 : vector<8x128xf32>
    %95 = arith.mulf %79, %87 : vector<8x128xf32>
    %96 = arith.addf %94, %95 : vector<8x128xf32>
    %97 = math.tanh %96 : vector<8x128xf32>
    %98 = arith.mulf %93, %97 : vector<8x128xf32>
    %c16 = arith.constant 16 : index
    %c0_24 = arith.constant 0 : index
    %99 = vector.load %arg16[%c16, %c0_24] : memref<64x256xf32, #tpu.memory_space<vmem>>, vector<8x128xf32>
    tpu.vector_store %arg16[%c16, %c0_24], %98 {strides = array<i32>} : memref<64x256xf32, #tpu.memory_space<vmem>>, vector<8x128xf32>,
    %100 = vector.extract_strided_slice %6 {offsets = [24, 0], sizes = [8, 512], strides = [1, 1]} : vector<64x512xf32> to vector<8x512xf32>
    %101 = arith.truncf %98 : vector<8x128xf32> to vector<8x128xbf16>
    %cst_25 = arith.constant dense<0.000000e+00> : vector<8x512xf32>
    %102 = tpu.matmul %101, %7, %cst_25 {dimension_numbers = #tpu.dot_dimension_numbers<[1], [0], [0], [1], [0, 0, 1, 1], [], []>} : vector<8x128xbf16>, vector<128x512xbf16>, vector<8x512xf32> -> vector<8x512xf32>
    %103 = arith.addf %100, %102 : vector<8x512xf32>
    %104 = vector.extract_strided_slice %103 {offsets = [0, 0], sizes = [8, 128], strides = [1, 1]} : vector<8x512xf32> to vector<8x128xf32>
    %105 = arith.negf %104 : vector<8x128xf32>
    %106 = math.exp %105 : vector<8x128xf32>
    %cst_26 = arith.constant 1.000000e+00 : f32
    %107 = vector.broadcast %cst_26 : f32 to vector<8x128xf32>
    %108 = arith.addf %107, %106 : vector<8x128xf32>
    %109 = arith.divf %107, %108 : vector<8x128xf32>
    %110 = vector.extract_strided_slice %103 {offsets = [0, 128], sizes = [8, 128], strides = [1, 1]} : vector<8x512xf32> to vector<8x128xf32>
    %111 = arith.negf %110 : vector<8x128xf32>
    %112 = math.exp %111 : vector<8x128xf32>
    %cst_27 = arith.constant 1.000000e+00 : f32
    %113 = vector.broadcast %cst_27 : f32 to vector<8x128xf32>
    %114 = arith.addf %113, %112 : vector<8x128xf32>
    %115 = arith.divf %113, %114 : vector<8x128xf32>
    %116 = vector.extract_strided_slice %103 {offsets = [0, 256], sizes = [8, 128], strides = [1, 1]} : vector<8x512xf32> to vector<8x128xf32>
    %117 = math.tanh %116 : vector<8x128xf32>
    %118 = vector.extract_strided_slice %103 {offsets = [0, 384], sizes = [8, 128], strides = [1, 1]} : vector<8x512xf32> to vector<8x128xf32>
    %119 = arith.negf %118 : vector<8x128xf32>
    %120 = math.exp %119 : vector<8x128xf32>
    %cst_28 = arith.constant 1.000000e+00 : f32
    %121 = vector.broadcast %cst_28 : f32 to vector<8x128xf32>
    %122 = arith.addf %121, %120 : vector<8x128xf32>
    %123 = arith.divf %121, %122 : vector<8x128xf32>
    %124 = arith.mulf %115, %96 : vector<8x128xf32>
    %125 = arith.mulf %109, %117 : vector<8x128xf32>
    %126 = arith.addf %124, %125 : vector<8x128xf32>
    %127 = math.tanh %126 : vector<8x128xf32>
    %128 = arith.mulf %123, %127 : vector<8x128xf32>
    %c24 = arith.constant 24 : index
    %c0_29 = arith.constant 0 : index
    %129 = vector.load %arg16[%c24, %c0_29] : memref<64x256xf32, #tpu.memory_space<vmem>>, vector<8x128xf32>
    tpu.vector_store %arg16[%c24, %c0_29], %128 {strides = array<i32>} : memref<64x256xf32, #tpu.memory_space<vmem>>, vector<8x128xf32>,
    %130 = vector.extract_strided_slice %6 {offsets = [32, 0], sizes = [8, 512], strides = [1, 1]} : vector<64x512xf32> to vector<8x512xf32>
    %131 = arith.truncf %128 : vector<8x128xf32> to vector<8x128xbf16>
    %cst_30 = arith.constant dense<0.000000e+00> : vector<8x512xf32>
    %132 = tpu.matmul %131, %7, %cst_30 {dimension_numbers = #tpu.dot_dimension_numbers<[1], [0], [0], [1], [0, 0, 1, 1], [], []>} : vector<8x128xbf16>, vector<128x512xbf16>, vector<8x512xf32> -> vector<8x512xf32>
    %133 = arith.addf %130, %132 : vector<8x512xf32>
    %134 = vector.extract_strided_slice %133 {offsets = [0, 0], sizes = [8, 128], strides = [1, 1]} : vector<8x512xf32> to vector<8x128xf32>
    %135 = arith.negf %134 : vector<8x128xf32>
    %136 = math.exp %135 : vector<8x128xf32>
    %cst_31 = arith.constant 1.000000e+00 : f32
    %137 = vector.broadcast %cst_31 : f32 to vector<8x128xf32>
    %138 = arith.addf %137, %136 : vector<8x128xf32>
    %139 = arith.divf %137, %138 : vector<8x128xf32>
    %140 = vector.extract_strided_slice %133 {offsets = [0, 128], sizes = [8, 128], strides = [1, 1]} : vector<8x512xf32> to vector<8x128xf32>
    %141 = arith.negf %140 : vector<8x128xf32>
    %142 = math.exp %141 : vector<8x128xf32>
    %cst_32 = arith.constant 1.000000e+00 : f32
    %143 = vector.broadcast %cst_32 : f32 to vector<8x128xf32>
    %144 = arith.addf %143, %142 : vector<8x128xf32>
    %145 = arith.divf %143, %144 : vector<8x128xf32>
    %146 = vector.extract_strided_slice %133 {offsets = [0, 256], sizes = [8, 128], strides = [1, 1]} : vector<8x512xf32> to vector<8x128xf32>
    %147 = math.tanh %146 : vector<8x128xf32>
    %148 = vector.extract_strided_slice %133 {offsets = [0, 384], sizes = [8, 128], strides = [1, 1]} : vector<8x512xf32> to vector<8x128xf32>
    %149 = arith.negf %148 : vector<8x128xf32>
    %150 = math.exp %149 : vector<8x128xf32>
    %cst_33 = arith.constant 1.000000e+00 : f32
    %151 = vector.broadcast %cst_33 : f32 to vector<8x128xf32>
    %152 = arith.addf %151, %150 : vector<8x128xf32>
    %153 = arith.divf %151, %152 : vector<8x128xf32>
    %154 = arith.mulf %145, %126 : vector<8x128xf32>
    %155 = arith.mulf %139, %147 : vector<8x128xf32>
    %156 = arith.addf %154, %155 : vector<8x128xf32>
    %157 = math.tanh %156 : vector<8x128xf32>
    %158 = arith.mulf %153, %157 : vector<8x128xf32>
    %c32 = arith.constant 32 : index
    %c0_34 = arith.constant 0 : index
    %159 = vector.load %arg16[%c32, %c0_34] : memref<64x256xf32, #tpu.memory_space<vmem>>, vector<8x128xf32>
    tpu.vector_store %arg16[%c32, %c0_34], %158 {strides = array<i32>} : memref<64x256xf32, #tpu.memory_space<vmem>>, vector<8x128xf32>,
    %160 = vector.extract_strided_slice %6 {offsets = [40, 0], sizes = [8, 512], strides = [1, 1]} : vector<64x512xf32> to vector<8x512xf32>
    %161 = arith.truncf %158 : vector<8x128xf32> to vector<8x128xbf16>
    %cst_35 = arith.constant dense<0.000000e+00> : vector<8x512xf32>
    %162 = tpu.matmul %161, %7, %cst_35 {dimension_numbers = #tpu.dot_dimension_numbers<[1], [0], [0], [1], [0, 0, 1, 1], [], []>} : vector<8x128xbf16>, vector<128x512xbf16>, vector<8x512xf32> -> vector<8x512xf32>
    %163 = arith.addf %160, %162 : vector<8x512xf32>
    %164 = vector.extract_strided_slice %163 {offsets = [0, 0], sizes = [8, 128], strides = [1, 1]} : vector<8x512xf32> to vector<8x128xf32>
    %165 = arith.negf %164 : vector<8x128xf32>
    %166 = math.exp %165 : vector<8x128xf32>
    %cst_36 = arith.constant 1.000000e+00 : f32
    %167 = vector.broadcast %cst_36 : f32 to vector<8x128xf32>
    %168 = arith.addf %167, %166 : vector<8x128xf32>
    %169 = arith.divf %167, %168 : vector<8x128xf32>
    %170 = vector.extract_strided_slice %163 {offsets = [0, 128], sizes = [8, 128], strides = [1, 1]} : vector<8x512xf32> to vector<8x128xf32>
    %171 = arith.negf %170 : vector<8x128xf32>
    %172 = math.exp %171 : vector<8x128xf32>
    %cst_37 = arith.constant 1.000000e+00 : f32
    %173 = vector.broadcast %cst_37 : f32 to vector<8x128xf32>
    %174 = arith.addf %173, %172 : vector<8x128xf32>
    %175 = arith.divf %173, %174 : vector<8x128xf32>
    %176 = vector.extract_strided_slice %163 {offsets = [0, 256], sizes = [8, 128], strides = [1, 1]} : vector<8x512xf32> to vector<8x128xf32>
    %177 = math.tanh %176 : vector<8x128xf32>
    %178 = vector.extract_strided_slice %163 {offsets = [0, 384], sizes = [8, 128], strides = [1, 1]} : vector<8x512xf32> to vector<8x128xf32>
    %179 = arith.negf %178 : vector<8x128xf32>
    %180 = math.exp %179 : vector<8x128xf32>
    %cst_38 = arith.constant 1.000000e+00 : f32
    %181 = vector.broadcast %cst_38 : f32 to vector<8x128xf32>
    %182 = arith.addf %181, %180 : vector<8x128xf32>
    %183 = arith.divf %181, %182 : vector<8x128xf32>
    %184 = arith.mulf %175, %156 : vector<8x128xf32>
    %185 = arith.mulf %169, %177 : vector<8x128xf32>
    %186 = arith.addf %184, %185 : vector<8x128xf32>
    %187 = math.tanh %186 : vector<8x128xf32>
    %188 = arith.mulf %183, %187 : vector<8x128xf32>
    %c40 = arith.constant 40 : index
    %c0_39 = arith.constant 0 : index
    %189 = vector.load %arg16[%c40, %c0_39] : memref<64x256xf32, #tpu.memory_space<vmem>>, vector<8x128xf32>
    tpu.vector_store %arg16[%c40, %c0_39], %188 {strides = array<i32>} : memref<64x256xf32, #tpu.memory_space<vmem>>, vector<8x128xf32>,
    %190 = vector.extract_strided_slice %6 {offsets = [48, 0], sizes = [8, 512], strides = [1, 1]} : vector<64x512xf32> to vector<8x512xf32>
    %191 = arith.truncf %188 : vector<8x128xf32> to vector<8x128xbf16>
    %cst_40 = arith.constant dense<0.000000e+00> : vector<8x512xf32>
    %192 = tpu.matmul %191, %7, %cst_40 {dimension_numbers = #tpu.dot_dimension_numbers<[1], [0], [0], [1], [0, 0, 1, 1], [], []>} : vector<8x128xbf16>, vector<128x512xbf16>, vector<8x512xf32> -> vector<8x512xf32>
    %193 = arith.addf %190, %192 : vector<8x512xf32>
    %194 = vector.extract_strided_slice %193 {offsets = [0, 0], sizes = [8, 128], strides = [1, 1]} : vector<8x512xf32> to vector<8x128xf32>
    %195 = arith.negf %194 : vector<8x128xf32>
    %196 = math.exp %195 : vector<8x128xf32>
    %cst_41 = arith.constant 1.000000e+00 : f32
    %197 = vector.broadcast %cst_41 : f32 to vector<8x128xf32>
    %198 = arith.addf %197, %196 : vector<8x128xf32>
    %199 = arith.divf %197, %198 : vector<8x128xf32>
    %200 = vector.extract_strided_slice %193 {offsets = [0, 128], sizes = [8, 128], strides = [1, 1]} : vector<8x512xf32> to vector<8x128xf32>
    %201 = arith.negf %200 : vector<8x128xf32>
    %202 = math.exp %201 : vector<8x128xf32>
    %cst_42 = arith.constant 1.000000e+00 : f32
    %203 = vector.broadcast %cst_42 : f32 to vector<8x128xf32>
    %204 = arith.addf %203, %202 : vector<8x128xf32>
    %205 = arith.divf %203, %204 : vector<8x128xf32>
    %206 = vector.extract_strided_slice %193 {offsets = [0, 256], sizes = [8, 128], strides = [1, 1]} : vector<8x512xf32> to vector<8x128xf32>
    %207 = math.tanh %206 : vector<8x128xf32>
    %208 = vector.extract_strided_slice %193 {offsets = [0, 384], sizes = [8, 128], strides = [1, 1]} : vector<8x512xf32> to vector<8x128xf32>
    %209 = arith.negf %208 : vector<8x128xf32>
    %210 = math.exp %209 : vector<8x128xf32>
    %cst_43 = arith.constant 1.000000e+00 : f32
    %211 = vector.broadcast %cst_43 : f32 to vector<8x128xf32>
    %212 = arith.addf %211, %210 : vector<8x128xf32>
    %213 = arith.divf %211, %212 : vector<8x128xf32>
    %214 = arith.mulf %205, %186 : vector<8x128xf32>
    %215 = arith.mulf %199, %207 : vector<8x128xf32>
    %216 = arith.addf %214, %215 : vector<8x128xf32>
    %217 = math.tanh %216 : vector<8x128xf32>
    %218 = arith.mulf %213, %217 : vector<8x128xf32>
    %c48 = arith.constant 48 : index
    %c0_44 = arith.constant 0 : index
    %219 = vector.load %arg16[%c48, %c0_44] : memref<64x256xf32, #tpu.memory_space<vmem>>, vector<8x128xf32>
    tpu.vector_store %arg16[%c48, %c0_44], %218 {strides = array<i32>} : memref<64x256xf32, #tpu.memory_space<vmem>>, vector<8x128xf32>,
    %220 = vector.extract_strided_slice %6 {offsets = [56, 0], sizes = [8, 512], strides = [1, 1]} : vector<64x512xf32> to vector<8x512xf32>
    %221 = arith.truncf %218 : vector<8x128xf32> to vector<8x128xbf16>
    %cst_45 = arith.constant dense<0.000000e+00> : vector<8x512xf32>
    %222 = tpu.matmul %221, %7, %cst_45 {dimension_numbers = #tpu.dot_dimension_numbers<[1], [0], [0], [1], [0, 0, 1, 1], [], []>} : vector<8x128xbf16>, vector<128x512xbf16>, vector<8x512xf32> -> vector<8x512xf32>
    %223 = arith.addf %220, %222 : vector<8x512xf32>
    %224 = vector.extract_strided_slice %223 {offsets = [0, 0], sizes = [8, 128], strides = [1, 1]} : vector<8x512xf32> to vector<8x128xf32>
    %225 = arith.negf %224 : vector<8x128xf32>
    %226 = math.exp %225 : vector<8x128xf32>
    %cst_46 = arith.constant 1.000000e+00 : f32
    %227 = vector.broadcast %cst_46 : f32 to vector<8x128xf32>
    %228 = arith.addf %227, %226 : vector<8x128xf32>
    %229 = arith.divf %227, %228 : vector<8x128xf32>
    %230 = vector.extract_strided_slice %223 {offsets = [0, 128], sizes = [8, 128], strides = [1, 1]} : vector<8x512xf32> to vector<8x128xf32>
    %231 = arith.negf %230 : vector<8x128xf32>
    %232 = math.exp %231 : vector<8x128xf32>
    %cst_47 = arith.constant 1.000000e+00 : f32
    %233 = vector.broadcast %cst_47 : f32 to vector<8x128xf32>
    %234 = arith.addf %233, %232 : vector<8x128xf32>
    %235 = arith.divf %233, %234 : vector<8x128xf32>
    %236 = vector.extract_strided_slice %223 {offsets = [0, 256], sizes = [8, 128], strides = [1, 1]} : vector<8x512xf32> to vector<8x128xf32>
    %237 = math.tanh %236 : vector<8x128xf32>
    %238 = vector.extract_strided_slice %223 {offsets = [0, 384], sizes = [8, 128], strides = [1, 1]} : vector<8x512xf32> to vector<8x128xf32>
    %239 = arith.negf %238 : vector<8x128xf32>
    %240 = math.exp %239 : vector<8x128xf32>
    %cst_48 = arith.constant 1.000000e+00 : f32
    %241 = vector.broadcast %cst_48 : f32 to vector<8x128xf32>
    %242 = arith.addf %241, %240 : vector<8x128xf32>
    %243 = arith.divf %241, %242 : vector<8x128xf32>
    %244 = arith.mulf %235, %216 : vector<8x128xf32>
    %245 = arith.mulf %229, %237 : vector<8x128xf32>
    %246 = arith.addf %244, %245 : vector<8x128xf32>
    %247 = math.tanh %246 : vector<8x128xf32>
    %248 = arith.mulf %243, %247 : vector<8x128xf32>
    %c56 = arith.constant 56 : index
    %c0_49 = arith.constant 0 : index
    %249 = vector.load %arg16[%c56, %c0_49] : memref<64x256xf32, #tpu.memory_space<vmem>>, vector<8x128xf32>
    tpu.vector_store %arg16[%c56, %c0_49], %248 {strides = array<i32>} : memref<64x256xf32, #tpu.memory_space<vmem>>, vector<8x128xf32>,
    %c0_50 = arith.constant 0 : index
    %c0_51 = arith.constant 0 : index
    %250 = vector.load %arg4[%c0_50, %c0_51] : memref<128x512xbf16, #tpu.memory_space<vmem>>, vector<128x512xbf16>
    %cst_52 = arith.constant dense<0.000000e+00> : vector<64x512xf32>
    %251 = tpu.matmul %1, %250, %cst_52 {dimension_numbers = #tpu.dot_dimension_numbers<[1], [0], [0], [1], [0, 0, 1, 1], [], []>} : vector<64x128xbf16>, vector<128x512xbf16>, vector<64x512xf32> -> vector<64x512xf32>
    %c0_53 = arith.constant 0 : index
    %c0_54 = arith.constant 0 : index
    %252 = vector.load %arg6[%c0_53, %c0_54] : memref<1x512xf32, #tpu.memory_space<vmem>>, vector<1x512xf32>
    %253 = vector.broadcast %252 : vector<1x512xf32> to vector<64x512xf32>
    %254 = arith.addf %251, %253 : vector<64x512xf32>
    %c0_55 = arith.constant 0 : index
    %c0_56 = arith.constant 0 : index
    %255 = vector.load %arg5[%c0_55, %c0_56] : memref<128x512xbf16, #tpu.memory_space<vmem>>, vector<128x512xbf16>
    %cst_57 = arith.constant 0.000000e+00 : f32
    %256 = vector.broadcast %cst_57 : f32 to vector<8x128xf32>
    %cst_58 = arith.constant 0.000000e+00 : f32
    %257 = vector.broadcast %cst_58 : f32 to vector<8x128xf32>
    %258 = vector.extract_strided_slice %254 {offsets = [56, 0], sizes = [8, 512], strides = [1, 1]} : vector<64x512xf32> to vector<8x512xf32>
    %259 = arith.truncf %256 : vector<8x128xf32> to vector<8x128xbf16>
    %cst_59 = arith.constant dense<0.000000e+00> : vector<8x512xf32>
    %260 = tpu.matmul %259, %255, %cst_59 {dimension_numbers = #tpu.dot_dimension_numbers<[1], [0], [0], [1], [0, 0, 1, 1], [], []>} : vector<8x128xbf16>, vector<128x512xbf16>, vector<8x512xf32> -> vector<8x512xf32>
    %261 = arith.addf %258, %260 : vector<8x512xf32>
    %262 = vector.extract_strided_slice %261 {offsets = [0, 0], sizes = [8, 128], strides = [1, 1]} : vector<8x512xf32> to vector<8x128xf32>
    %263 = arith.negf %262 : vector<8x128xf32>
    %264 = math.exp %263 : vector<8x128xf32>
    %cst_60 = arith.constant 1.000000e+00 : f32
    %265 = vector.broadcast %cst_60 : f32 to vector<8x128xf32>
    %266 = arith.addf %265, %264 : vector<8x128xf32>
    %267 = arith.divf %265, %266 : vector<8x128xf32>
    %268 = vector.extract_strided_slice %261 {offsets = [0, 128], sizes = [8, 128], strides = [1, 1]} : vector<8x512xf32> to vector<8x128xf32>
    %269 = arith.negf %268 : vector<8x128xf32>
    %270 = math.exp %269 : vector<8x128xf32>
    %cst_61 = arith.constant 1.000000e+00 : f32
    %271 = vector.broadcast %cst_61 : f32 to vector<8x128xf32>
    %272 = arith.addf %271, %270 : vector<8x128xf32>
    %273 = arith.divf %271, %272 : vector<8x128xf32>
    %274 = vector.extract_strided_slice %261 {offsets = [0, 256], sizes = [8, 128], strides = [1, 1]} : vector<8x512xf32> to vector<8x128xf32>
    %275 = math.tanh %274 : vector<8x128xf32>
    %276 = vector.extract_strided_slice %261 {offsets = [0, 384], sizes = [8, 128], strides = [1, 1]} : vector<8x512xf32> to vector<8x128xf32>
    %277 = arith.negf %276 : vector<8x128xf32>
    %278 = math.exp %277 : vector<8x128xf32>
    %cst_62 = arith.constant 1.000000e+00 : f32
    %279 = vector.broadcast %cst_62 : f32 to vector<8x128xf32>
    %280 = arith.addf %279, %278 : vector<8x128xf32>
    %281 = arith.divf %279, %280 : vector<8x128xf32>
    %282 = arith.mulf %273, %257 : vector<8x128xf32>
    %283 = arith.mulf %267, %275 : vector<8x128xf32>
    %284 = arith.addf %282, %283 : vector<8x128xf32>
    %285 = math.tanh %284 : vector<8x128xf32>
    %286 = arith.mulf %281, %285 : vector<8x128xf32>
    %c56_63 = arith.constant 56 : index
    %c128 = arith.constant 128 : index
    %287 = vector.load %arg16[%c56_63, %c128] : memref<64x256xf32, #tpu.memory_space<vmem>>, vector<8x128xf32>
    tpu.vector_store %arg16[%c56_63, %c128], %286 {strides = array<i32>} : memref<64x256xf32, #tpu.memory_space<vmem>>, vector<8x128xf32>,
    %288 = vector.extract_strided_slice %254 {offsets = [48, 0], sizes = [8, 512], strides = [1, 1]} : vector<64x512xf32> to vector<8x512xf32>
    %289 = arith.truncf %286 : vector<8x128xf32> to vector<8x128xbf16>
    %cst_64 = arith.constant dense<0.000000e+00> : vector<8x512xf32>
    %290 = tpu.matmul %289, %255, %cst_64 {dimension_numbers = #tpu.dot_dimension_numbers<[1], [0], [0], [1], [0, 0, 1, 1], [], []>} : vector<8x128xbf16>, vector<128x512xbf16>, vector<8x512xf32> -> vector<8x512xf32>
    %291 = arith.addf %288, %290 : vector<8x512xf32>
    %292 = vector.extract_strided_slice %291 {offsets = [0, 0], sizes = [8, 128], strides = [1, 1]} : vector<8x512xf32> to vector<8x128xf32>
    %293 = arith.negf %292 : vector<8x128xf32>
    %294 = math.exp %293 : vector<8x128xf32>
    %cst_65 = arith.constant 1.000000e+00 : f32
    %295 = vector.broadcast %cst_65 : f32 to vector<8x128xf32>
    %296 = arith.addf %295, %294 : vector<8x128xf32>
    %297 = arith.divf %295, %296 : vector<8x128xf32>
    %298 = vector.extract_strided_slice %291 {offsets = [0, 128], sizes = [8, 128], strides = [1, 1]} : vector<8x512xf32> to vector<8x128xf32>
    %299 = arith.negf %298 : vector<8x128xf32>
    %300 = math.exp %299 : vector<8x128xf32>
    %cst_66 = arith.constant 1.000000e+00 : f32
    %301 = vector.broadcast %cst_66 : f32 to vector<8x128xf32>
    %302 = arith.addf %301, %300 : vector<8x128xf32>
    %303 = arith.divf %301, %302 : vector<8x128xf32>
    %304 = vector.extract_strided_slice %291 {offsets = [0, 256], sizes = [8, 128], strides = [1, 1]} : vector<8x512xf32> to vector<8x128xf32>
    %305 = math.tanh %304 : vector<8x128xf32>
    %306 = vector.extract_strided_slice %291 {offsets = [0, 384], sizes = [8, 128], strides = [1, 1]} : vector<8x512xf32> to vector<8x128xf32>
    %307 = arith.negf %306 : vector<8x128xf32>
    %308 = math.exp %307 : vector<8x128xf32>
    %cst_67 = arith.constant 1.000000e+00 : f32
    %309 = vector.broadcast %cst_67 : f32 to vector<8x128xf32>
    %310 = arith.addf %309, %308 : vector<8x128xf32>
    %311 = arith.divf %309, %310 : vector<8x128xf32>
    %312 = arith.mulf %303, %284 : vector<8x128xf32>
    %313 = arith.mulf %297, %305 : vector<8x128xf32>
    %314 = arith.addf %312, %313 : vector<8x128xf32>
    %315 = math.tanh %314 : vector<8x128xf32>
    %316 = arith.mulf %311, %315 : vector<8x128xf32>
    %c48_68 = arith.constant 48 : index
    %c128_69 = arith.constant 128 : index
    %317 = vector.load %arg16[%c48_68, %c128_69] : memref<64x256xf32, #tpu.memory_space<vmem>>, vector<8x128xf32>
    tpu.vector_store %arg16[%c48_68, %c128_69], %316 {strides = array<i32>} : memref<64x256xf32, #tpu.memory_space<vmem>>, vector<8x128xf32>,
    %318 = vector.extract_strided_slice %254 {offsets = [40, 0], sizes = [8, 512], strides = [1, 1]} : vector<64x512xf32> to vector<8x512xf32>
    %319 = arith.truncf %316 : vector<8x128xf32> to vector<8x128xbf16>
    %cst_70 = arith.constant dense<0.000000e+00> : vector<8x512xf32>
    %320 = tpu.matmul %319, %255, %cst_70 {dimension_numbers = #tpu.dot_dimension_numbers<[1], [0], [0], [1], [0, 0, 1, 1], [], []>} : vector<8x128xbf16>, vector<128x512xbf16>, vector<8x512xf32> -> vector<8x512xf32>
    %321 = arith.addf %318, %320 : vector<8x512xf32>
    %322 = vector.extract_strided_slice %321 {offsets = [0, 0], sizes = [8, 128], strides = [1, 1]} : vector<8x512xf32> to vector<8x128xf32>
    %323 = arith.negf %322 : vector<8x128xf32>
    %324 = math.exp %323 : vector<8x128xf32>
    %cst_71 = arith.constant 1.000000e+00 : f32
    %325 = vector.broadcast %cst_71 : f32 to vector<8x128xf32>
    %326 = arith.addf %325, %324 : vector<8x128xf32>
    %327 = arith.divf %325, %326 : vector<8x128xf32>
    %328 = vector.extract_strided_slice %321 {offsets = [0, 128], sizes = [8, 128], strides = [1, 1]} : vector<8x512xf32> to vector<8x128xf32>
    %329 = arith.negf %328 : vector<8x128xf32>
    %330 = math.exp %329 : vector<8x128xf32>
    %cst_72 = arith.constant 1.000000e+00 : f32
    %331 = vector.broadcast %cst_72 : f32 to vector<8x128xf32>
    %332 = arith.addf %331, %330 : vector<8x128xf32>
    %333 = arith.divf %331, %332 : vector<8x128xf32>
    %334 = vector.extract_strided_slice %321 {offsets = [0, 256], sizes = [8, 128], strides = [1, 1]} : vector<8x512xf32> to vector<8x128xf32>
    %335 = math.tanh %334 : vector<8x128xf32>
    %336 = vector.extract_strided_slice %321 {offsets = [0, 384], sizes = [8, 128], strides = [1, 1]} : vector<8x512xf32> to vector<8x128xf32>
    %337 = arith.negf %336 : vector<8x128xf32>
    %338 = math.exp %337 : vector<8x128xf32>
    %cst_73 = arith.constant 1.000000e+00 : f32
    %339 = vector.broadcast %cst_73 : f32 to vector<8x128xf32>
    %340 = arith.addf %339, %338 : vector<8x128xf32>
    %341 = arith.divf %339, %340 : vector<8x128xf32>
    %342 = arith.mulf %333, %314 : vector<8x128xf32>
    %343 = arith.mulf %327, %335 : vector<8x128xf32>
    %344 = arith.addf %342, %343 : vector<8x128xf32>
    %345 = math.tanh %344 : vector<8x128xf32>
    %346 = arith.mulf %341, %345 : vector<8x128xf32>
    %c40_74 = arith.constant 40 : index
    %c128_75 = arith.constant 128 : index
    %347 = vector.load %arg16[%c40_74, %c128_75] : memref<64x256xf32, #tpu.memory_space<vmem>>, vector<8x128xf32>
    tpu.vector_store %arg16[%c40_74, %c128_75], %346 {strides = array<i32>} : memref<64x256xf32, #tpu.memory_space<vmem>>, vector<8x128xf32>,
    %348 = vector.extract_strided_slice %254 {offsets = [32, 0], sizes = [8, 512], strides = [1, 1]} : vector<64x512xf32> to vector<8x512xf32>
    %349 = arith.truncf %346 : vector<8x128xf32> to vector<8x128xbf16>
    %cst_76 = arith.constant dense<0.000000e+00> : vector<8x512xf32>
    %350 = tpu.matmul %349, %255, %cst_76 {dimension_numbers = #tpu.dot_dimension_numbers<[1], [0], [0], [1], [0, 0, 1, 1], [], []>} : vector<8x128xbf16>, vector<128x512xbf16>, vector<8x512xf32> -> vector<8x512xf32>
    %351 = arith.addf %348, %350 : vector<8x512xf32>
    %352 = vector.extract_strided_slice %351 {offsets = [0, 0], sizes = [8, 128], strides = [1, 1]} : vector<8x512xf32> to vector<8x128xf32>
    %353 = arith.negf %352 : vector<8x128xf32>
    %354 = math.exp %353 : vector<8x128xf32>
    %cst_77 = arith.constant 1.000000e+00 : f32
    %355 = vector.broadcast %cst_77 : f32 to vector<8x128xf32>
    %356 = arith.addf %355, %354 : vector<8x128xf32>
    %357 = arith.divf %355, %356 : vector<8x128xf32>
    %358 = vector.extract_strided_slice %351 {offsets = [0, 128], sizes = [8, 128], strides = [1, 1]} : vector<8x512xf32> to vector<8x128xf32>
    %359 = arith.negf %358 : vector<8x128xf32>
    %360 = math.exp %359 : vector<8x128xf32>
    %cst_78 = arith.constant 1.000000e+00 : f32
    %361 = vector.broadcast %cst_78 : f32 to vector<8x128xf32>
    %362 = arith.addf %361, %360 : vector<8x128xf32>
    %363 = arith.divf %361, %362 : vector<8x128xf32>
    %364 = vector.extract_strided_slice %351 {offsets = [0, 256], sizes = [8, 128], strides = [1, 1]} : vector<8x512xf32> to vector<8x128xf32>
    %365 = math.tanh %364 : vector<8x128xf32>
    %366 = vector.extract_strided_slice %351 {offsets = [0, 384], sizes = [8, 128], strides = [1, 1]} : vector<8x512xf32> to vector<8x128xf32>
    %367 = arith.negf %366 : vector<8x128xf32>
    %368 = math.exp %367 : vector<8x128xf32>
    %cst_79 = arith.constant 1.000000e+00 : f32
    %369 = vector.broadcast %cst_79 : f32 to vector<8x128xf32>
    %370 = arith.addf %369, %368 : vector<8x128xf32>
    %371 = arith.divf %369, %370 : vector<8x128xf32>
    %372 = arith.mulf %363, %344 : vector<8x128xf32>
    %373 = arith.mulf %357, %365 : vector<8x128xf32>
    %374 = arith.addf %372, %373 : vector<8x128xf32>
    %375 = math.tanh %374 : vector<8x128xf32>
    %376 = arith.mulf %371, %375 : vector<8x128xf32>
    %c32_80 = arith.constant 32 : index
    %c128_81 = arith.constant 128 : index
    %377 = vector.load %arg16[%c32_80, %c128_81] : memref<64x256xf32, #tpu.memory_space<vmem>>, vector<8x128xf32>
    tpu.vector_store %arg16[%c32_80, %c128_81], %376 {strides = array<i32>} : memref<64x256xf32, #tpu.memory_space<vmem>>, vector<8x128xf32>,
    %378 = vector.extract_strided_slice %254 {offsets = [24, 0], sizes = [8, 512], strides = [1, 1]} : vector<64x512xf32> to vector<8x512xf32>
    %379 = arith.truncf %376 : vector<8x128xf32> to vector<8x128xbf16>
    %cst_82 = arith.constant dense<0.000000e+00> : vector<8x512xf32>
    %380 = tpu.matmul %379, %255, %cst_82 {dimension_numbers = #tpu.dot_dimension_numbers<[1], [0], [0], [1], [0, 0, 1, 1], [], []>} : vector<8x128xbf16>, vector<128x512xbf16>, vector<8x512xf32> -> vector<8x512xf32>
    %381 = arith.addf %378, %380 : vector<8x512xf32>
    %382 = vector.extract_strided_slice %381 {offsets = [0, 0], sizes = [8, 128], strides = [1, 1]} : vector<8x512xf32> to vector<8x128xf32>
    %383 = arith.negf %382 : vector<8x128xf32>
    %384 = math.exp %383 : vector<8x128xf32>
    %cst_83 = arith.constant 1.000000e+00 : f32
    %385 = vector.broadcast %cst_83 : f32 to vector<8x128xf32>
    %386 = arith.addf %385, %384 : vector<8x128xf32>
    %387 = arith.divf %385, %386 : vector<8x128xf32>
    %388 = vector.extract_strided_slice %381 {offsets = [0, 128], sizes = [8, 128], strides = [1, 1]} : vector<8x512xf32> to vector<8x128xf32>
    %389 = arith.negf %388 : vector<8x128xf32>
    %390 = math.exp %389 : vector<8x128xf32>
    %cst_84 = arith.constant 1.000000e+00 : f32
    %391 = vector.broadcast %cst_84 : f32 to vector<8x128xf32>
    %392 = arith.addf %391, %390 : vector<8x128xf32>
    %393 = arith.divf %391, %392 : vector<8x128xf32>
    %394 = vector.extract_strided_slice %381 {offsets = [0, 256], sizes = [8, 128], strides = [1, 1]} : vector<8x512xf32> to vector<8x128xf32>
    %395 = math.tanh %394 : vector<8x128xf32>
    %396 = vector.extract_strided_slice %381 {offsets = [0, 384], sizes = [8, 128], strides = [1, 1]} : vector<8x512xf32> to vector<8x128xf32>
    %397 = arith.negf %396 : vector<8x128xf32>
    %398 = math.exp %397 : vector<8x128xf32>
    %cst_85 = arith.constant 1.000000e+00 : f32
    %399 = vector.broadcast %cst_85 : f32 to vector<8x128xf32>
    %400 = arith.addf %399, %398 : vector<8x128xf32>
    %401 = arith.divf %399, %400 : vector<8x128xf32>
    %402 = arith.mulf %393, %374 : vector<8x128xf32>
    %403 = arith.mulf %387, %395 : vector<8x128xf32>
    %404 = arith.addf %402, %403 : vector<8x128xf32>
    %405 = math.tanh %404 : vector<8x128xf32>
    %406 = arith.mulf %401, %405 : vector<8x128xf32>
    %c24_86 = arith.constant 24 : index
    %c128_87 = arith.constant 128 : index
    %407 = vector.load %arg16[%c24_86, %c128_87] : memref<64x256xf32, #tpu.memory_space<vmem>>, vector<8x128xf32>
    tpu.vector_store %arg16[%c24_86, %c128_87], %406 {strides = array<i32>} : memref<64x256xf32, #tpu.memory_space<vmem>>, vector<8x128xf32>,
    %408 = vector.extract_strided_slice %254 {offsets = [16, 0], sizes = [8, 512], strides = [1, 1]} : vector<64x512xf32> to vector<8x512xf32>
    %409 = arith.truncf %406 : vector<8x128xf32> to vector<8x128xbf16>
    %cst_88 = arith.constant dense<0.000000e+00> : vector<8x512xf32>
    %410 = tpu.matmul %409, %255, %cst_88 {dimension_numbers = #tpu.dot_dimension_numbers<[1], [0], [0], [1], [0, 0, 1, 1], [], []>} : vector<8x128xbf16>, vector<128x512xbf16>, vector<8x512xf32> -> vector<8x512xf32>
    %411 = arith.addf %408, %410 : vector<8x512xf32>
    %412 = vector.extract_strided_slice %411 {offsets = [0, 0], sizes = [8, 128], strides = [1, 1]} : vector<8x512xf32> to vector<8x128xf32>
    %413 = arith.negf %412 : vector<8x128xf32>
    %414 = math.exp %413 : vector<8x128xf32>
    %cst_89 = arith.constant 1.000000e+00 : f32
    %415 = vector.broadcast %cst_89 : f32 to vector<8x128xf32>
    %416 = arith.addf %415, %414 : vector<8x128xf32>
    %417 = arith.divf %415, %416 : vector<8x128xf32>
    %418 = vector.extract_strided_slice %411 {offsets = [0, 128], sizes = [8, 128], strides = [1, 1]} : vector<8x512xf32> to vector<8x128xf32>
    %419 = arith.negf %418 : vector<8x128xf32>
    %420 = math.exp %419 : vector<8x128xf32>
    %cst_90 = arith.constant 1.000000e+00 : f32
    %421 = vector.broadcast %cst_90 : f32 to vector<8x128xf32>
    %422 = arith.addf %421, %420 : vector<8x128xf32>
    %423 = arith.divf %421, %422 : vector<8x128xf32>
    %424 = vector.extract_strided_slice %411 {offsets = [0, 256], sizes = [8, 128], strides = [1, 1]} : vector<8x512xf32> to vector<8x128xf32>
    %425 = math.tanh %424 : vector<8x128xf32>
    %426 = vector.extract_strided_slice %411 {offsets = [0, 384], sizes = [8, 128], strides = [1, 1]} : vector<8x512xf32> to vector<8x128xf32>
    %427 = arith.negf %426 : vector<8x128xf32>
    %428 = math.exp %427 : vector<8x128xf32>
    %cst_91 = arith.constant 1.000000e+00 : f32
    %429 = vector.broadcast %cst_91 : f32 to vector<8x128xf32>
    %430 = arith.addf %429, %428 : vector<8x128xf32>
    %431 = arith.divf %429, %430 : vector<8x128xf32>
    %432 = arith.mulf %423, %404 : vector<8x128xf32>
    %433 = arith.mulf %417, %425 : vector<8x128xf32>
    %434 = arith.addf %432, %433 : vector<8x128xf32>
    %435 = math.tanh %434 : vector<8x128xf32>
    %436 = arith.mulf %431, %435 : vector<8x128xf32>
    %c16_92 = arith.constant 16 : index
    %c128_93 = arith.constant 128 : index
    %437 = vector.load %arg16[%c16_92, %c128_93] : memref<64x256xf32, #tpu.memory_space<vmem>>, vector<8x128xf32>
    tpu.vector_store %arg16[%c16_92, %c128_93], %436 {strides = array<i32>} : memref<64x256xf32, #tpu.memory_space<vmem>>, vector<8x128xf32>,
    %438 = vector.extract_strided_slice %254 {offsets = [8, 0], sizes = [8, 512], strides = [1, 1]} : vector<64x512xf32> to vector<8x512xf32>
    %439 = arith.truncf %436 : vector<8x128xf32> to vector<8x128xbf16>
    %cst_94 = arith.constant dense<0.000000e+00> : vector<8x512xf32>
    %440 = tpu.matmul %439, %255, %cst_94 {dimension_numbers = #tpu.dot_dimension_numbers<[1], [0], [0], [1], [0, 0, 1, 1], [], []>} : vector<8x128xbf16>, vector<128x512xbf16>, vector<8x512xf32> -> vector<8x512xf32>
    %441 = arith.addf %438, %440 : vector<8x512xf32>
    %442 = vector.extract_strided_slice %441 {offsets = [0, 0], sizes = [8, 128], strides = [1, 1]} : vector<8x512xf32> to vector<8x128xf32>
    %443 = arith.negf %442 : vector<8x128xf32>
    %444 = math.exp %443 : vector<8x128xf32>
    %cst_95 = arith.constant 1.000000e+00 : f32
    %445 = vector.broadcast %cst_95 : f32 to vector<8x128xf32>
    %446 = arith.addf %445, %444 : vector<8x128xf32>
    %447 = arith.divf %445, %446 : vector<8x128xf32>
    %448 = vector.extract_strided_slice %441 {offsets = [0, 128], sizes = [8, 128], strides = [1, 1]} : vector<8x512xf32> to vector<8x128xf32>
    %449 = arith.negf %448 : vector<8x128xf32>
    %450 = math.exp %449 : vector<8x128xf32>
    %cst_96 = arith.constant 1.000000e+00 : f32
    %451 = vector.broadcast %cst_96 : f32 to vector<8x128xf32>
    %452 = arith.addf %451, %450 : vector<8x128xf32>
    %453 = arith.divf %451, %452 : vector<8x128xf32>
    %454 = vector.extract_strided_slice %441 {offsets = [0, 256], sizes = [8, 128], strides = [1, 1]} : vector<8x512xf32> to vector<8x128xf32>
    %455 = math.tanh %454 : vector<8x128xf32>
    %456 = vector.extract_strided_slice %441 {offsets = [0, 384], sizes = [8, 128], strides = [1, 1]} : vector<8x512xf32> to vector<8x128xf32>
    %457 = arith.negf %456 : vector<8x128xf32>
    %458 = math.exp %457 : vector<8x128xf32>
    %cst_97 = arith.constant 1.000000e+00 : f32
    %459 = vector.broadcast %cst_97 : f32 to vector<8x128xf32>
    %460 = arith.addf %459, %458 : vector<8x128xf32>
    %461 = arith.divf %459, %460 : vector<8x128xf32>
    %462 = arith.mulf %453, %434 : vector<8x128xf32>
    %463 = arith.mulf %447, %455 : vector<8x128xf32>
    %464 = arith.addf %462, %463 : vector<8x128xf32>
    %465 = math.tanh %464 : vector<8x128xf32>
    %466 = arith.mulf %461, %465 : vector<8x128xf32>
    %c8_98 = arith.constant 8 : index
    %c128_99 = arith.constant 128 : index
    %467 = vector.load %arg16[%c8_98, %c128_99] : memref<64x256xf32, #tpu.memory_space<vmem>>, vector<8x128xf32>
    tpu.vector_store %arg16[%c8_98, %c128_99], %466 {strides = array<i32>} : memref<64x256xf32, #tpu.memory_space<vmem>>, vector<8x128xf32>,
    %468 = vector.extract_strided_slice %254 {offsets = [0, 0], sizes = [8, 512], strides = [1, 1]} : vector<64x512xf32> to vector<8x512xf32>
    %469 = arith.truncf %466 : vector<8x128xf32> to vector<8x128xbf16>
    %cst_100 = arith.constant dense<0.000000e+00> : vector<8x512xf32>
    %470 = tpu.matmul %469, %255, %cst_100 {dimension_numbers = #tpu.dot_dimension_numbers<[1], [0], [0], [1], [0, 0, 1, 1], [], []>} : vector<8x128xbf16>, vector<128x512xbf16>, vector<8x512xf32> -> vector<8x512xf32>
    %471 = arith.addf %468, %470 : vector<8x512xf32>
    %472 = vector.extract_strided_slice %471 {offsets = [0, 0], sizes = [8, 128], strides = [1, 1]} : vector<8x512xf32> to vector<8x128xf32>
    %473 = arith.negf %472 : vector<8x128xf32>
    %474 = math.exp %473 : vector<8x128xf32>
    %cst_101 = arith.constant 1.000000e+00 : f32
    %475 = vector.broadcast %cst_101 : f32 to vector<8x128xf32>
    %476 = arith.addf %475, %474 : vector<8x128xf32>
    %477 = arith.divf %475, %476 : vector<8x128xf32>
    %478 = vector.extract_strided_slice %471 {offsets = [0, 128], sizes = [8, 128], strides = [1, 1]} : vector<8x512xf32> to vector<8x128xf32>
    %479 = arith.negf %478 : vector<8x128xf32>
    %480 = math.exp %479 : vector<8x128xf32>
    %cst_102 = arith.constant 1.000000e+00 : f32
    %481 = vector.broadcast %cst_102 : f32 to vector<8x128xf32>
    %482 = arith.addf %481, %480 : vector<8x128xf32>
    %483 = arith.divf %481, %482 : vector<8x128xf32>
    %484 = vector.extract_strided_slice %471 {offsets = [0, 256], sizes = [8, 128], strides = [1, 1]} : vector<8x512xf32> to vector<8x128xf32>
    %485 = math.tanh %484 : vector<8x128xf32>
    %486 = vector.extract_strided_slice %471 {offsets = [0, 384], sizes = [8, 128], strides = [1, 1]} : vector<8x512xf32> to vector<8x128xf32>
    %487 = arith.negf %486 : vector<8x128xf32>
    %488 = math.exp %487 : vector<8x128xf32>
    %cst_103 = arith.constant 1.000000e+00 : f32
    %489 = vector.broadcast %cst_103 : f32 to vector<8x128xf32>
    %490 = arith.addf %489, %488 : vector<8x128xf32>
    %491 = arith.divf %489, %490 : vector<8x128xf32>
    %492 = arith.mulf %483, %464 : vector<8x128xf32>
    %493 = arith.mulf %477, %485 : vector<8x128xf32>
    %494 = arith.addf %492, %493 : vector<8x128xf32>
    %495 = math.tanh %494 : vector<8x128xf32>
    %496 = arith.mulf %491, %495 : vector<8x128xf32>
    %c0_104 = arith.constant 0 : index
    %c128_105 = arith.constant 128 : index
    %497 = vector.load %arg16[%c0_104, %c128_105] : memref<64x256xf32, #tpu.memory_space<vmem>>, vector<8x128xf32>
    tpu.vector_store %arg16[%c0_104, %c128_105], %496 {strides = array<i32>} : memref<64x256xf32, #tpu.memory_space<vmem>>, vector<8x128xf32>,
    %c0_106 = arith.constant 0 : index
    %c0_107 = arith.constant 0 : index
    %498 = vector.load %arg16[%c0_106, %c0_107] : memref<64x256xf32, #tpu.memory_space<vmem>>, vector<64x256xf32>
    %499 = arith.truncf %498 : vector<64x256xf32> to vector<64x256xbf16>
    %c0_108 = arith.constant 0 : index
    %c0_109 = arith.constant 0 : index
    %500 = vector.load %arg7[%c0_108, %c0_109] : memref<256x512xbf16, #tpu.memory_space<vmem>>, vector<256x512xbf16>
    %cst_110 = arith.constant dense<0.000000e+00> : vector<64x512xf32>
    %501 = tpu.matmul %499, %500, %cst_110 {dimension_numbers = #tpu.dot_dimension_numbers<[1], [0], [0], [1], [0, 0, 1, 1], [], []>} : vector<64x256xbf16>, vector<256x512xbf16>, vector<64x512xf32> -> vector<64x512xf32>
    %c0_111 = arith.constant 0 : index
    %c0_112 = arith.constant 0 : index
    %502 = vector.load %arg9[%c0_111, %c0_112] : memref<1x512xf32, #tpu.memory_space<vmem>>, vector<1x512xf32>
    %503 = vector.broadcast %502 : vector<1x512xf32> to vector<64x512xf32>
    %504 = arith.addf %501, %503 : vector<64x512xf32>
    %c0_113 = arith.constant 0 : index
    %c0_114 = arith.constant 0 : index
    %505 = vector.load %arg8[%c0_113, %c0_114] : memref<128x512xbf16, #tpu.memory_space<vmem>>, vector<128x512xbf16>
    %cst_115 = arith.constant 0.000000e+00 : f32
    %506 = vector.broadcast %cst_115 : f32 to vector<8x128xf32>
    %cst_116 = arith.constant 0.000000e+00 : f32
    %507 = vector.broadcast %cst_116 : f32 to vector<8x128xf32>
    %508 = vector.extract_strided_slice %504 {offsets = [0, 0], sizes = [8, 512], strides = [1, 1]} : vector<64x512xf32> to vector<8x512xf32>
    %509 = arith.truncf %506 : vector<8x128xf32> to vector<8x128xbf16>
    %cst_117 = arith.constant dense<0.000000e+00> : vector<8x512xf32>
    %510 = tpu.matmul %509, %505, %cst_117 {dimension_numbers = #tpu.dot_dimension_numbers<[1], [0], [0], [1], [0, 0, 1, 1], [], []>} : vector<8x128xbf16>, vector<128x512xbf16>, vector<8x512xf32> -> vector<8x512xf32>
    %511 = arith.addf %508, %510 : vector<8x512xf32>
    %512 = vector.extract_strided_slice %511 {offsets = [0, 0], sizes = [8, 128], strides = [1, 1]} : vector<8x512xf32> to vector<8x128xf32>
    %513 = arith.negf %512 : vector<8x128xf32>
    %514 = math.exp %513 : vector<8x128xf32>
    %cst_118 = arith.constant 1.000000e+00 : f32
    %515 = vector.broadcast %cst_118 : f32 to vector<8x128xf32>
    %516 = arith.addf %515, %514 : vector<8x128xf32>
    %517 = arith.divf %515, %516 : vector<8x128xf32>
    %518 = vector.extract_strided_slice %511 {offsets = [0, 128], sizes = [8, 128], strides = [1, 1]} : vector<8x512xf32> to vector<8x128xf32>
    %519 = arith.negf %518 : vector<8x128xf32>
    %520 = math.exp %519 : vector<8x128xf32>
    %cst_119 = arith.constant 1.000000e+00 : f32
    %521 = vector.broadcast %cst_119 : f32 to vector<8x128xf32>
    %522 = arith.addf %521, %520 : vector<8x128xf32>
    %523 = arith.divf %521, %522 : vector<8x128xf32>
    %524 = vector.extract_strided_slice %511 {offsets = [0, 256], sizes = [8, 128], strides = [1, 1]} : vector<8x512xf32> to vector<8x128xf32>
    %525 = math.tanh %524 : vector<8x128xf32>
    %526 = vector.extract_strided_slice %511 {offsets = [0, 384], sizes = [8, 128], strides = [1, 1]} : vector<8x512xf32> to vector<8x128xf32>
    %527 = arith.negf %526 : vector<8x128xf32>
    %528 = math.exp %527 : vector<8x128xf32>
    %cst_120 = arith.constant 1.000000e+00 : f32
    %529 = vector.broadcast %cst_120 : f32 to vector<8x128xf32>
    %530 = arith.addf %529, %528 : vector<8x128xf32>
    %531 = arith.divf %529, %530 : vector<8x128xf32>
    %532 = arith.mulf %523, %507 : vector<8x128xf32>
    %533 = arith.mulf %517, %525 : vector<8x128xf32>
    %534 = arith.addf %532, %533 : vector<8x128xf32>
    %535 = math.tanh %534 : vector<8x128xf32>
    %536 = arith.mulf %531, %535 : vector<8x128xf32>
    %c0_121 = arith.constant 0 : index
    %c0_122 = arith.constant 0 : index
    %537 = vector.load %arg16[%c0_121, %c0_122] : memref<64x256xf32, #tpu.memory_space<vmem>>, vector<8x128xf32>
    tpu.vector_store %arg16[%c0_121, %c0_122], %536 {strides = array<i32>} : memref<64x256xf32, #tpu.memory_space<vmem>>, vector<8x128xf32>,
    %538 = vector.extract_strided_slice %504 {offsets = [8, 0], sizes = [8, 512], strides = [1, 1]} : vector<64x512xf32> to vector<8x512xf32>
    %539 = arith.truncf %536 : vector<8x128xf32> to vector<8x128xbf16>
    %cst_123 = arith.constant dense<0.000000e+00> : vector<8x512xf32>
    %540 = tpu.matmul %539, %505, %cst_123 {dimension_numbers = #tpu.dot_dimension_numbers<[1], [0], [0], [1], [0, 0, 1, 1], [], []>} : vector<8x128xbf16>, vector<128x512xbf16>, vector<8x512xf32> -> vector<8x512xf32>
    %541 = arith.addf %538, %540 : vector<8x512xf32>
    %542 = vector.extract_strided_slice %541 {offsets = [0, 0], sizes = [8, 128], strides = [1, 1]} : vector<8x512xf32> to vector<8x128xf32>
    %543 = arith.negf %542 : vector<8x128xf32>
    %544 = math.exp %543 : vector<8x128xf32>
    %cst_124 = arith.constant 1.000000e+00 : f32
    %545 = vector.broadcast %cst_124 : f32 to vector<8x128xf32>
    %546 = arith.addf %545, %544 : vector<8x128xf32>
    %547 = arith.divf %545, %546 : vector<8x128xf32>
    %548 = vector.extract_strided_slice %541 {offsets = [0, 128], sizes = [8, 128], strides = [1, 1]} : vector<8x512xf32> to vector<8x128xf32>
    %549 = arith.negf %548 : vector<8x128xf32>
    %550 = math.exp %549 : vector<8x128xf32>
    %cst_125 = arith.constant 1.000000e+00 : f32
    %551 = vector.broadcast %cst_125 : f32 to vector<8x128xf32>
    %552 = arith.addf %551, %550 : vector<8x128xf32>
    %553 = arith.divf %551, %552 : vector<8x128xf32>
    %554 = vector.extract_strided_slice %541 {offsets = [0, 256], sizes = [8, 128], strides = [1, 1]} : vector<8x512xf32> to vector<8x128xf32>
    %555 = math.tanh %554 : vector<8x128xf32>
    %556 = vector.extract_strided_slice %541 {offsets = [0, 384], sizes = [8, 128], strides = [1, 1]} : vector<8x512xf32> to vector<8x128xf32>
    %557 = arith.negf %556 : vector<8x128xf32>
    %558 = math.exp %557 : vector<8x128xf32>
    %cst_126 = arith.constant 1.000000e+00 : f32
    %559 = vector.broadcast %cst_126 : f32 to vector<8x128xf32>
    %560 = arith.addf %559, %558 : vector<8x128xf32>
    %561 = arith.divf %559, %560 : vector<8x128xf32>
    %562 = arith.mulf %553, %534 : vector<8x128xf32>
    %563 = arith.mulf %547, %555 : vector<8x128xf32>
    %564 = arith.addf %562, %563 : vector<8x128xf32>
    %565 = math.tanh %564 : vector<8x128xf32>
    %566 = arith.mulf %561, %565 : vector<8x128xf32>
    %c8_127 = arith.constant 8 : index
    %c0_128 = arith.constant 0 : index
    %567 = vector.load %arg16[%c8_127, %c0_128] : memref<64x256xf32, #tpu.memory_space<vmem>>, vector<8x128xf32>
    tpu.vector_store %arg16[%c8_127, %c0_128], %566 {strides = array<i32>} : memref<64x256xf32, #tpu.memory_space<vmem>>, vector<8x128xf32>,
    %568 = vector.extract_strided_slice %504 {offsets = [16, 0], sizes = [8, 512], strides = [1, 1]} : vector<64x512xf32> to vector<8x512xf32>
    %569 = arith.truncf %566 : vector<8x128xf32> to vector<8x128xbf16>
    %cst_129 = arith.constant dense<0.000000e+00> : vector<8x512xf32>
    %570 = tpu.matmul %569, %505, %cst_129 {dimension_numbers = #tpu.dot_dimension_numbers<[1], [0], [0], [1], [0, 0, 1, 1], [], []>} : vector<8x128xbf16>, vector<128x512xbf16>, vector<8x512xf32> -> vector<8x512xf32>
    %571 = arith.addf %568, %570 : vector<8x512xf32>
    %572 = vector.extract_strided_slice %571 {offsets = [0, 0], sizes = [8, 128], strides = [1, 1]} : vector<8x512xf32> to vector<8x128xf32>
    %573 = arith.negf %572 : vector<8x128xf32>
    %574 = math.exp %573 : vector<8x128xf32>
    %cst_130 = arith.constant 1.000000e+00 : f32
    %575 = vector.broadcast %cst_130 : f32 to vector<8x128xf32>
    %576 = arith.addf %575, %574 : vector<8x128xf32>
    %577 = arith.divf %575, %576 : vector<8x128xf32>
    %578 = vector.extract_strided_slice %571 {offsets = [0, 128], sizes = [8, 128], strides = [1, 1]} : vector<8x512xf32> to vector<8x128xf32>
    %579 = arith.negf %578 : vector<8x128xf32>
    %580 = math.exp %579 : vector<8x128xf32>
    %cst_131 = arith.constant 1.000000e+00 : f32
    %581 = vector.broadcast %cst_131 : f32 to vector<8x128xf32>
    %582 = arith.addf %581, %580 : vector<8x128xf32>
    %583 = arith.divf %581, %582 : vector<8x128xf32>
    %584 = vector.extract_strided_slice %571 {offsets = [0, 256], sizes = [8, 128], strides = [1, 1]} : vector<8x512xf32> to vector<8x128xf32>
    %585 = math.tanh %584 : vector<8x128xf32>
    %586 = vector.extract_strided_slice %571 {offsets = [0, 384], sizes = [8, 128], strides = [1, 1]} : vector<8x512xf32> to vector<8x128xf32>
    %587 = arith.negf %586 : vector<8x128xf32>
    %588 = math.exp %587 : vector<8x128xf32>
    %cst_132 = arith.constant 1.000000e+00 : f32
    %589 = vector.broadcast %cst_132 : f32 to vector<8x128xf32>
    %590 = arith.addf %589, %588 : vector<8x128xf32>
    %591 = arith.divf %589, %590 : vector<8x128xf32>
    %592 = arith.mulf %583, %564 : vector<8x128xf32>
    %593 = arith.mulf %577, %585 : vector<8x128xf32>
    %594 = arith.addf %592, %593 : vector<8x128xf32>
    %595 = math.tanh %594 : vector<8x128xf32>
    %596 = arith.mulf %591, %595 : vector<8x128xf32>
    %c16_133 = arith.constant 16 : index
    %c0_134 = arith.constant 0 : index
    %597 = vector.load %arg16[%c16_133, %c0_134] : memref<64x256xf32, #tpu.memory_space<vmem>>, vector<8x128xf32>
    tpu.vector_store %arg16[%c16_133, %c0_134], %596 {strides = array<i32>} : memref<64x256xf32, #tpu.memory_space<vmem>>, vector<8x128xf32>,
    %598 = vector.extract_strided_slice %504 {offsets = [24, 0], sizes = [8, 512], strides = [1, 1]} : vector<64x512xf32> to vector<8x512xf32>
    %599 = arith.truncf %596 : vector<8x128xf32> to vector<8x128xbf16>
    %cst_135 = arith.constant dense<0.000000e+00> : vector<8x512xf32>
    %600 = tpu.matmul %599, %505, %cst_135 {dimension_numbers = #tpu.dot_dimension_numbers<[1], [0], [0], [1], [0, 0, 1, 1], [], []>} : vector<8x128xbf16>, vector<128x512xbf16>, vector<8x512xf32> -> vector<8x512xf32>
    %601 = arith.addf %598, %600 : vector<8x512xf32>
    %602 = vector.extract_strided_slice %601 {offsets = [0, 0], sizes = [8, 128], strides = [1, 1]} : vector<8x512xf32> to vector<8x128xf32>
    %603 = arith.negf %602 : vector<8x128xf32>
    %604 = math.exp %603 : vector<8x128xf32>
    %cst_136 = arith.constant 1.000000e+00 : f32
    %605 = vector.broadcast %cst_136 : f32 to vector<8x128xf32>
    %606 = arith.addf %605, %604 : vector<8x128xf32>
    %607 = arith.divf %605, %606 : vector<8x128xf32>
    %608 = vector.extract_strided_slice %601 {offsets = [0, 128], sizes = [8, 128], strides = [1, 1]} : vector<8x512xf32> to vector<8x128xf32>
    %609 = arith.negf %608 : vector<8x128xf32>
    %610 = math.exp %609 : vector<8x128xf32>
    %cst_137 = arith.constant 1.000000e+00 : f32
    %611 = vector.broadcast %cst_137 : f32 to vector<8x128xf32>
    %612 = arith.addf %611, %610 : vector<8x128xf32>
    %613 = arith.divf %611, %612 : vector<8x128xf32>
    %614 = vector.extract_strided_slice %601 {offsets = [0, 256], sizes = [8, 128], strides = [1, 1]} : vector<8x512xf32> to vector<8x128xf32>
    %615 = math.tanh %614 : vector<8x128xf32>
    %616 = vector.extract_strided_slice %601 {offsets = [0, 384], sizes = [8, 128], strides = [1, 1]} : vector<8x512xf32> to vector<8x128xf32>
    %617 = arith.negf %616 : vector<8x128xf32>
    %618 = math.exp %617 : vector<8x128xf32>
    %cst_138 = arith.constant 1.000000e+00 : f32
    %619 = vector.broadcast %cst_138 : f32 to vector<8x128xf32>
    %620 = arith.addf %619, %618 : vector<8x128xf32>
    %621 = arith.divf %619, %620 : vector<8x128xf32>
    %622 = arith.mulf %613, %594 : vector<8x128xf32>
    %623 = arith.mulf %607, %615 : vector<8x128xf32>
    %624 = arith.addf %622, %623 : vector<8x128xf32>
    %625 = math.tanh %624 : vector<8x128xf32>
    %626 = arith.mulf %621, %625 : vector<8x128xf32>
    %c24_139 = arith.constant 24 : index
    %c0_140 = arith.constant 0 : index
    %627 = vector.load %arg16[%c24_139, %c0_140] : memref<64x256xf32, #tpu.memory_space<vmem>>, vector<8x128xf32>
    tpu.vector_store %arg16[%c24_139, %c0_140], %626 {strides = array<i32>} : memref<64x256xf32, #tpu.memory_space<vmem>>, vector<8x128xf32>,
    %628 = vector.extract_strided_slice %504 {offsets = [32, 0], sizes = [8, 512], strides = [1, 1]} : vector<64x512xf32> to vector<8x512xf32>
    %629 = arith.truncf %626 : vector<8x128xf32> to vector<8x128xbf16>
    %cst_141 = arith.constant dense<0.000000e+00> : vector<8x512xf32>
    %630 = tpu.matmul %629, %505, %cst_141 {dimension_numbers = #tpu.dot_dimension_numbers<[1], [0], [0], [1], [0, 0, 1, 1], [], []>} : vector<8x128xbf16>, vector<128x512xbf16>, vector<8x512xf32> -> vector<8x512xf32>
    %631 = arith.addf %628, %630 : vector<8x512xf32>
    %632 = vector.extract_strided_slice %631 {offsets = [0, 0], sizes = [8, 128], strides = [1, 1]} : vector<8x512xf32> to vector<8x128xf32>
    %633 = arith.negf %632 : vector<8x128xf32>
    %634 = math.exp %633 : vector<8x128xf32>
    %cst_142 = arith.constant 1.000000e+00 : f32
    %635 = vector.broadcast %cst_142 : f32 to vector<8x128xf32>
    %636 = arith.addf %635, %634 : vector<8x128xf32>
    %637 = arith.divf %635, %636 : vector<8x128xf32>
    %638 = vector.extract_strided_slice %631 {offsets = [0, 128], sizes = [8, 128], strides = [1, 1]} : vector<8x512xf32> to vector<8x128xf32>
    %639 = arith.negf %638 : vector<8x128xf32>
    %640 = math.exp %639 : vector<8x128xf32>
    %cst_143 = arith.constant 1.000000e+00 : f32
    %641 = vector.broadcast %cst_143 : f32 to vector<8x128xf32>
    %642 = arith.addf %641, %640 : vector<8x128xf32>
    %643 = arith.divf %641, %642 : vector<8x128xf32>
    %644 = vector.extract_strided_slice %631 {offsets = [0, 256], sizes = [8, 128], strides = [1, 1]} : vector<8x512xf32> to vector<8x128xf32>
    %645 = math.tanh %644 : vector<8x128xf32>
    %646 = vector.extract_strided_slice %631 {offsets = [0, 384], sizes = [8, 128], strides = [1, 1]} : vector<8x512xf32> to vector<8x128xf32>
    %647 = arith.negf %646 : vector<8x128xf32>
    %648 = math.exp %647 : vector<8x128xf32>
    %cst_144 = arith.constant 1.000000e+00 : f32
    %649 = vector.broadcast %cst_144 : f32 to vector<8x128xf32>
    %650 = arith.addf %649, %648 : vector<8x128xf32>
    %651 = arith.divf %649, %650 : vector<8x128xf32>
    %652 = arith.mulf %643, %624 : vector<8x128xf32>
    %653 = arith.mulf %637, %645 : vector<8x128xf32>
    %654 = arith.addf %652, %653 : vector<8x128xf32>
    %655 = math.tanh %654 : vector<8x128xf32>
    %656 = arith.mulf %651, %655 : vector<8x128xf32>
    %c32_145 = arith.constant 32 : index
    %c0_146 = arith.constant 0 : index
    %657 = vector.load %arg16[%c32_145, %c0_146] : memref<64x256xf32, #tpu.memory_space<vmem>>, vector<8x128xf32>
    tpu.vector_store %arg16[%c32_145, %c0_146], %656 {strides = array<i32>} : memref<64x256xf32, #tpu.memory_space<vmem>>, vector<8x128xf32>,
    %658 = vector.extract_strided_slice %504 {offsets = [40, 0], sizes = [8, 512], strides = [1, 1]} : vector<64x512xf32> to vector<8x512xf32>
    %659 = arith.truncf %656 : vector<8x128xf32> to vector<8x128xbf16>
    %cst_147 = arith.constant dense<0.000000e+00> : vector<8x512xf32>
    %660 = tpu.matmul %659, %505, %cst_147 {dimension_numbers = #tpu.dot_dimension_numbers<[1], [0], [0], [1], [0, 0, 1, 1], [], []>} : vector<8x128xbf16>, vector<128x512xbf16>, vector<8x512xf32> -> vector<8x512xf32>
    %661 = arith.addf %658, %660 : vector<8x512xf32>
    %662 = vector.extract_strided_slice %661 {offsets = [0, 0], sizes = [8, 128], strides = [1, 1]} : vector<8x512xf32> to vector<8x128xf32>
    %663 = arith.negf %662 : vector<8x128xf32>
    %664 = math.exp %663 : vector<8x128xf32>
    %cst_148 = arith.constant 1.000000e+00 : f32
    %665 = vector.broadcast %cst_148 : f32 to vector<8x128xf32>
    %666 = arith.addf %665, %664 : vector<8x128xf32>
    %667 = arith.divf %665, %666 : vector<8x128xf32>
    %668 = vector.extract_strided_slice %661 {offsets = [0, 128], sizes = [8, 128], strides = [1, 1]} : vector<8x512xf32> to vector<8x128xf32>
    %669 = arith.negf %668 : vector<8x128xf32>
    %670 = math.exp %669 : vector<8x128xf32>
    %cst_149 = arith.constant 1.000000e+00 : f32
    %671 = vector.broadcast %cst_149 : f32 to vector<8x128xf32>
    %672 = arith.addf %671, %670 : vector<8x128xf32>
    %673 = arith.divf %671, %672 : vector<8x128xf32>
    %674 = vector.extract_strided_slice %661 {offsets = [0, 256], sizes = [8, 128], strides = [1, 1]} : vector<8x512xf32> to vector<8x128xf32>
    %675 = math.tanh %674 : vector<8x128xf32>
    %676 = vector.extract_strided_slice %661 {offsets = [0, 384], sizes = [8, 128], strides = [1, 1]} : vector<8x512xf32> to vector<8x128xf32>
    %677 = arith.negf %676 : vector<8x128xf32>
    %678 = math.exp %677 : vector<8x128xf32>
    %cst_150 = arith.constant 1.000000e+00 : f32
    %679 = vector.broadcast %cst_150 : f32 to vector<8x128xf32>
    %680 = arith.addf %679, %678 : vector<8x128xf32>
    %681 = arith.divf %679, %680 : vector<8x128xf32>
    %682 = arith.mulf %673, %654 : vector<8x128xf32>
    %683 = arith.mulf %667, %675 : vector<8x128xf32>
    %684 = arith.addf %682, %683 : vector<8x128xf32>
    %685 = math.tanh %684 : vector<8x128xf32>
    %686 = arith.mulf %681, %685 : vector<8x128xf32>
    %c40_151 = arith.constant 40 : index
    %c0_152 = arith.constant 0 : index
    %687 = vector.load %arg16[%c40_151, %c0_152] : memref<64x256xf32, #tpu.memory_space<vmem>>, vector<8x128xf32>
    tpu.vector_store %arg16[%c40_151, %c0_152], %686 {strides = array<i32>} : memref<64x256xf32, #tpu.memory_space<vmem>>, vector<8x128xf32>,
    %688 = vector.extract_strided_slice %504 {offsets = [48, 0], sizes = [8, 512], strides = [1, 1]} : vector<64x512xf32> to vector<8x512xf32>
    %689 = arith.truncf %686 : vector<8x128xf32> to vector<8x128xbf16>
    %cst_153 = arith.constant dense<0.000000e+00> : vector<8x512xf32>
    %690 = tpu.matmul %689, %505, %cst_153 {dimension_numbers = #tpu.dot_dimension_numbers<[1], [0], [0], [1], [0, 0, 1, 1], [], []>} : vector<8x128xbf16>, vector<128x512xbf16>, vector<8x512xf32> -> vector<8x512xf32>
    %691 = arith.addf %688, %690 : vector<8x512xf32>
    %692 = vector.extract_strided_slice %691 {offsets = [0, 0], sizes = [8, 128], strides = [1, 1]} : vector<8x512xf32> to vector<8x128xf32>
    %693 = arith.negf %692 : vector<8x128xf32>
    %694 = math.exp %693 : vector<8x128xf32>
    %cst_154 = arith.constant 1.000000e+00 : f32
    %695 = vector.broadcast %cst_154 : f32 to vector<8x128xf32>
    %696 = arith.addf %695, %694 : vector<8x128xf32>
    %697 = arith.divf %695, %696 : vector<8x128xf32>
    %698 = vector.extract_strided_slice %691 {offsets = [0, 128], sizes = [8, 128], strides = [1, 1]} : vector<8x512xf32> to vector<8x128xf32>
    %699 = arith.negf %698 : vector<8x128xf32>
    %700 = math.exp %699 : vector<8x128xf32>
    %cst_155 = arith.constant 1.000000e+00 : f32
    %701 = vector.broadcast %cst_155 : f32 to vector<8x128xf32>
    %702 = arith.addf %701, %700 : vector<8x128xf32>
    %703 = arith.divf %701, %702 : vector<8x128xf32>
    %704 = vector.extract_strided_slice %691 {offsets = [0, 256], sizes = [8, 128], strides = [1, 1]} : vector<8x512xf32> to vector<8x128xf32>
    %705 = math.tanh %704 : vector<8x128xf32>
    %706 = vector.extract_strided_slice %691 {offsets = [0, 384], sizes = [8, 128], strides = [1, 1]} : vector<8x512xf32> to vector<8x128xf32>
    %707 = arith.negf %706 : vector<8x128xf32>
    %708 = math.exp %707 : vector<8x128xf32>
    %cst_156 = arith.constant 1.000000e+00 : f32
    %709 = vector.broadcast %cst_156 : f32 to vector<8x128xf32>
    %710 = arith.addf %709, %708 : vector<8x128xf32>
    %711 = arith.divf %709, %710 : vector<8x128xf32>
    %712 = arith.mulf %703, %684 : vector<8x128xf32>
    %713 = arith.mulf %697, %705 : vector<8x128xf32>
    %714 = arith.addf %712, %713 : vector<8x128xf32>
    %715 = math.tanh %714 : vector<8x128xf32>
    %716 = arith.mulf %711, %715 : vector<8x128xf32>
    %c48_157 = arith.constant 48 : index
    %c0_158 = arith.constant 0 : index
    %717 = vector.load %arg16[%c48_157, %c0_158] : memref<64x256xf32, #tpu.memory_space<vmem>>, vector<8x128xf32>
    tpu.vector_store %arg16[%c48_157, %c0_158], %716 {strides = array<i32>} : memref<64x256xf32, #tpu.memory_space<vmem>>, vector<8x128xf32>,
    %718 = vector.extract_strided_slice %504 {offsets = [56, 0], sizes = [8, 512], strides = [1, 1]} : vector<64x512xf32> to vector<8x512xf32>
    %719 = arith.truncf %716 : vector<8x128xf32> to vector<8x128xbf16>
    %cst_159 = arith.constant dense<0.000000e+00> : vector<8x512xf32>
    %720 = tpu.matmul %719, %505, %cst_159 {dimension_numbers = #tpu.dot_dimension_numbers<[1], [0], [0], [1], [0, 0, 1, 1], [], []>} : vector<8x128xbf16>, vector<128x512xbf16>, vector<8x512xf32> -> vector<8x512xf32>
    %721 = arith.addf %718, %720 : vector<8x512xf32>
    %722 = vector.extract_strided_slice %721 {offsets = [0, 0], sizes = [8, 128], strides = [1, 1]} : vector<8x512xf32> to vector<8x128xf32>
    %723 = arith.negf %722 : vector<8x128xf32>
    %724 = math.exp %723 : vector<8x128xf32>
    %cst_160 = arith.constant 1.000000e+00 : f32
    %725 = vector.broadcast %cst_160 : f32 to vector<8x128xf32>
    %726 = arith.addf %725, %724 : vector<8x128xf32>
    %727 = arith.divf %725, %726 : vector<8x128xf32>
    %728 = vector.extract_strided_slice %721 {offsets = [0, 128], sizes = [8, 128], strides = [1, 1]} : vector<8x512xf32> to vector<8x128xf32>
    %729 = arith.negf %728 : vector<8x128xf32>
    %730 = math.exp %729 : vector<8x128xf32>
    %cst_161 = arith.constant 1.000000e+00 : f32
    %731 = vector.broadcast %cst_161 : f32 to vector<8x128xf32>
    %732 = arith.addf %731, %730 : vector<8x128xf32>
    %733 = arith.divf %731, %732 : vector<8x128xf32>
    %734 = vector.extract_strided_slice %721 {offsets = [0, 256], sizes = [8, 128], strides = [1, 1]} : vector<8x512xf32> to vector<8x128xf32>
    %735 = math.tanh %734 : vector<8x128xf32>
    %736 = vector.extract_strided_slice %721 {offsets = [0, 384], sizes = [8, 128], strides = [1, 1]} : vector<8x512xf32> to vector<8x128xf32>
    %737 = arith.negf %736 : vector<8x128xf32>
    %738 = math.exp %737 : vector<8x128xf32>
    %cst_162 = arith.constant 1.000000e+00 : f32
    %739 = vector.broadcast %cst_162 : f32 to vector<8x128xf32>
    %740 = arith.addf %739, %738 : vector<8x128xf32>
    %741 = arith.divf %739, %740 : vector<8x128xf32>
    %742 = arith.mulf %733, %714 : vector<8x128xf32>
    %743 = arith.mulf %727, %735 : vector<8x128xf32>
    %744 = arith.addf %742, %743 : vector<8x128xf32>
    %745 = math.tanh %744 : vector<8x128xf32>
    %746 = arith.mulf %741, %745 : vector<8x128xf32>
    %c56_163 = arith.constant 56 : index
    %c0_164 = arith.constant 0 : index
    %747 = vector.load %arg16[%c56_163, %c0_164] : memref<64x256xf32, #tpu.memory_space<vmem>>, vector<8x128xf32>
    tpu.vector_store %arg16[%c56_163, %c0_164], %746 {strides = array<i32>} : memref<64x256xf32, #tpu.memory_space<vmem>>, vector<8x128xf32>,
    %c0_165 = arith.constant 0 : index
    %c0_166 = arith.constant 0 : index
    %748 = vector.load %arg10[%c0_165, %c0_166] : memref<256x512xbf16, #tpu.memory_space<vmem>>, vector<256x512xbf16>
    %cst_167 = arith.constant dense<0.000000e+00> : vector<64x512xf32>
    %749 = tpu.matmul %499, %748, %cst_167 {dimension_numbers = #tpu.dot_dimension_numbers<[1], [0], [0], [1], [0, 0, 1, 1], [], []>} : vector<64x256xbf16>, vector<256x512xbf16>, vector<64x512xf32> -> vector<64x512xf32>
    %c0_168 = arith.constant 0 : index
    %c0_169 = arith.constant 0 : index
    %750 = vector.load %arg12[%c0_168, %c0_169] : memref<1x512xf32, #tpu.memory_space<vmem>>, vector<1x512xf32>
    %751 = vector.broadcast %750 : vector<1x512xf32> to vector<64x512xf32>
    %752 = arith.addf %749, %751 : vector<64x512xf32>
    %c0_170 = arith.constant 0 : index
    %c0_171 = arith.constant 0 : index
    %753 = vector.load %arg11[%c0_170, %c0_171] : memref<128x512xbf16, #tpu.memory_space<vmem>>, vector<128x512xbf16>
    %cst_172 = arith.constant 0.000000e+00 : f32
    %754 = vector.broadcast %cst_172 : f32 to vector<8x128xf32>
    %cst_173 = arith.constant 0.000000e+00 : f32
    %755 = vector.broadcast %cst_173 : f32 to vector<8x128xf32>
    %756 = vector.extract_strided_slice %752 {offsets = [56, 0], sizes = [8, 512], strides = [1, 1]} : vector<64x512xf32> to vector<8x512xf32>
    %757 = arith.truncf %754 : vector<8x128xf32> to vector<8x128xbf16>
    %cst_174 = arith.constant dense<0.000000e+00> : vector<8x512xf32>
    %758 = tpu.matmul %757, %753, %cst_174 {dimension_numbers = #tpu.dot_dimension_numbers<[1], [0], [0], [1], [0, 0, 1, 1], [], []>} : vector<8x128xbf16>, vector<128x512xbf16>, vector<8x512xf32> -> vector<8x512xf32>
    %759 = arith.addf %756, %758 : vector<8x512xf32>
    %760 = vector.extract_strided_slice %759 {offsets = [0, 0], sizes = [8, 128], strides = [1, 1]} : vector<8x512xf32> to vector<8x128xf32>
    %761 = arith.negf %760 : vector<8x128xf32>
    %762 = math.exp %761 : vector<8x128xf32>
    %cst_175 = arith.constant 1.000000e+00 : f32
    %763 = vector.broadcast %cst_175 : f32 to vector<8x128xf32>
    %764 = arith.addf %763, %762 : vector<8x128xf32>
    %765 = arith.divf %763, %764 : vector<8x128xf32>
    %766 = vector.extract_strided_slice %759 {offsets = [0, 128], sizes = [8, 128], strides = [1, 1]} : vector<8x512xf32> to vector<8x128xf32>
    %767 = arith.negf %766 : vector<8x128xf32>
    %768 = math.exp %767 : vector<8x128xf32>
    %cst_176 = arith.constant 1.000000e+00 : f32
    %769 = vector.broadcast %cst_176 : f32 to vector<8x128xf32>
    %770 = arith.addf %769, %768 : vector<8x128xf32>
    %771 = arith.divf %769, %770 : vector<8x128xf32>
    %772 = vector.extract_strided_slice %759 {offsets = [0, 256], sizes = [8, 128], strides = [1, 1]} : vector<8x512xf32> to vector<8x128xf32>
    %773 = math.tanh %772 : vector<8x128xf32>
    %774 = vector.extract_strided_slice %759 {offsets = [0, 384], sizes = [8, 128], strides = [1, 1]} : vector<8x512xf32> to vector<8x128xf32>
    %775 = arith.negf %774 : vector<8x128xf32>
    %776 = math.exp %775 : vector<8x128xf32>
    %cst_177 = arith.constant 1.000000e+00 : f32
    %777 = vector.broadcast %cst_177 : f32 to vector<8x128xf32>
    %778 = arith.addf %777, %776 : vector<8x128xf32>
    %779 = arith.divf %777, %778 : vector<8x128xf32>
    %780 = arith.mulf %771, %755 : vector<8x128xf32>
    %781 = arith.mulf %765, %773 : vector<8x128xf32>
    %782 = arith.addf %780, %781 : vector<8x128xf32>
    %783 = math.tanh %782 : vector<8x128xf32>
    %784 = arith.mulf %779, %783 : vector<8x128xf32>
    %c56_178 = arith.constant 56 : index
    %c128_179 = arith.constant 128 : index
    %785 = vector.load %arg16[%c56_178, %c128_179] : memref<64x256xf32, #tpu.memory_space<vmem>>, vector<8x128xf32>
    tpu.vector_store %arg16[%c56_178, %c128_179], %784 {strides = array<i32>} : memref<64x256xf32, #tpu.memory_space<vmem>>, vector<8x128xf32>,
    %786 = vector.extract_strided_slice %752 {offsets = [48, 0], sizes = [8, 512], strides = [1, 1]} : vector<64x512xf32> to vector<8x512xf32>
    %787 = arith.truncf %784 : vector<8x128xf32> to vector<8x128xbf16>
    %cst_180 = arith.constant dense<0.000000e+00> : vector<8x512xf32>
    %788 = tpu.matmul %787, %753, %cst_180 {dimension_numbers = #tpu.dot_dimension_numbers<[1], [0], [0], [1], [0, 0, 1, 1], [], []>} : vector<8x128xbf16>, vector<128x512xbf16>, vector<8x512xf32> -> vector<8x512xf32>
    %789 = arith.addf %786, %788 : vector<8x512xf32>
    %790 = vector.extract_strided_slice %789 {offsets = [0, 0], sizes = [8, 128], strides = [1, 1]} : vector<8x512xf32> to vector<8x128xf32>
    %791 = arith.negf %790 : vector<8x128xf32>
    %792 = math.exp %791 : vector<8x128xf32>
    %cst_181 = arith.constant 1.000000e+00 : f32
    %793 = vector.broadcast %cst_181 : f32 to vector<8x128xf32>
    %794 = arith.addf %793, %792 : vector<8x128xf32>
    %795 = arith.divf %793, %794 : vector<8x128xf32>
    %796 = vector.extract_strided_slice %789 {offsets = [0, 128], sizes = [8, 128], strides = [1, 1]} : vector<8x512xf32> to vector<8x128xf32>
    %797 = arith.negf %796 : vector<8x128xf32>
    %798 = math.exp %797 : vector<8x128xf32>
    %cst_182 = arith.constant 1.000000e+00 : f32
    %799 = vector.broadcast %cst_182 : f32 to vector<8x128xf32>
    %800 = arith.addf %799, %798 : vector<8x128xf32>
    %801 = arith.divf %799, %800 : vector<8x128xf32>
    %802 = vector.extract_strided_slice %789 {offsets = [0, 256], sizes = [8, 128], strides = [1, 1]} : vector<8x512xf32> to vector<8x128xf32>
    %803 = math.tanh %802 : vector<8x128xf32>
    %804 = vector.extract_strided_slice %789 {offsets = [0, 384], sizes = [8, 128], strides = [1, 1]} : vector<8x512xf32> to vector<8x128xf32>
    %805 = arith.negf %804 : vector<8x128xf32>
    %806 = math.exp %805 : vector<8x128xf32>
    %cst_183 = arith.constant 1.000000e+00 : f32
    %807 = vector.broadcast %cst_183 : f32 to vector<8x128xf32>
    %808 = arith.addf %807, %806 : vector<8x128xf32>
    %809 = arith.divf %807, %808 : vector<8x128xf32>
    %810 = arith.mulf %801, %782 : vector<8x128xf32>
    %811 = arith.mulf %795, %803 : vector<8x128xf32>
    %812 = arith.addf %810, %811 : vector<8x128xf32>
    %813 = math.tanh %812 : vector<8x128xf32>
    %814 = arith.mulf %809, %813 : vector<8x128xf32>
    %c48_184 = arith.constant 48 : index
    %c128_185 = arith.constant 128 : index
    %815 = vector.load %arg16[%c48_184, %c128_185] : memref<64x256xf32, #tpu.memory_space<vmem>>, vector<8x128xf32>
    tpu.vector_store %arg16[%c48_184, %c128_185], %814 {strides = array<i32>} : memref<64x256xf32, #tpu.memory_space<vmem>>, vector<8x128xf32>,
    %816 = vector.extract_strided_slice %752 {offsets = [40, 0], sizes = [8, 512], strides = [1, 1]} : vector<64x512xf32> to vector<8x512xf32>
    %817 = arith.truncf %814 : vector<8x128xf32> to vector<8x128xbf16>
    %cst_186 = arith.constant dense<0.000000e+00> : vector<8x512xf32>
    %818 = tpu.matmul %817, %753, %cst_186 {dimension_numbers = #tpu.dot_dimension_numbers<[1], [0], [0], [1], [0, 0, 1, 1], [], []>} : vector<8x128xbf16>, vector<128x512xbf16>, vector<8x512xf32> -> vector<8x512xf32>
    %819 = arith.addf %816, %818 : vector<8x512xf32>
    %820 = vector.extract_strided_slice %819 {offsets = [0, 0], sizes = [8, 128], strides = [1, 1]} : vector<8x512xf32> to vector<8x128xf32>
    %821 = arith.negf %820 : vector<8x128xf32>
    %822 = math.exp %821 : vector<8x128xf32>
    %cst_187 = arith.constant 1.000000e+00 : f32
    %823 = vector.broadcast %cst_187 : f32 to vector<8x128xf32>
    %824 = arith.addf %823, %822 : vector<8x128xf32>
    %825 = arith.divf %823, %824 : vector<8x128xf32>
    %826 = vector.extract_strided_slice %819 {offsets = [0, 128], sizes = [8, 128], strides = [1, 1]} : vector<8x512xf32> to vector<8x128xf32>
    %827 = arith.negf %826 : vector<8x128xf32>
    %828 = math.exp %827 : vector<8x128xf32>
    %cst_188 = arith.constant 1.000000e+00 : f32
    %829 = vector.broadcast %cst_188 : f32 to vector<8x128xf32>
    %830 = arith.addf %829, %828 : vector<8x128xf32>
    %831 = arith.divf %829, %830 : vector<8x128xf32>
    %832 = vector.extract_strided_slice %819 {offsets = [0, 256], sizes = [8, 128], strides = [1, 1]} : vector<8x512xf32> to vector<8x128xf32>
    %833 = math.tanh %832 : vector<8x128xf32>
    %834 = vector.extract_strided_slice %819 {offsets = [0, 384], sizes = [8, 128], strides = [1, 1]} : vector<8x512xf32> to vector<8x128xf32>
    %835 = arith.negf %834 : vector<8x128xf32>
    %836 = math.exp %835 : vector<8x128xf32>
    %cst_189 = arith.constant 1.000000e+00 : f32
    %837 = vector.broadcast %cst_189 : f32 to vector<8x128xf32>
    %838 = arith.addf %837, %836 : vector<8x128xf32>
    %839 = arith.divf %837, %838 : vector<8x128xf32>
    %840 = arith.mulf %831, %812 : vector<8x128xf32>
    %841 = arith.mulf %825, %833 : vector<8x128xf32>
    %842 = arith.addf %840, %841 : vector<8x128xf32>
    %843 = math.tanh %842 : vector<8x128xf32>
    %844 = arith.mulf %839, %843 : vector<8x128xf32>
    %c40_190 = arith.constant 40 : index
    %c128_191 = arith.constant 128 : index
    %845 = vector.load %arg16[%c40_190, %c128_191] : memref<64x256xf32, #tpu.memory_space<vmem>>, vector<8x128xf32>
    tpu.vector_store %arg16[%c40_190, %c128_191], %844 {strides = array<i32>} : memref<64x256xf32, #tpu.memory_space<vmem>>, vector<8x128xf32>,
    %846 = vector.extract_strided_slice %752 {offsets = [32, 0], sizes = [8, 512], strides = [1, 1]} : vector<64x512xf32> to vector<8x512xf32>
    %847 = arith.truncf %844 : vector<8x128xf32> to vector<8x128xbf16>
    %cst_192 = arith.constant dense<0.000000e+00> : vector<8x512xf32>
    %848 = tpu.matmul %847, %753, %cst_192 {dimension_numbers = #tpu.dot_dimension_numbers<[1], [0], [0], [1], [0, 0, 1, 1], [], []>} : vector<8x128xbf16>, vector<128x512xbf16>, vector<8x512xf32> -> vector<8x512xf32>
    %849 = arith.addf %846, %848 : vector<8x512xf32>
    %850 = vector.extract_strided_slice %849 {offsets = [0, 0], sizes = [8, 128], strides = [1, 1]} : vector<8x512xf32> to vector<8x128xf32>
    %851 = arith.negf %850 : vector<8x128xf32>
    %852 = math.exp %851 : vector<8x128xf32>
    %cst_193 = arith.constant 1.000000e+00 : f32
    %853 = vector.broadcast %cst_193 : f32 to vector<8x128xf32>
    %854 = arith.addf %853, %852 : vector<8x128xf32>
    %855 = arith.divf %853, %854 : vector<8x128xf32>
    %856 = vector.extract_strided_slice %849 {offsets = [0, 128], sizes = [8, 128], strides = [1, 1]} : vector<8x512xf32> to vector<8x128xf32>
    %857 = arith.negf %856 : vector<8x128xf32>
    %858 = math.exp %857 : vector<8x128xf32>
    %cst_194 = arith.constant 1.000000e+00 : f32
    %859 = vector.broadcast %cst_194 : f32 to vector<8x128xf32>
    %860 = arith.addf %859, %858 : vector<8x128xf32>
    %861 = arith.divf %859, %860 : vector<8x128xf32>
    %862 = vector.extract_strided_slice %849 {offsets = [0, 256], sizes = [8, 128], strides = [1, 1]} : vector<8x512xf32> to vector<8x128xf32>
    %863 = math.tanh %862 : vector<8x128xf32>
    %864 = vector.extract_strided_slice %849 {offsets = [0, 384], sizes = [8, 128], strides = [1, 1]} : vector<8x512xf32> to vector<8x128xf32>
    %865 = arith.negf %864 : vector<8x128xf32>
    %866 = math.exp %865 : vector<8x128xf32>
    %cst_195 = arith.constant 1.000000e+00 : f32
    %867 = vector.broadcast %cst_195 : f32 to vector<8x128xf32>
    %868 = arith.addf %867, %866 : vector<8x128xf32>
    %869 = arith.divf %867, %868 : vector<8x128xf32>
    %870 = arith.mulf %861, %842 : vector<8x128xf32>
    %871 = arith.mulf %855, %863 : vector<8x128xf32>
    %872 = arith.addf %870, %871 : vector<8x128xf32>
    %873 = math.tanh %872 : vector<8x128xf32>
    %874 = arith.mulf %869, %873 : vector<8x128xf32>
    %c32_196 = arith.constant 32 : index
    %c128_197 = arith.constant 128 : index
    %875 = vector.load %arg16[%c32_196, %c128_197] : memref<64x256xf32, #tpu.memory_space<vmem>>, vector<8x128xf32>
    tpu.vector_store %arg16[%c32_196, %c128_197], %874 {strides = array<i32>} : memref<64x256xf32, #tpu.memory_space<vmem>>, vector<8x128xf32>,
    %876 = vector.extract_strided_slice %752 {offsets = [24, 0], sizes = [8, 512], strides = [1, 1]} : vector<64x512xf32> to vector<8x512xf32>
    %877 = arith.truncf %874 : vector<8x128xf32> to vector<8x128xbf16>
    %cst_198 = arith.constant dense<0.000000e+00> : vector<8x512xf32>
    %878 = tpu.matmul %877, %753, %cst_198 {dimension_numbers = #tpu.dot_dimension_numbers<[1], [0], [0], [1], [0, 0, 1, 1], [], []>} : vector<8x128xbf16>, vector<128x512xbf16>, vector<8x512xf32> -> vector<8x512xf32>
    %879 = arith.addf %876, %878 : vector<8x512xf32>
    %880 = vector.extract_strided_slice %879 {offsets = [0, 0], sizes = [8, 128], strides = [1, 1]} : vector<8x512xf32> to vector<8x128xf32>
    %881 = arith.negf %880 : vector<8x128xf32>
    %882 = math.exp %881 : vector<8x128xf32>
    %cst_199 = arith.constant 1.000000e+00 : f32
    %883 = vector.broadcast %cst_199 : f32 to vector<8x128xf32>
    %884 = arith.addf %883, %882 : vector<8x128xf32>
    %885 = arith.divf %883, %884 : vector<8x128xf32>
    %886 = vector.extract_strided_slice %879 {offsets = [0, 128], sizes = [8, 128], strides = [1, 1]} : vector<8x512xf32> to vector<8x128xf32>
    %887 = arith.negf %886 : vector<8x128xf32>
    %888 = math.exp %887 : vector<8x128xf32>
    %cst_200 = arith.constant 1.000000e+00 : f32
    %889 = vector.broadcast %cst_200 : f32 to vector<8x128xf32>
    %890 = arith.addf %889, %888 : vector<8x128xf32>
    %891 = arith.divf %889, %890 : vector<8x128xf32>
    %892 = vector.extract_strided_slice %879 {offsets = [0, 256], sizes = [8, 128], strides = [1, 1]} : vector<8x512xf32> to vector<8x128xf32>
    %893 = math.tanh %892 : vector<8x128xf32>
    %894 = vector.extract_strided_slice %879 {offsets = [0, 384], sizes = [8, 128], strides = [1, 1]} : vector<8x512xf32> to vector<8x128xf32>
    %895 = arith.negf %894 : vector<8x128xf32>
    %896 = math.exp %895 : vector<8x128xf32>
    %cst_201 = arith.constant 1.000000e+00 : f32
    %897 = vector.broadcast %cst_201 : f32 to vector<8x128xf32>
    %898 = arith.addf %897, %896 : vector<8x128xf32>
    %899 = arith.divf %897, %898 : vector<8x128xf32>
    %900 = arith.mulf %891, %872 : vector<8x128xf32>
    %901 = arith.mulf %885, %893 : vector<8x128xf32>
    %902 = arith.addf %900, %901 : vector<8x128xf32>
    %903 = math.tanh %902 : vector<8x128xf32>
    %904 = arith.mulf %899, %903 : vector<8x128xf32>
    %c24_202 = arith.constant 24 : index
    %c128_203 = arith.constant 128 : index
    %905 = vector.load %arg16[%c24_202, %c128_203] : memref<64x256xf32, #tpu.memory_space<vmem>>, vector<8x128xf32>
    tpu.vector_store %arg16[%c24_202, %c128_203], %904 {strides = array<i32>} : memref<64x256xf32, #tpu.memory_space<vmem>>, vector<8x128xf32>,
    %906 = vector.extract_strided_slice %752 {offsets = [16, 0], sizes = [8, 512], strides = [1, 1]} : vector<64x512xf32> to vector<8x512xf32>
    %907 = arith.truncf %904 : vector<8x128xf32> to vector<8x128xbf16>
    %cst_204 = arith.constant dense<0.000000e+00> : vector<8x512xf32>
    %908 = tpu.matmul %907, %753, %cst_204 {dimension_numbers = #tpu.dot_dimension_numbers<[1], [0], [0], [1], [0, 0, 1, 1], [], []>} : vector<8x128xbf16>, vector<128x512xbf16>, vector<8x512xf32> -> vector<8x512xf32>
    %909 = arith.addf %906, %908 : vector<8x512xf32>
    %910 = vector.extract_strided_slice %909 {offsets = [0, 0], sizes = [8, 128], strides = [1, 1]} : vector<8x512xf32> to vector<8x128xf32>
    %911 = arith.negf %910 : vector<8x128xf32>
    %912 = math.exp %911 : vector<8x128xf32>
    %cst_205 = arith.constant 1.000000e+00 : f32
    %913 = vector.broadcast %cst_205 : f32 to vector<8x128xf32>
    %914 = arith.addf %913, %912 : vector<8x128xf32>
    %915 = arith.divf %913, %914 : vector<8x128xf32>
    %916 = vector.extract_strided_slice %909 {offsets = [0, 128], sizes = [8, 128], strides = [1, 1]} : vector<8x512xf32> to vector<8x128xf32>
    %917 = arith.negf %916 : vector<8x128xf32>
    %918 = math.exp %917 : vector<8x128xf32>
    %cst_206 = arith.constant 1.000000e+00 : f32
    %919 = vector.broadcast %cst_206 : f32 to vector<8x128xf32>
    %920 = arith.addf %919, %918 : vector<8x128xf32>
    %921 = arith.divf %919, %920 : vector<8x128xf32>
    %922 = vector.extract_strided_slice %909 {offsets = [0, 256], sizes = [8, 128], strides = [1, 1]} : vector<8x512xf32> to vector<8x128xf32>
    %923 = math.tanh %922 : vector<8x128xf32>
    %924 = vector.extract_strided_slice %909 {offsets = [0, 384], sizes = [8, 128], strides = [1, 1]} : vector<8x512xf32> to vector<8x128xf32>
    %925 = arith.negf %924 : vector<8x128xf32>
    %926 = math.exp %925 : vector<8x128xf32>
    %cst_207 = arith.constant 1.000000e+00 : f32
    %927 = vector.broadcast %cst_207 : f32 to vector<8x128xf32>
    %928 = arith.addf %927, %926 : vector<8x128xf32>
    %929 = arith.divf %927, %928 : vector<8x128xf32>
    %930 = arith.mulf %921, %902 : vector<8x128xf32>
    %931 = arith.mulf %915, %923 : vector<8x128xf32>
    %932 = arith.addf %930, %931 : vector<8x128xf32>
    %933 = math.tanh %932 : vector<8x128xf32>
    %934 = arith.mulf %929, %933 : vector<8x128xf32>
    %c16_208 = arith.constant 16 : index
    %c128_209 = arith.constant 128 : index
    %935 = vector.load %arg16[%c16_208, %c128_209] : memref<64x256xf32, #tpu.memory_space<vmem>>, vector<8x128xf32>
    tpu.vector_store %arg16[%c16_208, %c128_209], %934 {strides = array<i32>} : memref<64x256xf32, #tpu.memory_space<vmem>>, vector<8x128xf32>,
    %936 = vector.extract_strided_slice %752 {offsets = [8, 0], sizes = [8, 512], strides = [1, 1]} : vector<64x512xf32> to vector<8x512xf32>
    %937 = arith.truncf %934 : vector<8x128xf32> to vector<8x128xbf16>
    %cst_210 = arith.constant dense<0.000000e+00> : vector<8x512xf32>
    %938 = tpu.matmul %937, %753, %cst_210 {dimension_numbers = #tpu.dot_dimension_numbers<[1], [0], [0], [1], [0, 0, 1, 1], [], []>} : vector<8x128xbf16>, vector<128x512xbf16>, vector<8x512xf32> -> vector<8x512xf32>
    %939 = arith.addf %936, %938 : vector<8x512xf32>
    %940 = vector.extract_strided_slice %939 {offsets = [0, 0], sizes = [8, 128], strides = [1, 1]} : vector<8x512xf32> to vector<8x128xf32>
    %941 = arith.negf %940 : vector<8x128xf32>
    %942 = math.exp %941 : vector<8x128xf32>
    %cst_211 = arith.constant 1.000000e+00 : f32
    %943 = vector.broadcast %cst_211 : f32 to vector<8x128xf32>
    %944 = arith.addf %943, %942 : vector<8x128xf32>
    %945 = arith.divf %943, %944 : vector<8x128xf32>
    %946 = vector.extract_strided_slice %939 {offsets = [0, 128], sizes = [8, 128], strides = [1, 1]} : vector<8x512xf32> to vector<8x128xf32>
    %947 = arith.negf %946 : vector<8x128xf32>
    %948 = math.exp %947 : vector<8x128xf32>
    %cst_212 = arith.constant 1.000000e+00 : f32
    %949 = vector.broadcast %cst_212 : f32 to vector<8x128xf32>
    %950 = arith.addf %949, %948 : vector<8x128xf32>
    %951 = arith.divf %949, %950 : vector<8x128xf32>
    %952 = vector.extract_strided_slice %939 {offsets = [0, 256], sizes = [8, 128], strides = [1, 1]} : vector<8x512xf32> to vector<8x128xf32>
    %953 = math.tanh %952 : vector<8x128xf32>
    %954 = vector.extract_strided_slice %939 {offsets = [0, 384], sizes = [8, 128], strides = [1, 1]} : vector<8x512xf32> to vector<8x128xf32>
    %955 = arith.negf %954 : vector<8x128xf32>
    %956 = math.exp %955 : vector<8x128xf32>
    %cst_213 = arith.constant 1.000000e+00 : f32
    %957 = vector.broadcast %cst_213 : f32 to vector<8x128xf32>
    %958 = arith.addf %957, %956 : vector<8x128xf32>
    %959 = arith.divf %957, %958 : vector<8x128xf32>
    %960 = arith.mulf %951, %932 : vector<8x128xf32>
    %961 = arith.mulf %945, %953 : vector<8x128xf32>
    %962 = arith.addf %960, %961 : vector<8x128xf32>
    %963 = math.tanh %962 : vector<8x128xf32>
    %964 = arith.mulf %959, %963 : vector<8x128xf32>
    %c8_214 = arith.constant 8 : index
    %c128_215 = arith.constant 128 : index
    %965 = vector.load %arg16[%c8_214, %c128_215] : memref<64x256xf32, #tpu.memory_space<vmem>>, vector<8x128xf32>
    tpu.vector_store %arg16[%c8_214, %c128_215], %964 {strides = array<i32>} : memref<64x256xf32, #tpu.memory_space<vmem>>, vector<8x128xf32>,
    %966 = vector.extract_strided_slice %752 {offsets = [0, 0], sizes = [8, 512], strides = [1, 1]} : vector<64x512xf32> to vector<8x512xf32>
    %967 = arith.truncf %964 : vector<8x128xf32> to vector<8x128xbf16>
    %cst_216 = arith.constant dense<0.000000e+00> : vector<8x512xf32>
    %968 = tpu.matmul %967, %753, %cst_216 {dimension_numbers = #tpu.dot_dimension_numbers<[1], [0], [0], [1], [0, 0, 1, 1], [], []>} : vector<8x128xbf16>, vector<128x512xbf16>, vector<8x512xf32> -> vector<8x512xf32>
    %969 = arith.addf %966, %968 : vector<8x512xf32>
    %970 = vector.extract_strided_slice %969 {offsets = [0, 0], sizes = [8, 128], strides = [1, 1]} : vector<8x512xf32> to vector<8x128xf32>
    %971 = arith.negf %970 : vector<8x128xf32>
    %972 = math.exp %971 : vector<8x128xf32>
    %cst_217 = arith.constant 1.000000e+00 : f32
    %973 = vector.broadcast %cst_217 : f32 to vector<8x128xf32>
    %974 = arith.addf %973, %972 : vector<8x128xf32>
    %975 = arith.divf %973, %974 : vector<8x128xf32>
    %976 = vector.extract_strided_slice %969 {offsets = [0, 128], sizes = [8, 128], strides = [1, 1]} : vector<8x512xf32> to vector<8x128xf32>
    %977 = arith.negf %976 : vector<8x128xf32>
    %978 = math.exp %977 : vector<8x128xf32>
    %cst_218 = arith.constant 1.000000e+00 : f32
    %979 = vector.broadcast %cst_218 : f32 to vector<8x128xf32>
    %980 = arith.addf %979, %978 : vector<8x128xf32>
    %981 = arith.divf %979, %980 : vector<8x128xf32>
    %982 = vector.extract_strided_slice %969 {offsets = [0, 256], sizes = [8, 128], strides = [1, 1]} : vector<8x512xf32> to vector<8x128xf32>
    %983 = math.tanh %982 : vector<8x128xf32>
    %984 = vector.extract_strided_slice %969 {offsets = [0, 384], sizes = [8, 128], strides = [1, 1]} : vector<8x512xf32> to vector<8x128xf32>
    %985 = arith.negf %984 : vector<8x128xf32>
    %986 = math.exp %985 : vector<8x128xf32>
    %cst_219 = arith.constant 1.000000e+00 : f32
    %987 = vector.broadcast %cst_219 : f32 to vector<8x128xf32>
    %988 = arith.addf %987, %986 : vector<8x128xf32>
    %989 = arith.divf %987, %988 : vector<8x128xf32>
    %990 = arith.mulf %981, %962 : vector<8x128xf32>
    %991 = arith.mulf %975, %983 : vector<8x128xf32>
    %992 = arith.addf %990, %991 : vector<8x128xf32>
    %993 = math.tanh %992 : vector<8x128xf32>
    %994 = arith.mulf %989, %993 : vector<8x128xf32>
    %c0_220 = arith.constant 0 : index
    %c128_221 = arith.constant 128 : index
    %995 = vector.load %arg16[%c0_220, %c128_221] : memref<64x256xf32, #tpu.memory_space<vmem>>, vector<8x128xf32>
    tpu.vector_store %arg16[%c0_220, %c128_221], %994 {strides = array<i32>} : memref<64x256xf32, #tpu.memory_space<vmem>>, vector<8x128xf32>,
    %c0_222 = arith.constant 0 : index
    %c0_223 = arith.constant 0 : index
    %996 = vector.load %arg16[%c0_222, %c0_223] : memref<64x256xf32, #tpu.memory_space<vmem>>, vector<64x256xf32>
    %c0_224 = arith.constant 0 : index
    %c0_225 = arith.constant 0 : index
    %997 = vector.load %arg13[%c0_224, %c0_225] : memref<1x256xf32, #tpu.memory_space<vmem>>, vector<1x256xf32>
    %998 = vector.broadcast %997 : vector<1x256xf32> to vector<64x256xf32>
    %999 = arith.mulf %996, %998 : vector<64x256xf32>
    %cst_226 = arith.constant dense<0.000000e+00> : vector<64xf32>
    %1000 = vector.multi_reduction <add>, %999, %cst_226 [1] : vector<64x256xf32> to vector<64xf32>
    %1001 = vector.shape_cast %1000 : vector<64xf32> to vector<64x1xf32>
    %c0_227 = arith.constant 0 : index
    %c0_228 = arith.constant 0 : index
    %1002 = vector.load %arg14[%c0_227, %c0_228] : memref<1x1xf32, #tpu.memory_space<vmem>>, vector<1x1xf32>
    %1003 = vector.broadcast %1002 : vector<1x1xf32> to vector<64x1xf32>
    %1004 = arith.addf %1001, %1003 : vector<64x1xf32>
    %1005 = vector.extract_strided_slice %1004 {offsets = [0, 0], sizes = [8, 1], strides = [1, 1]} : vector<64x1xf32> to vector<8x1xf32>
    %1006 = vector.extract_strided_slice %1004 {offsets = [8, 0], sizes = [8, 1], strides = [1, 1]} : vector<64x1xf32> to vector<8x1xf32>
    %1007 = arith.maximumf %1005, %1006 : vector<8x1xf32>
    %1008 = vector.extract_strided_slice %1004 {offsets = [16, 0], sizes = [8, 1], strides = [1, 1]} : vector<64x1xf32> to vector<8x1xf32>
    %1009 = arith.maximumf %1007, %1008 : vector<8x1xf32>
    %1010 = vector.extract_strided_slice %1004 {offsets = [24, 0], sizes = [8, 1], strides = [1, 1]} : vector<64x1xf32> to vector<8x1xf32>
    %1011 = arith.maximumf %1009, %1010 : vector<8x1xf32>
    %1012 = vector.extract_strided_slice %1004 {offsets = [32, 0], sizes = [8, 1], strides = [1, 1]} : vector<64x1xf32> to vector<8x1xf32>
    %1013 = arith.maximumf %1011, %1012 : vector<8x1xf32>
    %1014 = vector.extract_strided_slice %1004 {offsets = [40, 0], sizes = [8, 1], strides = [1, 1]} : vector<64x1xf32> to vector<8x1xf32>
    %1015 = arith.maximumf %1013, %1014 : vector<8x1xf32>
    %1016 = vector.extract_strided_slice %1004 {offsets = [48, 0], sizes = [8, 1], strides = [1, 1]} : vector<64x1xf32> to vector<8x1xf32>
    %1017 = arith.maximumf %1015, %1016 : vector<8x1xf32>
    %1018 = vector.extract_strided_slice %1004 {offsets = [56, 0], sizes = [8, 1], strides = [1, 1]} : vector<64x1xf32> to vector<8x1xf32>
    %1019 = arith.maximumf %1017, %1018 : vector<8x1xf32>
    %cst_229 = arith.constant 0.000000e+00 : f32
    %1020 = vector.broadcast %cst_229 : f32 to vector<8x1xf32>
    %cst_230 = arith.constant 0.000000e+00 : f32
    %1021 = vector.broadcast %cst_230 : f32 to vector<8x256xf32>
    %1022 = vector.extract_strided_slice %1004 {offsets = [0, 0], sizes = [8, 1], strides = [1, 1]} : vector<64x1xf32> to vector<8x1xf32>
    %1023 = arith.subf %1022, %1019 : vector<8x1xf32>
    %1024 = math.exp %1023 : vector<8x1xf32>
    %1025 = arith.addf %1020, %1024 : vector<8x1xf32>
    %1026 = vector.extract_strided_slice %996 {offsets = [0, 0], sizes = [8, 256], strides = [1, 1]} : vector<64x256xf32> to vector<8x256xf32>
    %1027 = vector.broadcast %1024 : vector<8x1xf32> to vector<8x256xf32>
    %1028 = arith.mulf %1027, %1026 : vector<8x256xf32>
    %1029 = arith.addf %1021, %1028 : vector<8x256xf32>
    %1030 = vector.extract_strided_slice %1004 {offsets = [8, 0], sizes = [8, 1], strides = [1, 1]} : vector<64x1xf32> to vector<8x1xf32>
    %1031 = arith.subf %1030, %1019 : vector<8x1xf32>
    %1032 = math.exp %1031 : vector<8x1xf32>
    %1033 = arith.addf %1025, %1032 : vector<8x1xf32>
    %1034 = vector.extract_strided_slice %996 {offsets = [8, 0], sizes = [8, 256], strides = [1, 1]} : vector<64x256xf32> to vector<8x256xf32>
    %1035 = vector.broadcast %1032 : vector<8x1xf32> to vector<8x256xf32>
    %1036 = arith.mulf %1035, %1034 : vector<8x256xf32>
    %1037 = arith.addf %1029, %1036 : vector<8x256xf32>
    %1038 = vector.extract_strided_slice %1004 {offsets = [16, 0], sizes = [8, 1], strides = [1, 1]} : vector<64x1xf32> to vector<8x1xf32>
    %1039 = arith.subf %1038, %1019 : vector<8x1xf32>
    %1040 = math.exp %1039 : vector<8x1xf32>
    %1041 = arith.addf %1033, %1040 : vector<8x1xf32>
    %1042 = vector.extract_strided_slice %996 {offsets = [16, 0], sizes = [8, 256], strides = [1, 1]} : vector<64x256xf32> to vector<8x256xf32>
    %1043 = vector.broadcast %1040 : vector<8x1xf32> to vector<8x256xf32>
    %1044 = arith.mulf %1043, %1042 : vector<8x256xf32>
    %1045 = arith.addf %1037, %1044 : vector<8x256xf32>
    %1046 = vector.extract_strided_slice %1004 {offsets = [24, 0], sizes = [8, 1], strides = [1, 1]} : vector<64x1xf32> to vector<8x1xf32>
    %1047 = arith.subf %1046, %1019 : vector<8x1xf32>
    %1048 = math.exp %1047 : vector<8x1xf32>
    %1049 = arith.addf %1041, %1048 : vector<8x1xf32>
    %1050 = vector.extract_strided_slice %996 {offsets = [24, 0], sizes = [8, 256], strides = [1, 1]} : vector<64x256xf32> to vector<8x256xf32>
    %1051 = vector.broadcast %1048 : vector<8x1xf32> to vector<8x256xf32>
    %1052 = arith.mulf %1051, %1050 : vector<8x256xf32>
    %1053 = arith.addf %1045, %1052 : vector<8x256xf32>
    %1054 = vector.extract_strided_slice %1004 {offsets = [32, 0], sizes = [8, 1], strides = [1, 1]} : vector<64x1xf32> to vector<8x1xf32>
    %1055 = arith.subf %1054, %1019 : vector<8x1xf32>
    %1056 = math.exp %1055 : vector<8x1xf32>
    %1057 = arith.addf %1049, %1056 : vector<8x1xf32>
    %1058 = vector.extract_strided_slice %996 {offsets = [32, 0], sizes = [8, 256], strides = [1, 1]} : vector<64x256xf32> to vector<8x256xf32>
    %1059 = vector.broadcast %1056 : vector<8x1xf32> to vector<8x256xf32>
    %1060 = arith.mulf %1059, %1058 : vector<8x256xf32>
    %1061 = arith.addf %1053, %1060 : vector<8x256xf32>
    %1062 = vector.extract_strided_slice %1004 {offsets = [40, 0], sizes = [8, 1], strides = [1, 1]} : vector<64x1xf32> to vector<8x1xf32>
    %1063 = arith.subf %1062, %1019 : vector<8x1xf32>
    %1064 = math.exp %1063 : vector<8x1xf32>
    %1065 = arith.addf %1057, %1064 : vector<8x1xf32>
    %1066 = vector.extract_strided_slice %996 {offsets = [40, 0], sizes = [8, 256], strides = [1, 1]} : vector<64x256xf32> to vector<8x256xf32>
    %1067 = vector.broadcast %1064 : vector<8x1xf32> to vector<8x256xf32>
    %1068 = arith.mulf %1067, %1066 : vector<8x256xf32>
    %1069 = arith.addf %1061, %1068 : vector<8x256xf32>
    %1070 = vector.extract_strided_slice %1004 {offsets = [48, 0], sizes = [8, 1], strides = [1, 1]} : vector<64x1xf32> to vector<8x1xf32>
    %1071 = arith.subf %1070, %1019 : vector<8x1xf32>
    %1072 = math.exp %1071 : vector<8x1xf32>
    %1073 = arith.addf %1065, %1072 : vector<8x1xf32>
    %1074 = vector.extract_strided_slice %996 {offsets = [48, 0], sizes = [8, 256], strides = [1, 1]} : vector<64x256xf32> to vector<8x256xf32>
    %1075 = vector.broadcast %1072 : vector<8x1xf32> to vector<8x256xf32>
    %1076 = arith.mulf %1075, %1074 : vector<8x256xf32>
    %1077 = arith.addf %1069, %1076 : vector<8x256xf32>
    %1078 = vector.extract_strided_slice %1004 {offsets = [56, 0], sizes = [8, 1], strides = [1, 1]} : vector<64x1xf32> to vector<8x1xf32>
    %1079 = arith.subf %1078, %1019 : vector<8x1xf32>
    %1080 = math.exp %1079 : vector<8x1xf32>
    %1081 = arith.addf %1073, %1080 : vector<8x1xf32>
    %1082 = vector.extract_strided_slice %996 {offsets = [56, 0], sizes = [8, 256], strides = [1, 1]} : vector<64x256xf32> to vector<8x256xf32>
    %1083 = vector.broadcast %1080 : vector<8x1xf32> to vector<8x256xf32>
    %1084 = arith.mulf %1083, %1082 : vector<8x256xf32>
    %1085 = arith.addf %1077, %1084 : vector<8x256xf32>
    %1086 = tpu.reciprocal %1081 {approx = true} : vector<8x1xf32> -> vector<8x1xf32>
    %1087 = vector.broadcast %1086 : vector<8x1xf32> to vector<8x256xf32>
    %1088 = arith.mulf %1085, %1087 : vector<8x256xf32>
    %c0_231 = arith.constant 0 : index
    %c0_232 = arith.constant 0 : index
    %1089 = vector.load %arg15[%c0_231, %c0_232] : memref<8x256xf32, #tpu.memory_space<vmem>>, vector<8x256xf32>
    tpu.vector_store %arg15[%c0_231, %c0_232], %1088 {strides = array<i32>} : memref<8x256xf32, #tpu.memory_space<vmem>>, vector<8x256xf32>,
    return
  }
}

module attributes {stable_mosaic.version = 11 : i64} {
  func.func @fc_kernel(%arg0: i32, %arg1: memref<8x256xf32, #tpu.memory_space<vmem>>, %arg2: memref<256x128xbf16, #tpu.memory_space<vmem>>, %arg3: memref<1x128xf32, #tpu.memory_space<vmem>>, %arg4: memref<8x128xf32, #tpu.memory_space<vmem>>) attributes {dimension_semantics = [#tpu.dimension_semantics<parallel>], iteration_bounds = array<i64: 4>, scalar_prefetch = 0 : i64, scratch_operands = 0 : i64, tpu.core_type = #tpu.core_type<tc>, window_params = [{pipeline_mode = #tpu.pipeline_mode<synchronous>, transform_indices = @transform_0, window_bounds = array<i64: 8, 256>}, {transform_indices = @transform_1, window_bounds = array<i64: 256, 128>}, {transform_indices = @transform_2, window_bounds = array<i64: 1, 128>}, {transform_indices = @transform_3, window_bounds = array<i64: 8, 128>}]} {
    %c0 = arith.constant 0 : index
    %c0_0 = arith.constant 0 : index
    %0 = vector.load %arg1[%c0, %c0_0] : memref<8x256xf32, #tpu.memory_space<vmem>>, vector<8x256xf32>
    %1 = arith.truncf %0 : vector<8x256xf32> to vector<8x256xbf16>
    %c0_1 = arith.constant 0 : index
    %c0_2 = arith.constant 0 : index
    %2 = vector.load %arg2[%c0_1, %c0_2] : memref<256x128xbf16, #tpu.memory_space<vmem>>, vector<256x128xbf16>
    %cst = arith.constant dense<0.000000e+00> : vector<8x128xf32>
    %3 = tpu.matmul %1, %2, %cst {dimension_numbers = #tpu.dot_dimension_numbers<[1], [0], [0], [1], [0, 0, 1, 1], [], []>} : vector<8x256xbf16>, vector<256x128xbf16>, vector<8x128xf32> -> vector<8x128xf32>
    %c0_3 = arith.constant 0 : index
    %c0_4 = arith.constant 0 : index
    %4 = vector.load %arg3[%c0_3, %c0_4] : memref<1x128xf32, #tpu.memory_space<vmem>>, vector<1x128xf32>
    %5 = vector.broadcast %4 : vector<1x128xf32> to vector<8x128xf32>
    %6 = arith.addf %3, %5 : vector<8x128xf32>
    %c0_5 = arith.constant 0 : index
    %c0_6 = arith.constant 0 : index
    %7 = vector.load %arg4[%c0_5, %c0_6] : memref<8x128xf32, #tpu.memory_space<vmem>>, vector<8x128xf32>
    tpu.vector_store %arg4[%c0_5, %c0_6], %6 {strides = array<i32>} : memref<8x128xf32, #tpu.memory_space<vmem>>, vector<8x128xf32>,
    return
  }
  func.func @transform_0(%arg0: i32) -> (i32, i32) {
    %c0_i32 = arith.constant 0 : i32
    %c0_i32_0 = arith.constant 0 : i32
    %c0_i32_1 = arith.constant 0 : i32
    return %c0_i32, %c0_i32_0 : i32, i32
  }
  func.func @transform_1(%arg0: i32) -> (i32, i32) {
    %c0_i32 = arith.constant 0 : i32
    %c0_i32_0 = arith.constant 0 : i32
    return %c0_i32, %arg0 : i32, i32
  }
  func.func @transform_2(%arg0: i32) -> (i32, i32) {
    %c0_i32 = arith.constant 0 : i32
    %c0_i32_0 = arith.constant 0 : i32
    return %c0_i32, %arg0 : i32, i32
  }
  func.func @transform_3(%arg0: i32) -> (i32, i32) {
    %c0_i32 = arith.constant 0 : i32
    %c0_i32_0 = arith.constant 0 : i32
    return %c0_i32, %arg0 : i32, i32
  }
}

</mosaic_0001>

<bundles_post_ra>
// kernel: text_generator_forward.3
= control target key start
LH: loop header
LB: loop body
LE: loop exit
PB: predicated region body
PF: predicated region fallthrough
CT: control target
= control target key end

     0   :  { %8 = vsyncpa [#allocation4], 0  ;;  %s1012_s0 = inlined_call_operand.vmem [shape: f32[8,256], index: 0, kind: input, shape index: {}]   ;;  %s1013_s1 = inlined_call_operand.vmem [shape: bf16[256,512], index: 1, kind: input, shape index: {}]   ;;  %s1014_s2 = inlined_call_operand.vmem [shape: f32[1,512], index: 2, kind: input, shape index: {}]   ;;  %s1015_s3 = inlined_call_operand.hbm [shape: f32[8,512], index: 3, kind: output, shape index: {}]  }
   0x1   :  { %10 = vsyncpa [#allocation4 + $0x1], 0  ;;  %s808_s12 = smov 0   ;;  %s810_s13 = smov 0  }
   0x2   :  { %s812_s14 = smov 0   ;;  %s814_s15 = smov 0  }
   0x3 LB: > { %s829_s16 = sadd.s32 4294967295, %s785_s15   ;;  %s617_s17 = sadd.s32 4294967294, %s785_s15   ;;  %s785_s15 = sphi %s814_s15, %s1021_s15   ;;  %s781_s14 = sphi %s812_s14, %s1020_s14   ;;  %s777_s13 = sphi %s810_s13, %s1019_s13   ;;  %s773_s12 = sphi %s808_s12, %s1018_s12  }
   0x4   : > { %s833_s18 = sadd.s32 1, %s785_s15   ;;  %s44_s19 = sadd.s32 1, %s781_s14 }
   0x5   : > { %s41_s20 = ssub.s32 %s785_s15, %s833_s18  ;;  %p51_p0 = scmp.ne.s32.totalorder %s781_s14, %s777_s13 }
   0x6   : > { %p42_p1 = scmp.eq.s32.totalorder %s41_s20, 0  ;;  %p52_p2 = scmp.eq.s32.totalorder %s785_s15, 0 }
   0x7   : > { %p107_p3 = scmp.eq.s32.totalorder %s829_s16, 3  ;;  %p112_p4 = scmp.ne.s32.totalorder %s777_s13, %s773_s12 }
   0x8   : > { %s845_s21 = scalar_select %p42_p1, %s781_s14, %s44_s19  }
   0x9   : > { %p53_p5 = por %p52_p2, %p51_p0  ;;  %p847_p6 = por %p107_p3, %p51_p0 }
   0xa   : > { %p113_p7 = scmp.eq.s32.totalorder %s617_s17, 3  ;;  %p619_p9 = scmp.ge.s32.totalorder %s785_s15, 4 }
   0xc   : > { %p851_p8 = por %p113_p7, %p112_p4  ;;  %132 = sbr.rel (%p619_p9) target bundleno = 44 (0x2c), region = 20 }
  0x13   : > { %135 = sbr.rel (!%p53_p5) target bundleno = 44 (0x2c), region = 24  ;;  %s137_s24 = sand.u32 (%p53_p5), 1, %s781_s14  }
  0x14   : > { %s621_s25 = sshll.u32 (%p53_p5), %s785_s15, 2  ;;  %s620_s26 = sshll.u32 (%p53_p5), %s137_s24, 7 }
  0x15   : > { %s861_s29 = scalar_lea.vmem (%p53_p5), %s1013_s1, %s621_s25  ;;  %s865_s30 = scalar_lea.vmem (%p53_p5), [#allocation2], %s620_s26 }
  0x16   : > { %v157_v0 = vld [vmem:[%s861_s29] sm:$0xf] (%p53_p5)  ;;  %v159_v1 = vld [vmem:[%s861_s29 + $0x10] sm:$0xf] (%p53_p5) }
  0x17   : > { %158 = vst [vmem:[%s865_s30] sm:$0xf] (%p53_p5), %v157_v0  ;;  %160 = vst [vmem:[%s865_s30 + $0x4] sm:$0xf] (%p53_p5), %v159_v1  ;;  %v161_v2 = vld [vmem:[%s861_s29 + $0x20] sm:$0xf] (%p53_p5) }
  0x18   : > { %v163_v3 = vld [vmem:[%s861_s29 + $0x30] sm:$0xf] (%p53_p5)  ;;  %v165_v4 = vld [vmem:[%s861_s29 + $0x40] sm:$0xf] (%p53_p5)  ;;  %162 = vst [vmem:[%s865_s30 + $0x8] sm:$0xf] (%p53_p5), %v161_v2 }
  0x19   : > { %164 = vst [vmem:[%s865_s30 + $0xc] sm:$0xf] (%p53_p5), %v163_v3  ;;  %166 = vst [vmem:[%s865_s30 + $0x10] sm:$0xf] (%p53_p5), %v165_v4  ;;  %v167_v5 = vld [vmem:[%s861_s29 + $0x50] sm:$0xf] (%p53_p5) }
  0x1a   : > { %v169_v6 = vld [vmem:[%s861_s29 + $0x60] sm:$0xf]  ;;  %v171_v7 = vld [vmem:[%s861_s29 + $0x70] sm:$0xf]  ;;  %168 = vst [vmem:[%s865_s30 + $0x14] sm:$0xf] %v167_v5 }
  0x1b   : > { %170 = vst [vmem:[%s865_s30 + $0x18] sm:$0xf] %v169_v6  ;;  %172 = vst [vmem:[%s865_s30 + $0x1c] sm:$0xf] %v171_v7  ;;  %v173_v8 = vld [vmem:[%s861_s29 + $0x80] sm:$0xf] }
  0x1c   : > { %v175_v9 = vld [vmem:[%s861_s29 + $0x90] sm:$0xf]  ;;  %v177_v10 = vld [vmem:[%s861_s29 + $0xa0] sm:$0xf]  ;;  %174 = vst [vmem:[%s865_s30 + $0x20] sm:$0xf] %v173_v8 }
  0x1d   : > { %176 = vst [vmem:[%s865_s30 + $0x24] sm:$0xf] %v175_v9  ;;  %178 = vst [vmem:[%s865_s30 + $0x28] sm:$0xf] %v177_v10  ;;  %v179_v11 = vld [vmem:[%s861_s29 + $0xb0] sm:$0xf] }
  0x1e   : > { %v181_v12 = vld [vmem:[%s861_s29 + $0xc0] sm:$0xf]  ;;  %v183_v13 = vld [vmem:[%s861_s29 + $0xd0] sm:$0xf]  ;;  %180 = vst [vmem:[%s865_s30 + $0x2c] sm:$0xf] %v179_v11 }
  0x1f   : > { %182 = vst [vmem:[%s865_s30 + $0x30] sm:$0xf] %v181_v12  ;;  %184 = vst [vmem:[%s865_s30 + $0x34] sm:$0xf] %v183_v13  ;;  %v185_v14 = vld [vmem:[%s861_s29 + $0xe0] sm:$0xf] }
  0x20   : > { %v187_v15 = vld [vmem:[%s861_s29 + $0xf0] sm:$0xf]  ;;  %v189_v16 = vld [vmem:[%s861_s29 + $0x100] sm:$0xf]  ;;  %186 = vst [vmem:[%s865_s30 + $0x38] sm:$0xf] %v185_v14 }
  0x21   : > { %188 = vst [vmem:[%s865_s30 + $0x3c] sm:$0xf] %v187_v15  ;;  %190 = vst [vmem:[%s865_s30 + $0x40] sm:$0xf] %v189_v16  ;;  %v191_v17 = vld [vmem:[%s861_s29 + $0x110] sm:$0xf] }
  0x22   : > { %v193_v18 = vld [vmem:[%s861_s29 + $0x120] sm:$0xf]  ;;  %v195_v19 = vld [vmem:[%s861_s29 + $0x130] sm:$0xf]  ;;  %192 = vst [vmem:[%s865_s30 + $0x44] sm:$0xf] %v191_v17 }
  0x23   : > { %194 = vst [vmem:[%s865_s30 + $0x48] sm:$0xf] %v193_v18  ;;  %196 = vst [vmem:[%s865_s30 + $0x4c] sm:$0xf] %v195_v19  ;;  %v197_v20 = vld [vmem:[%s861_s29 + $0x140] sm:$0xf] }
  0x24   : > { %v199_v21 = vld [vmem:[%s861_s29 + $0x150] sm:$0xf]  ;;  %v201_v22 = vld [vmem:[%s861_s29 + $0x160] sm:$0xf]  ;;  %198 = vst [vmem:[%s865_s30 + $0x50] sm:$0xf] %v197_v20 }
  0x25   : > { %200 = vst [vmem:[%s865_s30 + $0x54] sm:$0xf] %v199_v21  ;;  %202 = vst [vmem:[%s865_s30 + $0x58] sm:$0xf] %v201_v22  ;;  %v203_v23 = vld [vmem:[%s861_s29 + $0x170] sm:$0xf] }
  0x26   : > { %v205_v24 = vld [vmem:[%s861_s29 + $0x180] sm:$0xf]  ;;  %v207_v25 = vld [vmem:[%s861_s29 + $0x190] sm:$0xf]  ;;  %204 = vst [vmem:[%s865_s30 + $0x5c] sm:$0xf] %v203_v23 }
  0x27   : > { %206 = vst [vmem:[%s865_s30 + $0x60] sm:$0xf] %v205_v24  ;;  %208 = vst [vmem:[%s865_s30 + $0x64] sm:$0xf] %v207_v25  ;;  %v209_v26 = vld [vmem:[%s861_s29 + $0x1a0] sm:$0xf] }
  0x28   : > { %v211_v27 = vld [vmem:[%s861_s29 + $0x1b0] sm:$0xf]  ;;  %v213_v28 = vld [vmem:[%s861_s29 + $0x1c0] sm:$0xf]  ;;  %210 = vst [vmem:[%s865_s30 + $0x68] sm:$0xf] %v209_v26 }
  0x29   : > { %212 = vst [vmem:[%s865_s30 + $0x6c] sm:$0xf] %v211_v27  ;;  %214 = vst [vmem:[%s865_s30 + $0x70] sm:$0xf] %v213_v28  ;;  %v215_v29 = vld [vmem:[%s861_s29 + $0x1d0] sm:$0xf] }
  0x2a   : > { %v217_v30 = vld [vmem:[%s861_s29 + $0x1e0] sm:$0xf]  ;;  %v219_v31 = vld [vmem:[%s861_s29 + $0x1f0] sm:$0xf]  ;;  %216 = vst [vmem:[%s865_s30 + $0x74] sm:$0xf] %v215_v29 }
  0x2b   : > { %218 = vst [vmem:[%s865_s30 + $0x78] sm:$0xf] %v217_v30  ;;  %220 = vst [vmem:[%s865_s30 + $0x7c] sm:$0xf] %v219_v31 }
  0x2c PF: > { %p622_p10 = scmp.ge.s32.totalorder %s785_s15, 1  ;;  %p312_p11 = scmp.lt.s32.totalorder %s785_s15, 5 }
  0x2e   : > { %p313_p12 = pnand %p622_p10, %p312_p11 }
  0x2f   : > { %s932_s4 = sand.u32 (!%p313_p12), 1, %s777_s13   ;;  %v350_v32 = vld [vmem:[%s1012_s0 + $0x8] sm:$0xff] (!%p313_p12)  ;;  %v349_v50 = vld [vmem:[%s1012_s0] sm:$0xff] (!%p313_p12)  ;;  %p345_p13 = scmp.lt.s32.totalorder (!%p313_p12), %s829_s16, 3 }
  0x30   : > { %316 = sbr.rel (%p313_p12) target bundleno = 314 (0x13a), region = 69  ;;  %s623_s7 = sshll.u32 (!%p313_p12), %s932_s4, 7  ;;  %v352_v33 = vpack.c.bf16 (!%p313_p12), %v350_v32, %v350_v32  ;;  %v351_v51 = vpack.c.bf16 (!%p313_p12), %v349_v50, %v349_v50 }
  0x31   : > { %s938_s8 = scalar_lea.vmem (!%p313_p12), [#allocation2], %s623_s7  ;;  %s624_s17 = sshll.u32 (!%p313_p12), %s932_s4, 3 }
  0x32   : > { %v707_v34 = vld [vmem:[%s938_s8 + $0x40] sm:$0xff] (!%p313_p12)   ;;  %520 = vmatprep.mubr.bf16.mxu0 (!%p313_p12), %v352_v33  ;;  %v709_v36 = vld [vmem:[%s938_s8 + $0x48] sm:$0xff] (!%p313_p12)   ;;  %v711_v38 = vld [vmem:[%s938_s8 + $0x50] sm:$0xff] (!%p313_p12)   ;;  %s643_s25 = sshll.u32 (!%p313_p12), %s829_s16, 7  ;;  %s344_s26 = scalar_lea.vmem (!%p313_p12), [#allocation3], %s624_s17 }
  0x33   : > { %v708_v35 = vld [vmem:[%s938_s8] sm:$0xff] (!%p313_p12)   ;;  %646 = vmatprep.subr.bf16.mxu0 (!%p313_p12), %v707_v34  ;;  %v710_v37 = vld [vmem:[%s938_s8 + $0x8] sm:$0xff] (!%p313_p12)   ;;  %v712_v39 = vld [vmem:[%s938_s8 + $0x10] sm:$0xff] (!%p313_p12)   ;;  %s543_s27 = sshll.u32 (!%p313_p12), %s344_s26, 4  ;;  %s969_s30 = scalar_lea.hbm (!%p313_p12), %s1015_s3, %s643_s25  ;;  %s971_s27 = int_to_ptr.vmem [resolvable:$true] %s543_s27 }
  0x34   : > { %647 = vmatpush3.bf16.msra.mxu0 (!%p313_p12), %v708_v35  ;;  %v713_v40 = vld [vmem:[%s938_s8 + $0x58] sm:$0xff] (!%p313_p12)   ;;  %v715_v42 = vld [vmem:[%s938_s8 + $0x60] sm:$0xff] (!%p313_p12)   ;;  %v717_v44 = vld [vmem:[%s938_s8 + $0x68] sm:$0xff] (!%p313_p12)   ;;  %s530_s5 = scalar_lea.sflag (!%p313_p12), [#allocation4], %s932_s4  ;;  %s723_s6 = scalar_lea.vmem (!%p313_p12), %s971_s27, 128 }
  0x35   : > { %648 = vmatprep.subr.bf16.mxu0 (!%p313_p12), %v709_v36  ;;  %v714_v41 = vld [vmem:[%s938_s8 + $0x18] sm:$0xff] (!%p313_p12)   ;;  %v716_v43 = vld [vmem:[%s938_s8 + $0x20] sm:$0xff] (!%p313_p12)   ;;  %v718_v45 = vld [vmem:[%s938_s8 + $0x28] sm:$0xff] (!%p313_p12)   ;;  %p724_p0 = scmp.ne.s32.totalorder (!%p313_p12), %s971_s27, %s723_s6 }
  0x36   : > { %v719_v46 = vld [vmem:[%s938_s8 + $0x70] sm:$0xff] (!%p313_p12)   ;;  %v721_v48 = vld [vmem:[%s938_s8 + $0x78] sm:$0xff] (!%p313_p12)  }
  0x37   : > { %v720_v47 = vld [vmem:[%s938_s8 + $0x30] sm:$0xff]   ;;  %v722_v49 = vld [vmem:[%s938_s8 + $0x38] sm:$0xff]   ;;  %s346_s11 = scalar_select %p345_p13, %s829_s16, 3 }
  0x38   : > { %649 = vmatpush3.bf16.msra.mxu0 %v710_v37  ;;  %p725_p1 = pnand %p724_p0, %p847_p6  ;;  %s787_s16 = smov [#allocation3]  }
  0x39   : > { %650 = vmatprep.subr.bf16.mxu0 %v711_v38  ;;  %s347_s24 = scalar_lea.vmem %s1014_s2, %s346_s11  ;;  %s727_s7 = sshll.u32 %s787_s16, 4  ;;  %s728_s7 = int_to_ptr.vmem [resolvable:$false] %s727_s7 }
  0x3a   : > { %v625_v53 = vld [vmem:[%s347_s24] ss:$0 sm:$0xff]  ;;  %p726_p2 = pneg %p725_p1  ;;  %s729_s8 = scalar_lea.vmem %s728_s7, 256 }
  0x3b   : > { %p730_p3 = scmp.lt.s32.totalorder %s971_s27, %s728_s7  ;;  %p731_p4 = scmp.lt.s32.totalorder %s729_s8, %s723_s6 }
  0x3c   : > { %651 = vmatpush3.bf16.msra.mxu0 %v712_v39 }
  0x3d   : > { %652 = vmatprep.subr.bf16.mxu0 %v713_v40  ;;  %p732_p5 = por %p731_p4, %p730_p3 }
  0x3f   : > { %p733_p7 = pnand %p732_p5, %p726_p2 }
  0x40   : > { %653 = vmatpush3.bf16.msra.mxu0 %v714_v41 }
  0x41   : > { %654 = vmatprep.subr.bf16.mxu0 %v715_v42 }
  0x44   : > { %655 = vmatpush3.bf16.msra.mxu0 %v716_v43 }
  0x45   : > { %656 = vmatprep.subr.bf16.mxu0 %v717_v44 }
  0x48   : > { %657 = vmatpush3.bf16.msra.mxu0 %v718_v45 }
  0x49   : > { %658 = vmatprep.subr.bf16.mxu0 %v719_v46 }
  0x4c   : > { %659 = vmatpush3.bf16.msra.mxu0 %v720_v47 }
  0x4d   : > { %660 = vmatprep.subr.bf16.mxu0 %v721_v48 }
  0x50   : > { %661 = vmatpush3.bf16.msra.mxu0 %v722_v49 }
  0x53   : > { %521 = vmatmul.mubr.bf16.vlgmr.msra.gmra.mrb[0].mxu0 %v351_v51 }
 0x126   : > { %v662_v52 = vpop.f32.mrb[0].mxu0 }
 0x127   : > { %v663_v54 = vpop.f32.mrb[1].mxu0 }
 0x128   : > { %v664_v55 = vadd.f32 %v663_v54, %v662_v52  ;;  %v665_v56 = vpop.f32.mrb[2].mxu0 }
 0x129   : > { %v666_v57 = vpop.f32.mrb[3].mxu0 }
 0x12a   : > { %v523_v58 = vadd.f32 %v664_v55, %v625_v53 }
 0x12c   : > { %528 = vst [vmem:[%s344_s26] sm:$0xff] %v523_v58 }
 0x12d   : > { %736 = shalt.err (!%p733_p7)
}
 0x12e   : > { %s737_s4 = scalar_lea.hbm %s969_s30, 128  ;;  %s741_s11 = scalar_lea.hbm %s1015_s3, 512 }
 0x12f   : > { %p738_p9 = scmp.ne.s32.totalorder %s969_s30, %s737_s4  ;;  %p742_p12 = scmp.lt.u32.totalorder %s969_s30, %s1015_s3 }
 0x130   : > { %p743_p13 = scmp.lt.u32.totalorder %s741_s11, %s737_s4  ;;  %p745_p1 = scmp.lt.u32.totalorder %s737_s4, %s969_s30 }
 0x131   : > { %p739_p10 = pnand %p738_p9, %p847_p6 }
 0x132   : > { %p744_p0 = por %p743_p13, %p742_p12 }
 0x133   : > { %p740_p11 = pneg %p739_p10 }
 0x134   : > { %p746_p2 = por %p745_p1, %p744_p0 }
 0x136   : > { %p747_p3 = pnand %p746_p2, %p740_p11 }
 0x138   : > { %750 = shalt.err (!%p747_p3)
}
 0x139   : > { %668 = dma.vmem_to_hbm [thread:$0]  (%p847_p6), %s971_s27, 128, %s969_s30, %s530_s5  }
 0x13a PF: > { %p674_p4 = scmp.ge.s32.totalorder %s785_s15, 2  ;;  %s555_s20 = sand.u32 1, %s773_s12  }
 0x13b   : > { %s556_s24 = scalar_lea.sflag [#allocation4], %s555_s20 }
 0x13c   : > { %p671_p5 = pnand %p674_p4, %p851_p8 }
 0x13e   : > { %768 = dma.done.wait (!%p671_p5), %s556_s24, 128  }
 0x13f   : > { %770 = vsyncadd (!%p671_p5), %s556_s24, 4294967168  ;;  %p13_p7 = scmp.ge.s32.totalorder %s833_s18, 6   ;;  %s1018_s12 = smov %s777_s13 }
 0x140   : > { %s1019_s13 = smov %s781_s14  ;;  %s1020_s14 = smov %s845_s21 }
 0x141   : > { %s1021_s15 = smov %s833_s18  ;;  %15 = sbr.rel (!%p13_p7) target bundleno = 3 (0x3), region = 116 }
 0x148   :  { %561 = vsyncpa [#allocation4], 1 }
 0x149   :  { %563 = vsyncpa [#allocation4 + $0x1], 1 }

// kernel: text_generator_forward.2
= control target key start
LH: loop header
LB: loop body
LE: loop exit
PB: predicated region body
PF: predicated region fallthrough
CT: control target
= control target key end

     0   :  { %s11208_s0 = inlined_call_operand.vmem [shape: f32[64,128], index: 0, kind: input, shape index: {}]   ;;  %s11209_s1 = inlined_call_operand.vmem [shape: bf16[128,512], index: 1, kind: input, shape index: {}]   ;;  %s11210_s2 = inlined_call_operand.hbm [shape: bf16[128,512], index: 2, kind: input, shape index: {}]   ;;  %s11211_s3 = inlined_call_operand.vmem [shape: f32[1,512], index: 3, kind: input, shape index: {}]   ;;  %s11212_s4 = inlined_call_operand.hbm [shape: bf16[128,512], index: 4, kind: input, shape index: {}]   ;;  %s11213_s5 = inlined_call_operand.hbm [shape: bf16[128,512], index: 5, kind: input, shape index: {}]   ;;  %s11214_s6 = inlined_call_operand.vmem [shape: f32[1,512], index: 6, kind: input, shape index: {}]   ;;  %s11215_s7 = inlined_call_operand.vmem [shape: bf16[256,512], index: 7, kind: input, shape index: {}]   ;;  %s11216_s8 = inlined_call_operand.hbm [shape: bf16[128,512], index: 8, kind: input, shape index: {}]   ;;  %s11217_s9 = inlined_call_operand.vmem [shape: f32[1,512], index: 9, kind: input, shape index: {}]   ;;  %s11218_s10 = inlined_call_operand.hbm [shape: bf16[256,512], index: 10, kind: input, shape index: {}]   ;;  %s11219_s11 = inlined_call_operand.hbm [shape: bf16[128,512], index: 11, kind: input, shape index: {}]   ;;  %s11220_s12 = inlined_call_operand.vmem [shape: f32[1,512], index: 12, kind: input, shape index: {}]   ;;  %s11221_s13 = inlined_call_operand.vmem [shape: f32[1,256], index: 13, kind: input, shape index: {}]   ;;  %s11222_s14 = inlined_call_operand.<no memory space> [shape: f32[1,1], index: 14, kind: input, shape index: {}]   ;;  %s11223_s15 = inlined_call_operand.vmem [shape: f32[8,256], index: 15, kind: output, shape index: {}]  }
   0x1   :  { %v20_v0 = vstv %s11222_s14 }
   0x2   :  { %21 = vst [vmem:[#allocation3] sm:$0x1] %v20_v0 }
   0x3   :  { %22 = vsyncpa [#allocation5], 0 }
   0x4   :  { %23 = vsyncpa [#allocation7], 0 }
   0x5   :  { %24 = vsyncpa [#allocation10], 0 }
   0x6   :  { %25 = vsyncpa [#allocation13], 0  ;;  %s8261_s20 = smov [#allocation6]   ;;  %s8262_s22 = smov [#allocation9]  }
   0x7   :  { %s49_s21 = sshll.u32 %s8261_s20, 4  ;;  %s77_s23 = sshll.u32 %s8262_s22, 4  ;;  %s50_s21 = int_to_ptr.vmem [resolvable:$true] %s49_s21  ;;  %s8353_s23 = int_to_ptr.vmem [resolvable:$true] %s77_s23 }
   0x8   :  { %s8121_s26 = scalar_lea.hbm %s11212_s4, 4096 }
   0x9   :  { %p8122_p0 = scmp.ne.s32.totalorder %s11212_s4, %s8121_s26  ;;  %p8125_p1 = scmp.lt.u32.totalorder %s8121_s26, %s11212_s4 }
   0xb   :  { %p8127_p2 = pnand %p8125_p1, %p8122_p0 }
   0xd   :  { %8130 = shalt.err (!%p8127_p2)
}
   0xe   :  { %s8131_s30 = scalar_lea.vmem %s50_s21, 4096  ;;  %p8136_p4 = scmp.lt.s32.totalorder %s50_s21, %s50_s21 }
   0xf   :  { %p8132_p3 = scmp.ne.s32.totalorder %s50_s21, %s8131_s30  ;;  %p8137_p5 = scmp.lt.s32.totalorder %s8131_s30, %s8131_s30 }
  0x11   :  { %p8138_p6 = por %p8137_p5, %p8136_p4 }
  0x13   :  { %p8139_p7 = pnand %p8138_p6, %p8132_p3 }
  0x15   :  { %8142 = shalt.err (!%p8139_p7)
}
  0x16   :  { %s8263_s16 = smov 256   ;;  %s8264_s17 = smov 16  }
  0x17   :  { %55 = dma.hbm_to_vmem [thread:$0]  %s11212_s4, 4096, %s50_s21, [#allocation7], %s8263_s16, %s8263_s16, %s8264_s17  }
  0x18   :  { %s8143_s24 = scalar_lea.hbm %s11216_s8, 4096 }
  0x19   :  { %p8144_p8 = scmp.ne.s32.totalorder %s11216_s8, %s8143_s24  ;;  %p8147_p9 = scmp.lt.u32.totalorder %s8143_s24, %s11216_s8 }
  0x1b   :  { %p8149_p10 = pnand %p8147_p9, %p8144_p8 }
  0x1d   :  { %8152 = shalt.err (!%p8149_p10)
}
  0x1e   :  { %s8153_s14 = scalar_lea.vmem %s8353_s23, 4096  ;;  %p8158_p12 = scmp.lt.s32.totalorder %s8353_s23, %s8353_s23 }
  0x1f   :  { %p8154_p11 = scmp.ne.s32.totalorder %s8353_s23, %s8153_s14  ;;  %p8159_p13 = scmp.lt.s32.totalorder %s8153_s14, %s8153_s14 }
  0x21   :  { %p8160_p0 = por %p8159_p13, %p8158_p12 }
  0x23   :  { %p8161_p1 = pnand %p8160_p0, %p8154_p11 }
  0x25   :  { %8164 = shalt.err (!%p8161_p1)
}
  0x26   :  { %83 = dma.hbm_to_vmem [thread:$0]  %s11216_s8, 4096, %s8353_s23, [#allocation10], %s8263_s16, %s8263_s16, %s8264_s17  }
  0x27   :  { %s8265_s29 = smov [#allocation4]   ;;  %s8266_s18 = smov [#allocation8]  }
  0x28   :  { %s35_s30 = sshll.u32 %s8265_s29, 4  ;;  %s61_s19 = sshll.u32 %s8266_s18, 4  ;;  %s36_s30 = int_to_ptr.vmem [resolvable:$true] %s35_s30  ;;  %s8390_s19 = int_to_ptr.vmem [resolvable:$true] %s61_s19 }
  0x29   :  { %s8165_s24 = scalar_lea.hbm %s11210_s2, 4096 }
  0x2a   :  { %p8166_p2 = scmp.ne.s32.totalorder %s11210_s2, %s8165_s24  ;;  %p8169_p3 = scmp.lt.u32.totalorder %s8165_s24, %s11210_s2 }
  0x2c   :  { %p8171_p4 = pnand %p8169_p3, %p8166_p2 }
  0x2e   :  { %8174 = shalt.err (!%p8171_p4)
}
  0x2f   :  { %s8175_s8 = scalar_lea.vmem %s36_s30, 4096  ;;  %p8180_p6 = scmp.lt.s32.totalorder %s36_s30, %s36_s30 }
  0x30   :  { %p8176_p5 = scmp.ne.s32.totalorder %s36_s30, %s8175_s8  ;;  %p8181_p7 = scmp.lt.s32.totalorder %s8175_s8, %s8175_s8 }
  0x32   :  { %p8182_p8 = por %p8181_p7, %p8180_p6 }
  0x34   :  { %p8183_p9 = pnand %p8182_p8, %p8176_p5 }
  0x36   :  { %8186 = shalt.err (!%p8183_p9)
}
  0x37   :  { %41 = dma.hbm_to_vmem [thread:$0]  %s11210_s2, 4096, %s36_s30, [#allocation5], %s8263_s16, %s8263_s16, %s8264_s17  }
  0x38   :  { %s8187_s29 = scalar_lea.hbm %s11213_s5, 4096 }
  0x39   :  { %p8188_p10 = scmp.ne.s32.totalorder %s11213_s5, %s8187_s29  ;;  %p8191_p11 = scmp.lt.u32.totalorder %s8187_s29, %s11213_s5 }
  0x3b   :  { %p8193_p12 = pnand %p8191_p11, %p8188_p10 }
  0x3d   :  { %8196 = shalt.err (!%p8193_p12)
}
  0x3e   :  { %s8197_s25 = scalar_lea.vmem %s8390_s19, 4096  ;;  %p8202_p0 = scmp.lt.s32.totalorder %s8390_s19, %s8390_s19 }
  0x3f   :  { %p8198_p13 = scmp.ne.s32.totalorder %s8390_s19, %s8197_s25  ;;  %p8203_p1 = scmp.lt.s32.totalorder %s8197_s25, %s8197_s25 }
  0x41   :  { %p8204_p2 = por %p8203_p1, %p8202_p0 }
  0x43   :  { %p8205_p3 = pnand %p8204_p2, %p8198_p13 }
  0x45   :  { %8208 = shalt.err (!%p8205_p3)
}
  0x46   :  { %67 = dma.hbm_to_vmem [thread:$0]  %s11213_s5, 4096, %s8390_s19, [#allocation7], %s8263_s16, %s8263_s16, %s8264_s17  }
  0x47   :  { %s8267_s26 = smov [#allocation11]   ;;  %s8268_s28 = smov [#allocation12]  }
  0x48   :  { %s91_s27 = sshll.u32 %s8267_s26, 4  ;;  %s103_s8 = sshll.u32 %s8268_s28, 4  ;;  %s92_s27 = int_to_ptr.vmem [resolvable:$true] %s91_s27  ;;  %s8427_s8 = int_to_ptr.vmem [resolvable:$true] %s103_s8 }
  0x49   :  { %s8209_s4 = scalar_lea.hbm %s11218_s10, 8192 }
  0x4a   :  { %p8210_p4 = scmp.ne.s32.totalorder %s11218_s10, %s8209_s4  ;;  %p8213_p5 = scmp.lt.u32.totalorder %s8209_s4, %s11218_s10 }
  0x4c   :  { %p8215_p6 = pnand %p8213_p5, %p8210_p4 }
  0x4e   :  { %8218 = shalt.err (!%p8215_p6)
}
  0x4f   :  { %s8219_s5 = scalar_lea.vmem %s92_s27, 8192  ;;  %p8224_p8 = scmp.lt.s32.totalorder %s92_s27, %s92_s27 }
  0x50   :  { %p8220_p7 = scmp.ne.s32.totalorder %s92_s27, %s8219_s5  ;;  %p8225_p9 = scmp.lt.s32.totalorder %s8219_s5, %s8219_s5 }
  0x52   :  { %p8226_p10 = por %p8225_p9, %p8224_p8 }
  0x54   :  { %p8227_p11 = pnand %p8226_p10, %p8220_p7 }
  0x56   :  { %8230 = shalt.err (!%p8227_p11)
}
  0x57   :  { %97 = dma.hbm_to_vmem [thread:$0]  %s11218_s10, 8192, %s92_s27, [#allocation10], %s8263_s16, %s8263_s16, %s8264_s17  }
  0x58   :  { %s8231_s2 = scalar_lea.hbm %s11219_s11, 4096 }
  0x59   :  { %p8232_p12 = scmp.ne.s32.totalorder %s11219_s11, %s8231_s2  ;;  %p8235_p13 = scmp.lt.u32.totalorder %s8231_s2, %s11219_s11 }
  0x5b   :  { %p8237_p0 = pnand %p8235_p13, %p8232_p12 }
  0x5d   :  { %8240 = shalt.err (!%p8237_p0)
}
  0x5e   :  { %s8241_s14 = scalar_lea.vmem %s8427_s8, 4096  ;;  %p8246_p2 = scmp.lt.s32.totalorder %s8427_s8, %s8427_s8 }
  0x5f   :  { %p8242_p1 = scmp.ne.s32.totalorder %s8427_s8, %s8241_s14  ;;  %p8247_p3 = scmp.lt.s32.totalorder %s8241_s14, %s8241_s14 }
  0x61   :  { %p8248_p4 = por %p8247_p3, %p8246_p2 }
  0x63   :  { %p8249_p5 = pnand %p8248_p4, %p8242_p1 }
  0x65   :  { %8252 = shalt.err (!%p8249_p5)
}
  0x66   :  { %109 = dma.hbm_to_vmem [thread:$0]  %s11219_s11, 4096, %s8427_s8, [#allocation13], %s8263_s16, %s8263_s16, %s8264_s17  }
  0x67   :  { %8253 = dma.done.wait [#allocation5], 4096  }
  0x68   :  { %8254 = vsyncadd [#allocation5], 4294963200 }
  0x69   :  { %8255 = dma.done.wait [#allocation7], 8192  }
  0x6a   :  { %8256 = vsyncadd [#allocation7], 4294959104 }
  0x6b   :  { %8257 = dma.done.wait [#allocation10], 12288  }
  0x6c   :  { %8258 = vsyncadd [#allocation10], 4294955008 }
  0x6d   :  { %8259 = dma.done.wait [#allocation13], 4096  }
  0x6e   :  { %8260 = vsyncadd [#allocation13], 4294963200  ;;  %v11224_v1 = vmov 0   ;;  %v6983_v2 = vld [vmem:[%s11209_s1 + $0x4] ss:$16 sps:$4 sm:$0xff]   ;;  %v136_v35 = vld [vmem:[%s11208_s0 + $0x8] sm:$0xff] }
  0x6f   :  { %393 = vmatprep.mubr.bf16.mxu0 %v11224_v1  ;;  %466 = vmatprep.mubr.bf16.mxu1 %v11224_v1  ;;  %v6985_v3 = vld [vmem:[%s11209_s1 + $0xc] ss:$16 sps:$4 sm:$0xff]   ;;  %v6987_v4 = vld [vmem:[%s11209_s1] ss:$16 sps:$4 sm:$0xff]   ;;  %v6988_v5 = vld [vmem:[%s11209_s1 + $0x8] ss:$16 sps:$4 sm:$0xff]  }
  0x70   :  { %6982 = vset.pattern.permute.xlu1 %v11224_v1  ;;  %6981 = vset.pattern.permute.xlu0 %v11224_v1  ;;  %v6989_v6 = vld [vmem:[%s11209_s1 + $0x24] ss:$16 sps:$4 sm:$0xff]   ;;  %v6991_v7 = vld [vmem:[%s11209_s1 + $0x2c] ss:$16 sps:$4 sm:$0xff]   ;;  %v6993_v8 = vld [vmem:[%s11209_s1 + $0x20] ss:$16 sps:$4 sm:$0xff]  }
  0x71   :  { %361 = vmatprep.subr.bf16.mxu0 %v6983_v2  ;;  %434 = vmatprep.subr.bf16.mxu1 %v6985_v3  ;;  %v6994_v9 = vld [vmem:[%s11209_s1 + $0x28] ss:$16 sps:$4 sm:$0xff]   ;;  %v6995_v10 = vld [vmem:[%s11209_s1 + $0x44] ss:$16 sps:$4 sm:$0xff]   ;;  %v6997_v11 = vld [vmem:[%s11209_s1 + $0x4c] ss:$16 sps:$4 sm:$0xff]  }
  0x72   :  { %362 = vmatpush1.bf16.msra.mxu0 %v6987_v4  ;;  %435 = vmatpush1.bf16.msra.mxu1 %v6988_v5  ;;  %v6999_v12 = vld [vmem:[%s11209_s1 + $0x40] ss:$16 sps:$4 sm:$0xff]   ;;  %v7000_v13 = vld [vmem:[%s11209_s1 + $0x48] ss:$16 sps:$4 sm:$0xff]   ;;  %v7001_v14 = vld [vmem:[%s11209_s1 + $0x64] ss:$16 sps:$4 sm:$0xff]  }
  0x73   :  { %363 = vmatprep.subr.bf16.mxu0 %v6989_v6  ;;  %436 = vmatprep.subr.bf16.mxu1 %v6991_v7  ;;  %v7003_v15 = vld [vmem:[%s11209_s1 + $0x6c] ss:$16 sps:$4 sm:$0xff]   ;;  %v7005_v16 = vld [vmem:[%s11209_s1 + $0x60] ss:$16 sps:$4 sm:$0xff]   ;;  %v7006_v17 = vld [vmem:[%s11209_s1 + $0x68] ss:$16 sps:$4 sm:$0xff]  }
  0x74   :  { %v7007_v18 = vld [vmem:[%s11209_s1 + $0x84] ss:$16 sps:$4 sm:$0xff]   ;;  %v7009_v19 = vld [vmem:[%s11209_s1 + $0x8c] ss:$16 sps:$4 sm:$0xff]   ;;  %v7011_v20 = vld [vmem:[%s11209_s1 + $0x80] ss:$16 sps:$4 sm:$0xff]  }
  0x75   :  { %v7012_v21 = vld [vmem:[%s11209_s1 + $0x88] ss:$16 sps:$4 sm:$0xff]   ;;  %v7013_v22 = vld [vmem:[%s11209_s1 + $0xa4] ss:$16 sps:$4 sm:$0xff]   ;;  %v7015_v23 = vld [vmem:[%s11209_s1 + $0xac] ss:$16 sps:$4 sm:$0xff]  }
  0x76   :  { %364 = vmatpush1.bf16.msra.mxu0 %v6993_v8  ;;  %437 = vmatpush1.bf16.msra.mxu1 %v6994_v9  ;;  %v7017_v24 = vld [vmem:[%s11209_s1 + $0xa0] ss:$16 sps:$4 sm:$0xff]   ;;  %v7018_v25 = vld [vmem:[%s11209_s1 + $0xa8] ss:$16 sps:$4 sm:$0xff]   ;;  %v7019_v26 = vld [vmem:[%s11209_s1 + $0xc4] ss:$16 sps:$4 sm:$0xff]  }
  0x77   :  { %365 = vmatprep.subr.bf16.mxu0 %v6995_v10  ;;  %438 = vmatprep.subr.bf16.mxu1 %v6997_v11  ;;  %v7021_v27 = vld [vmem:[%s11209_s1 + $0xcc] ss:$16 sps:$4 sm:$0xff]   ;;  %v7023_v28 = vld [vmem:[%s11209_s1 + $0xc0] ss:$16 sps:$4 sm:$0xff]   ;;  %v7024_v29 = vld [vmem:[%s11209_s1 + $0xc8] ss:$16 sps:$4 sm:$0xff]  }
  0x78   :  { %v7025_v30 = vld [vmem:[%s11209_s1 + $0xe4] ss:$16 sps:$4 sm:$0xff]   ;;  %v7027_v31 = vld [vmem:[%s11209_s1 + $0xec] ss:$16 sps:$4 sm:$0xff]   ;;  %v7029_v32 = vld [vmem:[%s11209_s1 + $0xe0] ss:$16 sps:$4 sm:$0xff]  }
  0x79   :  { %v7030_v33 = vld [vmem:[%s11209_s1 + $0xe8] ss:$16 sps:$4 sm:$0xff]   ;;  %v135_v34 = vld [vmem:[%s11208_s0] sm:$0xff]  ;;  %v137_v45 = vld [vmem:[%s11208_s0 + $0x10] sm:$0xff] }
  0x7a   :  { %366 = vmatpush1.bf16.msra.mxu0 %v6999_v12  ;;  %439 = vmatpush1.bf16.msra.mxu1 %v7000_v13  ;;  %v8570_v36 = vld [vmem:[#allocation4 + $0x4] ss:$16 sps:$4 sm:$0xff]   ;;  %v8572_v37 = vld [vmem:[#allocation4 + $0xc] ss:$16 sps:$4 sm:$0xff]   ;;  %v8574_v38 = vpack.c.bf16 %v136_v35, %v135_v34  ;;  %v8576_v39 = vld [vmem:[#allocation4] ss:$16 sps:$4 sm:$0xff]  }
  0x7b   :  { %367 = vmatprep.subr.bf16.mxu0 %v7001_v14  ;;  %440 = vmatprep.subr.bf16.mxu1 %v7003_v15  ;;  %v8578_v40 = vld [vmem:[#allocation4 + $0x8] ss:$16 sps:$4 sm:$0xff]   ;;  %v8582_v41 = vld [vmem:[#allocation4 + $0x24] ss:$16 sps:$4 sm:$0xff]   ;;  %v8584_v42 = vld [vmem:[#allocation4 + $0x2c] ss:$16 sps:$4 sm:$0xff]   ;;  %v181_v15 = vlaneseq }
  0x7c   :  { %11280 = vst [vmem:[#allocation18_spill] sm:$0xff] %v8574_v38  ;;  %v8586_v43 = vld [vmem:[#allocation4 + $0x20] ss:$16 sps:$4 sm:$0xff]   ;;  %v8588_v44 = vld [vmem:[#allocation4 + $0x28] ss:$16 sps:$4 sm:$0xff]  }
  0x7d   :  { %v138_v46 = vld [vmem:[%s11208_s0 + $0x18] sm:$0xff]  ;;  %v8610_v50 = vld [vmem:[#allocation4 + $0x40] ss:$16 sps:$4 sm:$0xff]   ;;  %v140_v57 = vld [vmem:[%s11208_s0 + $0x28] sm:$0xff] }
  0x7e   :  { %368 = vmatpush1.bf16.msra.mxu0 %v7005_v16  ;;  %441 = vmatpush1.bf16.msra.mxu1 %v7006_v17  ;;  %v8600_v47 = vld [vmem:[#allocation4 + $0x44] ss:$16 sps:$4 sm:$0xff]   ;;  %v8604_v48 = vld [vmem:[#allocation4 + $0x4c] ss:$16 sps:$4 sm:$0xff]   ;;  %v8608_v49 = vpack.c.bf16 %v138_v46, %v137_v45  ;;  %v8612_v51 = vld [vmem:[#allocation4 + $0x48] ss:$16 sps:$4 sm:$0xff]  }
  0x7f   :  { %369 = vmatprep.subr.bf16.mxu0 %v7007_v18  ;;  %442 = vmatprep.subr.bf16.mxu1 %v7009_v19  ;;  %v8616_v52 = vld [vmem:[#allocation4 + $0x64] ss:$16 sps:$4 sm:$0xff]   ;;  %v8620_v53 = vld [vmem:[#allocation4 + $0x6c] ss:$16 sps:$4 sm:$0xff]   ;;  %v8622_v54 = vld [vmem:[#allocation4 + $0x60] ss:$16 sps:$4 sm:$0xff]  }
  0x80   :  { %11281 = vst [vmem:[#allocation19_spill] sm:$0xff] %v8608_v49  ;;  %v8626_v55 = vld [vmem:[#allocation4 + $0x68] ss:$16 sps:$4 sm:$0xff]   ;;  %v139_v56 = vld [vmem:[%s11208_s0 + $0x20] sm:$0xff]  ;;  %v141_v4 = vld [vmem:[%s11208_s0 + $0x30] sm:$0xff]  ;;  %v182_v16 = vshrl.u32 %v181_v15, 7 }
  0x81   :  { %v8638_v58 = vld [vmem:[#allocation4 + $0x84] ss:$16 sps:$4 sm:$0xff]   ;;  %v8640_v59 = vld [vmem:[#allocation4 + $0x8c] ss:$16 sps:$4 sm:$0xff]   ;;  %v8644_v60 = vld [vmem:[#allocation4 + $0x80] ss:$16 sps:$4 sm:$0xff]   ;;  %v8648_v62 = vpack.c.bf16 %v140_v57, %v139_v56 }
  0x82   :  { %370 = vmatpush1.bf16.msra.mxu0 %v7011_v20  ;;  %443 = vmatpush1.bf16.msra.mxu1 %v7012_v21  ;;  %v8646_v61 = vld [vmem:[#allocation4 + $0x88] ss:$16 sps:$4 sm:$0xff]   ;;  %v8650_v63 = vld [vmem:[#allocation4 + $0xa4] ss:$16 sps:$4 sm:$0xff]   ;;  %v8652_v0 = vld [vmem:[#allocation4 + $0xac] ss:$16 sps:$4 sm:$0xff]  }
  0x83   :  { %371 = vmatprep.subr.bf16.mxu0 %v7013_v22  ;;  %444 = vmatprep.subr.bf16.mxu1 %v7015_v23  ;;  %11282 = vst [vmem:[#allocation20_spill] sm:$0xff] %v8648_v62  ;;  %v8658_v2 = vld [vmem:[#allocation4 + $0xa0] ss:$16 sps:$4 sm:$0xff]   ;;  %v8660_v3 = vld [vmem:[#allocation4 + $0xa8] ss:$16 sps:$4 sm:$0xff]   ;;  %v8746_v17 = vsub.s32 2, %v182_v16 }
  0x84   :  { %v142_v5 = vld [vmem:[%s11208_s0 + $0x38] sm:$0xff]  ;;  %v8680_v8 = vld [vmem:[#allocation4 + $0xc0] ss:$16 sps:$4 sm:$0xff]   ;;  %v8748_v18 = vsub.s32 3, %v182_v16  ;;  %v8750_v19 = vsub.s32 0, %v182_v16  ;;  %v8755_v21 = vsub.s32 1, %v182_v16 }
  0x85   :  { %v8670_v6 = vld [vmem:[#allocation4 + $0xc4] ss:$16 sps:$4 sm:$0xff]   ;;  %v8672_v7 = vld [vmem:[#allocation4 + $0xcc] ss:$16 sps:$4 sm:$0xff]   ;;  %v8682_v9 = vld [vmem:[#allocation4 + $0xc8] ss:$16 sps:$4 sm:$0xff]   ;;  %v8684_v10 = vpack.c.bf16 %v142_v5, %v141_v4 }
  0x86   :  { %372 = vmatpush1.bf16.msra.mxu0 %v7017_v24  ;;  %445 = vmatpush1.bf16.msra.mxu1 %v7018_v25  ;;  %v8686_v11 = vld [vmem:[#allocation4 + $0xe4] ss:$16 sps:$4 sm:$0xff]   ;;  %v8688_v12 = vld [vmem:[#allocation4 + $0xec] ss:$16 sps:$4 sm:$0xff]   ;;  %v8694_v13 = vld [vmem:[#allocation4 + $0xe0] ss:$16 sps:$4 sm:$0xff]  }
  0x87   :  { %373 = vmatprep.subr.bf16.mxu0 %v7019_v26  ;;  %446 = vmatprep.subr.bf16.mxu1 %v7021_v27  ;;  %11283 = vst [vmem:[#allocation21_spill] sm:$0xff] %v8684_v10  ;;  %v8696_v14 = vld [vmem:[#allocation4 + $0xe8] ss:$16 sps:$4 sm:$0xff]   ;;  %11284 = vst [vmem:[#allocation22_spill] sm:$0xff] %v8746_v17  ;;  %v179_v20 = vld [vmem:[%s11211_s3] sm:$0xf] }
  0x88   :  { %11285 = vst [vmem:[#allocation23_spill] sm:$0xff] %v8748_v18  ;;  %11286 = vst [vmem:[#allocation24_spill] sm:$0xff] %v8750_v19  ;;  %v8758_v22 = vrot.slane %v179_v20, %v8746_v17  ;;  %v8765_v25 = vrot.slane %v179_v20, %v8748_v18  ;;  %v184_v26 = vrot.slane %v179_v20, %v8750_v19 }
  0x89   :  { %11287 = vst [vmem:[#allocation25_spill] sm:$0xff] %v8755_v21 }
  0x8a   :  { %374 = vmatpush1.bf16.msra.mxu0 %v7023_v28  ;;  %447 = vmatpush1.bf16.msra.mxu1 %v7024_v29  ;;  %v188_v29 = vrot.slane %v179_v20, %v8755_v21 }
  0x8b   :  { %375 = vmatprep.subr.bf16.mxu0 %v7025_v30  ;;  %448 = vmatprep.subr.bf16.mxu1 %v7027_v31 }
  0x8e   :  { %376 = vmatpush1.bf16.msra.mxu0 %v7029_v32  ;;  %449 = vmatpush1.bf16.msra.mxu1 %v7030_v33 }
  0x8f   :  { %699 = vmatprep.subr.bf16.mxu0 %v8570_v36  ;;  %740 = vmatprep.subr.bf16.mxu1 %v8572_v37 }
  0x91   :  { %394 = vmatmul.mubr.bf16.vlgmr.msra.gmra.mrb[0].mxu0 %v8574_v38  ;;  %467 = vmatmul.mubr.bf16.vlgmr.msra.gmra.mrb[0].mxu1 %v8574_v38 }
  0x92   :  { %700 = vmatpush1.bf16.msra.mxu0 %v8576_v39  ;;  %741 = vmatpush1.bf16.msra.mxu1 %v8578_v40 }
  0x93   :  { %701 = vmatprep.subr.bf16.mxu0 %v8582_v41  ;;  %742 = vmatprep.subr.bf16.mxu1 %v8584_v42 }
  0x94   :  { %403 = vmatprep.mubr.bf16.mxu0 %v11224_v1  ;;  %476 = vmatprep.mubr.bf16.mxu1 %v11224_v1 }
  0x96   :  { %702 = vmatpush1.bf16.msra.mxu0 %v8586_v43  ;;  %743 = vmatpush1.bf16.msra.mxu1 %v8588_v44 }
  0x97   :  { %703 = vmatprep.subr.bf16.mxu0 %v8600_v47  ;;  %744 = vmatprep.subr.bf16.mxu1 %v8604_v48 }
  0x99   :  { %404 = vmatmul.mubr.bf16.gmra.mrb[4].mxu0 %v8608_v49  ;;  %477 = vmatmul.mubr.bf16.gmra.mrb[4].mxu1 %v8608_v49 }
  0x9a   :  { %704 = vmatpush1.bf16.msra.mxu0 %v8610_v50  ;;  %745 = vmatpush1.bf16.msra.mxu1 %v8612_v51 }
  0x9b   :  { %705 = vmatprep.subr.bf16.mxu0 %v8616_v52  ;;  %746 = vmatprep.subr.bf16.mxu1 %v8620_v53 }
  0x9c   :  { %413 = vmatprep.mubr.bf16.mxu0 %v11224_v1  ;;  %486 = vmatprep.mubr.bf16.mxu1 %v11224_v1 }
  0x9e   :  { %706 = vmatpush1.bf16.msra.mxu0 %v8622_v54  ;;  %747 = vmatpush1.bf16.msra.mxu1 %v8626_v55 }
  0x9f   :  { %707 = vmatprep.subr.bf16.mxu0 %v8638_v58  ;;  %748 = vmatprep.subr.bf16.mxu1 %v8640_v59 }
  0xa1   :  { %414 = vmatmul.mubr.bf16.gmra.mrb[8].mxu0 %v8648_v62  ;;  %487 = vmatmul.mubr.bf16.gmra.mrb[8].mxu1 %v8648_v62 }
  0xa2   :  { %708 = vmatpush1.bf16.msra.mxu0 %v8644_v60  ;;  %749 = vmatpush1.bf16.msra.mxu1 %v8646_v61 }
  0xa3   :  { %709 = vmatprep.subr.bf16.mxu0 %v8650_v63  ;;  %750 = vmatprep.subr.bf16.mxu1 %v8652_v0 }
  0xa4   :  { %423 = vmatprep.mubr.bf16.mxu0 %v11224_v1  ;;  %496 = vmatprep.mubr.bf16.mxu1 %v11224_v1 }
  0xa6   :  { %710 = vmatpush1.bf16.msra.mxu0 %v8658_v2  ;;  %751 = vmatpush1.bf16.msra.mxu1 %v8660_v3 }
  0xa7   :  { %711 = vmatprep.subr.bf16.mxu0 %v8670_v6  ;;  %752 = vmatprep.subr.bf16.mxu1 %v8672_v7 }
  0xa9   :  { %424 = vmatmul.mubr.bf16.gmra.mrb[12].mxu0 %v8684_v10  ;;  %497 = vmatmul.mubr.bf16.gmra.mrb[12].mxu1 %v8684_v10 }
  0xaa   :  { %712 = vmatpush1.bf16.msra.mxu0 %v8680_v8  ;;  %753 = vmatpush1.bf16.msra.mxu1 %v8682_v9 }
  0xab   :  { %713 = vmatprep.subr.bf16.mxu0 %v8686_v11  ;;  %754 = vmatprep.subr.bf16.mxu1 %v8688_v12 }
  0xac   :  { %731 = vmatprep.mubr.bf16.mxu0 %v11224_v1  ;;  %772 = vmatprep.mubr.bf16.mxu1 %v11224_v1 }
  0xae   :  { %714 = vmatpush1.bf16.msra.mxu0 %v8694_v13  ;;  %755 = vmatpush1.bf16.msra.mxu1 %v8696_v14 }
  0xaf   :  { %811 = vmatprep.subr.bf16.mxu0 %v8570_v36  ;;  %852 = vmatprep.subr.bf16.mxu1 %v8572_v37 }
  0xb1   :  { %732 = vmatmul.mubr.bf16.vlgmr.msra.gmra.mrb[16].mxu0 %v11224_v1  ;;  %773 = vmatmul.mubr.bf16.vlgmr.msra.gmra.mrb[16].mxu1 %v11224_v1 }
  0xb2   :  { %812 = vmatpush1.bf16.msra.mxu0 %v8576_v39  ;;  %853 = vmatpush1.bf16.msra.mxu1 %v8578_v40 }
  0xb3   :  { %813 = vmatprep.subr.bf16.mxu0 %v8582_v41  ;;  %854 = vmatprep.subr.bf16.mxu1 %v8584_v42 }
  0xb4   :  { %843 = vmatprep.mubr.bf16.mxu0 %v11224_v1  ;;  %884 = vmatprep.mubr.bf16.mxu1 %v11224_v1 }
  0xb6   :  { %814 = vmatpush1.bf16.msra.mxu0 %v8586_v43  ;;  %855 = vmatpush1.bf16.msra.mxu1 %v8588_v44 }
  0xb7   :  { %815 = vmatprep.subr.bf16.mxu0 %v8600_v47  ;;  %856 = vmatprep.subr.bf16.mxu1 %v8604_v48 }
  0xba   :  { %816 = vmatpush1.bf16.msra.mxu0 %v8610_v50  ;;  %857 = vmatpush1.bf16.msra.mxu1 %v8612_v51 }
  0xbb   :  { %817 = vmatprep.subr.bf16.mxu0 %v8616_v52  ;;  %858 = vmatprep.subr.bf16.mxu1 %v8620_v53 }
  0xbe   :  { %818 = vmatpush1.bf16.msra.mxu0 %v8622_v54  ;;  %859 = vmatpush1.bf16.msra.mxu1 %v8626_v55 }
  0xbf   :  { %819 = vmatprep.subr.bf16.mxu0 %v8638_v58  ;;  %860 = vmatprep.subr.bf16.mxu1 %v8640_v59 }
  0xc2   :  { %820 = vmatpush1.bf16.msra.mxu0 %v8644_v60  ;;  %861 = vmatpush1.bf16.msra.mxu1 %v8646_v61 }
  0xc3   :  { %821 = vmatprep.subr.bf16.mxu0 %v8650_v63  ;;  %862 = vmatprep.subr.bf16.mxu1 %v8652_v0 }
  0xc6   :  { %822 = vmatpush1.bf16.msra.mxu0 %v8658_v2  ;;  %863 = vmatpush1.bf16.msra.mxu1 %v8660_v3 }
  0xc7   :  { %823 = vmatprep.subr.bf16.mxu0 %v8670_v6  ;;  %864 = vmatprep.subr.bf16.mxu1 %v8672_v7 }
  0xca   :  { %824 = vmatpush1.bf16.msra.mxu0 %v8680_v8  ;;  %865 = vmatpush1.bf16.msra.mxu1 %v8682_v9 }
  0xcb   :  { %825 = vmatprep.subr.bf16.mxu0 %v8686_v11  ;;  %866 = vmatprep.subr.bf16.mxu1 %v8688_v12 }
  0xce   :  { %826 = vmatpush1.bf16.msra.mxu0 %v8694_v13  ;;  %867 = vmatpush1.bf16.msra.mxu1 %v8696_v14 }
  0xcf   :  { %923 = vmatprep.subr.bf16.mxu0 %v8570_v36  ;;  %964 = vmatprep.subr.bf16.mxu1 %v8572_v37 }
 0x164   :  { %v8760_v23 = vpop.f32.mrb[0].mxu0  ;;  %v8762_v24 = vpop.f32.mrb[0].mxu1 }
 0x165   :  { %v397_v27 = vpop.f32.mrb[1].mxu0  ;;  %v470_v28 = vpop.f32.mrb[1].mxu1 }
 0x166   :  { %v399_v30 = vpop.f32.mrb[2].mxu0  ;;  %v472_v31 = vpop.f32.mrb[2].mxu1 }
 0x167   :  { %v8769_v32 = vadd.f32 %v399_v30, %v184_v26  ;;  %v401_v33 = vpop.f32.mrb[3].mxu0  ;;  %v8772_v34 = vadd.f32 %v472_v31, %v8758_v22  ;;  %v474_v35 = vpop.f32.mrb[3].mxu1 }
 0x168   :  { %v8774_v36 = vadd.f32 %v401_v33, %v188_v29  ;;  %v8777_v37 = vadd.f32 %v474_v35, %v8765_v25 }
 0x16c   :  { %v405_v39 = vpop.f32.mrb[4].mxu0  ;;  %v478_v40 = vpop.f32.mrb[4].mxu1 }
 0x16d   :  { %v8779_v43 = vadd.f32 %v405_v39, %v184_v26  ;;  %v407_v44 = vpop.f32.mrb[5].mxu0  ;;  %v8782_v45 = vadd.f32 %v478_v40, %v8758_v22  ;;  %v480_v46 = vpop.f32.mrb[5].mxu1 }
 0x16e   :  { %v8784_v56 = vadd.f32 %v407_v44, %v188_v29  ;;  %v409_v57 = vpop.f32.mrb[6].mxu0  ;;  %v8787_v4 = vadd.f32 %v480_v46, %v8765_v25  ;;  %v482_v5 = vpop.f32.mrb[6].mxu1 }
 0x16f   :  { %v8789_v15 = vadd.f32 %v409_v57, %v184_v26  ;;  %v411_v16 = vpop.f32.mrb[7].mxu0  ;;  %v8792_v20 = vadd.f32 %v482_v5, %v8758_v22  ;;  %v484_v30 = vpop.f32.mrb[7].mxu1 }
 0x170   :  { %v8794_v31 = vadd.f32 %v411_v16, %v188_v29  ;;  %v8797_v33 = vadd.f32 %v484_v30, %v8765_v25 }
 0x174   :  { %v415_v35 = vpop.f32.mrb[8].mxu0  ;;  %v488_v39 = vpop.f32.mrb[8].mxu1 }
 0x175   :  { %v8799_v40 = vadd.f32 %v415_v35, %v184_v26  ;;  %v417_v44 = vpop.f32.mrb[9].mxu0  ;;  %v8802_v46 = vadd.f32 %v488_v39, %v8758_v22  ;;  %v490_v57 = vpop.f32.mrb[9].mxu1 }
 0x176   :  { %v8804_v1 = vadd.f32 %v417_v44, %v188_v29  ;;  %v419_v18 = vpop.f32.mrb[10].mxu0  ;;  %v8807_v5 = vadd.f32 %v490_v57, %v8765_v25  ;;  %v492_v16 = vpop.f32.mrb[10].mxu1 }
 0x177   :  { %11288 = vst [vmem:[#allocation26_spill] sm:$0xff] %v8802_v46  ;;  %v8809_v21 = vadd.f32 %v419_v18, %v184_v26  ;;  %v421_v30 = vpop.f32.mrb[11].mxu0  ;;  %v8812_v17 = vadd.f32 %v492_v16, %v8758_v22  ;;  %v494_v35 = vpop.f32.mrb[11].mxu1 }
 0x178   :  { %11289 = vst [vmem:[#allocation27_spill] sm:$0xff] %v8804_v1  ;;  %11290 = vst [vmem:[#allocation28_spill] sm:$0xff] %v8807_v5  ;;  %v8814_v19 = vadd.f32 %v421_v30, %v188_v29  ;;  %v8817_v39 = vadd.f32 %v494_v35, %v8765_v25 }
 0x179   :  { %11291 = vst [vmem:[#allocation29_spill] sm:$0xff] %v8809_v21  ;;  %11292 = vst [vmem:[#allocation30_spill] sm:$0xff] %v8812_v17 }
 0x17a   :  { %11293 = vst [vmem:[#allocation31_spill] sm:$0xff] %v8814_v19  ;;  %11294 = vst [vmem:[#allocation32_spill] sm:$0xff] %v8817_v39 }
 0x17c   :  { %v425_v10 = vpop.f32.mrb[12].mxu0  ;;  %v498_v44 = vpop.f32.mrb[12].mxu1 }
 0x17d   :  { %v8819_v62 = vadd.f32 %v425_v10, %v184_v26  ;;  %v427_v49 = vpop.f32.mrb[13].mxu0  ;;  %v8822_v57 = vadd.f32 %v498_v44, %v8758_v22  ;;  %v500_v18 = vpop.f32.mrb[13].mxu1 }
 0x17e   :  { %v8824_v38 = vadd.f32 %v427_v49, %v188_v29  ;;  %v429_v21 = vpop.f32.mrb[14].mxu0  ;;  %v8827_v16 = vadd.f32 %v500_v18, %v8765_v25  ;;  %v502_v30 = vpop.f32.mrb[14].mxu1  ;;  %v396_v49 = vadd.f32 %v8760_v23, %v184_v26  ;;  %v398_v18 = vadd.f32 %v397_v27, %v188_v29 }
 0x17f   :  { %11295 = vst [vmem:[#allocation33_spill] sm:$0xff] %v8819_v62  ;;  %11296 = vst [vmem:[#allocation34_spill] sm:$0xff] %v8822_v57  ;;  %v8829_v19 = vadd.f32 %v429_v21, %v184_v26  ;;  %v431_v35 = vpop.f32.mrb[15].mxu0  ;;  %v8832_v39 = vadd.f32 %v502_v30, %v8758_v22  ;;  %v504_v10 = vpop.f32.mrb[15].mxu1 }
 0x180   :  { %11297 = vst [vmem:[#allocation35_spill] sm:$0xff] %v8824_v38  ;;  %11298 = vst [vmem:[#allocation36_spill] sm:$0xff] %v8827_v16  ;;  %v8834_v62 = vadd.f32 %v431_v35, %v188_v29  ;;  %v8837_v44 = vadd.f32 %v504_v10, %v8765_v25  ;;  %v469_v38 = vadd.f32 %v8762_v24, %v8758_v22 }
 0x181   :  { %11299 = vst [vmem:[#allocation37_spill] sm:$0xff] %v8829_v19  ;;  %11300 = vst [vmem:[#allocation38_spill] sm:$0xff] %v8832_v39  ;;  %v471_v16 = vadd.f32 %v470_v28, %v8765_v25 }
 0x182   :  { %11301 = vst [vmem:[#allocation39_spill] sm:$0xff] %v8834_v62  ;;  %11302 = vst [vmem:[#allocation40_spill] sm:$0xff] %v8837_v44 }
 0x184   :  { %v733_v21 = vpop.f32.mrb[16].mxu0  ;;  %v774_v19 = vpop.f32.mrb[16].mxu1 }
 0x185   :  { %v781_v57 = vadd.f32 %v733_v21, %v396_v49  ;;  %v783_v17 = vadd.f32 %v774_v19, %v469_v38  ;;  %v735_v30 = vpop.f32.mrb[17].mxu0  ;;  %v776_v39 = vpop.f32.mrb[17].mxu1  ;;  %v8853_v49 = vld [vmem:[#allocation4 + $0x8] ss:$16 sps:$4 sm:$0xff]   ;;  %v8860_v21 = vld [vmem:[#allocation4 + $0x20] ss:$16 sps:$4 sm:$0xff]  }
 0x186   :  { %v782_v5 = vadd.f32 %v735_v30, %v398_v18  ;;  %v784_v35 = vadd.f32 %v776_v39, %v471_v16  ;;  %v737_v62 = vpop.f32.mrb[18].mxu0  ;;  %v778_v1 = vpop.f32.mrb[18].mxu1  ;;  %v11304_v18 = vmov 0   ;;  %v8863_v30 = vld [vmem:[#allocation4 + $0x28] ss:$16 sps:$4 sm:$0xff]  }
 0x187   :  { %v6619_v10 = vmul.f32 -1.442695, %v781_v57  ;;  %v738_v44 = vpop.f32.mrb[19].mxu0  ;;  %v779_v46 = vpop.f32.mrb[19].mxu1 }
 0x188   :  { %v6620_v23 = vmul.f32 -1.442695, %v782_v5  ;;  %v6621_v22 = vmul.f32 -1.442695, %v784_v35  ;;  %v8850_v44 = vld [vmem:[#allocation4] ss:$16 sps:$4 sm:$0xff]  }
 0x189   :  { %7463 = vpow2.f32 %v6619_v10 }
 0x18a   :  { %7465 = vpow2.f32 %v6620_v23 }
 0x18b   :  { %7467 = vpow2.f32 %v6621_v22 }
 0x18c   :  { %7469 = vtanh.f32 %v783_v17 }
 0x193   :  { %v7464_v24 = vpop.eup %7463 }
 0x194   :  { %v7466_v26 = vpop.eup %7465  ;;  %v788_v25 = vadd.f32 1.0, %v7464_v24 }
 0x195   :  { %v794_v27 = vadd.f32 1.0, %v7466_v26  ;;  %v7468_v38 = vpop.eup %7467 }
 0x196   :  { %7471 = vrcp.f32 %v788_v25  ;;  %v7470_v19 = vpop.eup %7469  ;;  %v801_v29 = vadd.f32 1.0, %v7468_v38 }
 0x197   :  { %7473 = vrcp.f32 %v794_v27 }
 0x198   :  { %7475 = vrcp.f32 %v801_v29  ;;  %v8926_v29 = vld [vmem:[#allocation4 + $0x40] ss:$16 sps:$4 sm:$0xff]  }
 0x1a0   :  { %v7472_v28 = vpop.eup %7471 }
 0x1a1   :  { %v7474_v62 = vpop.eup %7473  ;;  %v805_v1 = vmul.f32 %v7472_v28, %v7470_v19  ;;  %v8910_v19 = vld [vmem:[#allocation4 + $0x24] ss:$16 sps:$4 sm:$0xff]   ;;  %v8913_v28 = vld [vmem:[#allocation4 + $0x2c] ss:$16 sps:$4 sm:$0xff]  }
 0x1a2   :  { %v804_v39 = vmul.f32 0.0, %v7474_v62  ;;  %v7476_v5 = vpop.eup %7475  ;;  %v8920_v62 = vld [vmem:[#allocation4 + $0x44] ss:$16 sps:$4 sm:$0xff]  }
 0x1a4   :  { %v8843_v46 = vadd.f32 %v805_v1, %v804_v39  ;;  %v8923_v1 = vld [vmem:[#allocation4 + $0x4c] ss:$16 sps:$4 sm:$0xff]   ;;  %v8929_v39 = vld [vmem:[#allocation4 + $0x48] ss:$16 sps:$4 sm:$0xff]  }
 0x1a6   :  { %7477 = vtanh.f32 %v8843_v46 }
 0x1b0   :  { %v7478_v57 = vpop.eup %7477 }
 0x1b1   :  { %v8846_v16 = vmul.f32 %v7478_v57, %v7476_v5  ;;  %v8935_v5 = vld [vmem:[#allocation4 + $0x6c] ss:$16 sps:$4 sm:$0xff]   ;;  %v8938_v57 = vld [vmem:[#allocation4 + $0x60] ss:$16 sps:$4 sm:$0xff]  }
 0x1b3   :  { %11303 = vst [vmem:[#allocation41_spill] sm:$0xff] %v8846_v16  ;;  %v810_v17 = vpack.c.bf16 %v8846_v16, %v8846_v16 }
 0x1b5   :  { %844 = vmatmul.mubr.bf16.vlgmr.msra.gmra.mrb[20].mxu0 %v810_v17  ;;  %885 = vmatmul.mubr.bf16.vlgmr.msra.gmra.mrb[20].mxu1 %v810_v17  ;;  %v8941_v17 = vld [vmem:[#allocation4 + $0x68] ss:$16 sps:$4 sm:$0xff]  }
 0x1b6   :  { %924 = vmatpush1.bf16.msra.mxu0 %v8850_v44  ;;  %965 = vmatpush1.bf16.msra.mxu1 %v8853_v49 }
 0x1b7   :  { %925 = vmatprep.subr.bf16.mxu0 %v8582_v41  ;;  %966 = vmatprep.subr.bf16.mxu1 %v8584_v42  ;;  %v8890_v41 = vld [vmem:[#allocation4 + $0x4] ss:$16 sps:$4 sm:$0xff]   ;;  %v8893_v42 = vld [vmem:[#allocation4 + $0xc] ss:$16 sps:$4 sm:$0xff]  }
 0x1b8   :  { %955 = vmatprep.mubr.bf16.mxu0 %v11304_v18  ;;  %996 = vmatprep.mubr.bf16.mxu1 %v11304_v18 }
 0x1ba   :  { %926 = vmatpush1.bf16.msra.mxu0 %v8860_v21  ;;  %967 = vmatpush1.bf16.msra.mxu1 %v8863_v30 }
 0x1bb   :  { %927 = vmatprep.subr.bf16.mxu0 %v8600_v47  ;;  %968 = vmatprep.subr.bf16.mxu1 %v8604_v48 }
 0x1be   :  { %928 = vmatpush1.bf16.msra.mxu0 %v8610_v50  ;;  %969 = vmatpush1.bf16.msra.mxu1 %v8612_v51 }
 0x1bf   :  { %929 = vmatprep.subr.bf16.mxu0 %v8616_v52  ;;  %970 = vmatprep.subr.bf16.mxu1 %v8620_v53 }
 0x1c2   :  { %930 = vmatpush1.bf16.msra.mxu0 %v8622_v54  ;;  %971 = vmatpush1.bf16.msra.mxu1 %v8626_v55 }
 0x1c3   :  { %931 = vmatprep.subr.bf16.mxu0 %v8638_v58  ;;  %972 = vmatprep.subr.bf16.mxu1 %v8640_v59 }
 0x1c6   :  { %932 = vmatpush1.bf16.msra.mxu0 %v8644_v60  ;;  %973 = vmatpush1.bf16.msra.mxu1 %v8646_v61 }
 0x1c7   :  { %933 = vmatprep.subr.bf16.mxu0 %v8650_v63  ;;  %974 = vmatprep.subr.bf16.mxu1 %v8652_v0 }
 0x1ca   :  { %934 = vmatpush1.bf16.msra.mxu0 %v8658_v2  ;;  %975 = vmatpush1.bf16.msra.mxu1 %v8660_v3 }
 0x1cb   :  { %935 = vmatprep.subr.bf16.mxu0 %v8670_v6  ;;  %976 = vmatprep.subr.bf16.mxu1 %v8672_v7 }
 0x1ce   :  { %936 = vmatpush1.bf16.msra.mxu0 %v8680_v8  ;;  %977 = vmatpush1.bf16.msra.mxu1 %v8682_v9 }
 0x1cf   :  { %937 = vmatprep.subr.bf16.mxu0 %v8686_v11  ;;  %978 = vmatprep.subr.bf16.mxu1 %v8688_v12 }
 0x1d2   :  { %938 = vmatpush1.bf16.msra.mxu0 %v8694_v13  ;;  %979 = vmatpush1.bf16.msra.mxu1 %v8696_v14 }
 0x1d3   :  { %1035 = vmatprep.subr.bf16.mxu0 %v8890_v41  ;;  %1076 = vmatprep.subr.bf16.mxu1 %v8893_v42 }
 0x288   :  { %v845_v47 = vpop.f32.mrb[20].mxu0  ;;  %v886_v48 = vpop.f32.mrb[20].mxu1 }
 0x289   :  { %v893_v50 = vadd.f32 %v845_v47, %v8769_v32  ;;  %v895_v51 = vadd.f32 %v886_v48, %v8772_v34  ;;  %v847_v52 = vpop.f32.mrb[21].mxu0  ;;  %v888_v53 = vpop.f32.mrb[21].mxu1  ;;  %v8944_v47 = vld [vmem:[#allocation4 + $0x84] ss:$16 sps:$4 sm:$0xff]   ;;  %v8947_v48 = vld [vmem:[#allocation4 + $0x8c] ss:$16 sps:$4 sm:$0xff]  }
 0x28a   :  { %v894_v54 = vadd.f32 %v847_v52, %v8774_v36  ;;  %v896_v55 = vadd.f32 %v888_v53, %v8777_v37  ;;  %v849_v58 = vpop.f32.mrb[22].mxu0  ;;  %v890_v59 = vpop.f32.mrb[22].mxu1  ;;  %v8956_v52 = vld [vmem:[#allocation4 + $0xa4] ss:$16 sps:$4 sm:$0xff]   ;;  %v8959_v53 = vld [vmem:[#allocation4 + $0xac] ss:$16 sps:$4 sm:$0xff]  }
 0x28b   :  { %v6622_v60 = vmul.f32 -1.442695, %v893_v50  ;;  %v850_v61 = vpop.f32.mrb[23].mxu0  ;;  %v891_v63 = vpop.f32.mrb[23].mxu1  ;;  %v8950_v50 = vld [vmem:[#allocation4 + $0x80] ss:$16 sps:$4 sm:$0xff]  }
 0x28c   :  { %v6623_v0 = vmul.f32 -1.442695, %v894_v54  ;;  %v6624_v2 = vmul.f32 -1.442695, %v896_v55  ;;  %v8962_v54 = vld [vmem:[#allocation4 + $0xa0] ss:$16 sps:$4 sm:$0xff]  }
 0x28d   :  { %7479 = vpow2.f32 %v6622_v60  ;;  %v8965_v55 = vld [vmem:[#allocation4 + $0xa8] ss:$16 sps:$4 sm:$0xff]   ;;  %v8968_v58 = vld [vmem:[#allocation4 + $0xc4] ss:$16 sps:$4 sm:$0xff]   ;;  %v8971_v59 = vld [vmem:[#allocation4 + $0xcc] ss:$16 sps:$4 sm:$0xff]  }
 0x28e   :  { %7481 = vpow2.f32 %v6623_v0 }
 0x28f   :  { %7483 = vpow2.f32 %v6624_v2 }
 0x290   :  { %7485 = vtanh.f32 %v895_v51  ;;  %v8953_v51 = vld [vmem:[#allocation4 + $0x88] ss:$16 sps:$4 sm:$0xff]  }
 0x297   :  { %v7480_v3 = vpop.eup %7479 }
 0x298   :  { %v7482_v6 = vpop.eup %7481  ;;  %v900_v7 = vadd.f32 1.0, %v7480_v3 }
 0x299   :  { %v906_v32 = vadd.f32 1.0, %v7482_v6  ;;  %v7484_v34 = vpop.eup %7483 }
 0x29a   :  { %7487 = vrcp.f32 %v900_v7  ;;  %v7486_v36 = vpop.eup %7485  ;;  %v913_v23 = vadd.f32 1.0, %v7484_v34 }
 0x29b   :  { %7489 = vrcp.f32 %v906_v32 }
 0x29c   :  { %7491 = vrcp.f32 %v913_v23 }
 0x2a4   :  { %v7488_v37 = vpop.eup %7487 }
 0x2a5   :  { %v7490_v35 = vpop.eup %7489  ;;  %v917_v10 = vmul.f32 %v7488_v37, %v7486_v36 }
 0x2a6   :  { %v916_v22 = vmul.f32 %v7490_v35, %v8843_v46  ;;  %v7492_v26 = vpop.eup %7491  ;;  %v8932_v46 = vld [vmem:[#allocation4 + $0x64] ss:$16 sps:$4 sm:$0xff]  }
 0x2a8   :  { %v8901_v24 = vadd.f32 %v917_v10, %v916_v22 }
 0x2aa   :  { %7493 = vtanh.f32 %v8901_v24 }
 0x2b4   :  { %v7494_v25 = vpop.eup %7493 }
 0x2b5   :  { %v8904_v27 = vmul.f32 %v7494_v25, %v7492_v26 }
 0x2b7   :  { %11305 = vst [vmem:[#allocation42_spill] sm:$0xff] %v8904_v27  ;;  %v922_v38 = vpack.c.bf16 %v8904_v27, %v8904_v27 }
 0x2b9   :  { %956 = vmatmul.mubr.bf16.vlgmr.msra.gmra.mrb[24].mxu0 %v922_v38  ;;  %997 = vmatmul.mubr.bf16.vlgmr.msra.gmra.mrb[24].mxu1 %v922_v38 }
 0x2ba   :  { %1036 = vmatpush1.bf16.msra.mxu0 %v8850_v44  ;;  %1077 = vmatpush1.bf16.msra.mxu1 %v8853_v49 }
 0x2bb   :  { %1037 = vmatprep.subr.bf16.mxu0 %v8910_v19  ;;  %1078 = vmatprep.subr.bf16.mxu1 %v8913_v28 }
 0x2bc   :  { %1067 = vmatprep.mubr.bf16.mxu0 %v11304_v18  ;;  %1108 = vmatprep.mubr.bf16.mxu1 %v11304_v18 }
 0x2be   :  { %1038 = vmatpush1.bf16.msra.mxu0 %v8860_v21  ;;  %1079 = vmatpush1.bf16.msra.mxu1 %v8863_v30 }
 0x2bf   :  { %1039 = vmatprep.subr.bf16.mxu0 %v8920_v62  ;;  %1080 = vmatprep.subr.bf16.mxu1 %v8923_v1 }
 0x2c2   :  { %1040 = vmatpush1.bf16.msra.mxu0 %v8926_v29  ;;  %1081 = vmatpush1.bf16.msra.mxu1 %v8929_v39 }
 0x2c3   :  { %1041 = vmatprep.subr.bf16.mxu0 %v8932_v46  ;;  %1082 = vmatprep.subr.bf16.mxu1 %v8935_v5 }
 0x2c6   :  { %1042 = vmatpush1.bf16.msra.mxu0 %v8938_v57  ;;  %1083 = vmatpush1.bf16.msra.mxu1 %v8941_v17 }
 0x2c7   :  { %1043 = vmatprep.subr.bf16.mxu0 %v8944_v47  ;;  %1084 = vmatprep.subr.bf16.mxu1 %v8947_v48 }
 0x2ca   :  { %1044 = vmatpush1.bf16.msra.mxu0 %v8950_v50  ;;  %1085 = vmatpush1.bf16.msra.mxu1 %v8953_v51 }
 0x2cb   :  { %1045 = vmatprep.subr.bf16.mxu0 %v8956_v52  ;;  %1086 = vmatprep.subr.bf16.mxu1 %v8959_v53 }
 0x2ce   :  { %1046 = vmatpush1.bf16.msra.mxu0 %v8962_v54  ;;  %1087 = vmatpush1.bf16.msra.mxu1 %v8965_v55 }
 0x2cf   :  { %1047 = vmatprep.subr.bf16.mxu0 %v8968_v58  ;;  %1088 = vmatprep.subr.bf16.mxu1 %v8971_v59 }
 0x2d2   :  { %1048 = vmatpush1.bf16.msra.mxu0 %v8680_v8  ;;  %1089 = vmatpush1.bf16.msra.mxu1 %v8682_v9 }
 0x2d3   :  { %1049 = vmatprep.subr.bf16.mxu0 %v8686_v11  ;;  %1090 = vmatprep.subr.bf16.mxu1 %v8688_v12 }
 0x2d6   :  { %1050 = vmatpush1.bf16.msra.mxu0 %v8694_v13  ;;  %1091 = vmatpush1.bf16.msra.mxu1 %v8696_v14 }
 0x2d7   :  { %1147 = vmatprep.subr.bf16.mxu0 %v8890_v41  ;;  %1188 = vmatprep.subr.bf16.mxu1 %v8893_v42 }
 0x38c   :  { %v957_v60 = vpop.f32.mrb[24].mxu0  ;;  %v998_v61 = vpop.f32.mrb[24].mxu1 }
 0x38d   :  { %v1005_v63 = vadd.f32 %v957_v60, %v8779_v43  ;;  %v1007_v8 = vadd.f32 %v998_v61, %v8782_v45  ;;  %v959_v0 = vpop.f32.mrb[25].mxu0  ;;  %v1000_v9 = vpop.f32.mrb[25].mxu1 }
 0x38e   :  { %v1006_v11 = vadd.f32 %v959_v0, %v8784_v56  ;;  %v1008_v12 = vadd.f32 %v1000_v9, %v8787_v4  ;;  %v961_v2 = vpop.f32.mrb[26].mxu0  ;;  %v1002_v13 = vpop.f32.mrb[26].mxu1  ;;  %v9029_v0 = vld [vmem:[#allocation4 + $0xec] ss:$16 sps:$4 sm:$0xff]   ;;  %v9032_v9 = vld [vmem:[#allocation4 + $0xe0] ss:$16 sps:$4 sm:$0xff]  }
 0x38f   :  { %v6625_v3 = vmul.f32 -1.442695, %v1005_v63  ;;  %v962_v14 = vpop.f32.mrb[27].mxu0  ;;  %v1003_v6 = vpop.f32.mrb[27].mxu1  ;;  %v9023_v63 = vld [vmem:[#allocation4 + $0xc8] ss:$16 sps:$4 sm:$0xff]  }
 0x390   :  { %v6626_v7 = vmul.f32 -1.442695, %v1006_v11  ;;  %v6627_v32 = vmul.f32 -1.442695, %v1008_v12  ;;  %v9035_v11 = vld [vmem:[#allocation4 + $0xe8] ss:$16 sps:$4 sm:$0xff]  }
 0x391   :  { %7495 = vpow2.f32 %v6625_v3 }
 0x392   :  { %7497 = vpow2.f32 %v6626_v7 }
 0x393   :  { %7499 = vpow2.f32 %v6627_v32 }
 0x394   :  { %7501 = vtanh.f32 %v1007_v8  ;;  %v9026_v8 = vld [vmem:[#allocation4 + $0xe4] ss:$16 sps:$4 sm:$0xff]  }
 0x39b   :  { %v7496_v34 = vpop.eup %7495 }
 0x39c   :  { %v7498_v36 = vpop.eup %7497  ;;  %v1012_v43 = vadd.f32 1.0, %v7496_v34 }
 0x39d   :  { %v1018_v45 = vadd.f32 1.0, %v7498_v36  ;;  %v7500_v56 = vpop.eup %7499 }
 0x39e   :  { %7503 = vrcp.f32 %v1012_v43  ;;  %v7502_v37 = vpop.eup %7501  ;;  %v1025_v23 = vadd.f32 1.0, %v7500_v56 }
 0x39f   :  { %7505 = vrcp.f32 %v1018_v45 }
 0x3a0   :  { %7507 = vrcp.f32 %v1025_v23 }
 0x3a8   :  { %v7504_v4 = vpop.eup %7503 }
 0x3a9   :  { %v7506_v35 = vpop.eup %7505  ;;  %v1029_v10 = vmul.f32 %v7504_v4, %v7502_v37 }
 0x3aa   :  { %v1028_v22 = vmul.f32 %v7506_v35, %v8901_v24  ;;  %v7508_v25 = vpop.eup %7507  ;;  %v9020_v24 = vld [vmem:[#allocation4 + $0xc0] ss:$16 sps:$4 sm:$0xff]  }
 0x3ac   :  { %v8987_v26 = vadd.f32 %v1029_v10, %v1028_v22 }
 0x3ae   :  { %7509 = vtanh.f32 %v8987_v26 }
 0x3b8   :  { %v7510_v38 = vpop.eup %7509 }
 0x3b9   :  { %v8990_v60 = vmul.f32 %v7510_v38, %v7508_v25 }
 0x3bb   :  { %11306 = vst [vmem:[#allocation43_spill] sm:$0xff] %v8990_v60  ;;  %v1034_v61 = vpack.c.bf16 %v8990_v60, %v8990_v60 }
 0x3bd   :  { %1068 = vmatmul.mubr.bf16.vlgmr.msra.gmra.mrb[28].mxu0 %v1034_v61  ;;  %1109 = vmatmul.mubr.bf16.vlgmr.msra.gmra.mrb[28].mxu1 %v1034_v61 }
 0x3be   :  { %1148 = vmatpush1.bf16.msra.mxu0 %v8850_v44  ;;  %1189 = vmatpush1.bf16.msra.mxu1 %v8853_v49 }
 0x3bf   :  { %1149 = vmatprep.subr.bf16.mxu0 %v8910_v19  ;;  %1190 = vmatprep.subr.bf16.mxu1 %v8913_v28 }
 0x3c0   :  { %1179 = vmatprep.mubr.bf16.mxu0 %v11304_v18  ;;  %1220 = vmatprep.mubr.bf16.mxu1 %v11304_v18 }
 0x3c2   :  { %1150 = vmatpush1.bf16.msra.mxu0 %v8860_v21  ;;  %1191 = vmatpush1.bf16.msra.mxu1 %v8863_v30 }
 0x3c3   :  { %1151 = vmatprep.subr.bf16.mxu0 %v8920_v62  ;;  %1192 = vmatprep.subr.bf16.mxu1 %v8923_v1 }
 0x3c6   :  { %1152 = vmatpush1.bf16.msra.mxu0 %v8926_v29  ;;  %1193 = vmatpush1.bf16.msra.mxu1 %v8929_v39 }
 0x3c7   :  { %1153 = vmatprep.subr.bf16.mxu0 %v8932_v46  ;;  %1194 = vmatprep.subr.bf16.mxu1 %v8935_v5 }
 0x3ca   :  { %1154 = vmatpush1.bf16.msra.mxu0 %v8938_v57  ;;  %1195 = vmatpush1.bf16.msra.mxu1 %v8941_v17 }
 0x3cb   :  { %1155 = vmatprep.subr.bf16.mxu0 %v8944_v47  ;;  %1196 = vmatprep.subr.bf16.mxu1 %v8947_v48 }
 0x3ce   :  { %1156 = vmatpush1.bf16.msra.mxu0 %v8950_v50  ;;  %1197 = vmatpush1.bf16.msra.mxu1 %v8953_v51 }
 0x3cf   :  { %1157 = vmatprep.subr.bf16.mxu0 %v8956_v52  ;;  %1198 = vmatprep.subr.bf16.mxu1 %v8959_v53 }
 0x3d2   :  { %1158 = vmatpush1.bf16.msra.mxu0 %v8962_v54  ;;  %1199 = vmatpush1.bf16.msra.mxu1 %v8965_v55 }
 0x3d3   :  { %1159 = vmatprep.subr.bf16.mxu0 %v8968_v58  ;;  %1200 = vmatprep.subr.bf16.mxu1 %v8971_v59 }
 0x3d6   :  { %1160 = vmatpush1.bf16.msra.mxu0 %v9020_v24  ;;  %1201 = vmatpush1.bf16.msra.mxu1 %v9023_v63 }
 0x3d7   :  { %1161 = vmatprep.subr.bf16.mxu0 %v9026_v8  ;;  %1202 = vmatprep.subr.bf16.mxu1 %v9029_v0 }
 0x3da   :  { %1162 = vmatpush1.bf16.msra.mxu0 %v9032_v9  ;;  %1203 = vmatpush1.bf16.msra.mxu1 %v9035_v11 }
 0x3db   :  { %1259 = vmatprep.subr.bf16.mxu0 %v8890_v41  ;;  %1300 = vmatprep.subr.bf16.mxu1 %v8893_v42 }
 0x490   :  { %v1069_v12 = vpop.f32.mrb[28].mxu0  ;;  %v1110_v2 = vpop.f32.mrb[28].mxu1 }
 0x491   :  { %v1117_v13 = vadd.f32 %v1069_v12, %v8789_v15  ;;  %v1119_v3 = vadd.f32 %v1110_v2, %v8792_v20  ;;  %v1071_v14 = vpop.f32.mrb[29].mxu0  ;;  %v1112_v6 = vpop.f32.mrb[29].mxu1 }
 0x492   :  { %v1118_v7 = vadd.f32 %v1071_v14, %v8794_v31  ;;  %v1120_v32 = vadd.f32 %v1112_v6, %v8797_v33  ;;  %v1073_v34 = vpop.f32.mrb[30].mxu0  ;;  %v1114_v36 = vpop.f32.mrb[30].mxu1 }
 0x493   :  { %v6628_v43 = vmul.f32 -1.442695, %v1117_v13  ;;  %v1074_v45 = vpop.f32.mrb[31].mxu0  ;;  %v1115_v56 = vpop.f32.mrb[31].mxu1 }
 0x494   :  { %v6629_v37 = vmul.f32 -1.442695, %v1118_v7  ;;  %v6630_v4 = vmul.f32 -1.442695, %v1120_v32  ;;  %v11308_v32 = vld [vmem:[#allocation26_spill] sm:$0xff]  ;;  %v11309_v45 = vld [vmem:[#allocation27_spill] sm:$0xff] }
 0x495   :  { %7511 = vpow2.f32 %v6628_v43 }
 0x496   :  { %7513 = vpow2.f32 %v6629_v37  ;;  %v11310_v37 = vld [vmem:[#allocation28_spill] sm:$0xff] }
 0x497   :  { %7515 = vpow2.f32 %v6630_v4 }
 0x498   :  { %7517 = vtanh.f32 %v1119_v3 }
 0x49f   :  { %v7512_v35 = vpop.eup %7511 }
 0x4a0   :  { %v7514_v10 = vpop.eup %7513  ;;  %v1124_v15 = vadd.f32 1.0, %v7512_v35 }
 0x4a1   :  { %v1130_v20 = vadd.f32 1.0, %v7514_v10  ;;  %v7516_v31 = vpop.eup %7515 }
 0x4a2   :  { %7519 = vrcp.f32 %v1124_v15  ;;  %v7518_v23 = vpop.eup %7517  ;;  %v1137_v38 = vadd.f32 1.0, %v7516_v31 }
 0x4a3   :  { %7521 = vrcp.f32 %v1130_v20 }
 0x4a4   :  { %7523 = vrcp.f32 %v1137_v38 }
 0x4ac   :  { %v7520_v33 = vpop.eup %7519 }
 0x4ad   :  { %v7522_v22 = vpop.eup %7521  ;;  %v1141_v25 = vmul.f32 %v7520_v33, %v7518_v23 }
 0x4ae   :  { %v1140_v61 = vmul.f32 %v7522_v22, %v8987_v26  ;;  %v7524_v2 = vpop.eup %7523 }
 0x4b0   :  { %v9045_v12 = vadd.f32 %v1141_v25, %v1140_v61 }
 0x4b2   :  { %7525 = vtanh.f32 %v9045_v12 }
 0x4bc   :  { %v7526_v13 = vpop.eup %7525 }
 0x4bd   :  { %v9048_v14 = vmul.f32 %v7526_v13, %v7524_v2 }
 0x4bf   :  { %11307 = vst [vmem:[#allocation44_spill] sm:$0xff] %v9048_v14  ;;  %v1146_v3 = vpack.c.bf16 %v9048_v14, %v9048_v14 }
 0x4c1   :  { %1180 = vmatmul.mubr.bf16.vlgmr.msra.gmra.mrb[32].mxu0 %v1146_v3  ;;  %1221 = vmatmul.mubr.bf16.vlgmr.msra.gmra.mrb[32].mxu1 %v1146_v3 }
 0x4c2   :  { %1260 = vmatpush1.bf16.msra.mxu0 %v8850_v44  ;;  %1301 = vmatpush1.bf16.msra.mxu1 %v8853_v49 }
 0x4c3   :  { %1261 = vmatprep.subr.bf16.mxu0 %v8910_v19  ;;  %1302 = vmatprep.subr.bf16.mxu1 %v8913_v28 }
 0x4c4   :  { %1291 = vmatprep.mubr.bf16.mxu0 %v11304_v18  ;;  %1332 = vmatprep.mubr.bf16.mxu1 %v11304_v18 }
 0x4c6   :  { %1262 = vmatpush1.bf16.msra.mxu0 %v8860_v21  ;;  %1303 = vmatpush1.bf16.msra.mxu1 %v8863_v30 }
 0x4c7   :  { %1263 = vmatprep.subr.bf16.mxu0 %v8920_v62  ;;  %1304 = vmatprep.subr.bf16.mxu1 %v8923_v1 }
 0x4ca   :  { %1264 = vmatpush1.bf16.msra.mxu0 %v8926_v29  ;;  %1305 = vmatpush1.bf16.msra.mxu1 %v8929_v39 }
 0x4cb   :  { %1265 = vmatprep.subr.bf16.mxu0 %v8932_v46  ;;  %1306 = vmatprep.subr.bf16.mxu1 %v8935_v5 }
 0x4ce   :  { %1266 = vmatpush1.bf16.msra.mxu0 %v8938_v57  ;;  %1307 = vmatpush1.bf16.msra.mxu1 %v8941_v17 }
 0x4cf   :  { %1267 = vmatprep.subr.bf16.mxu0 %v8944_v47  ;;  %1308 = vmatprep.subr.bf16.mxu1 %v8947_v48 }
 0x4d2   :  { %1268 = vmatpush1.bf16.msra.mxu0 %v8950_v50  ;;  %1309 = vmatpush1.bf16.msra.mxu1 %v8953_v51 }
 0x4d3   :  { %1269 = vmatprep.subr.bf16.mxu0 %v8956_v52  ;;  %1310 = vmatprep.subr.bf16.mxu1 %v8959_v53 }
 0x4d6   :  { %1270 = vmatpush1.bf16.msra.mxu0 %v8962_v54  ;;  %1311 = vmatpush1.bf16.msra.mxu1 %v8965_v55 }
 0x4d7   :  { %1271 = vmatprep.subr.bf16.mxu0 %v8968_v58  ;;  %1312 = vmatprep.subr.bf16.mxu1 %v8971_v59 }
 0x4da   :  { %1272 = vmatpush1.bf16.msra.mxu0 %v9020_v24  ;;  %1313 = vmatpush1.bf16.msra.mxu1 %v9023_v63 }
 0x4db   :  { %1273 = vmatprep.subr.bf16.mxu0 %v9026_v8  ;;  %1314 = vmatprep.subr.bf16.mxu1 %v9029_v0 }
 0x4de   :  { %1274 = vmatpush1.bf16.msra.mxu0 %v9032_v9  ;;  %1315 = vmatpush1.bf16.msra.mxu1 %v9035_v11 }
 0x4df   :  { %1371 = vmatprep.subr.bf16.mxu0 %v8890_v41  ;;  %1412 = vmatprep.subr.bf16.mxu1 %v8893_v42 }
 0x594   :  { %v1181_v26 = vpop.f32.mrb[32].mxu0  ;;  %v1222_v6 = vpop.f32.mrb[32].mxu1 }
 0x595   :  { %v1229_v7 = vadd.f32 %v1181_v26, %v8799_v40  ;;  %v1231_v34 = vadd.f32 %v1222_v6, %v11308_v32  ;;  %v1183_v36 = vpop.f32.mrb[33].mxu0  ;;  %v1224_v43 = vpop.f32.mrb[33].mxu1 }
 0x596   :  { %v1230_v56 = vadd.f32 %v1183_v36, %v11309_v45  ;;  %v1232_v4 = vadd.f32 %v1224_v43, %v11310_v37  ;;  %v1185_v35 = vpop.f32.mrb[34].mxu0  ;;  %v1226_v10 = vpop.f32.mrb[34].mxu1  ;;  %v11312_v37 = vld [vmem:[#allocation29_spill] sm:$0xff] }
 0x597   :  { %v6631_v15 = vmul.f32 -1.442695, %v1229_v7  ;;  %v1186_v20 = vpop.f32.mrb[35].mxu0  ;;  %v1227_v31 = vpop.f32.mrb[35].mxu1  ;;  %v11313_v35 = vld [vmem:[#allocation30_spill] sm:$0xff] }
 0x598   :  { %v6632_v23 = vmul.f32 -1.442695, %v1230_v56  ;;  %v6633_v33 = vmul.f32 -1.442695, %v1232_v4  ;;  %v11314_v31 = vld [vmem:[#allocation31_spill] sm:$0xff] }
 0x599   :  { %7527 = vpow2.f32 %v6631_v15 }
 0x59a   :  { %7529 = vpow2.f32 %v6632_v23 }
 0x59b   :  { %7531 = vpow2.f32 %v6633_v33  ;;  %v11315_v33 = vld [vmem:[#allocation32_spill] sm:$0xff] }
 0x59c   :  { %7533 = vtanh.f32 %v1231_v34 }
 0x5a3   :  { %v7528_v22 = vpop.eup %7527 }
 0x5a4   :  { %v7530_v25 = vpop.eup %7529  ;;  %v1236_v40 = vadd.f32 1.0, %v7528_v22 }
 0x5a5   :  { %v1242_v38 = vadd.f32 1.0, %v7530_v25  ;;  %v7532_v61 = vpop.eup %7531 }
 0x5a6   :  { %7535 = vrcp.f32 %v1236_v40  ;;  %v7534_v2 = vpop.eup %7533  ;;  %v1249_v6 = vadd.f32 1.0, %v7532_v61 }
 0x5a7   :  { %7537 = vrcp.f32 %v1242_v38 }
 0x5a8   :  { %7539 = vrcp.f32 %v1249_v6 }
 0x5b0   :  { %v7536_v13 = vpop.eup %7535 }
 0x5b1   :  { %v7538_v3 = vpop.eup %7537  ;;  %v1253_v26 = vmul.f32 %v7536_v13, %v7534_v2 }
 0x5b2   :  { %v1252_v7 = vmul.f32 %v7538_v3, %v9045_v12  ;;  %v7540_v36 = vpop.eup %7539 }
 0x5b4   :  { %v9091_v32 = vadd.f32 %v1253_v26, %v1252_v7 }
 0x5b6   :  { %7541 = vtanh.f32 %v9091_v32 }
 0x5c0   :  { %v7542_v43 = vpop.eup %7541 }
 0x5c1   :  { %v9094_v45 = vmul.f32 %v7542_v43, %v7540_v36 }
 0x5c3   :  { %11311 = vst [vmem:[#allocation26_spill] sm:$0xff] %v9094_v45  ;;  %v1258_v34 = vpack.c.bf16 %v9094_v45, %v9094_v45 }
 0x5c5   :  { %1292 = vmatmul.mubr.bf16.vlgmr.msra.gmra.mrb[36].mxu0 %v1258_v34  ;;  %1333 = vmatmul.mubr.bf16.vlgmr.msra.gmra.mrb[36].mxu1 %v1258_v34 }
 0x5c6   :  { %1372 = vmatpush1.bf16.msra.mxu0 %v8850_v44  ;;  %1413 = vmatpush1.bf16.msra.mxu1 %v8853_v49 }
 0x5c7   :  { %1373 = vmatprep.subr.bf16.mxu0 %v8910_v19  ;;  %1414 = vmatprep.subr.bf16.mxu1 %v8913_v28 }
 0x5c8   :  { %1403 = vmatprep.mubr.bf16.mxu0 %v11304_v18  ;;  %1444 = vmatprep.mubr.bf16.mxu1 %v11304_v18 }
 0x5ca   :  { %1374 = vmatpush1.bf16.msra.mxu0 %v8860_v21  ;;  %1415 = vmatpush1.bf16.msra.mxu1 %v8863_v30 }
 0x5cb   :  { %1375 = vmatprep.subr.bf16.mxu0 %v8920_v62  ;;  %1416 = vmatprep.subr.bf16.mxu1 %v8923_v1 }
 0x5ce   :  { %1376 = vmatpush1.bf16.msra.mxu0 %v8926_v29  ;;  %1417 = vmatpush1.bf16.msra.mxu1 %v8929_v39 }
 0x5cf   :  { %1377 = vmatprep.subr.bf16.mxu0 %v8932_v46  ;;  %1418 = vmatprep.subr.bf16.mxu1 %v8935_v5 }
 0x5d2   :  { %1378 = vmatpush1.bf16.msra.mxu0 %v8938_v57  ;;  %1419 = vmatpush1.bf16.msra.mxu1 %v8941_v17 }
 0x5d3   :  { %1379 = vmatprep.subr.bf16.mxu0 %v8944_v47  ;;  %1420 = vmatprep.subr.bf16.mxu1 %v8947_v48 }
 0x5d6   :  { %1380 = vmatpush1.bf16.msra.mxu0 %v8950_v50  ;;  %1421 = vmatpush1.bf16.msra.mxu1 %v8953_v51 }
 0x5d7   :  { %1381 = vmatprep.subr.bf16.mxu0 %v8956_v52  ;;  %1422 = vmatprep.subr.bf16.mxu1 %v8959_v53 }
 0x5da   :  { %1382 = vmatpush1.bf16.msra.mxu0 %v8962_v54  ;;  %1423 = vmatpush1.bf16.msra.mxu1 %v8965_v55 }
 0x5db   :  { %1383 = vmatprep.subr.bf16.mxu0 %v8968_v58  ;;  %1424 = vmatprep.subr.bf16.mxu1 %v8971_v59 }
 0x5de   :  { %1384 = vmatpush1.bf16.msra.mxu0 %v9020_v24  ;;  %1425 = vmatpush1.bf16.msra.mxu1 %v9023_v63 }
 0x5df   :  { %1385 = vmatprep.subr.bf16.mxu0 %v9026_v8  ;;  %1426 = vmatprep.subr.bf16.mxu1 %v9029_v0 }
 0x5e2   :  { %1386 = vmatpush1.bf16.msra.mxu0 %v9032_v9  ;;  %1427 = vmatpush1.bf16.msra.mxu1 %v9035_v11 }
 0x5e3   :  { %1483 = vmatprep.subr.bf16.mxu0 %v8890_v41  ;;  %1524 = vmatprep.subr.bf16.mxu1 %v8893_v42 }
 0x698   :  { %v1293_v12 = vpop.f32.mrb[36].mxu0  ;;  %v1334_v56 = vpop.f32.mrb[36].mxu1 }
 0x699   :  { %v1341_v4 = vadd.f32 %v1293_v12, %v11312_v37  ;;  %v1343_v10 = vadd.f32 %v1334_v56, %v11313_v35  ;;  %v1295_v15 = vpop.f32.mrb[37].mxu0  ;;  %v1336_v20 = vpop.f32.mrb[37].mxu1 }
 0x69a   :  { %v1342_v23 = vadd.f32 %v1295_v15, %v11314_v31  ;;  %v1344_v22 = vadd.f32 %v1336_v20, %v11315_v33  ;;  %v1297_v25 = vpop.f32.mrb[38].mxu0  ;;  %v1338_v40 = vpop.f32.mrb[38].mxu1 }
 0x69b   :  { %v6634_v38 = vmul.f32 -1.442695, %v1341_v4  ;;  %v1298_v61 = vpop.f32.mrb[39].mxu0  ;;  %v1339_v2 = vpop.f32.mrb[39].mxu1  ;;  %v7079_v40 = vld [vmem:[#allocation6] ss:$16 sps:$4 sm:$0xff]  }
 0x69c   :  { %v6635_v41 = vmul.f32 -1.442695, %v1342_v23  ;;  %v6636_v42 = vmul.f32 -1.442695, %v1344_v22  ;;  %v7084_v2 = vld [vmem:[#allocation6 + $0x24] ss:$16 sps:$4 sm:$0xff]  }
 0x69d   :  { %7543 = vpow2.f32 %v6634_v38  ;;  %v7088_v38 = vld [vmem:[#allocation6 + $0x8] ss:$16 sps:$4 sm:$0xff]  }
 0x69e   :  { %7545 = vpow2.f32 %v6635_v41  ;;  %v7096_v41 = vld [vmem:[#allocation6 + $0x2c] ss:$16 sps:$4 sm:$0xff]  }
 0x69f   :  { %7547 = vpow2.f32 %v6636_v42  ;;  %v7082_v42 = vld [vmem:[#allocation6 + $0x20] ss:$16 sps:$4 sm:$0xff]  }
 0x6a0   :  { %7549 = vtanh.f32 %v1343_v10 }
 0x6a7   :  { %v7544_v13 = vpop.eup %7543 }
 0x6a8   :  { %v7546_v3 = vpop.eup %7545  ;;  %v1348_v26 = vadd.f32 1.0, %v7544_v13  ;;  %v7094_v13 = vld [vmem:[#allocation6 + $0x28] ss:$16 sps:$4 sm:$0xff]  }
 0x6a9   :  { %v1354_v6 = vadd.f32 1.0, %v7546_v3  ;;  %v7548_v7 = vpop.eup %7547  ;;  %v7087_v3 = vld [vmem:[#allocation6 + $0x44] ss:$16 sps:$4 sm:$0xff]  }
 0x6aa   :  { %7551 = vrcp.f32 %v1348_v26  ;;  %v7550_v36 = vpop.eup %7549  ;;  %v1361_v56 = vadd.f32 1.0, %v7548_v7  ;;  %v7102_v26 = vld [vmem:[#allocation6 + $0x4c] ss:$16 sps:$4 sm:$0xff]   ;;  %v7100_v7 = vld [vmem:[#allocation6 + $0x48] ss:$16 sps:$4 sm:$0xff]  }
 0x6ab   :  { %7553 = vrcp.f32 %v1354_v6  ;;  %v7085_v6 = vld [vmem:[#allocation6 + $0x40] ss:$16 sps:$4 sm:$0xff]  }
 0x6ac   :  { %7555 = vrcp.f32 %v1361_v56  ;;  %v7099_v56 = vld [vmem:[#allocation6 + $0x84] ss:$16 sps:$4 sm:$0xff]  }
 0x6b4   :  { %v7552_v43 = vpop.eup %7551 }
 0x6b5   :  { %v7554_v34 = vpop.eup %7553  ;;  %v1365_v12 = vmul.f32 %v7552_v43, %v7550_v36  ;;  %v7093_v36 = vld [vmem:[#allocation6 + $0x64] ss:$16 sps:$4 sm:$0xff]   ;;  %v7108_v43 = vld [vmem:[#allocation6 + $0x6c] ss:$16 sps:$4 sm:$0xff]  }
 0x6b6   :  { %v1364_v37 = vmul.f32 %v7554_v34, %v9091_v32  ;;  %v7556_v35 = vpop.eup %7555  ;;  %v7091_v34 = vld [vmem:[#allocation6 + $0x60] ss:$16 sps:$4 sm:$0xff]  }
 0x6b8   :  { %v9137_v4 = vadd.f32 %v1365_v12, %v1364_v37  ;;  %v7106_v12 = vld [vmem:[#allocation6 + $0x68] ss:$16 sps:$4 sm:$0xff]   ;;  %v7114_v37 = vld [vmem:[#allocation6 + $0x8c] ss:$16 sps:$4 sm:$0xff]  }
 0x6ba   :  { %7557 = vtanh.f32 %v9137_v4 }
 0x6c4   :  { %v7558_v15 = vpop.eup %7557 }
 0x6c5   :  { %v9140_v20 = vmul.f32 %v7558_v15, %v7556_v35  ;;  %v7112_v35 = vld [vmem:[#allocation6 + $0x88] ss:$16 sps:$4 sm:$0xff]   ;;  %v7105_v15 = vld [vmem:[#allocation6 + $0xa4] ss:$16 sps:$4 sm:$0xff]  }
 0x6c7   :  { %11316 = vst [vmem:[#allocation27_spill] sm:$0xff] %v9140_v20  ;;  %v1370_v10 = vpack.c.bf16 %v9140_v20, %v9140_v20 }
 0x6c9   :  { %1404 = vmatmul.mubr.bf16.vlgmr.msra.gmra.mrb[40].mxu0 %v1370_v10  ;;  %1445 = vmatmul.mubr.bf16.vlgmr.msra.gmra.mrb[40].mxu1 %v1370_v10  ;;  %v7120_v10 = vld [vmem:[#allocation6 + $0xac] ss:$16 sps:$4 sm:$0xff]  }
 0x6ca   :  { %1484 = vmatpush1.bf16.msra.mxu0 %v8850_v44  ;;  %1525 = vmatpush1.bf16.msra.mxu1 %v8853_v49  ;;  %v7081_v44 = vld [vmem:[#allocation6 + $0x4] ss:$16 sps:$4 sm:$0xff]   ;;  %v7090_v49 = vld [vmem:[#allocation6 + $0xc] ss:$16 sps:$4 sm:$0xff]  }
 0x6cb   :  { %1485 = vmatprep.subr.bf16.mxu0 %v8910_v19  ;;  %1526 = vmatprep.subr.bf16.mxu1 %v8913_v28  ;;  %v11317_v19 = vld [vmem:[#allocation33_spill] sm:$0xff] }
 0x6cc   :  { %1515 = vmatprep.mubr.bf16.mxu0 %v11304_v18  ;;  %1556 = vmatprep.mubr.bf16.mxu1 %v11304_v18 }
 0x6ce   :  { %1486 = vmatpush1.bf16.msra.mxu0 %v8860_v21  ;;  %1527 = vmatpush1.bf16.msra.mxu1 %v8863_v30 }
 0x6cf   :  { %1487 = vmatprep.subr.bf16.mxu0 %v8920_v62  ;;  %1528 = vmatprep.subr.bf16.mxu1 %v8923_v1  ;;  %v11318_v62 = vld [vmem:[#allocation34_spill] sm:$0xff] }
 0x6d2   :  { %1488 = vmatpush1.bf16.msra.mxu0 %v8926_v29  ;;  %1529 = vmatpush1.bf16.msra.mxu1 %v8929_v39 }
 0x6d3   :  { %1489 = vmatprep.subr.bf16.mxu0 %v8932_v46  ;;  %1530 = vmatprep.subr.bf16.mxu1 %v8935_v5  ;;  %v11319_v46 = vld [vmem:[#allocation35_spill] sm:$0xff] }
 0x6d6   :  { %1490 = vmatpush1.bf16.msra.mxu0 %v8938_v57  ;;  %1531 = vmatpush1.bf16.msra.mxu1 %v8941_v17  ;;  %v11320_v57 = vld [vmem:[#allocation36_spill] sm:$0xff] }
 0x6d7   :  { %1491 = vmatprep.subr.bf16.mxu0 %v8944_v47  ;;  %1532 = vmatprep.subr.bf16.mxu1 %v8947_v48 }
 0x6da   :  { %1492 = vmatpush1.bf16.msra.mxu0 %v8950_v50  ;;  %1533 = vmatpush1.bf16.msra.mxu1 %v8953_v51 }
 0x6db   :  { %1493 = vmatprep.subr.bf16.mxu0 %v8956_v52  ;;  %1534 = vmatprep.subr.bf16.mxu1 %v8959_v53 }
 0x6de   :  { %1494 = vmatpush1.bf16.msra.mxu0 %v8962_v54  ;;  %1535 = vmatpush1.bf16.msra.mxu1 %v8965_v55 }
 0x6df   :  { %1495 = vmatprep.subr.bf16.mxu0 %v8968_v58  ;;  %1536 = vmatprep.subr.bf16.mxu1 %v8971_v59 }
 0x6e2   :  { %1496 = vmatpush1.bf16.msra.mxu0 %v9020_v24  ;;  %1537 = vmatpush1.bf16.msra.mxu1 %v9023_v63 }
 0x6e3   :  { %1497 = vmatprep.subr.bf16.mxu0 %v9026_v8  ;;  %1538 = vmatprep.subr.bf16.mxu1 %v9029_v0 }
 0x6e6   :  { %1498 = vmatpush1.bf16.msra.mxu0 %v9032_v9  ;;  %1539 = vmatpush1.bf16.msra.mxu1 %v9035_v11 }
 0x6e7   :  { %1808 = vmatprep.subr.bf16.mxu0 %v7081_v44  ;;  %1881 = vmatprep.subr.bf16.mxu1 %v7090_v49  ;;  %v7103_v44 = vld [vmem:[#allocation6 + $0xa0] ss:$16 sps:$4 sm:$0xff]   ;;  %v7118_v49 = vld [vmem:[#allocation6 + $0xa8] ss:$16 sps:$4 sm:$0xff]  }
 0x79c   :  { %v1405_v21 = vpop.f32.mrb[40].mxu0  ;;  %v1446_v30 = vpop.f32.mrb[40].mxu1 }
 0x79d   :  { %v1453_v28 = vadd.f32 %v1405_v21, %v11317_v19  ;;  %v1455_v1 = vadd.f32 %v1446_v30, %v11318_v62  ;;  %v1407_v29 = vpop.f32.mrb[41].mxu0  ;;  %v1448_v39 = vpop.f32.mrb[41].mxu1  ;;  %v7111_v21 = vld [vmem:[#allocation6 + $0xc4] ss:$16 sps:$4 sm:$0xff]   ;;  %v7123_v30 = vld [vmem:[#allocation6 + $0xcc] ss:$16 sps:$4 sm:$0xff]  }
 0x79e   :  { %v1454_v5 = vadd.f32 %v1407_v29, %v11319_v46  ;;  %v1456_v17 = vadd.f32 %v1448_v39, %v11320_v57  ;;  %v1409_v47 = vpop.f32.mrb[42].mxu0  ;;  %v1450_v48 = vpop.f32.mrb[42].mxu1  ;;  %v7109_v19 = vld [vmem:[#allocation6 + $0xc0] ss:$16 sps:$4 sm:$0xff]   ;;  %v7117_v62 = vld [vmem:[#allocation6 + $0xe4] ss:$16 sps:$4 sm:$0xff]  }
 0x79f   :  { %v6637_v50 = vmul.f32 -1.442695, %v1453_v28  ;;  %v1410_v51 = vpop.f32.mrb[43].mxu0  ;;  %v1451_v52 = vpop.f32.mrb[43].mxu1  ;;  %v7121_v28 = vld [vmem:[#allocation6 + $0xc8] ss:$16 sps:$4 sm:$0xff]  }
 0x7a0   :  { %v6638_v53 = vmul.f32 -1.442695, %v1454_v5  ;;  %v6639_v54 = vmul.f32 -1.442695, %v1456_v17  ;;  %v7115_v29 = vld [vmem:[#allocation6 + $0xe0] ss:$16 sps:$4 sm:$0xff]  }
 0x7a1   :  { %7559 = vpow2.f32 %v6637_v50  ;;  %v7127_v39 = vld [vmem:[#allocation6 + $0xe8] ss:$16 sps:$4 sm:$0xff]   ;;  %v9190_v46 = vld [vmem:[#allocation8 + $0x4] ss:$16 sps:$4 sm:$0xff]   ;;  %v9192_v5 = vld [vmem:[#allocation8 + $0xc] ss:$16 sps:$4 sm:$0xff]  }
 0x7a2   :  { %7561 = vpow2.f32 %v6638_v53  ;;  %v9194_v57 = vld [vmem:[#allocation8] ss:$16 sps:$4 sm:$0xff]   ;;  %v9197_v17 = vld [vmem:[#allocation8 + $0x24] ss:$16 sps:$4 sm:$0xff]   ;;  %v9200_v47 = vld [vmem:[#allocation8 + $0x8] ss:$16 sps:$4 sm:$0xff]  }
 0x7a3   :  { %7563 = vpow2.f32 %v6639_v54  ;;  %v9202_v48 = vld [vmem:[#allocation8 + $0x2c] ss:$16 sps:$4 sm:$0xff]   ;;  %v11322_v50 = vld [vmem:[#allocation18_spill] sm:$0xff]  ;;  %v9214_v53 = vld [vmem:[#allocation8 + $0x28] ss:$16 sps:$4 sm:$0xff]  }
 0x7a4   :  { %7565 = vtanh.f32 %v1455_v1  ;;  %v7129_v1 = vld [vmem:[#allocation6 + $0xec] ss:$16 sps:$4 sm:$0xff]   ;;  %v9207_v51 = vld [vmem:[#allocation8 + $0x20] ss:$16 sps:$4 sm:$0xff]   ;;  %v9211_v52 = vld [vmem:[#allocation8 + $0x44] ss:$16 sps:$4 sm:$0xff]  }
 0x7a5   :  { %v9218_v54 = vld [vmem:[#allocation8 + $0x4c] ss:$16 sps:$4 sm:$0xff]  }
 0x7ab   :  { %v7560_v55 = vpop.eup %7559 }
 0x7ac   :  { %v7562_v58 = vpop.eup %7561  ;;  %v1460_v59 = vadd.f32 1.0, %v7560_v55  ;;  %v9221_v55 = vld [vmem:[#allocation8 + $0x40] ss:$16 sps:$4 sm:$0xff]  }
 0x7ad   :  { %v1466_v24 = vadd.f32 1.0, %v7562_v58  ;;  %v7564_v63 = vpop.eup %7563  ;;  %v9224_v58 = vld [vmem:[#allocation8 + $0x64] ss:$16 sps:$4 sm:$0xff]  }
 0x7ae   :  { %7567 = vrcp.f32 %v1460_v59  ;;  %v7566_v8 = vpop.eup %7565  ;;  %v1473_v32 = vadd.f32 1.0, %v7564_v63  ;;  %v9227_v59 = vld [vmem:[#allocation8 + $0x48] ss:$16 sps:$4 sm:$0xff]  }
 0x7af   :  { %7569 = vrcp.f32 %v1466_v24  ;;  %v9230_v24 = vld [vmem:[#allocation8 + $0x6c] ss:$16 sps:$4 sm:$0xff]  }
 0x7b0   :  { %7571 = vrcp.f32 %v1473_v32  ;;  %v11323_v63 = vld [vmem:[#allocation19_spill] sm:$0xff]  ;;  %v9249_v32 = vld [vmem:[#allocation8 + $0x80] ss:$16 sps:$4 sm:$0xff]  }
 0x7b8   :  { %v7568_v0 = vpop.eup %7567 }
 0x7b9   :  { %v7570_v9 = vpop.eup %7569  ;;  %v1477_v11 = vmul.f32 %v7568_v0, %v7566_v8  ;;  %v9235_v8 = vld [vmem:[#allocation8 + $0x60] ss:$16 sps:$4 sm:$0xff]   ;;  %v9239_v0 = vld [vmem:[#allocation8 + $0x84] ss:$16 sps:$4 sm:$0xff]  }
 0x7ba   :  { %v1476_v31 = vmul.f32 %v7570_v9, %v9137_v4  ;;  %v7572_v33 = vpop.eup %7571  ;;  %v7097_v4 = vld [vmem:[#allocation6 + $0x80] ss:$16 sps:$4 sm:$0xff]   ;;  %v9242_v9 = vld [vmem:[#allocation8 + $0x68] ss:$16 sps:$4 sm:$0xff]  }
 0x7bc   :  { %v9181_v23 = vadd.f32 %v1477_v11, %v1476_v31  ;;  %v9246_v11 = vld [vmem:[#allocation8 + $0x8c] ss:$16 sps:$4 sm:$0xff]   ;;  %v9252_v31 = vld [vmem:[#allocation8 + $0xa4] ss:$16 sps:$4 sm:$0xff]  }
 0x7be   :  { %7573 = vtanh.f32 %v9181_v23 }
 0x7c8   :  { %v7574_v22 = vpop.eup %7573 }
 0x7c9   :  { %v9184_v25 = vmul.f32 %v7574_v22, %v7572_v33  ;;  %v9255_v33 = vld [vmem:[#allocation8 + $0x88] ss:$16 sps:$4 sm:$0xff]   ;;  %v9258_v22 = vld [vmem:[#allocation8 + $0xac] ss:$16 sps:$4 sm:$0xff]  }
 0x7cb   :  { %11321 = vst [vmem:[#allocation28_spill] sm:$0xff] %v9184_v25  ;;  %v1482_v61 = vpack.c.bf16 %v9184_v25, %v9184_v25 }
 0x7cd   :  { %1516 = vmatmul.mubr.bf16.vlgmr.msra.gmra.mrb[44].mxu0 %v1482_v61  ;;  %1557 = vmatmul.mubr.bf16.vlgmr.msra.gmra.mrb[44].mxu1 %v1482_v61  ;;  %v9267_v61 = vld [vmem:[#allocation8 + $0xc4] ss:$16 sps:$4 sm:$0xff]  }
 0x7ce   :  { %1809 = vmatpush1.bf16.msra.mxu0 %v7079_v40  ;;  %1882 = vmatpush1.bf16.msra.mxu1 %v7088_v38  ;;  %v11324_v40 = vld [vmem:[#allocation20_spill] sm:$0xff] }
 0x7cf   :  { %1810 = vmatprep.subr.bf16.mxu0 %v7084_v2  ;;  %1883 = vmatprep.subr.bf16.mxu1 %v7096_v41  ;;  %v9263_v38 = vld [vmem:[#allocation8 + $0xa0] ss:$16 sps:$4 sm:$0xff]   ;;  %v9270_v2 = vld [vmem:[#allocation8 + $0xa8] ss:$16 sps:$4 sm:$0xff]   ;;  %v9274_v41 = vld [vmem:[#allocation8 + $0xcc] ss:$16 sps:$4 sm:$0xff]  }
 0x7d0   :  { %1840 = vmatprep.mubr.bf16.mxu0 %v11304_v18  ;;  %1913 = vmatprep.mubr.bf16.mxu1 %v11304_v18 }
 0x7d2   :  { %1811 = vmatpush1.bf16.msra.mxu0 %v7082_v42  ;;  %1884 = vmatpush1.bf16.msra.mxu1 %v7094_v13  ;;  %v9277_v42 = vld [vmem:[#allocation8 + $0xc0] ss:$16 sps:$4 sm:$0xff]   ;;  %v9280_v13 = vld [vmem:[#allocation8 + $0xe4] ss:$16 sps:$4 sm:$0xff]  }
 0x7d3   :  { %1812 = vmatprep.subr.bf16.mxu0 %v7087_v3  ;;  %1885 = vmatprep.subr.bf16.mxu1 %v7102_v26  ;;  %v9283_v3 = vld [vmem:[#allocation8 + $0xc8] ss:$16 sps:$4 sm:$0xff]   ;;  %v9286_v26 = vld [vmem:[#allocation8 + $0xec] ss:$16 sps:$4 sm:$0xff]  }
 0x7d6   :  { %1813 = vmatpush1.bf16.msra.mxu0 %v7085_v6  ;;  %1886 = vmatpush1.bf16.msra.mxu1 %v7100_v7  ;;  %v11325_v6 = vld [vmem:[#allocation21_spill] sm:$0xff]  ;;  %v9291_v7 = vld [vmem:[#allocation8 + $0xe0] ss:$16 sps:$4 sm:$0xff]  }
 0x7d7   :  { %1814 = vmatprep.subr.bf16.mxu0 %v7093_v36  ;;  %1887 = vmatprep.subr.bf16.mxu1 %v7108_v43  ;;  %v9296_v36 = vld [vmem:[#allocation8 + $0xe8] ss:$16 sps:$4 sm:$0xff]  }
 0x7da   :  { %1815 = vmatpush1.bf16.msra.mxu0 %v7091_v34  ;;  %1888 = vmatpush1.bf16.msra.mxu1 %v7106_v12  ;;  %v11326_v12 = vld [vmem:[#allocation37_spill] sm:$0xff] }
 0x7db   :  { %1816 = vmatprep.subr.bf16.mxu0 %v7099_v56  ;;  %1889 = vmatprep.subr.bf16.mxu1 %v7114_v37  ;;  %v11327_v37 = vld [vmem:[#allocation38_spill] sm:$0xff] }
 0x7de   :  { %1817 = vmatpush1.bf16.msra.mxu0 %v7097_v4  ;;  %1890 = vmatpush1.bf16.msra.mxu1 %v7112_v35 }
 0x7df   :  { %1818 = vmatprep.subr.bf16.mxu0 %v7105_v15  ;;  %1891 = vmatprep.subr.bf16.mxu1 %v7120_v10  ;;  %v11328_v10 = vld [vmem:[#allocation39_spill] sm:$0xff] }
 0x7e2   :  { %1819 = vmatpush1.bf16.msra.mxu0 %v7103_v44  ;;  %1892 = vmatpush1.bf16.msra.mxu1 %v7118_v49  ;;  %v11329_v49 = vld [vmem:[#allocation40_spill] sm:$0xff] }
 0x7e3   :  { %1820 = vmatprep.subr.bf16.mxu0 %v7111_v21  ;;  %1893 = vmatprep.subr.bf16.mxu1 %v7123_v30 }
 0x7e6   :  { %1821 = vmatpush1.bf16.msra.mxu0 %v7109_v19  ;;  %1894 = vmatpush1.bf16.msra.mxu1 %v7121_v28 }
 0x7e7   :  { %1822 = vmatprep.subr.bf16.mxu0 %v7117_v62  ;;  %1895 = vmatprep.subr.bf16.mxu1 %v7129_v1 }
 0x7ea   :  { %1823 = vmatpush1.bf16.msra.mxu0 %v7115_v29  ;;  %1896 = vmatpush1.bf16.msra.mxu1 %v7127_v39 }
 0x7eb   :  { %2146 = vmatprep.subr.bf16.mxu0 %v9190_v46  ;;  %2187 = vmatprep.subr.bf16.mxu1 %v9192_v5 }
 0x7ed   :  { %1841 = vmatmul.mubr.bf16.vlgmr.msra.gmra.mrb[48].mxu0 %v11322_v50  ;;  %1914 = vmatmul.mubr.bf16.vlgmr.msra.gmra.mrb[48].mxu1 %v11322_v50 }
 0x7ee   :  { %2147 = vmatpush1.bf16.msra.mxu0 %v9194_v57  ;;  %1850 = vmatprep.mubr.bf16.mxu0 %v11304_v18 }
 0x7ef   :  { %2148 = vmatprep.subr.bf16.mxu0 %v9197_v17  ;;  %2188 = vmatpush1.bf16.msra.mxu1 %v9200_v47 }
 0x7f0   :  { %2189 = vmatprep.subr.bf16.mxu1 %v9202_v48  ;;  %1923 = vmatprep.mubr.bf16.mxu1 %v11304_v18 }
 0x7f2   :  { %2149 = vmatpush1.bf16.msra.mxu0 %v9207_v51 }
 0x7f3   :  { %2150 = vmatprep.subr.bf16.mxu0 %v9211_v52  ;;  %2190 = vmatpush1.bf16.msra.mxu1 %v9214_v53 }
 0x7f4   :  { %2191 = vmatprep.subr.bf16.mxu1 %v9218_v54 }
 0x7f5   :  { %1851 = vmatmul.mubr.bf16.gmra.mrb[52].mxu0 %v11323_v63  ;;  %1924 = vmatmul.mubr.bf16.gmra.mrb[52].mxu1 %v11323_v63 }
 0x7f6   :  { %2151 = vmatpush1.bf16.msra.mxu0 %v9221_v55  ;;  %1860 = vmatprep.mubr.bf16.mxu0 %v11304_v18 }
 0x7f7   :  { %2152 = vmatprep.subr.bf16.mxu0 %v9224_v58  ;;  %2192 = vmatpush1.bf16.msra.mxu1 %v9227_v59 }
 0x7f8   :  { %2193 = vmatprep.subr.bf16.mxu1 %v9230_v24  ;;  %1933 = vmatprep.mubr.bf16.mxu1 %v11304_v18 }
 0x7fa   :  { %2153 = vmatpush1.bf16.msra.mxu0 %v9235_v8 }
 0x7fb   :  { %2154 = vmatprep.subr.bf16.mxu0 %v9239_v0  ;;  %2194 = vmatpush1.bf16.msra.mxu1 %v9242_v9 }
 0x7fc   :  { %2195 = vmatprep.subr.bf16.mxu1 %v9246_v11 }
 0x7fd   :  { %1861 = vmatmul.mubr.bf16.gmra.mrb[56].mxu0 %v11324_v40  ;;  %1934 = vmatmul.mubr.bf16.gmra.mrb[56].mxu1 %v11324_v40 }
 0x7fe   :  { %2155 = vmatpush1.bf16.msra.mxu0 %v9249_v32  ;;  %1870 = vmatprep.mubr.bf16.mxu0 %v11304_v18 }
 0x7ff   :  { %2156 = vmatprep.subr.bf16.mxu0 %v9252_v31  ;;  %2196 = vmatpush1.bf16.msra.mxu1 %v9255_v33 }
 0x800   :  { %2197 = vmatprep.subr.bf16.mxu1 %v9258_v22  ;;  %1943 = vmatprep.mubr.bf16.mxu1 %v11304_v18 }
 0x802   :  { %2157 = vmatpush1.bf16.msra.mxu0 %v9263_v38 }
 0x803   :  { %2158 = vmatprep.subr.bf16.mxu0 %v9267_v61  ;;  %2198 = vmatpush1.bf16.msra.mxu1 %v9270_v2 }
 0x804   :  { %2199 = vmatprep.subr.bf16.mxu1 %v9274_v41 }
 0x805   :  { %1871 = vmatmul.mubr.bf16.gmra.mrb[60].mxu0 %v11325_v6  ;;  %1944 = vmatmul.mubr.bf16.gmra.mrb[60].mxu1 %v11325_v6 }
 0x806   :  { %2159 = vmatpush1.bf16.msra.mxu0 %v9277_v42  ;;  %2178 = vmatprep.mubr.bf16.mxu0 %v11304_v18 }
 0x807   :  { %2160 = vmatprep.subr.bf16.mxu0 %v9280_v13  ;;  %2200 = vmatpush1.bf16.msra.mxu1 %v9283_v3 }
 0x808   :  { %2201 = vmatprep.subr.bf16.mxu1 %v9286_v26  ;;  %2219 = vmatprep.mubr.bf16.mxu1 %v11304_v18 }
 0x80a   :  { %2161 = vmatpush1.bf16.msra.mxu0 %v9291_v7 }
 0x80b   :  { %2202 = vmatpush1.bf16.msra.mxu1 %v9296_v36  ;;  %2258 = vmatprep.subr.bf16.mxu0 %v9190_v46 }
 0x80c   :  { %2299 = vmatprep.subr.bf16.mxu1 %v9192_v5 }
 0x80d   :  { %2179 = vmatmul.mubr.bf16.vlgmr.msra.gmra.mrb[64].mxu0 %v11304_v18 }
 0x80e   :  { %2220 = vmatmul.mubr.bf16.vlgmr.msra.gmra.mrb[64].mxu1 %v11304_v18  ;;  %2259 = vmatpush1.bf16.msra.mxu0 %v9194_v57 }
 0x80f   :  { %2300 = vmatpush1.bf16.msra.mxu1 %v9200_v47  ;;  %2260 = vmatprep.subr.bf16.mxu0 %v9197_v17 }
 0x810   :  { %2301 = vmatprep.subr.bf16.mxu1 %v9202_v48  ;;  %2290 = vmatprep.mubr.bf16.mxu0 %v11304_v18 }
 0x811   :  { %2331 = vmatprep.mubr.bf16.mxu1 %v11304_v18 }
 0x812   :  { %2261 = vmatpush1.bf16.msra.mxu0 %v9207_v51 }
 0x813   :  { %2302 = vmatpush1.bf16.msra.mxu1 %v9214_v53  ;;  %2262 = vmatprep.subr.bf16.mxu0 %v9211_v52 }
 0x814   :  { %2303 = vmatprep.subr.bf16.mxu1 %v9218_v54 }
 0x816   :  { %2263 = vmatpush1.bf16.msra.mxu0 %v9221_v55 }
 0x817   :  { %2304 = vmatpush1.bf16.msra.mxu1 %v9227_v59  ;;  %2264 = vmatprep.subr.bf16.mxu0 %v9224_v58 }
 0x818   :  { %2305 = vmatprep.subr.bf16.mxu1 %v9230_v24 }
 0x81a   :  { %2265 = vmatpush1.bf16.msra.mxu0 %v9235_v8 }
 0x81b   :  { %2306 = vmatpush1.bf16.msra.mxu1 %v9242_v9  ;;  %2266 = vmatprep.subr.bf16.mxu0 %v9239_v0 }
 0x81c   :  { %2307 = vmatprep.subr.bf16.mxu1 %v9246_v11 }
 0x81e   :  { %2267 = vmatpush1.bf16.msra.mxu0 %v9249_v32 }
 0x81f   :  { %2308 = vmatpush1.bf16.msra.mxu1 %v9255_v33  ;;  %2268 = vmatprep.subr.bf16.mxu0 %v9252_v31 }
 0x820   :  { %2309 = vmatprep.subr.bf16.mxu1 %v9258_v22 }
 0x822   :  { %2269 = vmatpush1.bf16.msra.mxu0 %v9263_v38 }
 0x823   :  { %2310 = vmatpush1.bf16.msra.mxu1 %v9270_v2  ;;  %2270 = vmatprep.subr.bf16.mxu0 %v9267_v61 }
 0x824   :  { %2311 = vmatprep.subr.bf16.mxu1 %v9274_v41 }
 0x826   :  { %2271 = vmatpush1.bf16.msra.mxu0 %v9277_v42 }
 0x827   :  { %2312 = vmatpush1.bf16.msra.mxu1 %v9283_v3  ;;  %2272 = vmatprep.subr.bf16.mxu0 %v9280_v13 }
 0x828   :  { %2313 = vmatprep.subr.bf16.mxu1 %v9286_v26 }
 0x82a   :  { %2273 = vmatpush1.bf16.msra.mxu0 %v9291_v7 }
 0x82b   :  { %2314 = vmatpush1.bf16.msra.mxu1 %v9296_v36  ;;  %2370 = vmatprep.subr.bf16.mxu0 %v9190_v46 }
 0x82c   :  { %2411 = vmatprep.subr.bf16.mxu1 %v9192_v5 }
 0x8a0   :  { %v1517_v43 = vpop.f32.mrb[44].mxu0  ;;  %v1558_v34 = vpop.f32.mrb[44].mxu1 }
 0x8a1   :  { %v1565_v56 = vadd.f32 %v1517_v43, %v11326_v12  ;;  %v1567_v4 = vadd.f32 %v1558_v34, %v11327_v37  ;;  %v1519_v35 = vpop.f32.mrb[45].mxu0  ;;  %v1560_v15 = vpop.f32.mrb[45].mxu1  ;;  %v1626_v34 = vld [vmem:[%s11214_s6] sm:$0xf] }
 0x8a2   :  { %v1566_v44 = vadd.f32 %v1519_v35, %v11328_v10  ;;  %v1568_v21 = vadd.f32 %v1560_v15, %v11329_v49  ;;  %v1521_v30 = vpop.f32.mrb[46].mxu0  ;;  %v1562_v19 = vpop.f32.mrb[46].mxu1  ;;  %v11330_v10 = vld [vmem:[#allocation24_spill] sm:$0xff]  ;;  %v11331_v49 = vld [vmem:[#allocation22_spill] sm:$0xff] }
 0x8a3   :  { %v6640_v28 = vmul.f32 -1.442695, %v1565_v56  ;;  %v1522_v62 = vpop.f32.mrb[47].mxu0  ;;  %v1563_v1 = vpop.f32.mrb[47].mxu1  ;;  %v11332_v30 = vld [vmem:[#allocation25_spill] sm:$0xff] }
 0x8a4   :  { %v6641_v29 = vmul.f32 -1.442695, %v1566_v44  ;;  %v6642_v39 = vmul.f32 -1.442695, %v1568_v21  ;;  %v9348_v44 = vrot.slane %v1626_v34, %v11330_v10  ;;  %v9351_v21 = vrot.slane %v1626_v34, %v11331_v49 }
 0x8a5   :  { %7575 = vpow2.f32 %v6640_v28  ;;  %v9355_v19 = vrot.slane %v1626_v34, %v11332_v30  ;;  %v11333_v28 = vld [vmem:[#allocation23_spill] sm:$0xff] }
 0x8a6   :  { %7577 = vpow2.f32 %v6641_v29  ;;  %v9358_v62 = vrot.slane %v1626_v34, %v11333_v28 }
 0x8a7   :  { %7579 = vpow2.f32 %v6642_v39 }
 0x8a8   :  { %7581 = vtanh.f32 %v1567_v4 }
 0x8af   :  { %v7576_v50 = vpop.eup %7575 }
 0x8b0   :  { %v7578_v63 = vpop.eup %7577  ;;  %v1572_v40 = vadd.f32 1.0, %v7576_v50 }
 0x8b1   :  { %v1578_v6 = vadd.f32 1.0, %v7578_v63  ;;  %v7580_v43 = vpop.eup %7579 }
 0x8b2   :  { %7583 = vrcp.f32 %v1572_v40  ;;  %v7582_v12 = vpop.eup %7581  ;;  %v1585_v15 = vadd.f32 1.0, %v7580_v43 }
 0x8b3   :  { %7585 = vrcp.f32 %v1578_v6 }
 0x8b4   :  { %7587 = vrcp.f32 %v1585_v15 }
 0x8bc   :  { %v7584_v56 = vpop.eup %7583 }
 0x8bd   :  { %v7586_v37 = vpop.eup %7585  ;;  %v1589_v35 = vmul.f32 %v7584_v56, %v7582_v12 }
 0x8be   :  { %v1588_v4 = vmul.f32 %v7586_v37, %v9181_v23 }
 0x8c0   :  { %v1590_v1 = vadd.f32 %v1589_v35, %v1588_v4  ;;  %v1842_v29 = vpop.f32.mrb[48].mxu0  ;;  %v1915_v39 = vpop.f32.mrb[48].mxu1 }
 0x8c1   :  { %v9361_v50 = vadd.f32 %v1842_v29, %v9348_v44  ;;  %v1844_v63 = vpop.f32.mrb[49].mxu0  ;;  %v9364_v40 = vadd.f32 %v1915_v39, %v9351_v21  ;;  %v1917_v6 = vpop.f32.mrb[49].mxu1 }
 0x8c2   :  { %7589 = vtanh.f32 %v1590_v1  ;;  %v9367_v23 = vadd.f32 %v1844_v63, %v9355_v19  ;;  %v1846_v43 = vpop.f32.mrb[50].mxu0  ;;  %v9370_v34 = vadd.f32 %v1917_v6, %v9358_v62  ;;  %v1919_v12 = vpop.f32.mrb[50].mxu1 }
 0x8c3   :  { %11334 = vst [vmem:[#allocation29_spill] sm:$0xff] %v9361_v50  ;;  %11335 = vst [vmem:[#allocation30_spill] sm:$0xff] %v9364_v40  ;;  %v9373_v56 = vadd.f32 %v1846_v43, %v9348_v44  ;;  %v1848_v37 = vpop.f32.mrb[51].mxu0  ;;  %v9376_v35 = vadd.f32 %v1919_v12, %v9351_v21  ;;  %v1921_v15 = vpop.f32.mrb[51].mxu1 }
 0x8c4   :  { %11336 = vst [vmem:[#allocation31_spill] sm:$0xff] %v9367_v23  ;;  %11337 = vst [vmem:[#allocation32_spill] sm:$0xff] %v9370_v34  ;;  %v9379_v4 = vadd.f32 %v1848_v37, %v9355_v19  ;;  %v9382_v1 = vadd.f32 %v1921_v15, %v9358_v62  ;;  %v7588_v15 = vpop.eup %7587 }
 0x8c5   :  { %11338 = vst [vmem:[#allocation33_spill] sm:$0xff] %v9373_v56  ;;  %11339 = vst [vmem:[#allocation34_spill] sm:$0xff] %v9376_v35 }
 0x8c6   :  { %11340 = vst [vmem:[#allocation35_spill] sm:$0xff] %v9379_v4  ;;  %11341 = vst [vmem:[#allocation36_spill] sm:$0xff] %v9382_v1 }
 0x8c8   :  { %v1852_v29 = vpop.f32.mrb[52].mxu0  ;;  %v1925_v39 = vpop.f32.mrb[52].mxu1 }
 0x8c9   :  { %v9385_v63 = vadd.f32 %v1852_v29, %v9348_v44  ;;  %v1854_v6 = vpop.f32.mrb[53].mxu0  ;;  %v9388_v43 = vadd.f32 %v1925_v39, %v9351_v21  ;;  %v1927_v28 = vpop.f32.mrb[53].mxu1 }
 0x8ca   :  { %v9391_v12 = vadd.f32 %v1854_v6, %v9355_v19  ;;  %v1856_v30 = vpop.f32.mrb[54].mxu0  ;;  %v9394_v37 = vadd.f32 %v1927_v28, %v9358_v62  ;;  %v1929_v49 = vpop.f32.mrb[54].mxu1 }
 0x8cb   :  { %11342 = vst [vmem:[#allocation18_spill] sm:$0xff] %v9385_v63  ;;  %11343 = vst [vmem:[#allocation19_spill] sm:$0xff] %v9388_v43  ;;  %v9397_v10 = vadd.f32 %v1856_v30, %v9348_v44  ;;  %v1858_v25 = vpop.f32.mrb[55].mxu0  ;;  %v9400_v29 = vadd.f32 %v1929_v49, %v9351_v21  ;;  %v1931_v20 = vpop.f32.mrb[55].mxu1 }
 0x8cc   :  { %11344 = vst [vmem:[#allocation20_spill] sm:$0xff] %v9391_v12  ;;  %11345 = vst [vmem:[#allocation21_spill] sm:$0xff] %v9394_v37  ;;  %v7590_v39 = vpop.eup %7589  ;;  %v9403_v45 = vadd.f32 %v1858_v25, %v9355_v19  ;;  %v9406_v6 = vadd.f32 %v1931_v20, %v9358_v62 }
 0x8cd   :  { %11346 = vst [vmem:[#allocation37_spill] sm:$0xff] %v9397_v10  ;;  %11347 = vst [vmem:[#allocation38_spill] sm:$0xff] %v9400_v29  ;;  %v9408_v14 = vmul.f32 %v7590_v39, %v7588_v15 }
 0x8ce   :  { %11348 = vst [vmem:[#allocation39_spill] sm:$0xff] %v9403_v45  ;;  %11349 = vst [vmem:[#allocation40_spill] sm:$0xff] %v9406_v6 }
 0x8cf   :  { %11350 = vst [vmem:[#allocation45_spill] sm:$0xff] %v9408_v14 }
 0x8d0   :  { %v1862_v28 = vpop.f32.mrb[56].mxu0  ;;  %v1935_v60 = vpop.f32.mrb[56].mxu1 }
 0x8d1   :  { %v9411_v27 = vadd.f32 %v1862_v28, %v9348_v44  ;;  %v1864_v30 = vpop.f32.mrb[57].mxu0  ;;  %v9414_v16 = vadd.f32 %v1935_v60, %v9351_v21  ;;  %v1937_v49 = vpop.f32.mrb[57].mxu1 }
 0x8d2   :  { %v9417_v34 = vadd.f32 %v1864_v30, %v9355_v19  ;;  %v1866_v25 = vpop.f32.mrb[58].mxu0  ;;  %v9420_v23 = vadd.f32 %v1937_v49, %v9358_v62  ;;  %v1939_v20 = vpop.f32.mrb[58].mxu1 }
 0x8d3   :  { %11351 = vst [vmem:[#allocation46_spill] sm:$0xff] %v9411_v27  ;;  %11352 = vst [vmem:[#allocation47_spill] sm:$0xff] %v9414_v16  ;;  %v9423_v15 = vadd.f32 %v1866_v25, %v9348_v44  ;;  %v1868_v39 = vpop.f32.mrb[59].mxu0  ;;  %v9426_v28 = vadd.f32 %v1939_v20, %v9351_v21  ;;  %v1941_v14 = vpop.f32.mrb[59].mxu1 }
 0x8d4   :  { %11353 = vst [vmem:[#allocation48_spill] sm:$0xff] %v9417_v34  ;;  %11354 = vst [vmem:[#allocation49_spill] sm:$0xff] %v9420_v23  ;;  %v9429_v60 = vadd.f32 %v1868_v39, %v9355_v19  ;;  %v9432_v40 = vadd.f32 %v1941_v14, %v9358_v62 }
 0x8d6   :  { %11355 = vst [vmem:[#allocation50_spill] sm:$0xff] %v9429_v60  ;;  %11356 = vst [vmem:[#allocation51_spill] sm:$0xff] %v9432_v40 }
 0x8d8   :  { %v1872_v30 = vpop.f32.mrb[60].mxu0  ;;  %v1945_v50 = vpop.f32.mrb[60].mxu1 }
 0x8d9   :  { %v9435_v49 = vadd.f32 %v1872_v30, %v9348_v44  ;;  %v1874_v1 = vpop.f32.mrb[61].mxu0  ;;  %v9438_v25 = vadd.f32 %v1945_v50, %v9351_v21  ;;  %v1947_v4 = vpop.f32.mrb[61].mxu1 }
 0x8da   :  { %v9441_v20 = vadd.f32 %v1874_v1, %v9355_v19  ;;  %v1876_v35 = vpop.f32.mrb[62].mxu0  ;;  %v9444_v39 = vadd.f32 %v1947_v4, %v9358_v62  ;;  %v1949_v56 = vpop.f32.mrb[62].mxu1 }
 0x8db   :  { %v1878_v14 = vpop.f32.mrb[63].mxu0  ;;  %v1951_v37 = vpop.f32.mrb[63].mxu1  ;;  %v1950_v12 = vadd.f32 %v1949_v56, %v9351_v21  ;;  %v1877_v30 = vadd.f32 %v1876_v35, %v9348_v44 }
 0x8dc   :  { %v1952_v43 = vadd.f32 %v1951_v37, %v9358_v62  ;;  %v1879_v50 = vadd.f32 %v1878_v14, %v9355_v19 }
 0x8e0   :  { %v2180_v63 = vpop.f32.mrb[64].mxu0 }
 0x8e1   :  { %v2228_v6 = vadd.f32 %v2180_v63, %v1877_v30  ;;  %v2182_v45 = vpop.f32.mrb[65].mxu0  ;;  %v2221_v1 = vpop.f32.mrb[64].mxu1 }
 0x8e2   :  { %v2229_v29 = vadd.f32 %v2182_v45, %v1879_v50  ;;  %v2184_v10 = vpop.f32.mrb[66].mxu0  ;;  %v2230_v23 = vadd.f32 %v2221_v1, %v1950_v12  ;;  %v2223_v4 = vpop.f32.mrb[65].mxu1 }
 0x8e3   :  { %v6707_v34 = vmul.f32 -1.442695, %v2228_v6  ;;  %v2185_v16 = vpop.f32.mrb[67].mxu0  ;;  %v2231_v27 = vadd.f32 %v2223_v4, %v1952_v43  ;;  %v2225_v40 = vpop.f32.mrb[66].mxu1 }
 0x8e4   :  { %v6708_v60 = vmul.f32 -1.442695, %v2229_v29  ;;  %v2226_v21 = vpop.f32.mrb[67].mxu1 }
 0x8e5   :  { %7591 = vpow2.f32 %v6707_v34  ;;  %v6709_v44 = vmul.f32 -1.442695, %v2231_v27 }
 0x8e6   :  { %7593 = vpow2.f32 %v6708_v60 }
 0x8e7   :  { %7595 = vpow2.f32 %v6709_v44 }
 0x8e8   :  { %7597 = vtanh.f32 %v2230_v23 }
 0x8ef   :  { %v7592_v62 = vpop.eup %7591 }
 0x8f0   :  { %v7594_v56 = vpop.eup %7593  ;;  %v2235_v19 = vadd.f32 1.0, %v7592_v62 }
 0x8f1   :  { %v2241_v35 = vadd.f32 1.0, %v7594_v56  ;;  %v7596_v45 = vpop.eup %7595 }
 0x8f2   :  { %7599 = vrcp.f32 %v2235_v19  ;;  %v7598_v10 = vpop.eup %7597  ;;  %v2248_v43 = vadd.f32 1.0, %v7596_v45 }
 0x8f3   :  { %7601 = vrcp.f32 %v2241_v35 }
 0x8f4   :  { %7603 = vrcp.f32 %v2248_v43 }
 0x8fc   :  { %v7600_v63 = vpop.eup %7599 }
 0x8fd   :  { %v7602_v12 = vpop.eup %7601  ;;  %v2252_v16 = vmul.f32 %v7600_v63, %v7598_v10 }
 0x8fe   :  { %v2251_v40 = vmul.f32 0.0, %v7602_v12  ;;  %v7604_v27 = vpop.eup %7603 }
 0x900   :  { %v9450_v37 = vadd.f32 %v2252_v16, %v2251_v40 }
 0x902   :  { %7605 = vtanh.f32 %v9450_v37 }
 0x90c   :  { %v7606_v34 = vpop.eup %7605 }
 0x90d   :  { %v9453_v29 = vmul.f32 %v7606_v34, %v7604_v27 }
 0x90f   :  { %v2257_v23 = vpack.c.bf16 %v9453_v29, %v9453_v29 }
 0x911   :  { %2291 = vmatmul.mubr.bf16.vlgmr.msra.gmra.mrb[68].mxu0 %v2257_v23  ;;  %2332 = vmatmul.mubr.bf16.vlgmr.msra.gmra.mrb[68].mxu1 %v2257_v23 }
 0x912   :  { %2371 = vmatpush1.bf16.msra.mxu0 %v9194_v57  ;;  %2412 = vmatpush1.bf16.msra.mxu1 %v9200_v47 }
 0x913   :  { %2372 = vmatprep.subr.bf16.mxu0 %v9197_v17  ;;  %2413 = vmatprep.subr.bf16.mxu1 %v9202_v48 }
 0x914   :  { %2402 = vmatprep.mubr.bf16.mxu0 %v11304_v18  ;;  %2443 = vmatprep.mubr.bf16.mxu1 %v11304_v18 }
 0x916   :  { %2373 = vmatpush1.bf16.msra.mxu0 %v9207_v51  ;;  %2414 = vmatpush1.bf16.msra.mxu1 %v9214_v53 }
 0x917   :  { %2374 = vmatprep.subr.bf16.mxu0 %v9211_v52  ;;  %2415 = vmatprep.subr.bf16.mxu1 %v9218_v54 }
 0x91a   :  { %2375 = vmatpush1.bf16.msra.mxu0 %v9221_v55  ;;  %2416 = vmatpush1.bf16.msra.mxu1 %v9227_v59 }
 0x91b   :  { %2376 = vmatprep.subr.bf16.mxu0 %v9224_v58  ;;  %2417 = vmatprep.subr.bf16.mxu1 %v9230_v24 }
 0x91e   :  { %2377 = vmatpush1.bf16.msra.mxu0 %v9235_v8  ;;  %2418 = vmatpush1.bf16.msra.mxu1 %v9242_v9 }
 0x91f   :  { %2378 = vmatprep.subr.bf16.mxu0 %v9239_v0  ;;  %2419 = vmatprep.subr.bf16.mxu1 %v9246_v11 }
 0x922   :  { %2379 = vmatpush1.bf16.msra.mxu0 %v9249_v32  ;;  %2420 = vmatpush1.bf16.msra.mxu1 %v9255_v33 }
 0x923   :  { %2380 = vmatprep.subr.bf16.mxu0 %v9252_v31  ;;  %2421 = vmatprep.subr.bf16.mxu1 %v9258_v22 }
 0x926   :  { %2381 = vmatpush1.bf16.msra.mxu0 %v9263_v38  ;;  %2422 = vmatpush1.bf16.msra.mxu1 %v9270_v2 }
 0x927   :  { %2382 = vmatprep.subr.bf16.mxu0 %v9267_v61  ;;  %2423 = vmatprep.subr.bf16.mxu1 %v9274_v41 }
 0x92a   :  { %2383 = vmatpush1.bf16.msra.mxu0 %v9277_v42  ;;  %2424 = vmatpush1.bf16.msra.mxu1 %v9283_v3 }
 0x92b   :  { %2384 = vmatprep.subr.bf16.mxu0 %v9280_v13  ;;  %2425 = vmatprep.subr.bf16.mxu1 %v9286_v26 }
 0x92e   :  { %2385 = vmatpush1.bf16.msra.mxu0 %v9291_v7  ;;  %2426 = vmatpush1.bf16.msra.mxu1 %v9296_v36 }
 0x92f   :  { %2482 = vmatprep.subr.bf16.mxu0 %v9190_v46  ;;  %2523 = vmatprep.subr.bf16.mxu1 %v9192_v5 }
 0x9e4   :  { %v2292_v6 = vpop.f32.mrb[68].mxu0  ;;  %v2333_v60 = vpop.f32.mrb[68].mxu1 }
 0x9e5   :  { %v2340_v14 = vadd.f32 %v2292_v6, %v9435_v49  ;;  %v2342_v30 = vadd.f32 %v2333_v60, %v9438_v25  ;;  %v2294_v50 = vpop.f32.mrb[69].mxu0  ;;  %v2335_v1 = vpop.f32.mrb[69].mxu1 }
 0x9e6   :  { %v2341_v4 = vadd.f32 %v2294_v50, %v9441_v20  ;;  %v2343_v21 = vadd.f32 %v2335_v1, %v9444_v39  ;;  %v2296_v44 = vpop.f32.mrb[70].mxu0  ;;  %v2337_v62 = vpop.f32.mrb[70].mxu1 }
 0x9e7   :  { %v6710_v56 = vmul.f32 -1.442695, %v2340_v14  ;;  %v2297_v19 = vpop.f32.mrb[71].mxu0  ;;  %v2338_v35 = vpop.f32.mrb[71].mxu1  ;;  %v11357_v62 = vld [vmem:[#allocation50_spill] sm:$0xff] }
 0x9e8   :  { %v6711_v45 = vmul.f32 -1.442695, %v2341_v4  ;;  %v6712_v10 = vmul.f32 -1.442695, %v2343_v21  ;;  %v11358_v19 = vld [vmem:[#allocation51_spill] sm:$0xff] }
 0x9e9   :  { %7607 = vpow2.f32 %v6710_v56 }
 0x9ea   :  { %7609 = vpow2.f32 %v6711_v45 }
 0x9eb   :  { %7611 = vpow2.f32 %v6712_v10 }
 0x9ec   :  { %7613 = vtanh.f32 %v2342_v30 }
 0x9f3   :  { %v7608_v63 = vpop.eup %7607 }
 0x9f4   :  { %v7610_v12 = vpop.eup %7609  ;;  %v2347_v49 = vadd.f32 1.0, %v7608_v63 }
 0x9f5   :  { %v2353_v25 = vadd.f32 1.0, %v7610_v12  ;;  %v7612_v20 = vpop.eup %7611 }
 0x9f6   :  { %7615 = vrcp.f32 %v2347_v49  ;;  %v7614_v16 = vpop.eup %7613  ;;  %v2360_v27 = vadd.f32 1.0, %v7612_v20 }
 0x9f7   :  { %7617 = vrcp.f32 %v2353_v25 }
 0x9f8   :  { %7619 = vrcp.f32 %v2360_v27 }
 0xa00   :  { %v7616_v39 = vpop.eup %7615 }
 0xa01   :  { %v7618_v43 = vpop.eup %7617  ;;  %v2364_v40 = vmul.f32 %v7616_v39, %v7614_v16 }
 0xa02   :  { %v2363_v34 = vmul.f32 %v7618_v43, %v9450_v37  ;;  %v7620_v6 = vpop.eup %7619 }
 0xa04   :  { %v9496_v23 = vadd.f32 %v2364_v40, %v2363_v34 }
 0xa06   :  { %7621 = vtanh.f32 %v9496_v23 }
 0xa10   :  { %v7622_v60 = vpop.eup %7621 }
 0xa11   :  { %v9499_v14 = vmul.f32 %v7622_v60, %v7620_v6 }
 0xa13   :  { %v2369_v30 = vpack.c.bf16 %v9499_v14, %v9499_v14 }
 0xa15   :  { %2403 = vmatmul.mubr.bf16.vlgmr.msra.gmra.mrb[72].mxu0 %v2369_v30  ;;  %2444 = vmatmul.mubr.bf16.vlgmr.msra.gmra.mrb[72].mxu1 %v2369_v30 }
 0xa16   :  { %2483 = vmatpush1.bf16.msra.mxu0 %v9194_v57  ;;  %2524 = vmatpush1.bf16.msra.mxu1 %v9200_v47 }
 0xa17   :  { %2484 = vmatprep.subr.bf16.mxu0 %v9197_v17  ;;  %2525 = vmatprep.subr.bf16.mxu1 %v9202_v48 }
 0xa18   :  { %2514 = vmatprep.mubr.bf16.mxu0 %v11304_v18  ;;  %2555 = vmatprep.mubr.bf16.mxu1 %v11304_v18 }
 0xa1a   :  { %2485 = vmatpush1.bf16.msra.mxu0 %v9207_v51  ;;  %2526 = vmatpush1.bf16.msra.mxu1 %v9214_v53 }
 0xa1b   :  { %2486 = vmatprep.subr.bf16.mxu0 %v9211_v52  ;;  %2527 = vmatprep.subr.bf16.mxu1 %v9218_v54 }
 0xa1e   :  { %2487 = vmatpush1.bf16.msra.mxu0 %v9221_v55  ;;  %2528 = vmatpush1.bf16.msra.mxu1 %v9227_v59 }
 0xa1f   :  { %2488 = vmatprep.subr.bf16.mxu0 %v9224_v58  ;;  %2529 = vmatprep.subr.bf16.mxu1 %v9230_v24 }
 0xa22   :  { %2489 = vmatpush1.bf16.msra.mxu0 %v9235_v8  ;;  %2530 = vmatpush1.bf16.msra.mxu1 %v9242_v9 }
 0xa23   :  { %2490 = vmatprep.subr.bf16.mxu0 %v9239_v0  ;;  %2531 = vmatprep.subr.bf16.mxu1 %v9246_v11 }
 0xa26   :  { %2491 = vmatpush1.bf16.msra.mxu0 %v9249_v32  ;;  %2532 = vmatpush1.bf16.msra.mxu1 %v9255_v33 }
 0xa27   :  { %2492 = vmatprep.subr.bf16.mxu0 %v9252_v31  ;;  %2533 = vmatprep.subr.bf16.mxu1 %v9258_v22 }
 0xa2a   :  { %2493 = vmatpush1.bf16.msra.mxu0 %v9263_v38  ;;  %2534 = vmatpush1.bf16.msra.mxu1 %v9270_v2 }
 0xa2b   :  { %2494 = vmatprep.subr.bf16.mxu0 %v9267_v61  ;;  %2535 = vmatprep.subr.bf16.mxu1 %v9274_v41 }
 0xa2e   :  { %2495 = vmatpush1.bf16.msra.mxu0 %v9277_v42  ;;  %2536 = vmatpush1.bf16.msra.mxu1 %v9283_v3 }
 0xa2f   :  { %2496 = vmatprep.subr.bf16.mxu0 %v9280_v13  ;;  %2537 = vmatprep.subr.bf16.mxu1 %v9286_v26 }
 0xa32   :  { %2497 = vmatpush1.bf16.msra.mxu0 %v9291_v7  ;;  %2538 = vmatpush1.bf16.msra.mxu1 %v9296_v36 }
 0xa33   :  { %2594 = vmatprep.subr.bf16.mxu0 %v9190_v46  ;;  %2635 = vmatprep.subr.bf16.mxu1 %v9192_v5 }
 0xae8   :  { %v2404_v37 = vpop.f32.mrb[72].mxu0  ;;  %v2445_v50 = vpop.f32.mrb[72].mxu1 }
 0xae9   :  { %v2452_v1 = vadd.f32 %v2404_v37, %v9423_v15  ;;  %v2454_v4 = vadd.f32 %v2445_v50, %v9426_v28  ;;  %v2406_v21 = vpop.f32.mrb[73].mxu0  ;;  %v2447_v44 = vpop.f32.mrb[73].mxu1 }
 0xaea   :  { %v2453_v56 = vadd.f32 %v2406_v21, %v11357_v62  ;;  %v2455_v35 = vadd.f32 %v2447_v44, %v11358_v19  ;;  %v2408_v45 = vpop.f32.mrb[74].mxu0  ;;  %v2449_v10 = vpop.f32.mrb[74].mxu1  ;;  %v11359_v62 = vld [vmem:[#allocation46_spill] sm:$0xff]  ;;  %v11360_v19 = vld [vmem:[#allocation47_spill] sm:$0xff] }
 0xaeb   :  { %v6713_v63 = vmul.f32 -1.442695, %v2452_v1  ;;  %v2409_v12 = vpop.f32.mrb[75].mxu0  ;;  %v2450_v49 = vpop.f32.mrb[75].mxu1 }
 0xaec   :  { %v6714_v25 = vmul.f32 -1.442695, %v2453_v56  ;;  %v6715_v20 = vmul.f32 -1.442695, %v2455_v35  ;;  %v11362_v49 = vld [vmem:[#allocation49_spill] sm:$0xff] }
 0xaed   :  { %7623 = vpow2.f32 %v6713_v63  ;;  %v11361_v63 = vld [vmem:[#allocation48_spill] sm:$0xff] }
 0xaee   :  { %7625 = vpow2.f32 %v6714_v25 }
 0xaef   :  { %7627 = vpow2.f32 %v6715_v20 }
 0xaf0   :  { %7629 = vtanh.f32 %v2454_v4 }
 0xaf7   :  { %v7624_v16 = vpop.eup %7623 }
 0xaf8   :  { %v7626_v39 = vpop.eup %7625  ;;  %v2459_v15 = vadd.f32 1.0, %v7624_v16 }
 0xaf9   :  { %v2465_v28 = vadd.f32 1.0, %v7626_v39  ;;  %v7628_v43 = vpop.eup %7627 }
 0xafa   :  { %7631 = vrcp.f32 %v2459_v15  ;;  %v7630_v40 = vpop.eup %7629  ;;  %v2472_v60 = vadd.f32 1.0, %v7628_v43 }
 0xafb   :  { %7633 = vrcp.f32 %v2465_v28 }
 0xafc   :  { %7635 = vrcp.f32 %v2472_v60 }
 0xb04   :  { %v7632_v27 = vpop.eup %7631 }
 0xb05   :  { %v7634_v34 = vpop.eup %7633  ;;  %v2476_v6 = vmul.f32 %v7632_v27, %v7630_v40 }
 0xb06   :  { %v2475_v30 = vmul.f32 %v7634_v34, %v9496_v23  ;;  %v7636_v50 = vpop.eup %7635 }
 0xb08   :  { %v9542_v37 = vadd.f32 %v2476_v6, %v2475_v30 }
 0xb0a   :  { %7637 = vtanh.f32 %v9542_v37 }
 0xb14   :  { %v7638_v1 = vpop.eup %7637 }
 0xb15   :  { %v9545_v21 = vmul.f32 %v7638_v1, %v7636_v50 }
 0xb17   :  { %v2481_v4 = vpack.c.bf16 %v9545_v21, %v9545_v21 }
 0xb19   :  { %2515 = vmatmul.mubr.bf16.vlgmr.msra.gmra.mrb[76].mxu0 %v2481_v4  ;;  %2556 = vmatmul.mubr.bf16.vlgmr.msra.gmra.mrb[76].mxu1 %v2481_v4 }
 0xb1a   :  { %2595 = vmatpush1.bf16.msra.mxu0 %v9194_v57  ;;  %2636 = vmatpush1.bf16.msra.mxu1 %v9200_v47 }
 0xb1b   :  { %2596 = vmatprep.subr.bf16.mxu0 %v9197_v17  ;;  %2637 = vmatprep.subr.bf16.mxu1 %v9202_v48 }
 0xb1c   :  { %2626 = vmatprep.mubr.bf16.mxu0 %v11304_v18  ;;  %2667 = vmatprep.mubr.bf16.mxu1 %v11304_v18 }
 0xb1e   :  { %2597 = vmatpush1.bf16.msra.mxu0 %v9207_v51  ;;  %2638 = vmatpush1.bf16.msra.mxu1 %v9214_v53 }
 0xb1f   :  { %2598 = vmatprep.subr.bf16.mxu0 %v9211_v52  ;;  %2639 = vmatprep.subr.bf16.mxu1 %v9218_v54 }
 0xb22   :  { %2599 = vmatpush1.bf16.msra.mxu0 %v9221_v55  ;;  %2640 = vmatpush1.bf16.msra.mxu1 %v9227_v59 }
 0xb23   :  { %2600 = vmatprep.subr.bf16.mxu0 %v9224_v58  ;;  %2641 = vmatprep.subr.bf16.mxu1 %v9230_v24 }
 0xb26   :  { %2601 = vmatpush1.bf16.msra.mxu0 %v9235_v8  ;;  %2642 = vmatpush1.bf16.msra.mxu1 %v9242_v9 }
 0xb27   :  { %2602 = vmatprep.subr.bf16.mxu0 %v9239_v0  ;;  %2643 = vmatprep.subr.bf16.mxu1 %v9246_v11 }
 0xb2a   :  { %2603 = vmatpush1.bf16.msra.mxu0 %v9249_v32  ;;  %2644 = vmatpush1.bf16.msra.mxu1 %v9255_v33 }
 0xb2b   :  { %2604 = vmatprep.subr.bf16.mxu0 %v9252_v31  ;;  %2645 = vmatprep.subr.bf16.mxu1 %v9258_v22 }
 0xb2e   :  { %2605 = vmatpush1.bf16.msra.mxu0 %v9263_v38  ;;  %2646 = vmatpush1.bf16.msra.mxu1 %v9270_v2 }
 0xb2f   :  { %2606 = vmatprep.subr.bf16.mxu0 %v9267_v61  ;;  %2647 = vmatprep.subr.bf16.mxu1 %v9274_v41 }
 0xb32   :  { %2607 = vmatpush1.bf16.msra.mxu0 %v9277_v42  ;;  %2648 = vmatpush1.bf16.msra.mxu1 %v9283_v3 }
 0xb33   :  { %2608 = vmatprep.subr.bf16.mxu0 %v9280_v13  ;;  %2649 = vmatprep.subr.bf16.mxu1 %v9286_v26 }
 0xb36   :  { %2609 = vmatpush1.bf16.msra.mxu0 %v9291_v7  ;;  %2650 = vmatpush1.bf16.msra.mxu1 %v9296_v36 }
 0xb37   :  { %2706 = vmatprep.subr.bf16.mxu0 %v9190_v46  ;;  %2747 = vmatprep.subr.bf16.mxu1 %v9192_v5 }
 0xbec   :  { %v2516_v23 = vpop.f32.mrb[76].mxu0  ;;  %v2557_v44 = vpop.f32.mrb[76].mxu1 }
 0xbed   :  { %v2564_v56 = vadd.f32 %v2516_v23, %v11359_v62  ;;  %v2566_v35 = vadd.f32 %v2557_v44, %v11360_v19  ;;  %v2518_v45 = vpop.f32.mrb[77].mxu0  ;;  %v2559_v10 = vpop.f32.mrb[77].mxu1 }
 0xbee   :  { %v2565_v12 = vadd.f32 %v2518_v45, %v11361_v63  ;;  %v2567_v25 = vadd.f32 %v2559_v10, %v11362_v49  ;;  %v2520_v20 = vpop.f32.mrb[78].mxu0  ;;  %v2561_v16 = vpop.f32.mrb[78].mxu1 }
 0xbef   :  { %v6716_v39 = vmul.f32 -1.442695, %v2564_v56  ;;  %v2521_v15 = vpop.f32.mrb[79].mxu0  ;;  %v2562_v28 = vpop.f32.mrb[79].mxu1  ;;  %v9645_v20 = vld [vmem:[#allocation8] ss:$16 sps:$4 sm:$0xff]  }
 0xbf0   :  { %v6717_v46 = vmul.f32 -1.442695, %v2565_v12  ;;  %v6718_v5 = vmul.f32 -1.442695, %v2567_v25  ;;  %v9648_v16 = vld [vmem:[#allocation8 + $0x8] ss:$16 sps:$4 sm:$0xff]  }
 0xbf1   :  { %7639 = vpow2.f32 %v6716_v39  ;;  %v9651_v39 = vld [vmem:[#allocation8 + $0x24] ss:$16 sps:$4 sm:$0xff]   ;;  %v9654_v15 = vld [vmem:[#allocation8 + $0x2c] ss:$16 sps:$4 sm:$0xff]   ;;  %v9659_v28 = vld [vmem:[#allocation8 + $0x20] ss:$16 sps:$4 sm:$0xff]  }
 0xbf2   :  { %7641 = vpow2.f32 %v6717_v46  ;;  %v9662_v46 = vld [vmem:[#allocation8 + $0x28] ss:$16 sps:$4 sm:$0xff]  }
 0xbf3   :  { %7643 = vpow2.f32 %v6718_v5  ;;  %v9665_v5 = vld [vmem:[#allocation8 + $0x44] ss:$16 sps:$4 sm:$0xff]  }
 0xbf4   :  { %7645 = vtanh.f32 %v2566_v35 }
 0xbfb   :  { %v7640_v43 = vpop.eup %7639 }
 0xbfc   :  { %v7642_v40 = vpop.eup %7641  ;;  %v2571_v27 = vadd.f32 1.0, %v7640_v43  ;;  %v9668_v43 = vld [vmem:[#allocation8 + $0x4c] ss:$16 sps:$4 sm:$0xff]  }
 0xbfd   :  { %v2577_v34 = vadd.f32 1.0, %v7642_v40  ;;  %v7644_v6 = vpop.eup %7643  ;;  %v9671_v40 = vld [vmem:[#allocation8 + $0x40] ss:$16 sps:$4 sm:$0xff]  }
 0xbfe   :  { %7647 = vrcp.f32 %v2571_v27  ;;  %v7646_v60 = vpop.eup %7645  ;;  %v2584_v4 = vadd.f32 1.0, %v7644_v6  ;;  %v9674_v27 = vld [vmem:[#allocation8 + $0x48] ss:$16 sps:$4 sm:$0xff]   ;;  %v9680_v6 = vld [vmem:[#allocation8 + $0x6c] ss:$16 sps:$4 sm:$0xff]  }
 0xbff   :  { %7649 = vrcp.f32 %v2577_v34  ;;  %v9677_v34 = vld [vmem:[#allocation8 + $0x64] ss:$16 sps:$4 sm:$0xff]  }
 0xc00   :  { %7651 = vrcp.f32 %v2584_v4  ;;  %v9695_v4 = vld [vmem:[#allocation8 + $0x80] ss:$16 sps:$4 sm:$0xff]  }
 0xc08   :  { %v7648_v30 = vpop.eup %7647 }
 0xc09   :  { %v7650_v50 = vpop.eup %7649  ;;  %v2588_v1 = vmul.f32 %v7648_v30, %v7646_v60  ;;  %v9683_v60 = vld [vmem:[#allocation8 + $0x60] ss:$16 sps:$4 sm:$0xff]   ;;  %v9686_v30 = vld [vmem:[#allocation8 + $0x68] ss:$16 sps:$4 sm:$0xff]  }
 0xc0a   :  { %v2587_v23 = vmul.f32 %v7650_v50, %v9542_v37  ;;  %v7652_v62 = vpop.eup %7651  ;;  %v9689_v50 = vld [vmem:[#allocation8 + $0x84] ss:$16 sps:$4 sm:$0xff]  }
 0xc0c   :  { %v9588_v44 = vadd.f32 %v2588_v1, %v2587_v23  ;;  %v9692_v1 = vld [vmem:[#allocation8 + $0x8c] ss:$16 sps:$4 sm:$0xff]   ;;  %v9698_v23 = vld [vmem:[#allocation8 + $0x88] ss:$16 sps:$4 sm:$0xff]  }
 0xc0e   :  { %7653 = vtanh.f32 %v9588_v44 }
 0xc18   :  { %v7654_v56 = vpop.eup %7653 }
 0xc19   :  { %v9591_v19 = vmul.f32 %v7654_v56, %v7652_v62  ;;  %v9704_v62 = vld [vmem:[#allocation8 + $0xac] ss:$16 sps:$4 sm:$0xff]   ;;  %v9707_v56 = vld [vmem:[#allocation8 + $0xa0] ss:$16 sps:$4 sm:$0xff]  }
 0xc1b   :  { %v2593_v35 = vpack.c.bf16 %v9591_v19, %v9591_v19 }
 0xc1d   :  { %2627 = vmatmul.mubr.bf16.vlgmr.msra.gmra.mrb[80].mxu0 %v2593_v35  ;;  %2668 = vmatmul.mubr.bf16.vlgmr.msra.gmra.mrb[80].mxu1 %v2593_v35  ;;  %v9710_v35 = vld [vmem:[#allocation8 + $0xa8] ss:$16 sps:$4 sm:$0xff]  }
 0xc1e   :  { %2707 = vmatpush1.bf16.msra.mxu0 %v9194_v57  ;;  %2748 = vmatpush1.bf16.msra.mxu1 %v9200_v47  ;;  %v9627_v57 = vld [vmem:[#allocation8 + $0x4] ss:$16 sps:$4 sm:$0xff]  }
 0xc1f   :  { %2708 = vmatprep.subr.bf16.mxu0 %v9197_v17  ;;  %2749 = vmatprep.subr.bf16.mxu1 %v9202_v48  ;;  %v9630_v17 = vld [vmem:[#allocation8 + $0xc] ss:$16 sps:$4 sm:$0xff]  }
 0xc20   :  { %2738 = vmatprep.mubr.bf16.mxu0 %v11304_v18  ;;  %2779 = vmatprep.mubr.bf16.mxu1 %v11304_v18 }
 0xc22   :  { %2709 = vmatpush1.bf16.msra.mxu0 %v9207_v51  ;;  %2750 = vmatpush1.bf16.msra.mxu1 %v9214_v53  ;;  %v11363_v51 = vld [vmem:[#allocation37_spill] sm:$0xff]  ;;  %v11364_v53 = vld [vmem:[#allocation38_spill] sm:$0xff] }
 0xc23   :  { %2710 = vmatprep.subr.bf16.mxu0 %v9211_v52  ;;  %2751 = vmatprep.subr.bf16.mxu1 %v9218_v54 }
 0xc26   :  { %2711 = vmatpush1.bf16.msra.mxu0 %v9221_v55  ;;  %2752 = vmatpush1.bf16.msra.mxu1 %v9227_v59  ;;  %v11365_v59 = vld [vmem:[#allocation39_spill] sm:$0xff] }
 0xc27   :  { %2712 = vmatprep.subr.bf16.mxu0 %v9224_v58  ;;  %2753 = vmatprep.subr.bf16.mxu1 %v9230_v24 }
 0xc2a   :  { %2713 = vmatpush1.bf16.msra.mxu0 %v9235_v8  ;;  %2754 = vmatpush1.bf16.msra.mxu1 %v9242_v9  ;;  %v11366_v8 = vld [vmem:[#allocation40_spill] sm:$0xff] }
 0xc2b   :  { %2714 = vmatprep.subr.bf16.mxu0 %v9239_v0  ;;  %2755 = vmatprep.subr.bf16.mxu1 %v9246_v11 }
 0xc2e   :  { %2715 = vmatpush1.bf16.msra.mxu0 %v9249_v32  ;;  %2756 = vmatpush1.bf16.msra.mxu1 %v9255_v33 }
 0xc2f   :  { %2716 = vmatprep.subr.bf16.mxu0 %v9252_v31  ;;  %2757 = vmatprep.subr.bf16.mxu1 %v9258_v22 }
 0xc32   :  { %2717 = vmatpush1.bf16.msra.mxu0 %v9263_v38  ;;  %2758 = vmatpush1.bf16.msra.mxu1 %v9270_v2 }
 0xc33   :  { %2718 = vmatprep.subr.bf16.mxu0 %v9267_v61  ;;  %2759 = vmatprep.subr.bf16.mxu1 %v9274_v41 }
 0xc36   :  { %2719 = vmatpush1.bf16.msra.mxu0 %v9277_v42  ;;  %2760 = vmatpush1.bf16.msra.mxu1 %v9283_v3 }
 0xc37   :  { %2720 = vmatprep.subr.bf16.mxu0 %v9280_v13  ;;  %2761 = vmatprep.subr.bf16.mxu1 %v9286_v26 }
 0xc3a   :  { %2721 = vmatpush1.bf16.msra.mxu0 %v9291_v7  ;;  %2762 = vmatpush1.bf16.msra.mxu1 %v9296_v36 }
 0xc3b   :  { %2818 = vmatprep.subr.bf16.mxu0 %v9627_v57  ;;  %2859 = vmatprep.subr.bf16.mxu1 %v9630_v17 }
 0xcf0   :  { %v2628_v47 = vpop.f32.mrb[80].mxu0  ;;  %v2669_v48 = vpop.f32.mrb[80].mxu1 }
 0xcf1   :  { %v2676_v52 = vadd.f32 %v2628_v47, %v11363_v51  ;;  %v2678_v54 = vadd.f32 %v2669_v48, %v11364_v53  ;;  %v2630_v55 = vpop.f32.mrb[81].mxu0  ;;  %v2671_v58 = vpop.f32.mrb[81].mxu1  ;;  %v9713_v47 = vld [vmem:[#allocation8 + $0xc4] ss:$16 sps:$4 sm:$0xff]   ;;  %v9716_v48 = vld [vmem:[#allocation8 + $0xcc] ss:$16 sps:$4 sm:$0xff]  }
 0xcf2   :  { %v2677_v24 = vadd.f32 %v2630_v55, %v11365_v59  ;;  %v2679_v0 = vadd.f32 %v2671_v58, %v11366_v8  ;;  %v2632_v9 = vpop.f32.mrb[82].mxu0  ;;  %v2673_v11 = vpop.f32.mrb[82].mxu1  ;;  %v9719_v51 = vld [vmem:[#allocation8 + $0xc0] ss:$16 sps:$4 sm:$0xff]   ;;  %v9725_v53 = vld [vmem:[#allocation8 + $0xe4] ss:$16 sps:$4 sm:$0xff]  }
 0xcf3   :  { %v6719_v32 = vmul.f32 -1.442695, %v2676_v52  ;;  %v2633_v31 = vpop.f32.mrb[83].mxu0  ;;  %v2674_v33 = vpop.f32.mrb[83].mxu1  ;;  %v9722_v52 = vld [vmem:[#allocation8 + $0xc8] ss:$16 sps:$4 sm:$0xff]  }
 0xcf4   :  { %v6720_v22 = vmul.f32 -1.442695, %v2677_v24  ;;  %v6721_v38 = vmul.f32 -1.442695, %v2679_v0  ;;  %v9731_v55 = vld [vmem:[#allocation8 + $0xe0] ss:$16 sps:$4 sm:$0xff]  }
 0xcf5   :  { %7655 = vpow2.f32 %v6719_v32  ;;  %v9734_v58 = vld [vmem:[#allocation8 + $0xe8] ss:$16 sps:$4 sm:$0xff]   ;;  %v11367_v8 = vld [vmem:[#allocation18_spill] sm:$0xff]  ;;  %v11369_v33 = vld [vmem:[#allocation20_spill] sm:$0xff] }
 0xcf6   :  { %7657 = vpow2.f32 %v6720_v22  ;;  %v11368_v9 = vld [vmem:[#allocation19_spill] sm:$0xff] }
 0xcf7   :  { %7659 = vpow2.f32 %v6721_v38  ;;  %v11370_v38 = vld [vmem:[#allocation21_spill] sm:$0xff] }
 0xcf8   :  { %7661 = vtanh.f32 %v2678_v54  ;;  %v9728_v54 = vld [vmem:[#allocation8 + $0xec] ss:$16 sps:$4 sm:$0xff]  }
 0xcff   :  { %v7656_v61 = vpop.eup %7655 }
 0xd00   :  { %v7658_v2 = vpop.eup %7657  ;;  %v2683_v41 = vadd.f32 1.0, %v7656_v61 }
 0xd01   :  { %v2689_v42 = vadd.f32 1.0, %v7658_v2  ;;  %v7660_v13 = vpop.eup %7659 }
 0xd02   :  { %7663 = vrcp.f32 %v2683_v41  ;;  %v7662_v3 = vpop.eup %7661  ;;  %v2696_v37 = vadd.f32 1.0, %v7660_v13 }
 0xd03   :  { %7665 = vrcp.f32 %v2689_v42 }
 0xd04   :  { %7667 = vrcp.f32 %v2696_v37 }
 0xd0c   :  { %v7664_v26 = vpop.eup %7663 }
 0xd0d   :  { %v7666_v7 = vpop.eup %7665  ;;  %v2700_v36 = vmul.f32 %v7664_v26, %v7662_v3 }
 0xd0e   :  { %v2699_v45 = vmul.f32 %v7666_v7, %v9588_v44  ;;  %v7668_v63 = vpop.eup %7667  ;;  %v9701_v44 = vld [vmem:[#allocation8 + $0xa4] ss:$16 sps:$4 sm:$0xff]  }
 0xd10   :  { %v9638_v10 = vadd.f32 %v2700_v36, %v2699_v45 }
 0xd12   :  { %7669 = vtanh.f32 %v9638_v10 }
 0xd1c   :  { %v7670_v12 = vpop.eup %7669 }
 0xd1d   :  { %v9641_v49 = vmul.f32 %v7670_v12, %v7668_v63 }
 0xd1f   :  { %v2705_v25 = vpack.c.bf16 %v9641_v49, %v9641_v49 }
 0xd21   :  { %2739 = vmatmul.mubr.bf16.vlgmr.msra.gmra.mrb[84].mxu0 %v2705_v25  ;;  %2780 = vmatmul.mubr.bf16.vlgmr.msra.gmra.mrb[84].mxu1 %v2705_v25 }
 0xd22   :  { %2819 = vmatpush1.bf16.msra.mxu0 %v9645_v20  ;;  %2860 = vmatpush1.bf16.msra.mxu1 %v9648_v16 }
 0xd23   :  { %2820 = vmatprep.subr.bf16.mxu0 %v9651_v39  ;;  %2861 = vmatprep.subr.bf16.mxu1 %v9654_v15 }
 0xd24   :  { %2850 = vmatprep.mubr.bf16.mxu0 %v11304_v18  ;;  %2891 = vmatprep.mubr.bf16.mxu1 %v11304_v18 }
 0xd26   :  { %2821 = vmatpush1.bf16.msra.mxu0 %v9659_v28  ;;  %2862 = vmatpush1.bf16.msra.mxu1 %v9662_v46 }
 0xd27   :  { %2822 = vmatprep.subr.bf16.mxu0 %v9665_v5  ;;  %2863 = vmatprep.subr.bf16.mxu1 %v9668_v43 }
 0xd2a   :  { %2823 = vmatpush1.bf16.msra.mxu0 %v9671_v40  ;;  %2864 = vmatpush1.bf16.msra.mxu1 %v9674_v27 }
 0xd2b   :  { %2824 = vmatprep.subr.bf16.mxu0 %v9677_v34  ;;  %2865 = vmatprep.subr.bf16.mxu1 %v9680_v6 }
 0xd2e   :  { %2825 = vmatpush1.bf16.msra.mxu0 %v9683_v60  ;;  %2866 = vmatpush1.bf16.msra.mxu1 %v9686_v30 }
 0xd2f   :  { %2826 = vmatprep.subr.bf16.mxu0 %v9689_v50  ;;  %2867 = vmatprep.subr.bf16.mxu1 %v9692_v1 }
 0xd32   :  { %2827 = vmatpush1.bf16.msra.mxu0 %v9695_v4  ;;  %2868 = vmatpush1.bf16.msra.mxu1 %v9698_v23 }
 0xd33   :  { %2828 = vmatprep.subr.bf16.mxu0 %v9701_v44  ;;  %2869 = vmatprep.subr.bf16.mxu1 %v9704_v62 }
 0xd36   :  { %2829 = vmatpush1.bf16.msra.mxu0 %v9707_v56  ;;  %2870 = vmatpush1.bf16.msra.mxu1 %v9710_v35 }
 0xd37   :  { %2830 = vmatprep.subr.bf16.mxu0 %v9713_v47  ;;  %2871 = vmatprep.subr.bf16.mxu1 %v9716_v48 }
 0xd3a   :  { %2831 = vmatpush1.bf16.msra.mxu0 %v9719_v51  ;;  %2872 = vmatpush1.bf16.msra.mxu1 %v9722_v52 }
 0xd3b   :  { %2832 = vmatprep.subr.bf16.mxu0 %v9725_v53  ;;  %2873 = vmatprep.subr.bf16.mxu1 %v9728_v54 }
 0xd3e   :  { %2833 = vmatpush1.bf16.msra.mxu0 %v9731_v55  ;;  %2874 = vmatpush1.bf16.msra.mxu1 %v9734_v58 }
 0xd3f   :  { %2930 = vmatprep.subr.bf16.mxu0 %v9627_v57  ;;  %2971 = vmatprep.subr.bf16.mxu1 %v9630_v17 }
 0xdf4   :  { %v2740_v59 = vpop.f32.mrb[84].mxu0  ;;  %v2781_v24 = vpop.f32.mrb[84].mxu1 }
 0xdf5   :  { %v2788_v0 = vadd.f32 %v2740_v59, %v11367_v8  ;;  %v2790_v11 = vadd.f32 %v2781_v24, %v11368_v9  ;;  %v2742_v32 = vpop.f32.mrb[85].mxu0  ;;  %v2783_v31 = vpop.f32.mrb[85].mxu1 }
 0xdf6   :  { %v2789_v22 = vadd.f32 %v2742_v32, %v11369_v33  ;;  %v2791_v61 = vadd.f32 %v2783_v31, %v11370_v38  ;;  %v2744_v2 = vpop.f32.mrb[86].mxu0  ;;  %v2785_v41 = vpop.f32.mrb[86].mxu1 }
 0xdf7   :  { %v6722_v42 = vmul.f32 -1.442695, %v2788_v0  ;;  %v2745_v13 = vpop.f32.mrb[87].mxu0  ;;  %v2786_v3 = vpop.f32.mrb[87].mxu1  ;;  %v7175_v41 = vld [vmem:[%s11215_s7] ss:$16 sps:$4 sm:$0xff]  }
 0xdf8   :  { %v6723_v57 = vmul.f32 -1.442695, %v2789_v22  ;;  %v6724_v17 = vmul.f32 -1.442695, %v2791_v61  ;;  %v7183_v3 = vld [vmem:[%s11215_s7 + $0x24] ss:$16 sps:$4 sm:$0xff]  }
 0xdf9   :  { %7671 = vpow2.f32 %v6722_v42  ;;  %v7178_v42 = vld [vmem:[%s11215_s7 + $0x8] ss:$16 sps:$4 sm:$0xff]  }
 0xdfa   :  { %7673 = vpow2.f32 %v6723_v57  ;;  %v7186_v57 = vld [vmem:[%s11215_s7 + $0x2c] ss:$16 sps:$4 sm:$0xff]  }
 0xdfb   :  { %7675 = vpow2.f32 %v6724_v17  ;;  %v7181_v17 = vld [vmem:[%s11215_s7 + $0x20] ss:$16 sps:$4 sm:$0xff]  }
 0xdfc   :  { %7677 = vtanh.f32 %v2790_v11 }
 0xe03   :  { %v7672_v26 = vpop.eup %7671 }
 0xe04   :  { %v7674_v7 = vpop.eup %7673  ;;  %v2795_v36 = vadd.f32 1.0, %v7672_v26  ;;  %v7184_v26 = vld [vmem:[%s11215_s7 + $0x28] ss:$16 sps:$4 sm:$0xff]  }
 0xe05   :  { %v2801_v37 = vadd.f32 1.0, %v7674_v7  ;;  %v7676_v45 = vpop.eup %7675  ;;  %v7189_v7 = vld [vmem:[%s11215_s7 + $0x44] ss:$16 sps:$4 sm:$0xff]  }
 0xe06   :  { %7679 = vrcp.f32 %v2795_v36  ;;  %v7678_v63 = vpop.eup %7677  ;;  %v2808_v24 = vadd.f32 1.0, %v7676_v45  ;;  %v7192_v36 = vld [vmem:[%s11215_s7 + $0x4c] ss:$16 sps:$4 sm:$0xff]   ;;  %v7190_v45 = vld [vmem:[%s11215_s7 + $0x48] ss:$16 sps:$4 sm:$0xff]  }
 0xe07   :  { %7681 = vrcp.f32 %v2801_v37  ;;  %v7187_v37 = vld [vmem:[%s11215_s7 + $0x40] ss:$16 sps:$4 sm:$0xff]  }
 0xe08   :  { %7683 = vrcp.f32 %v2808_v24  ;;  %v7201_v24 = vld [vmem:[%s11215_s7 + $0x84] ss:$16 sps:$4 sm:$0xff]  }
 0xe10   :  { %v7680_v12 = vpop.eup %7679 }
 0xe11   :  { %v7682_v25 = vpop.eup %7681  ;;  %v2812_v59 = vmul.f32 %v7680_v12, %v7678_v63  ;;  %v7195_v63 = vld [vmem:[%s11215_s7 + $0x64] ss:$16 sps:$4 sm:$0xff]   ;;  %v7198_v12 = vld [vmem:[%s11215_s7 + $0x6c] ss:$16 sps:$4 sm:$0xff]  }
 0xe12   :  { %v2811_v8 = vmul.f32 %v7682_v25, %v9638_v10  ;;  %v7684_v9 = vpop.eup %7683  ;;  %v7177_v10 = vld [vmem:[%s11215_s7 + $0x4] ss:$16 sps:$4 sm:$0xff]   ;;  %v7193_v25 = vld [vmem:[%s11215_s7 + $0x60] ss:$16 sps:$4 sm:$0xff]  }
 0xe14   :  { %v9744_v0 = vadd.f32 %v2812_v59, %v2811_v8  ;;  %v7196_v59 = vld [vmem:[%s11215_s7 + $0x68] ss:$16 sps:$4 sm:$0xff]   ;;  %v7204_v8 = vld [vmem:[%s11215_s7 + $0x8c] ss:$16 sps:$4 sm:$0xff]  }
 0xe16   :  { %7685 = vtanh.f32 %v9744_v0 }
 0xe20   :  { %v7686_v32 = vpop.eup %7685 }
 0xe21   :  { %v9747_v31 = vmul.f32 %v7686_v32, %v7684_v9  ;;  %v7202_v9 = vld [vmem:[%s11215_s7 + $0x88] ss:$16 sps:$4 sm:$0xff]   ;;  %v7207_v32 = vld [vmem:[%s11215_s7 + $0xa4] ss:$16 sps:$4 sm:$0xff]  }
 0xe23   :  { %v2817_v11 = vpack.c.bf16 %v9747_v31, %v9747_v31 }
 0xe25   :  { %2851 = vmatmul.mubr.bf16.vlgmr.msra.gmra.mrb[88].mxu0 %v2817_v11  ;;  %2892 = vmatmul.mubr.bf16.vlgmr.msra.gmra.mrb[88].mxu1 %v2817_v11  ;;  %v7210_v11 = vld [vmem:[%s11215_s7 + $0xac] ss:$16 sps:$4 sm:$0xff]  }
 0xe26   :  { %2931 = vmatpush1.bf16.msra.mxu0 %v9645_v20  ;;  %2972 = vmatpush1.bf16.msra.mxu1 %v9648_v16  ;;  %v7180_v20 = vld [vmem:[%s11215_s7 + $0xc] ss:$16 sps:$4 sm:$0xff]  }
 0xe27   :  { %2932 = vmatprep.subr.bf16.mxu0 %v9651_v39  ;;  %2973 = vmatprep.subr.bf16.mxu1 %v9654_v15  ;;  %v11371_v15 = vld [vmem:[#allocation33_spill] sm:$0xff] }
 0xe28   :  { %2962 = vmatprep.mubr.bf16.mxu0 %v11304_v18  ;;  %3003 = vmatprep.mubr.bf16.mxu1 %v11304_v18 }
 0xe2a   :  { %2933 = vmatpush1.bf16.msra.mxu0 %v9659_v28  ;;  %2974 = vmatpush1.bf16.msra.mxu1 %v9662_v46  ;;  %v11372_v46 = vld [vmem:[#allocation34_spill] sm:$0xff] }
 0xe2b   :  { %2934 = vmatprep.subr.bf16.mxu0 %v9665_v5  ;;  %2975 = vmatprep.subr.bf16.mxu1 %v9668_v43 }
 0xe2e   :  { %2935 = vmatpush1.bf16.msra.mxu0 %v9671_v40  ;;  %2976 = vmatpush1.bf16.msra.mxu1 %v9674_v27  ;;  %v11373_v27 = vld [vmem:[#allocation35_spill] sm:$0xff] }
 0xe2f   :  { %2936 = vmatprep.subr.bf16.mxu0 %v9677_v34  ;;  %2977 = vmatprep.subr.bf16.mxu1 %v9680_v6  ;;  %v11374_v6 = vld [vmem:[#allocation36_spill] sm:$0xff] }
 0xe32   :  { %2937 = vmatpush1.bf16.msra.mxu0 %v9683_v60  ;;  %2978 = vmatpush1.bf16.msra.mxu1 %v9686_v30 }
 0xe33   :  { %2938 = vmatprep.subr.bf16.mxu0 %v9689_v50  ;;  %2979 = vmatprep.subr.bf16.mxu1 %v9692_v1 }
 0xe36   :  { %2939 = vmatpush1.bf16.msra.mxu0 %v9695_v4  ;;  %2980 = vmatpush1.bf16.msra.mxu1 %v9698_v23 }
 0xe37   :  { %2940 = vmatprep.subr.bf16.mxu0 %v9701_v44  ;;  %2981 = vmatprep.subr.bf16.mxu1 %v9704_v62 }
 0xe3a   :  { %2941 = vmatpush1.bf16.msra.mxu0 %v9707_v56  ;;  %2982 = vmatpush1.bf16.msra.mxu1 %v9710_v35 }
 0xe3b   :  { %2942 = vmatprep.subr.bf16.mxu0 %v9713_v47  ;;  %2983 = vmatprep.subr.bf16.mxu1 %v9716_v48 }
 0xe3e   :  { %2943 = vmatpush1.bf16.msra.mxu0 %v9719_v51  ;;  %2984 = vmatpush1.bf16.msra.mxu1 %v9722_v52 }
 0xe3f   :  { %2944 = vmatprep.subr.bf16.mxu0 %v9725_v53  ;;  %2985 = vmatprep.subr.bf16.mxu1 %v9728_v54 }
 0xe42   :  { %2945 = vmatpush1.bf16.msra.mxu0 %v9731_v55  ;;  %2986 = vmatpush1.bf16.msra.mxu1 %v9734_v58 }
 0xe43   :  { %3471 = vmatprep.subr.bf16.mxu0 %v7177_v10  ;;  %3544 = vmatprep.subr.bf16.mxu1 %v7180_v20  ;;  %v7205_v10 = vld [vmem:[%s11215_s7 + $0xa0] ss:$16 sps:$4 sm:$0xff]   ;;  %v7208_v20 = vld [vmem:[%s11215_s7 + $0xa8] ss:$16 sps:$4 sm:$0xff]  }
 0xef8   :  { %v2852_v16 = vpop.f32.mrb[88].mxu0  ;;  %v2893_v39 = vpop.f32.mrb[88].mxu1 }
 0xef9   :  { %v2900_v28 = vadd.f32 %v2852_v16, %v11371_v15  ;;  %v2902_v5 = vadd.f32 %v2893_v39, %v11372_v46  ;;  %v2854_v43 = vpop.f32.mrb[89].mxu0  ;;  %v2895_v40 = vpop.f32.mrb[89].mxu1  ;;  %v7213_v16 = vld [vmem:[%s11215_s7 + $0xc4] ss:$16 sps:$4 sm:$0xff]   ;;  %v7216_v39 = vld [vmem:[%s11215_s7 + $0xcc] ss:$16 sps:$4 sm:$0xff]  }
 0xefa   :  { %v2901_v34 = vadd.f32 %v2854_v43, %v11373_v27  ;;  %v2903_v60 = vadd.f32 %v2895_v40, %v11374_v6  ;;  %v2856_v30 = vpop.f32.mrb[90].mxu0  ;;  %v2897_v50 = vpop.f32.mrb[90].mxu1  ;;  %v7211_v15 = vld [vmem:[%s11215_s7 + $0xc0] ss:$16 sps:$4 sm:$0xff]   ;;  %v7219_v46 = vld [vmem:[%s11215_s7 + $0xe4] ss:$16 sps:$4 sm:$0xff]  }
 0xefb   :  { %v6725_v1 = vmul.f32 -1.442695, %v2900_v28  ;;  %v2857_v4 = vpop.f32.mrb[91].mxu0  ;;  %v2898_v23 = vpop.f32.mrb[91].mxu1  ;;  %v7214_v28 = vld [vmem:[%s11215_s7 + $0xc8] ss:$16 sps:$4 sm:$0xff]  }
 0xefc   :  { %v6726_v44 = vmul.f32 -1.442695, %v2901_v34  ;;  %v6727_v62 = vmul.f32 -1.442695, %v2903_v60  ;;  %v7217_v43 = vld [vmem:[%s11215_s7 + $0xe0] ss:$16 sps:$4 sm:$0xff]  }
 0xefd   :  { %7687 = vpow2.f32 %v6725_v1  ;;  %v7220_v40 = vld [vmem:[%s11215_s7 + $0xe8] ss:$16 sps:$4 sm:$0xff]   ;;  %v7225_v27 = vld [vmem:[%s11215_s7 + $0x104] ss:$16 sps:$4 sm:$0xff]   ;;  %v7228_v34 = vld [vmem:[%s11215_s7 + $0x10c] ss:$16 sps:$4 sm:$0xff]  }
 0xefe   :  { %7689 = vpow2.f32 %v6726_v44  ;;  %v7223_v6 = vld [vmem:[%s11215_s7 + $0x100] ss:$16 sps:$4 sm:$0xff]   ;;  %v7226_v60 = vld [vmem:[%s11215_s7 + $0x108] ss:$16 sps:$4 sm:$0xff]   ;;  %v7231_v30 = vld [vmem:[%s11215_s7 + $0x124] ss:$16 sps:$4 sm:$0xff]  }
 0xeff   :  { %7691 = vpow2.f32 %v6727_v62  ;;  %v7234_v50 = vld [vmem:[%s11215_s7 + $0x12c] ss:$16 sps:$4 sm:$0xff]   ;;  %v7229_v1 = vld [vmem:[%s11215_s7 + $0x120] ss:$16 sps:$4 sm:$0xff]   ;;  %v7232_v4 = vld [vmem:[%s11215_s7 + $0x128] ss:$16 sps:$4 sm:$0xff]  }
 0xf00   :  { %7693 = vtanh.f32 %v2902_v5  ;;  %v7222_v5 = vld [vmem:[%s11215_s7 + $0xec] ss:$16 sps:$4 sm:$0xff]   ;;  %v7237_v23 = vld [vmem:[%s11215_s7 + $0x144] ss:$16 sps:$4 sm:$0xff]   ;;  %v7235_v62 = vld [vmem:[%s11215_s7 + $0x140] ss:$16 sps:$4 sm:$0xff]  }
 0xf01   :  { %v7240_v44 = vld [vmem:[%s11215_s7 + $0x14c] ss:$16 sps:$4 sm:$0xff]  }
 0xf07   :  { %v7688_v56 = vpop.eup %7687 }
 0xf08   :  { %v7690_v35 = vpop.eup %7689  ;;  %v2907_v47 = vadd.f32 1.0, %v7688_v56  ;;  %v7238_v56 = vld [vmem:[%s11215_s7 + $0x148] ss:$16 sps:$4 sm:$0xff]  }
 0xf09   :  { %v2913_v48 = vadd.f32 1.0, %v7690_v35  ;;  %v7692_v51 = vpop.eup %7691  ;;  %v7243_v35 = vld [vmem:[%s11215_s7 + $0x164] ss:$16 sps:$4 sm:$0xff]  }
 0xf0a   :  { %7695 = vrcp.f32 %v2907_v47  ;;  %v7694_v52 = vpop.eup %7693  ;;  %v2920_v58 = vadd.f32 1.0, %v7692_v51  ;;  %v7246_v47 = vld [vmem:[%s11215_s7 + $0x16c] ss:$16 sps:$4 sm:$0xff]   ;;  %v7244_v51 = vld [vmem:[%s11215_s7 + $0x168] ss:$16 sps:$4 sm:$0xff]  }
 0xf0b   :  { %7697 = vrcp.f32 %v2913_v48  ;;  %v7241_v48 = vld [vmem:[%s11215_s7 + $0x160] ss:$16 sps:$4 sm:$0xff]  }
 0xf0c   :  { %7699 = vrcp.f32 %v2920_v58  ;;  %v7255_v58 = vld [vmem:[%s11215_s7 + $0x1a4] ss:$16 sps:$4 sm:$0xff]  }
 0xf14   :  { %v7696_v53 = vpop.eup %7695 }
 0xf15   :  { %v7698_v54 = vpop.eup %7697  ;;  %v2924_v55 = vmul.f32 %v7696_v53, %v7694_v52  ;;  %v7249_v52 = vld [vmem:[%s11215_s7 + $0x184] ss:$16 sps:$4 sm:$0xff]   ;;  %v7252_v53 = vld [vmem:[%s11215_s7 + $0x18c] ss:$16 sps:$4 sm:$0xff]  }
 0xf16   :  { %v2923_v33 = vmul.f32 %v7698_v54, %v9744_v0  ;;  %v7700_v38 = vpop.eup %7699  ;;  %v7199_v0 = vld [vmem:[%s11215_s7 + $0x80] ss:$16 sps:$4 sm:$0xff]  }
 0xf17   :  { %v7247_v54 = vld [vmem:[%s11215_s7 + $0x180] ss:$16 sps:$4 sm:$0xff]  }
 0xf18   :  { %v9794_v22 = vadd.f32 %v2924_v55, %v2923_v33  ;;  %v7250_v55 = vld [vmem:[%s11215_s7 + $0x188] ss:$16 sps:$4 sm:$0xff]   ;;  %v7258_v33 = vld [vmem:[%s11215_s7 + $0x1ac] ss:$16 sps:$4 sm:$0xff]  }
 0xf1a   :  { %7701 = vtanh.f32 %v9794_v22 }
 0xf24   :  { %v7702_v61 = vpop.eup %7701 }
 0xf25   :  { %v9797_v2 = vmul.f32 %v7702_v61, %v7700_v38  ;;  %v7253_v38 = vld [vmem:[%s11215_s7 + $0x1a0] ss:$16 sps:$4 sm:$0xff]   ;;  %v7256_v61 = vld [vmem:[%s11215_s7 + $0x1a8] ss:$16 sps:$4 sm:$0xff]  }
 0xf27   :  { %v2929_v13 = vpack.c.bf16 %v9797_v2, %v9797_v2 }
 0xf29   :  { %2963 = vmatmul.mubr.bf16.vlgmr.msra.gmra.mrb[92].mxu0 %v2929_v13  ;;  %3004 = vmatmul.mubr.bf16.vlgmr.msra.gmra.mrb[92].mxu1 %v2929_v13  ;;  %v7259_v13 = vld [vmem:[%s11215_s7 + $0x1c0] ss:$16 sps:$4 sm:$0xff]  }
 0xf2a   :  { %3472 = vmatpush1.bf16.msra.mxu0 %v7175_v41  ;;  %3545 = vmatpush1.bf16.msra.mxu1 %v7178_v42  ;;  %v7261_v41 = vld [vmem:[%s11215_s7 + $0x1c4] ss:$16 sps:$4 sm:$0xff]   ;;  %v7264_v42 = vld [vmem:[%s11215_s7 + $0x1cc] ss:$16 sps:$4 sm:$0xff]  }
 0xf2b   :  { %3473 = vmatprep.subr.bf16.mxu0 %v7183_v3  ;;  %3546 = vmatprep.subr.bf16.mxu1 %v7186_v57  ;;  %v7262_v3 = vld [vmem:[%s11215_s7 + $0x1c8] ss:$16 sps:$4 sm:$0xff]   ;;  %v7267_v57 = vld [vmem:[%s11215_s7 + $0x1e4] ss:$16 sps:$4 sm:$0xff]  }
 0xf2e   :  { %3474 = vmatpush1.bf16.msra.mxu0 %v7181_v17  ;;  %3547 = vmatpush1.bf16.msra.mxu1 %v7184_v26  ;;  %v7270_v17 = vld [vmem:[%s11215_s7 + $0x1ec] ss:$16 sps:$4 sm:$0xff]   ;;  %v7265_v26 = vld [vmem:[%s11215_s7 + $0x1e0] ss:$16 sps:$4 sm:$0xff]  }
 0xf2f   :  { %3475 = vmatprep.subr.bf16.mxu0 %v7189_v7  ;;  %3548 = vmatprep.subr.bf16.mxu1 %v7192_v36  ;;  %v7268_v7 = vld [vmem:[%s11215_s7 + $0x1e8] ss:$16 sps:$4 sm:$0xff]  }
 0xf30   :  { %v9987_v36 = vld [vmem:[#allocation9 + $0x4] ss:$16 sps:$4 sm:$0xff]  }
 0xf32   :  { %3476 = vmatpush1.bf16.msra.mxu0 %v7187_v37  ;;  %3549 = vmatpush1.bf16.msra.mxu1 %v7190_v45  ;;  %v9989_v37 = vld [vmem:[#allocation9 + $0xc] ss:$16 sps:$4 sm:$0xff]  }
 0xf33   :  { %3477 = vmatprep.subr.bf16.mxu0 %v7195_v63  ;;  %3550 = vmatprep.subr.bf16.mxu1 %v7198_v12  ;;  %v11375_v12 = vld [vmem:[#allocation29_spill] sm:$0xff] }
 0xf36   :  { %3478 = vmatpush1.bf16.msra.mxu0 %v7193_v25  ;;  %3551 = vmatpush1.bf16.msra.mxu1 %v7196_v59  ;;  %v11376_v59 = vld [vmem:[#allocation30_spill] sm:$0xff] }
 0xf37   :  { %3479 = vmatprep.subr.bf16.mxu0 %v7201_v24  ;;  %3552 = vmatprep.subr.bf16.mxu1 %v7204_v8 }
 0xf3a   :  { %3480 = vmatpush1.bf16.msra.mxu0 %v7199_v0  ;;  %3553 = vmatpush1.bf16.msra.mxu1 %v7202_v9  ;;  %v11377_v9 = vld [vmem:[#allocation31_spill] sm:$0xff] }
 0xf3b   :  { %3481 = vmatprep.subr.bf16.mxu0 %v7207_v32  ;;  %3554 = vmatprep.subr.bf16.mxu1 %v7210_v11  ;;  %v11378_v11 = vld [vmem:[#allocation32_spill] sm:$0xff] }
 0xf3e   :  { %3482 = vmatpush1.bf16.msra.mxu0 %v7205_v10  ;;  %3555 = vmatpush1.bf16.msra.mxu1 %v7208_v20 }
 0xf3f   :  { %3483 = vmatprep.subr.bf16.mxu0 %v7213_v16  ;;  %3556 = vmatprep.subr.bf16.mxu1 %v7216_v39 }
 0xf42   :  { %3484 = vmatpush1.bf16.msra.mxu0 %v7211_v15  ;;  %3557 = vmatpush1.bf16.msra.mxu1 %v7214_v28 }
 0xf43   :  { %3485 = vmatprep.subr.bf16.mxu0 %v7219_v46  ;;  %3558 = vmatprep.subr.bf16.mxu1 %v7222_v5 }
 0xf46   :  { %3486 = vmatpush1.bf16.msra.mxu0 %v7217_v43  ;;  %3559 = vmatpush1.bf16.msra.mxu1 %v7220_v40 }
 0xf47   :  { %3487 = vmatprep.subr.bf16.mxu0 %v7225_v27  ;;  %3560 = vmatprep.subr.bf16.mxu1 %v7228_v34 }
 0xf4a   :  { %3488 = vmatpush1.bf16.msra.mxu0 %v7223_v6  ;;  %3561 = vmatpush1.bf16.msra.mxu1 %v7226_v60 }
 0xf4b   :  { %3489 = vmatprep.subr.bf16.mxu0 %v7231_v30  ;;  %3562 = vmatprep.subr.bf16.mxu1 %v7234_v50 }
 0xf4e   :  { %3490 = vmatpush1.bf16.msra.mxu0 %v7229_v1  ;;  %3563 = vmatpush1.bf16.msra.mxu1 %v7232_v4 }
 0xf4f   :  { %3491 = vmatprep.subr.bf16.mxu0 %v7237_v23  ;;  %3564 = vmatprep.subr.bf16.mxu1 %v7240_v44 }
 0xf52   :  { %3492 = vmatpush1.bf16.msra.mxu0 %v7235_v62  ;;  %3565 = vmatpush1.bf16.msra.mxu1 %v7238_v56 }
 0xf53   :  { %3493 = vmatprep.subr.bf16.mxu0 %v7243_v35  ;;  %3566 = vmatprep.subr.bf16.mxu1 %v7246_v47 }
 0xf56   :  { %3494 = vmatpush1.bf16.msra.mxu0 %v7241_v48  ;;  %3567 = vmatpush1.bf16.msra.mxu1 %v7244_v51  ;;  %v11380_v48 = vld [vmem:[#allocation41_spill] sm:$0xff]  ;;  %v11381_v51 = vld [vmem:[#allocation42_spill] sm:$0xff] }
 0xf57   :  { %3495 = vmatprep.subr.bf16.mxu0 %v7249_v52  ;;  %3568 = vmatprep.subr.bf16.mxu1 %v7252_v53  ;;  %v10003_v52 = vpack.c.bf16 %v11381_v51, %v11380_v48  ;;  %v10005_v53 = vld [vmem:[#allocation9] ss:$16 sps:$4 sm:$0xff]  }
 0xf59   :  { %11382 = vst [vmem:[#allocation51_spill] sm:$0xff] %v10003_v52 }
 0xf5a   :  { %3496 = vmatpush1.bf16.msra.mxu0 %v7247_v54  ;;  %3569 = vmatpush1.bf16.msra.mxu1 %v7250_v55  ;;  %v10007_v54 = vld [vmem:[#allocation9 + $0x8] ss:$16 sps:$4 sm:$0xff]   ;;  %v10015_v55 = vld [vmem:[#allocation9 + $0x24] ss:$16 sps:$4 sm:$0xff]  }
 0xf5b   :  { %3497 = vmatprep.subr.bf16.mxu0 %v7255_v58  ;;  %3570 = vmatprep.subr.bf16.mxu1 %v7258_v33  ;;  %v10025_v58 = vld [vmem:[#allocation9 + $0x20] ss:$16 sps:$4 sm:$0xff]   ;;  %v10033_v33 = vld [vmem:[#allocation9 + $0x4c] ss:$16 sps:$4 sm:$0xff]  }
 0xf5e   :  { %3498 = vmatpush1.bf16.msra.mxu0 %v7253_v38  ;;  %3571 = vmatpush1.bf16.msra.mxu1 %v7256_v61  ;;  %v11384_v38 = vld [vmem:[#allocation43_spill] sm:$0xff]  ;;  %v11385_v61 = vld [vmem:[#allocation44_spill] sm:$0xff] }
 0xf5f   :  { %3499 = vmatprep.subr.bf16.mxu0 %v7261_v41  ;;  %3572 = vmatprep.subr.bf16.mxu1 %v7264_v42  ;;  %v10039_v41 = vpack.c.bf16 %v11385_v61, %v11384_v38  ;;  %v10041_v42 = vld [vmem:[#allocation9 + $0x40] ss:$16 sps:$4 sm:$0xff]  }
 0xf61   :  { %11386 = vst [vmem:[#allocation47_spill] sm:$0xff] %v10039_v41 }
 0xf62   :  { %3500 = vmatpush1.bf16.msra.mxu0 %v7259_v13  ;;  %3573 = vmatpush1.bf16.msra.mxu1 %v7262_v3  ;;  %v10043_v13 = vld [vmem:[#allocation9 + $0x48] ss:$16 sps:$4 sm:$0xff]   ;;  %v10049_v3 = vpack.c.bf16 %v9545_v21, %v9591_v19  ;;  %v10067_v19 = vld [vmem:[#allocation9 + $0x84] ss:$16 sps:$4 sm:$0xff]  }
 0xf63   :  { %3501 = vmatprep.subr.bf16.mxu0 %v7267_v57  ;;  %3574 = vmatprep.subr.bf16.mxu1 %v7270_v17  ;;  %v10051_v57 = vld [vmem:[#allocation9 + $0x64] ss:$16 sps:$4 sm:$0xff]   ;;  %v10053_v17 = vld [vmem:[#allocation9 + $0x6c] ss:$16 sps:$4 sm:$0xff]   ;;  %v10063_v21 = vld [vmem:[#allocation9 + $0x68] ss:$16 sps:$4 sm:$0xff]  }
 0xf64   :  { %11387 = vst [vmem:[#allocation48_spill] sm:$0xff] %v10049_v3 }
 0xf66   :  { %3502 = vmatpush1.bf16.msra.mxu0 %v7265_v26  ;;  %3575 = vmatpush1.bf16.msra.mxu1 %v7268_v7  ;;  %v10061_v26 = vld [vmem:[#allocation9 + $0x60] ss:$16 sps:$4 sm:$0xff]   ;;  %v10069_v7 = vld [vmem:[#allocation9 + $0x8c] ss:$16 sps:$4 sm:$0xff]  }
 0xf67   :  { %3809 = vmatprep.subr.bf16.mxu0 %v9987_v36  ;;  %3850 = vmatprep.subr.bf16.mxu1 %v9989_v37 }
 0xffc   :  { %v2964_v45 = vpop.f32.mrb[92].mxu0  ;;  %v3005_v63 = vpop.f32.mrb[92].mxu1 }
 0xffd   :  { %v3012_v25 = vadd.f32 %v2964_v45, %v11375_v12  ;;  %v3014_v24 = vadd.f32 %v3005_v63, %v11376_v59  ;;  %v2966_v8 = vpop.f32.mrb[93].mxu0  ;;  %v3007_v0 = vpop.f32.mrb[93].mxu1  ;;  %v11388_v45 = vld [vmem:[#allocation26_spill] sm:$0xff]  ;;  %v11389_v63 = vld [vmem:[#allocation27_spill] sm:$0xff] }
 0xffe   :  { %v3013_v32 = vadd.f32 %v2966_v8, %v11377_v9  ;;  %v3015_v10 = vadd.f32 %v3007_v0, %v11378_v11  ;;  %v2968_v20 = vpop.f32.mrb[94].mxu0  ;;  %v3009_v16 = vpop.f32.mrb[94].mxu1  ;;  %v10075_v12 = vpack.c.bf16 %v11389_v63, %v11388_v45  ;;  %v10079_v59 = vld [vmem:[#allocation9 + $0x88] ss:$16 sps:$4 sm:$0xff]   ;;  %v10087_v8 = vld [vmem:[#allocation9 + $0xa4] ss:$16 sps:$4 sm:$0xff]  }
 0xfff   :  { %v6728_v39 = vmul.f32 -1.442695, %v3012_v25  ;;  %v2969_v15 = vpop.f32.mrb[95].mxu0  ;;  %v3010_v28 = vpop.f32.mrb[95].mxu1  ;;  %v10077_v25 = vld [vmem:[#allocation9 + $0x80] ss:$16 sps:$4 sm:$0xff]  }
0x1000   :  { %v6729_v46 = vmul.f32 -1.442695, %v3013_v32  ;;  %v6730_v5 = vmul.f32 -1.442695, %v3015_v10  ;;  %11390 = vst [vmem:[#allocation49_spill] sm:$0xff] %v10075_v12  ;;  %v11392_v11 = vld [vmem:[#allocation28_spill] sm:$0xff] }
0x1001   :  { %7703 = vpow2.f32 %v6728_v39  ;;  %v10089_v0 = vld [vmem:[#allocation9 + $0xac] ss:$16 sps:$4 sm:$0xff]   ;;  %v10097_v9 = vld [vmem:[#allocation9 + $0xa0] ss:$16 sps:$4 sm:$0xff]   ;;  %v10115_v39 = vld [vmem:[#allocation9 + $0xc8] ss:$16 sps:$4 sm:$0xff]  }
0x1002   :  { %7705 = vpow2.f32 %v6729_v46  ;;  %v10105_v32 = vld [vmem:[#allocation9 + $0xcc] ss:$16 sps:$4 sm:$0xff]   ;;  %v10113_v16 = vld [vmem:[#allocation9 + $0xc0] ss:$16 sps:$4 sm:$0xff]   ;;  %v10119_v15 = vld [vmem:[#allocation9 + $0xe4] ss:$16 sps:$4 sm:$0xff]  }
0x1003   :  { %7707 = vpow2.f32 %v6730_v5  ;;  %v11393_v10 = vld [vmem:[#allocation45_spill] sm:$0xff]  ;;  %v10129_v46 = vld [vmem:[#allocation9 + $0xe0] ss:$16 sps:$4 sm:$0xff]  }
0x1004   :  { %7709 = vtanh.f32 %v3014_v24  ;;  %v10085_v24 = vpack.c.bf16 %v9453_v29, %v9499_v14  ;;  %v10099_v29 = vld [vmem:[#allocation9 + $0xa8] ss:$16 sps:$4 sm:$0xff]   ;;  %v10103_v14 = vld [vmem:[#allocation9 + $0xc4] ss:$16 sps:$4 sm:$0xff]   ;;  %v10111_v20 = vpack.c.bf16 %v11393_v10, %v11392_v11  ;;  %v10121_v28 = vld [vmem:[#allocation9 + $0xec] ss:$16 sps:$4 sm:$0xff]  }
0x1005   :  { %v10131_v5 = vld [vmem:[#allocation9 + $0xe8] ss:$16 sps:$4 sm:$0xff]  }
0x1006   :  { %11391 = vst [vmem:[#allocation37_spill] sm:$0xff] %v10085_v24  ;;  %11394 = vst [vmem:[#allocation38_spill] sm:$0xff] %v10111_v20 }
0x100b   :  { %v7704_v43 = vpop.eup %7703 }
0x100c   :  { %v7706_v40 = vpop.eup %7705  ;;  %v3019_v27 = vadd.f32 1.0, %v7704_v43  ;;  %v3129_v43 = vld [vmem:[%s11217_s9] sm:$0xf] }
0x100d   :  { %v3025_v34 = vadd.f32 1.0, %v7706_v40  ;;  %v7708_v6 = vpop.eup %7707 }
0x100e   :  { %7711 = vrcp.f32 %v3019_v27  ;;  %v7710_v60 = vpop.eup %7709  ;;  %v3032_v4 = vadd.f32 1.0, %v7708_v6 }
0x100f   :  { %7713 = vrcp.f32 %v3025_v34  ;;  %v11395_v34 = vld [vmem:[#allocation24_spill] sm:$0xff] }
0x1010   :  { %7715 = vrcp.f32 %v3032_v4  ;;  %v3134_v6 = vrot.slane %v3129_v43, %v11395_v34  ;;  %v11397_v4 = vld [vmem:[#allocation25_spill] sm:$0xff] }
0x1018   :  { %v7712_v30 = vpop.eup %7711 }
0x1019   :  { %v7714_v50 = vpop.eup %7713  ;;  %v3036_v1 = vmul.f32 %v7712_v30, %v7710_v60  ;;  %v11396_v60 = vld [vmem:[#allocation22_spill] sm:$0xff] }
0x101a   :  { %v3035_v23 = vmul.f32 %v7714_v50, %v9794_v22  ;;  %v7716_v62 = vpop.eup %7715  ;;  %v10013_v22 = vpack.c.bf16 %v9641_v49, %v9747_v31  ;;  %v10027_v49 = vld [vmem:[#allocation9 + $0x28] ss:$16 sps:$4 sm:$0xff]   ;;  %v10031_v31 = vld [vmem:[#allocation9 + $0x44] ss:$16 sps:$4 sm:$0xff]   ;;  %v3142_v30 = vrot.slane %v3129_v43, %v11396_v60 }
0x101c   :  { %v3037_v44 = vadd.f32 %v3036_v1, %v3035_v23  ;;  %11383 = vst [vmem:[#allocation46_spill] sm:$0xff] %v10013_v22  ;;  %v3138_v23 = vrot.slane %v3129_v43, %v11397_v4 }
0x101e   :  { %7717 = vtanh.f32 %v3037_v44  ;;  %v11398_v44 = vld [vmem:[#allocation23_spill] sm:$0xff] }
0x1028   :  { %v7718_v56 = vpop.eup %7717 }
0x1029   :  { %v3039_v35 = vmul.f32 %v7718_v56, %v7716_v62  ;;  %v3146_v62 = vrot.slane %v3129_v43, %v11398_v44 }
0x102b   :  { %v9999_v47 = vpack.c.bf16 %v9797_v2, %v3039_v35  ;;  %v10017_v2 = vld [vmem:[#allocation9 + $0x2c] ss:$16 sps:$4 sm:$0xff]  }
0x102d   :  { %11379 = vst [vmem:[#allocation50_spill] sm:$0xff] %v9999_v47  ;;  %3503 = vmatprep.mubr.bf16.mxu0 %v9999_v47  ;;  %3576 = vmatprep.mubr.bf16.mxu1 %v9999_v47 }
0x102e   :  { %3504 = vmatmul.mubr.bf16.vlgmr.msra.gmra.mrb[96].mxu0 %v10003_v52  ;;  %3577 = vmatmul.mubr.bf16.vlgmr.msra.gmra.mrb[96].mxu1 %v10003_v52 }
0x102f   :  { %3513 = vmatprep.mubr.bf16.mxu0 %v10013_v22  ;;  %3586 = vmatprep.mubr.bf16.mxu1 %v10013_v22 }
0x1030   :  { %3810 = vmatpush1.bf16.msra.mxu0 %v10005_v53  ;;  %3851 = vmatpush1.bf16.msra.mxu1 %v10007_v54 }
0x1031   :  { %3811 = vmatprep.subr.bf16.mxu0 %v10015_v55  ;;  %3852 = vmatprep.subr.bf16.mxu1 %v10017_v2 }
0x1034   :  { %3812 = vmatpush1.bf16.msra.mxu0 %v10025_v58  ;;  %3853 = vmatpush1.bf16.msra.mxu1 %v10027_v49 }
0x1035   :  { %3813 = vmatprep.subr.bf16.mxu0 %v10031_v31  ;;  %3854 = vmatprep.subr.bf16.mxu1 %v10033_v33 }
0x1036   :  { %3514 = vmatmul.mubr.bf16.gmra.mrb[100].mxu0 %v10039_v41  ;;  %3587 = vmatmul.mubr.bf16.gmra.mrb[100].mxu1 %v10039_v41 }
0x1037   :  { %3523 = vmatprep.mubr.bf16.mxu0 %v10049_v3  ;;  %3596 = vmatprep.mubr.bf16.mxu1 %v10049_v3 }
0x1038   :  { %3814 = vmatpush1.bf16.msra.mxu0 %v10041_v42  ;;  %3855 = vmatpush1.bf16.msra.mxu1 %v10043_v13 }
0x1039   :  { %3815 = vmatprep.subr.bf16.mxu0 %v10051_v57  ;;  %3856 = vmatprep.subr.bf16.mxu1 %v10053_v17 }
0x103c   :  { %3816 = vmatpush1.bf16.msra.mxu0 %v10061_v26  ;;  %3857 = vmatpush1.bf16.msra.mxu1 %v10063_v21 }
0x103d   :  { %3817 = vmatprep.subr.bf16.mxu0 %v10067_v19  ;;  %3858 = vmatprep.subr.bf16.mxu1 %v10069_v7 }
0x103e   :  { %3524 = vmatmul.mubr.bf16.gmra.mrb[104].mxu0 %v10075_v12  ;;  %3597 = vmatmul.mubr.bf16.gmra.mrb[104].mxu1 %v10075_v12 }
0x103f   :  { %3533 = vmatprep.mubr.bf16.mxu0 %v10085_v24  ;;  %3606 = vmatprep.mubr.bf16.mxu1 %v10085_v24 }
0x1040   :  { %3818 = vmatpush1.bf16.msra.mxu0 %v10077_v25  ;;  %3859 = vmatpush1.bf16.msra.mxu1 %v10079_v59 }
0x1041   :  { %3819 = vmatprep.subr.bf16.mxu0 %v10087_v8  ;;  %3860 = vmatprep.subr.bf16.mxu1 %v10089_v0 }
0x1044   :  { %3820 = vmatpush1.bf16.msra.mxu0 %v10097_v9  ;;  %3861 = vmatpush1.bf16.msra.mxu1 %v10099_v29 }
0x1045   :  { %3821 = vmatprep.subr.bf16.mxu0 %v10103_v14  ;;  %3862 = vmatprep.subr.bf16.mxu1 %v10105_v32 }
0x1046   :  { %3534 = vmatmul.mubr.bf16.gmra.mrb[108].mxu0 %v10111_v20  ;;  %3607 = vmatmul.mubr.bf16.gmra.mrb[108].mxu1 %v10111_v20 }
0x1047   :  { %3841 = vmatprep.mubr.bf16.mxu0 %v11304_v18  ;;  %3882 = vmatprep.mubr.bf16.mxu1 %v11304_v18 }
0x1048   :  { %3822 = vmatpush1.bf16.msra.mxu0 %v10113_v16  ;;  %3863 = vmatpush1.bf16.msra.mxu1 %v10115_v39 }
0x1049   :  { %3823 = vmatprep.subr.bf16.mxu0 %v10119_v15  ;;  %3864 = vmatprep.subr.bf16.mxu1 %v10121_v28 }
0x104c   :  { %3824 = vmatpush1.bf16.msra.mxu0 %v10129_v46  ;;  %3865 = vmatpush1.bf16.msra.mxu1 %v10131_v5 }
0x104d   :  { %3921 = vmatprep.subr.bf16.mxu0 %v9987_v36  ;;  %3962 = vmatprep.subr.bf16.mxu1 %v9989_v37 }
0x104f   :  { %3842 = vmatmul.mubr.bf16.vlgmr.msra.gmra.mrb[112].mxu0 %v11304_v18  ;;  %3883 = vmatmul.mubr.bf16.vlgmr.msra.gmra.mrb[112].mxu1 %v11304_v18 }
0x1050   :  { %3922 = vmatpush1.bf16.msra.mxu0 %v10005_v53  ;;  %3963 = vmatpush1.bf16.msra.mxu1 %v10007_v54 }
0x1051   :  { %3923 = vmatprep.subr.bf16.mxu0 %v10015_v55  ;;  %3964 = vmatprep.subr.bf16.mxu1 %v10017_v2 }
0x1052   :  { %3953 = vmatprep.mubr.bf16.mxu0 %v11304_v18  ;;  %3994 = vmatprep.mubr.bf16.mxu1 %v11304_v18 }
0x1054   :  { %3924 = vmatpush1.bf16.msra.mxu0 %v10025_v58  ;;  %3965 = vmatpush1.bf16.msra.mxu1 %v10027_v49 }
0x1055   :  { %3925 = vmatprep.subr.bf16.mxu0 %v10031_v31  ;;  %3966 = vmatprep.subr.bf16.mxu1 %v10033_v33 }
0x1058   :  { %3926 = vmatpush1.bf16.msra.mxu0 %v10041_v42  ;;  %3967 = vmatpush1.bf16.msra.mxu1 %v10043_v13 }
0x1059   :  { %3927 = vmatprep.subr.bf16.mxu0 %v10051_v57  ;;  %3968 = vmatprep.subr.bf16.mxu1 %v10053_v17 }
0x105c   :  { %3928 = vmatpush1.bf16.msra.mxu0 %v10061_v26  ;;  %3969 = vmatpush1.bf16.msra.mxu1 %v10063_v21 }
0x105d   :  { %3929 = vmatprep.subr.bf16.mxu0 %v10067_v19  ;;  %3970 = vmatprep.subr.bf16.mxu1 %v10069_v7 }
0x1060   :  { %3930 = vmatpush1.bf16.msra.mxu0 %v10077_v25  ;;  %3971 = vmatpush1.bf16.msra.mxu1 %v10079_v59 }
0x1061   :  { %3931 = vmatprep.subr.bf16.mxu0 %v10087_v8  ;;  %3972 = vmatprep.subr.bf16.mxu1 %v10089_v0 }
0x1064   :  { %3932 = vmatpush1.bf16.msra.mxu0 %v10097_v9  ;;  %3973 = vmatpush1.bf16.msra.mxu1 %v10099_v29 }
0x1065   :  { %3933 = vmatprep.subr.bf16.mxu0 %v10103_v14  ;;  %3974 = vmatprep.subr.bf16.mxu1 %v10105_v32 }
0x1068   :  { %3934 = vmatpush1.bf16.msra.mxu0 %v10113_v16  ;;  %3975 = vmatpush1.bf16.msra.mxu1 %v10115_v39 }
0x1069   :  { %3935 = vmatprep.subr.bf16.mxu0 %v10119_v15  ;;  %3976 = vmatprep.subr.bf16.mxu1 %v10121_v28 }
0x106c   :  { %3936 = vmatpush1.bf16.msra.mxu0 %v10129_v46  ;;  %3977 = vmatpush1.bf16.msra.mxu1 %v10131_v5 }
0x106d   :  { %4033 = vmatprep.subr.bf16.mxu0 %v9987_v36  ;;  %4074 = vmatprep.subr.bf16.mxu1 %v9989_v37 }
0x1101   :  { %v10178_v40 = vpop.f32.mrb[96].mxu0  ;;  %v10180_v27 = vpop.f32.mrb[96].mxu1 }
0x1102   :  { %v3507_v50 = vpop.f32.mrb[97].mxu0  ;;  %v3580_v1 = vpop.f32.mrb[97].mxu1 }
0x1103   :  { %v3509_v56 = vpop.f32.mrb[98].mxu0  ;;  %v3582_v35 = vpop.f32.mrb[98].mxu1 }
0x1104   :  { %v10186_v48 = vadd.f32 %v3509_v56, %v3134_v6  ;;  %v10188_v51 = vadd.f32 %v3582_v35, %v3142_v30  ;;  %v3511_v38 = vpop.f32.mrb[99].mxu0  ;;  %v3584_v61 = vpop.f32.mrb[99].mxu1 }
0x1105   :  { %v10190_v45 = vadd.f32 %v3511_v38, %v3138_v23  ;;  %v10192_v63 = vadd.f32 %v3584_v61, %v3146_v62 }
0x1109   :  { %v3515_v11 = vpop.f32.mrb[100].mxu0  ;;  %v3588_v10 = vpop.f32.mrb[100].mxu1 }
0x110a   :  { %v10194_v60 = vadd.f32 %v3515_v11, %v3134_v6  ;;  %v10196_v34 = vadd.f32 %v3588_v10, %v3142_v30  ;;  %v3517_v4 = vpop.f32.mrb[101].mxu0  ;;  %v3590_v43 = vpop.f32.mrb[101].mxu1 }
0x110b   :  { %v10198_v44 = vadd.f32 %v3517_v4, %v3138_v23  ;;  %v10200_v56 = vadd.f32 %v3590_v43, %v3146_v62  ;;  %v3519_v35 = vpop.f32.mrb[102].mxu0  ;;  %v3592_v20 = vpop.f32.mrb[102].mxu1 }
0x110c   :  { %11399 = vst [vmem:[#allocation39_spill] sm:$0xff] %v10196_v34  ;;  %v10202_v24 = vadd.f32 %v3519_v35, %v3134_v6  ;;  %v10204_v38 = vadd.f32 %v3592_v20, %v3142_v30  ;;  %v3521_v61 = vpop.f32.mrb[103].mxu0  ;;  %v3594_v12 = vpop.f32.mrb[103].mxu1 }
0x110d   :  { %11400 = vst [vmem:[#allocation40_spill] sm:$0xff] %v10198_v44  ;;  %11401 = vst [vmem:[#allocation18_spill] sm:$0xff] %v10200_v56  ;;  %v10206_v3 = vadd.f32 %v3521_v61, %v3138_v23  ;;  %v10208_v11 = vadd.f32 %v3594_v12, %v3146_v62 }
0x110e   :  { %11402 = vst [vmem:[#allocation19_spill] sm:$0xff] %v10202_v24  ;;  %11403 = vst [vmem:[#allocation20_spill] sm:$0xff] %v10204_v38 }
0x110f   :  { %11404 = vst [vmem:[#allocation21_spill] sm:$0xff] %v10206_v3  ;;  %11405 = vst [vmem:[#allocation33_spill] sm:$0xff] %v10208_v11 }
0x1111   :  { %v3525_v10 = vpop.f32.mrb[104].mxu0  ;;  %v3598_v41 = vpop.f32.mrb[104].mxu1 }
0x1112   :  { %v10210_v22 = vadd.f32 %v3525_v10, %v3134_v6  ;;  %v10212_v4 = vadd.f32 %v3598_v41, %v3142_v30  ;;  %v3527_v43 = vpop.f32.mrb[105].mxu0  ;;  %v3600_v52 = vpop.f32.mrb[105].mxu1 }
0x1113   :  { %v10214_v47 = vadd.f32 %v3527_v43, %v3138_v23  ;;  %v10216_v35 = vadd.f32 %v3600_v52, %v3146_v62  ;;  %v3529_v20 = vpop.f32.mrb[106].mxu0  ;;  %v3602_v38 = vpop.f32.mrb[106].mxu1 }
0x1114   :  { %11406 = vst [vmem:[#allocation34_spill] sm:$0xff] %v10210_v22  ;;  %11407 = vst [vmem:[#allocation35_spill] sm:$0xff] %v10212_v4  ;;  %v10218_v24 = vadd.f32 %v3529_v20, %v3134_v6  ;;  %v10220_v61 = vadd.f32 %v3602_v38, %v3142_v30  ;;  %v3531_v12 = vpop.f32.mrb[107].mxu0  ;;  %v3604_v11 = vpop.f32.mrb[107].mxu1 }
0x1115   :  { %11408 = vst [vmem:[#allocation36_spill] sm:$0xff] %v10214_v47  ;;  %11409 = vst [vmem:[#allocation29_spill] sm:$0xff] %v10216_v35  ;;  %v10222_v3 = vadd.f32 %v3531_v12, %v3138_v23  ;;  %v10224_v10 = vadd.f32 %v3604_v11, %v3146_v62 }
0x1116   :  { %11410 = vst [vmem:[#allocation30_spill] sm:$0xff] %v10218_v24  ;;  %11411 = vst [vmem:[#allocation31_spill] sm:$0xff] %v10220_v61 }
0x1117   :  { %11412 = vst [vmem:[#allocation32_spill] sm:$0xff] %v10222_v3  ;;  %11413 = vst [vmem:[#allocation41_spill] sm:$0xff] %v10224_v10 }
0x1119   :  { %v3535_v41 = vpop.f32.mrb[108].mxu0  ;;  %v3608_v4 = vpop.f32.mrb[108].mxu1 }
0x111a   :  { %v10226_v22 = vadd.f32 %v3535_v41, %v3134_v6  ;;  %v10228_v43 = vadd.f32 %v3608_v4, %v3142_v30  ;;  %v3537_v52 = vpop.f32.mrb[109].mxu0  ;;  %v3610_v35 = vpop.f32.mrb[109].mxu1  ;;  %v3506_v4 = vadd.f32 %v10178_v40, %v3134_v6 }
0x111b   :  { %v10230_v47 = vadd.f32 %v3537_v52, %v3138_v23  ;;  %v10232_v20 = vadd.f32 %v3610_v35, %v3146_v62  ;;  %v3539_v38 = vpop.f32.mrb[110].mxu0  ;;  %v3612_v61 = vpop.f32.mrb[110].mxu1  ;;  %v3508_v52 = vadd.f32 %v3507_v50, %v3138_v23 }
0x111c   :  { %11414 = vst [vmem:[#allocation42_spill] sm:$0xff] %v10226_v22  ;;  %11415 = vst [vmem:[#allocation43_spill] sm:$0xff] %v10228_v43  ;;  %v10234_v24 = vadd.f32 %v3539_v38, %v3134_v6  ;;  %v10236_v12 = vadd.f32 %v3612_v61, %v3142_v30  ;;  %v3541_v11 = vpop.f32.mrb[111].mxu0  ;;  %v3614_v10 = vpop.f32.mrb[111].mxu1  ;;  %v3579_v43 = vadd.f32 %v10180_v27, %v3142_v30 }
0x111d   :  { %11416 = vst [vmem:[#allocation44_spill] sm:$0xff] %v10230_v47  ;;  %11417 = vst [vmem:[#allocation26_spill] sm:$0xff] %v10232_v20  ;;  %v10238_v3 = vadd.f32 %v3541_v11, %v3138_v23  ;;  %v10240_v41 = vadd.f32 %v3614_v10, %v3146_v62  ;;  %v3581_v47 = vadd.f32 %v3580_v1, %v3146_v62 }
0x111e   :  { %11418 = vst [vmem:[#allocation27_spill] sm:$0xff] %v10234_v24  ;;  %11419 = vst [vmem:[#allocation28_spill] sm:$0xff] %v10236_v12 }
0x111f   :  { %11420 = vst [vmem:[#allocation45_spill] sm:$0xff] %v10238_v3  ;;  %11421 = vst [vmem:[#allocation52_spill] sm:$0xff] %v10240_v41 }
0x1122   :  { %v3843_v35 = vpop.f32.mrb[112].mxu0  ;;  %v3884_v20 = vpop.f32.mrb[112].mxu1 }
0x1123   :  { %v3891_v22 = vadd.f32 %v3843_v35, %v3506_v4  ;;  %v3893_v56 = vadd.f32 %v3884_v20, %v3579_v43  ;;  %v3845_v38 = vpop.f32.mrb[113].mxu0  ;;  %v3886_v24 = vpop.f32.mrb[113].mxu1 }
0x1124   :  { %v3892_v61 = vadd.f32 %v3845_v38, %v3508_v52  ;;  %v3894_v12 = vadd.f32 %v3886_v24, %v3581_v47  ;;  %v3847_v44 = vpop.f32.mrb[114].mxu0  ;;  %v3888_v34 = vpop.f32.mrb[114].mxu1 }
0x1125   :  { %v6827_v11 = vmul.f32 -1.442695, %v3891_v22  ;;  %v3848_v3 = vpop.f32.mrb[115].mxu0  ;;  %v3889_v10 = vpop.f32.mrb[115].mxu1 }
0x1126   :  { %v6828_v41 = vmul.f32 -1.442695, %v3892_v61  ;;  %v6829_v40 = vmul.f32 -1.442695, %v3894_v12 }
0x1127   :  { %7719 = vpow2.f32 %v6827_v11 }
0x1128   :  { %7721 = vpow2.f32 %v6828_v41 }
0x1129   :  { %7723 = vpow2.f32 %v6829_v40 }
0x112a   :  { %7725 = vtanh.f32 %v3893_v56 }
0x1131   :  { %v7720_v27 = vpop.eup %7719 }
0x1132   :  { %v7722_v6 = vpop.eup %7721  ;;  %v3898_v30 = vadd.f32 1.0, %v7720_v27 }
0x1133   :  { %v3904_v50 = vadd.f32 1.0, %v7722_v6  ;;  %v7724_v1 = vpop.eup %7723 }
0x1134   :  { %7727 = vrcp.f32 %v3898_v30  ;;  %v7726_v23 = vpop.eup %7725  ;;  %v3911_v22 = vadd.f32 1.0, %v7724_v1 }
0x1135   :  { %7729 = vrcp.f32 %v3904_v50 }
0x1136   :  { %7731 = vrcp.f32 %v3911_v22 }
0x113e   :  { %v7728_v47 = vpop.eup %7727 }
0x113f   :  { %v7730_v24 = vpop.eup %7729  ;;  %v3915_v34 = vmul.f32 %v7728_v47, %v7726_v23 }
0x1140   :  { %v3914_v3 = vmul.f32 0.0, %v7730_v24  ;;  %v7732_v62 = vpop.eup %7731 }
0x1142   :  { %v10244_v44 = vadd.f32 %v3915_v34, %v3914_v3 }
0x1144   :  { %7733 = vtanh.f32 %v10244_v44 }
0x114e   :  { %v7734_v43 = vpop.eup %7733 }
0x114f   :  { %v10247_v20 = vmul.f32 %v7734_v43, %v7732_v62 }
0x1151   :  { %11422 = vst [vmem:[#allocation53_spill] sm:$0xff] %v10247_v20  ;;  %v3920_v56 = vpack.c.bf16 %v10247_v20, %v10247_v20 }
0x1153   :  { %3954 = vmatmul.mubr.bf16.vlgmr.msra.gmra.mrb[116].mxu0 %v3920_v56  ;;  %3995 = vmatmul.mubr.bf16.vlgmr.msra.gmra.mrb[116].mxu1 %v3920_v56 }
0x1154   :  { %4034 = vmatpush1.bf16.msra.mxu0 %v10005_v53  ;;  %4075 = vmatpush1.bf16.msra.mxu1 %v10007_v54 }
0x1155   :  { %4035 = vmatprep.subr.bf16.mxu0 %v10015_v55  ;;  %4076 = vmatprep.subr.bf16.mxu1 %v10017_v2 }
0x1156   :  { %4065 = vmatprep.mubr.bf16.mxu0 %v11304_v18  ;;  %4106 = vmatprep.mubr.bf16.mxu1 %v11304_v18 }
0x1158   :  { %4036 = vmatpush1.bf16.msra.mxu0 %v10025_v58  ;;  %4077 = vmatpush1.bf16.msra.mxu1 %v10027_v49 }
0x1159   :  { %4037 = vmatprep.subr.bf16.mxu0 %v10031_v31  ;;  %4078 = vmatprep.subr.bf16.mxu1 %v10033_v33 }
0x115c   :  { %4038 = vmatpush1.bf16.msra.mxu0 %v10041_v42  ;;  %4079 = vmatpush1.bf16.msra.mxu1 %v10043_v13 }
0x115d   :  { %4039 = vmatprep.subr.bf16.mxu0 %v10051_v57  ;;  %4080 = vmatprep.subr.bf16.mxu1 %v10053_v17 }
0x1160   :  { %4040 = vmatpush1.bf16.msra.mxu0 %v10061_v26  ;;  %4081 = vmatpush1.bf16.msra.mxu1 %v10063_v21 }
0x1161   :  { %4041 = vmatprep.subr.bf16.mxu0 %v10067_v19  ;;  %4082 = vmatprep.subr.bf16.mxu1 %v10069_v7 }
0x1164   :  { %4042 = vmatpush1.bf16.msra.mxu0 %v10077_v25  ;;  %4083 = vmatpush1.bf16.msra.mxu1 %v10079_v59 }
0x1165   :  { %4043 = vmatprep.subr.bf16.mxu0 %v10087_v8  ;;  %4084 = vmatprep.subr.bf16.mxu1 %v10089_v0 }
0x1168   :  { %4044 = vmatpush1.bf16.msra.mxu0 %v10097_v9  ;;  %4085 = vmatpush1.bf16.msra.mxu1 %v10099_v29 }
0x1169   :  { %4045 = vmatprep.subr.bf16.mxu0 %v10103_v14  ;;  %4086 = vmatprep.subr.bf16.mxu1 %v10105_v32 }
0x116c   :  { %4046 = vmatpush1.bf16.msra.mxu0 %v10113_v16  ;;  %4087 = vmatpush1.bf16.msra.mxu1 %v10115_v39 }
0x116d   :  { %4047 = vmatprep.subr.bf16.mxu0 %v10119_v15  ;;  %4088 = vmatprep.subr.bf16.mxu1 %v10121_v28 }
0x1170   :  { %4048 = vmatpush1.bf16.msra.mxu0 %v10129_v46  ;;  %4089 = vmatpush1.bf16.msra.mxu1 %v10131_v5 }
0x1171   :  { %4145 = vmatprep.subr.bf16.mxu0 %v9987_v36  ;;  %4186 = vmatprep.subr.bf16.mxu1 %v9989_v37 }
0x1226   :  { %v3955_v12 = vpop.f32.mrb[116].mxu0  ;;  %v3996_v41 = vpop.f32.mrb[116].mxu1 }
0x1227   :  { %v4003_v4 = vadd.f32 %v3955_v12, %v10186_v48  ;;  %v4005_v52 = vadd.f32 %v3996_v41, %v10188_v51  ;;  %v3957_v35 = vpop.f32.mrb[117].mxu0  ;;  %v3998_v38 = vpop.f32.mrb[117].mxu1 }
0x1228   :  { %v4004_v61 = vadd.f32 %v3957_v35, %v10190_v45  ;;  %v4006_v11 = vadd.f32 %v3998_v38, %v10192_v63  ;;  %v3959_v10 = vpop.f32.mrb[118].mxu0  ;;  %v4000_v40 = vpop.f32.mrb[118].mxu1  ;;  %v11424_v38 = vld [vmem:[#allocation39_spill] sm:$0xff] }
0x1229   :  { %v6830_v27 = vmul.f32 -1.442695, %v4003_v4  ;;  %v3960_v6 = vpop.f32.mrb[119].mxu0  ;;  %v4001_v30 = vpop.f32.mrb[119].mxu1  ;;  %v11425_v40 = vld [vmem:[#allocation40_spill] sm:$0xff] }
0x122a   :  { %v6831_v50 = vmul.f32 -1.442695, %v4004_v61  ;;  %v6832_v1 = vmul.f32 -1.442695, %v4006_v11  ;;  %v11426_v6 = vld [vmem:[#allocation18_spill] sm:$0xff] }
0x122b   :  { %7735 = vpow2.f32 %v6830_v27 }
0x122c   :  { %7737 = vpow2.f32 %v6831_v50 }
0x122d   :  { %7739 = vpow2.f32 %v6832_v1 }
0x122e   :  { %7741 = vtanh.f32 %v4005_v52 }
0x1235   :  { %v7736_v23 = vpop.eup %7735 }
0x1236   :  { %v7738_v47 = vpop.eup %7737  ;;  %v4010_v48 = vadd.f32 1.0, %v7736_v23 }
0x1237   :  { %v4016_v51 = vadd.f32 1.0, %v7738_v47  ;;  %v7740_v45 = vpop.eup %7739 }
0x1238   :  { %7743 = vrcp.f32 %v4010_v48  ;;  %v7742_v24 = vpop.eup %7741  ;;  %v4023_v3 = vadd.f32 1.0, %v7740_v45 }
0x1239   :  { %7745 = vrcp.f32 %v4016_v51 }
0x123a   :  { %7747 = vrcp.f32 %v4023_v3 }
0x1242   :  { %v7744_v63 = vpop.eup %7743 }
0x1243   :  { %v7746_v34 = vpop.eup %7745  ;;  %v4027_v22 = vmul.f32 %v7744_v63, %v7742_v24 }
0x1244   :  { %v4026_v62 = vmul.f32 %v7746_v34, %v10244_v44  ;;  %v7748_v56 = vpop.eup %7747 }
0x1246   :  { %v10290_v43 = vadd.f32 %v4027_v22, %v4026_v62 }
0x1248   :  { %7749 = vtanh.f32 %v10290_v43 }
0x1252   :  { %v7750_v12 = vpop.eup %7749 }
0x1253   :  { %v10293_v41 = vmul.f32 %v7750_v12, %v7748_v56 }
0x1255   :  { %11423 = vst [vmem:[#allocation54_spill] sm:$0xff] %v10293_v41  ;;  %v4032_v4 = vpack.c.bf16 %v10293_v41, %v10293_v41 }
0x1257   :  { %4066 = vmatmul.mubr.bf16.vlgmr.msra.gmra.mrb[120].mxu0 %v4032_v4  ;;  %4107 = vmatmul.mubr.bf16.vlgmr.msra.gmra.mrb[120].mxu1 %v4032_v4 }
0x1258   :  { %4146 = vmatpush1.bf16.msra.mxu0 %v10005_v53  ;;  %4187 = vmatpush1.bf16.msra.mxu1 %v10007_v54 }
0x1259   :  { %4147 = vmatprep.subr.bf16.mxu0 %v10015_v55  ;;  %4188 = vmatprep.subr.bf16.mxu1 %v10017_v2 }
0x125a   :  { %4177 = vmatprep.mubr.bf16.mxu0 %v11304_v18  ;;  %4218 = vmatprep.mubr.bf16.mxu1 %v11304_v18 }
0x125c   :  { %4148 = vmatpush1.bf16.msra.mxu0 %v10025_v58  ;;  %4189 = vmatpush1.bf16.msra.mxu1 %v10027_v49 }
0x125d   :  { %4149 = vmatprep.subr.bf16.mxu0 %v10031_v31  ;;  %4190 = vmatprep.subr.bf16.mxu1 %v10033_v33 }
0x1260   :  { %4150 = vmatpush1.bf16.msra.mxu0 %v10041_v42  ;;  %4191 = vmatpush1.bf16.msra.mxu1 %v10043_v13 }
0x1261   :  { %4151 = vmatprep.subr.bf16.mxu0 %v10051_v57  ;;  %4192 = vmatprep.subr.bf16.mxu1 %v10053_v17 }
0x1264   :  { %4152 = vmatpush1.bf16.msra.mxu0 %v10061_v26  ;;  %4193 = vmatpush1.bf16.msra.mxu1 %v10063_v21 }
0x1265   :  { %4153 = vmatprep.subr.bf16.mxu0 %v10067_v19  ;;  %4194 = vmatprep.subr.bf16.mxu1 %v10069_v7 }
0x1268   :  { %4154 = vmatpush1.bf16.msra.mxu0 %v10077_v25  ;;  %4195 = vmatpush1.bf16.msra.mxu1 %v10079_v59 }
0x1269   :  { %4155 = vmatprep.subr.bf16.mxu0 %v10087_v8  ;;  %4196 = vmatprep.subr.bf16.mxu1 %v10089_v0 }
0x126c   :  { %4156 = vmatpush1.bf16.msra.mxu0 %v10097_v9  ;;  %4197 = vmatpush1.bf16.msra.mxu1 %v10099_v29 }
0x126d   :  { %4157 = vmatprep.subr.bf16.mxu0 %v10103_v14  ;;  %4198 = vmatprep.subr.bf16.mxu1 %v10105_v32 }
0x1270   :  { %4158 = vmatpush1.bf16.msra.mxu0 %v10113_v16  ;;  %4199 = vmatpush1.bf16.msra.mxu1 %v10115_v39 }
0x1271   :  { %4159 = vmatprep.subr.bf16.mxu0 %v10119_v15  ;;  %4200 = vmatprep.subr.bf16.mxu1 %v10121_v28 }
0x1274   :  { %4160 = vmatpush1.bf16.msra.mxu0 %v10129_v46  ;;  %4201 = vmatpush1.bf16.msra.mxu1 %v10131_v5 }
0x1275   :  { %4257 = vmatprep.subr.bf16.mxu0 %v9987_v36  ;;  %4298 = vmatprep.subr.bf16.mxu1 %v9989_v37 }
0x132a   :  { %v4067_v44 = vpop.f32.mrb[120].mxu0  ;;  %v4108_v52 = vpop.f32.mrb[120].mxu1 }
0x132b   :  { %v4115_v35 = vadd.f32 %v4067_v44, %v10194_v60  ;;  %v4117_v61 = vadd.f32 %v4108_v52, %v11424_v38  ;;  %v4069_v11 = vpop.f32.mrb[121].mxu0  ;;  %v4110_v10 = vpop.f32.mrb[121].mxu1 }
0x132c   :  { %v4116_v27 = vadd.f32 %v4069_v11, %v11425_v40  ;;  %v4118_v30 = vadd.f32 %v4110_v10, %v11426_v6  ;;  %v4071_v50 = vpop.f32.mrb[122].mxu0  ;;  %v4112_v1 = vpop.f32.mrb[122].mxu1  ;;  %v11428_v40 = vld [vmem:[#allocation19_spill] sm:$0xff]  ;;  %v11429_v6 = vld [vmem:[#allocation20_spill] sm:$0xff] }
0x132d   :  { %v6833_v23 = vmul.f32 -1.442695, %v4115_v35  ;;  %v4072_v47 = vpop.f32.mrb[123].mxu0  ;;  %v4113_v48 = vpop.f32.mrb[123].mxu1 }
0x132e   :  { %v6834_v51 = vmul.f32 -1.442695, %v4116_v27  ;;  %v6835_v45 = vmul.f32 -1.442695, %v4118_v30  ;;  %v11431_v48 = vld [vmem:[#allocation33_spill] sm:$0xff] }
0x132f   :  { %7751 = vpow2.f32 %v6833_v23  ;;  %v11430_v23 = vld [vmem:[#allocation21_spill] sm:$0xff] }
0x1330   :  { %7753 = vpow2.f32 %v6834_v51 }
0x1331   :  { %7755 = vpow2.f32 %v6835_v45 }
0x1332   :  { %7757 = vtanh.f32 %v4117_v61 }
0x1339   :  { %v7752_v24 = vpop.eup %7751 }
0x133a   :  { %v7754_v63 = vpop.eup %7753  ;;  %v4122_v60 = vadd.f32 1.0, %v7752_v24 }
0x133b   :  { %v4128_v34 = vadd.f32 1.0, %v7754_v63  ;;  %v7756_v22 = vpop.eup %7755 }
0x133c   :  { %7759 = vrcp.f32 %v4122_v60  ;;  %v7758_v3 = vpop.eup %7757  ;;  %v4135_v4 = vadd.f32 1.0, %v7756_v22 }
0x133d   :  { %7761 = vrcp.f32 %v4128_v34 }
0x133e   :  { %7763 = vrcp.f32 %v4135_v4 }
0x1346   :  { %v7760_v62 = vpop.eup %7759 }
0x1347   :  { %v7762_v56 = vpop.eup %7761  ;;  %v4139_v12 = vmul.f32 %v7760_v62, %v7758_v3 }
0x1348   :  { %v4138_v44 = vmul.f32 %v7762_v56, %v10290_v43  ;;  %v7764_v35 = vpop.eup %7763 }
0x134a   :  { %v10336_v52 = vadd.f32 %v4139_v12, %v4138_v44 }
0x134c   :  { %7765 = vtanh.f32 %v10336_v52 }
0x1356   :  { %v7766_v38 = vpop.eup %7765 }
0x1357   :  { %v10339_v11 = vmul.f32 %v7766_v38, %v7764_v35 }
0x1359   :  { %11427 = vst [vmem:[#allocation39_spill] sm:$0xff] %v10339_v11  ;;  %v4144_v61 = vpack.c.bf16 %v10339_v11, %v10339_v11 }
0x135b   :  { %4178 = vmatmul.mubr.bf16.vlgmr.msra.gmra.mrb[124].mxu0 %v4144_v61  ;;  %4219 = vmatmul.mubr.bf16.vlgmr.msra.gmra.mrb[124].mxu1 %v4144_v61 }
0x135c   :  { %4258 = vmatpush1.bf16.msra.mxu0 %v10005_v53  ;;  %4299 = vmatpush1.bf16.msra.mxu1 %v10007_v54 }
0x135d   :  { %4259 = vmatprep.subr.bf16.mxu0 %v10015_v55  ;;  %4300 = vmatprep.subr.bf16.mxu1 %v10017_v2 }
0x135e   :  { %4289 = vmatprep.mubr.bf16.mxu0 %v11304_v18  ;;  %4330 = vmatprep.mubr.bf16.mxu1 %v11304_v18 }
0x1360   :  { %4260 = vmatpush1.bf16.msra.mxu0 %v10025_v58  ;;  %4301 = vmatpush1.bf16.msra.mxu1 %v10027_v49 }
0x1361   :  { %4261 = vmatprep.subr.bf16.mxu0 %v10031_v31  ;;  %4302 = vmatprep.subr.bf16.mxu1 %v10033_v33 }
0x1364   :  { %4262 = vmatpush1.bf16.msra.mxu0 %v10041_v42  ;;  %4303 = vmatpush1.bf16.msra.mxu1 %v10043_v13 }
0x1365   :  { %4263 = vmatprep.subr.bf16.mxu0 %v10051_v57  ;;  %4304 = vmatprep.subr.bf16.mxu1 %v10053_v17 }
0x1368   :  { %4264 = vmatpush1.bf16.msra.mxu0 %v10061_v26  ;;  %4305 = vmatpush1.bf16.msra.mxu1 %v10063_v21 }
0x1369   :  { %4265 = vmatprep.subr.bf16.mxu0 %v10067_v19  ;;  %4306 = vmatprep.subr.bf16.mxu1 %v10069_v7 }
0x136c   :  { %4266 = vmatpush1.bf16.msra.mxu0 %v10077_v25  ;;  %4307 = vmatpush1.bf16.msra.mxu1 %v10079_v59 }
0x136d   :  { %4267 = vmatprep.subr.bf16.mxu0 %v10087_v8  ;;  %4308 = vmatprep.subr.bf16.mxu1 %v10089_v0 }
0x1370   :  { %4268 = vmatpush1.bf16.msra.mxu0 %v10097_v9  ;;  %4309 = vmatpush1.bf16.msra.mxu1 %v10099_v29 }
0x1371   :  { %4269 = vmatprep.subr.bf16.mxu0 %v10103_v14  ;;  %4310 = vmatprep.subr.bf16.mxu1 %v10105_v32 }
0x1374   :  { %4270 = vmatpush1.bf16.msra.mxu0 %v10113_v16  ;;  %4311 = vmatpush1.bf16.msra.mxu1 %v10115_v39 }
0x1375   :  { %4271 = vmatprep.subr.bf16.mxu0 %v10119_v15  ;;  %4312 = vmatprep.subr.bf16.mxu1 %v10121_v28 }
0x1378   :  { %4272 = vmatpush1.bf16.msra.mxu0 %v10129_v46  ;;  %4313 = vmatpush1.bf16.msra.mxu1 %v10131_v5 }
0x1379   :  { %4369 = vmatprep.subr.bf16.mxu0 %v9987_v36  ;;  %4410 = vmatprep.subr.bf16.mxu1 %v9989_v37 }
0x142e   :  { %v4179_v43 = vpop.f32.mrb[124].mxu0  ;;  %v4220_v10 = vpop.f32.mrb[124].mxu1 }
0x142f   :  { %v4227_v27 = vadd.f32 %v4179_v43, %v11428_v40  ;;  %v4229_v30 = vadd.f32 %v4220_v10, %v11429_v6  ;;  %v4181_v50 = vpop.f32.mrb[125].mxu0  ;;  %v4222_v1 = vpop.f32.mrb[125].mxu1 }
0x1430   :  { %v4228_v47 = vadd.f32 %v4181_v50, %v11430_v23  ;;  %v4230_v51 = vadd.f32 %v4222_v1, %v11431_v48  ;;  %v4183_v45 = vpop.f32.mrb[126].mxu0  ;;  %v4224_v24 = vpop.f32.mrb[126].mxu1 }
0x1431   :  { %v6836_v63 = vmul.f32 -1.442695, %v4227_v27  ;;  %v4184_v60 = vpop.f32.mrb[127].mxu0  ;;  %v4225_v34 = vpop.f32.mrb[127].mxu1 }
0x1432   :  { %v6837_v36 = vmul.f32 -1.442695, %v4228_v47  ;;  %v6838_v37 = vmul.f32 -1.442695, %v4230_v51 }
0x1433   :  { %7767 = vpow2.f32 %v6836_v63 }
0x1434   :  { %7769 = vpow2.f32 %v6837_v36 }
0x1435   :  { %7771 = vpow2.f32 %v6838_v37 }
0x1436   :  { %7773 = vtanh.f32 %v4229_v30 }
0x143d   :  { %v7768_v22 = vpop.eup %7767 }
0x143e   :  { %v7770_v3 = vpop.eup %7769  ;;  %v4234_v62 = vadd.f32 1.0, %v7768_v22 }
0x143f   :  { %v4240_v56 = vadd.f32 1.0, %v7770_v3  ;;  %v7772_v12 = vpop.eup %7771 }
0x1440   :  { %7775 = vrcp.f32 %v4234_v62  ;;  %v7774_v4 = vpop.eup %7773  ;;  %v4247_v61 = vadd.f32 1.0, %v7772_v12 }
0x1441   :  { %7777 = vrcp.f32 %v4240_v56 }
0x1442   :  { %7779 = vrcp.f32 %v4247_v61 }
0x144a   :  { %v7776_v44 = vpop.eup %7775 }
0x144b   :  { %v7778_v35 = vpop.eup %7777  ;;  %v4251_v38 = vmul.f32 %v7776_v44, %v7774_v4 }
0x144c   :  { %v4250_v43 = vmul.f32 %v7778_v35, %v10336_v52  ;;  %v7780_v40 = vpop.eup %7779  ;;  %v11436_v52 = vld [vmem:[#allocation29_spill] sm:$0xff] }
0x144e   :  { %v10382_v10 = vadd.f32 %v4251_v38, %v4250_v43 }
0x1450   :  { %7781 = vtanh.f32 %v10382_v10 }
0x145a   :  { %v7782_v27 = vpop.eup %7781 }
0x145b   :  { %v10385_v6 = vmul.f32 %v7782_v27, %v7780_v40  ;;  %v10439_v40 = vld [vmem:[#allocation9] ss:$16 sps:$4 sm:$0xff]   ;;  %v10442_v27 = vld [vmem:[#allocation9 + $0x8] ss:$16 sps:$4 sm:$0xff]  }
0x145d   :  { %11432 = vst [vmem:[#allocation40_spill] sm:$0xff] %v10385_v6  ;;  %v4256_v30 = vpack.c.bf16 %v10385_v6, %v10385_v6 }
0x145f   :  { %4290 = vmatmul.mubr.bf16.vlgmr.msra.gmra.mrb[128].mxu0 %v4256_v30  ;;  %4331 = vmatmul.mubr.bf16.vlgmr.msra.gmra.mrb[128].mxu1 %v4256_v30  ;;  %v10448_v30 = vld [vmem:[#allocation9 + $0x2c] ss:$16 sps:$4 sm:$0xff]  }
0x1460   :  { %4370 = vmatpush1.bf16.msra.mxu0 %v10005_v53  ;;  %4411 = vmatpush1.bf16.msra.mxu1 %v10007_v54  ;;  %v10421_v53 = vld [vmem:[#allocation9 + $0x4] ss:$16 sps:$4 sm:$0xff]   ;;  %v10424_v54 = vld [vmem:[#allocation9 + $0xc] ss:$16 sps:$4 sm:$0xff]  }
0x1461   :  { %4371 = vmatprep.subr.bf16.mxu0 %v10015_v55  ;;  %4412 = vmatprep.subr.bf16.mxu1 %v10017_v2 }
0x1462   :  { %4401 = vmatprep.mubr.bf16.mxu0 %v11304_v18  ;;  %4442 = vmatprep.mubr.bf16.mxu1 %v11304_v18 }
0x1464   :  { %4372 = vmatpush1.bf16.msra.mxu0 %v10025_v58  ;;  %4413 = vmatpush1.bf16.msra.mxu1 %v10027_v49  ;;  %v11433_v58 = vld [vmem:[#allocation34_spill] sm:$0xff] }
0x1465   :  { %4373 = vmatprep.subr.bf16.mxu0 %v10031_v31  ;;  %4414 = vmatprep.subr.bf16.mxu1 %v10033_v33  ;;  %v11434_v31 = vld [vmem:[#allocation35_spill] sm:$0xff] }
0x1468   :  { %4374 = vmatpush1.bf16.msra.mxu0 %v10041_v42  ;;  %4415 = vmatpush1.bf16.msra.mxu1 %v10043_v13 }
0x1469   :  { %4375 = vmatprep.subr.bf16.mxu0 %v10051_v57  ;;  %4416 = vmatprep.subr.bf16.mxu1 %v10053_v17  ;;  %v11435_v57 = vld [vmem:[#allocation36_spill] sm:$0xff] }
0x146c   :  { %4376 = vmatpush1.bf16.msra.mxu0 %v10061_v26  ;;  %4417 = vmatpush1.bf16.msra.mxu1 %v10063_v21 }
0x146d   :  { %4377 = vmatprep.subr.bf16.mxu0 %v10067_v19  ;;  %4418 = vmatprep.subr.bf16.mxu1 %v10069_v7 }
0x1470   :  { %4378 = vmatpush1.bf16.msra.mxu0 %v10077_v25  ;;  %4419 = vmatpush1.bf16.msra.mxu1 %v10079_v59 }
0x1471   :  { %4379 = vmatprep.subr.bf16.mxu0 %v10087_v8  ;;  %4420 = vmatprep.subr.bf16.mxu1 %v10089_v0 }
0x1474   :  { %4380 = vmatpush1.bf16.msra.mxu0 %v10097_v9  ;;  %4421 = vmatpush1.bf16.msra.mxu1 %v10099_v29 }
0x1475   :  { %4381 = vmatprep.subr.bf16.mxu0 %v10103_v14  ;;  %4422 = vmatprep.subr.bf16.mxu1 %v10105_v32 }
0x1478   :  { %4382 = vmatpush1.bf16.msra.mxu0 %v10113_v16  ;;  %4423 = vmatpush1.bf16.msra.mxu1 %v10115_v39 }
0x1479   :  { %4383 = vmatprep.subr.bf16.mxu0 %v10119_v15  ;;  %4424 = vmatprep.subr.bf16.mxu1 %v10121_v28 }
0x147c   :  { %4384 = vmatpush1.bf16.msra.mxu0 %v10129_v46  ;;  %4425 = vmatpush1.bf16.msra.mxu1 %v10131_v5 }
0x147d   :  { %4481 = vmatprep.subr.bf16.mxu0 %v10421_v53  ;;  %4522 = vmatprep.subr.bf16.mxu1 %v10424_v54 }
0x1532   :  { %v4291_v55 = vpop.f32.mrb[128].mxu0  ;;  %v4332_v2 = vpop.f32.mrb[128].mxu1 }
0x1533   :  { %v4339_v49 = vadd.f32 %v4291_v55, %v11433_v58  ;;  %v4341_v33 = vadd.f32 %v4332_v2, %v11434_v31  ;;  %v4293_v42 = vpop.f32.mrb[129].mxu0  ;;  %v4334_v13 = vpop.f32.mrb[129].mxu1  ;;  %v10453_v55 = vld [vmem:[#allocation9 + $0x20] ss:$16 sps:$4 sm:$0xff]   ;;  %v10456_v2 = vld [vmem:[#allocation9 + $0x28] ss:$16 sps:$4 sm:$0xff]  }
0x1534   :  { %v4340_v17 = vadd.f32 %v4293_v42, %v11435_v57  ;;  %v4342_v50 = vadd.f32 %v4334_v13, %v11436_v52  ;;  %v4295_v1 = vpop.f32.mrb[130].mxu0  ;;  %v4336_v23 = vpop.f32.mrb[130].mxu1  ;;  %v10459_v58 = vld [vmem:[#allocation9 + $0x44] ss:$16 sps:$4 sm:$0xff]   ;;  %v10465_v31 = vld [vmem:[#allocation9 + $0x40] ss:$16 sps:$4 sm:$0xff]  }
0x1535   :  { %v6839_v47 = vmul.f32 -1.442695, %v4339_v49  ;;  %v4296_v48 = vpop.f32.mrb[131].mxu0  ;;  %v4337_v51 = vpop.f32.mrb[131].mxu1  ;;  %v10462_v49 = vld [vmem:[#allocation9 + $0x4c] ss:$16 sps:$4 sm:$0xff]  }
0x1536   :  { %v6840_v45 = vmul.f32 -1.442695, %v4340_v17  ;;  %v6841_v24 = vmul.f32 -1.442695, %v4342_v50  ;;  %v10471_v42 = vld [vmem:[#allocation9 + $0x64] ss:$16 sps:$4 sm:$0xff]  }
0x1537   :  { %7783 = vpow2.f32 %v6839_v47  ;;  %v10474_v13 = vld [vmem:[#allocation9 + $0x6c] ss:$16 sps:$4 sm:$0xff]  }
0x1538   :  { %7785 = vpow2.f32 %v6840_v45 }
0x1539   :  { %7787 = vpow2.f32 %v6841_v24 }
0x153a   :  { %7789 = vtanh.f32 %v4341_v33  ;;  %v10468_v33 = vld [vmem:[#allocation9 + $0x48] ss:$16 sps:$4 sm:$0xff]  }
0x1541   :  { %v7784_v63 = vpop.eup %7783 }
0x1542   :  { %v7786_v60 = vpop.eup %7785  ;;  %v4346_v34 = vadd.f32 1.0, %v7784_v63 }
0x1543   :  { %v4352_v36 = vadd.f32 1.0, %v7786_v60  ;;  %v7788_v37 = vpop.eup %7787 }
0x1544   :  { %7791 = vrcp.f32 %v4346_v34  ;;  %v7790_v22 = vpop.eup %7789  ;;  %v4359_v12 = vadd.f32 1.0, %v7788_v37  ;;  %v8071_v37 = vld [vmem:[#allocation9 + $0x60] ss:$16 sps:$4 sm:$0xff]  }
0x1545   :  { %7793 = vrcp.f32 %v4352_v36 }
0x1546   :  { %7795 = vrcp.f32 %v4359_v12  ;;  %v8076_v12 = vld [vmem:[#allocation9 + $0x88] ss:$16 sps:$4 sm:$0xff]  }
0x154e   :  { %v7792_v3 = vpop.eup %7791 }
0x154f   :  { %v7794_v62 = vpop.eup %7793  ;;  %v4363_v56 = vmul.f32 %v7792_v3, %v7790_v22  ;;  %v8072_v22 = vld [vmem:[#allocation9 + $0x68] ss:$16 sps:$4 sm:$0xff]   ;;  %v8073_v3 = vld [vmem:[#allocation9 + $0x84] ss:$16 sps:$4 sm:$0xff]  }
0x1550   :  { %v4362_v4 = vmul.f32 %v7794_v62, %v10382_v10  ;;  %v7796_v35 = vpop.eup %7795  ;;  %v10445_v10 = vld [vmem:[#allocation9 + $0x24] ss:$16 sps:$4 sm:$0xff]   ;;  %v8074_v62 = vld [vmem:[#allocation9 + $0x8c] ss:$16 sps:$4 sm:$0xff]  }
0x1552   :  { %v10432_v44 = vadd.f32 %v4363_v56, %v4362_v4  ;;  %v8075_v56 = vld [vmem:[#allocation9 + $0x80] ss:$16 sps:$4 sm:$0xff]   ;;  %v8077_v4 = vld [vmem:[#allocation9 + $0xa4] ss:$16 sps:$4 sm:$0xff]  }
0x1554   :  { %7797 = vtanh.f32 %v10432_v44 }
0x155e   :  { %v7798_v38 = vpop.eup %7797 }
0x155f   :  { %v10435_v61 = vmul.f32 %v7798_v38, %v7796_v35  ;;  %v8079_v35 = vld [vmem:[#allocation9 + $0xa0] ss:$16 sps:$4 sm:$0xff]   ;;  %v8080_v38 = vld [vmem:[#allocation9 + $0xa8] ss:$16 sps:$4 sm:$0xff]  }
0x1561   :  { %11437 = vst [vmem:[#allocation18_spill] sm:$0xff] %v10435_v61  ;;  %v4368_v43 = vpack.c.bf16 %v10435_v61, %v10435_v61 }
0x1563   :  { %4402 = vmatmul.mubr.bf16.vlgmr.msra.gmra.mrb[132].mxu0 %v4368_v43  ;;  %4443 = vmatmul.mubr.bf16.vlgmr.msra.gmra.mrb[132].mxu1 %v4368_v43  ;;  %v8081_v43 = vld [vmem:[#allocation9 + $0xc4] ss:$16 sps:$4 sm:$0xff]  }
0x1564   :  { %4482 = vmatpush1.bf16.msra.mxu0 %v10439_v40  ;;  %4523 = vmatpush1.bf16.msra.mxu1 %v10442_v27 }
0x1565   :  { %4483 = vmatprep.subr.bf16.mxu0 %v10445_v10  ;;  %4524 = vmatprep.subr.bf16.mxu1 %v10448_v30 }
0x1566   :  { %4513 = vmatprep.mubr.bf16.mxu0 %v11304_v18  ;;  %4554 = vmatprep.mubr.bf16.mxu1 %v11304_v18 }
0x1568   :  { %4484 = vmatpush1.bf16.msra.mxu0 %v10453_v55  ;;  %4525 = vmatpush1.bf16.msra.mxu1 %v10456_v2 }
0x1569   :  { %4485 = vmatprep.subr.bf16.mxu0 %v10459_v58  ;;  %4526 = vmatprep.subr.bf16.mxu1 %v10462_v49 }
0x156c   :  { %4486 = vmatpush1.bf16.msra.mxu0 %v10465_v31  ;;  %4527 = vmatpush1.bf16.msra.mxu1 %v10468_v33 }
0x156d   :  { %4487 = vmatprep.subr.bf16.mxu0 %v10471_v42  ;;  %4528 = vmatprep.subr.bf16.mxu1 %v10474_v13 }
0x1570   :  { %4488 = vmatpush1.bf16.msra.mxu0 %v10061_v26  ;;  %4529 = vmatpush1.bf16.msra.mxu1 %v10063_v21 }
0x1571   :  { %4489 = vmatprep.subr.bf16.mxu0 %v10067_v19  ;;  %4530 = vmatprep.subr.bf16.mxu1 %v10069_v7  ;;  %v11438_v19 = vld [vmem:[#allocation30_spill] sm:$0xff] }
0x1574   :  { %4490 = vmatpush1.bf16.msra.mxu0 %v10077_v25  ;;  %4531 = vmatpush1.bf16.msra.mxu1 %v10079_v59  ;;  %v11439_v25 = vld [vmem:[#allocation31_spill] sm:$0xff] }
0x1575   :  { %4491 = vmatprep.subr.bf16.mxu0 %v10087_v8  ;;  %4532 = vmatprep.subr.bf16.mxu1 %v10089_v0 }
0x1578   :  { %4492 = vmatpush1.bf16.msra.mxu0 %v10097_v9  ;;  %4533 = vmatpush1.bf16.msra.mxu1 %v10099_v29  ;;  %v11440_v9 = vld [vmem:[#allocation32_spill] sm:$0xff] }
0x1579   :  { %4493 = vmatprep.subr.bf16.mxu0 %v10103_v14  ;;  %4534 = vmatprep.subr.bf16.mxu1 %v10105_v32  ;;  %v11441_v14 = vld [vmem:[#allocation41_spill] sm:$0xff] }
0x157c   :  { %4494 = vmatpush1.bf16.msra.mxu0 %v10113_v16  ;;  %4535 = vmatpush1.bf16.msra.mxu1 %v10115_v39 }
0x157d   :  { %4495 = vmatprep.subr.bf16.mxu0 %v10119_v15  ;;  %4536 = vmatprep.subr.bf16.mxu1 %v10121_v28 }
0x1580   :  { %4496 = vmatpush1.bf16.msra.mxu0 %v10129_v46  ;;  %4537 = vmatpush1.bf16.msra.mxu1 %v10131_v5 }
0x1581   :  { %4593 = vmatprep.subr.bf16.mxu0 %v10421_v53  ;;  %4634 = vmatprep.subr.bf16.mxu1 %v10424_v54 }
0x1636   :  { %v4403_v26 = vpop.f32.mrb[132].mxu0  ;;  %v4444_v21 = vpop.f32.mrb[132].mxu1 }
0x1637   :  { %v4451_v7 = vadd.f32 %v4403_v26, %v11438_v19  ;;  %v4453_v59 = vadd.f32 %v4444_v21, %v11439_v25  ;;  %v4405_v8 = vpop.f32.mrb[133].mxu0  ;;  %v4446_v0 = vpop.f32.mrb[133].mxu1  ;;  %v11444_v21 = vld [vmem:[#allocation43_spill] sm:$0xff] }
0x1638   :  { %v4452_v29 = vadd.f32 %v4405_v8, %v11440_v9  ;;  %v4454_v32 = vadd.f32 %v4446_v0, %v11441_v14  ;;  %v4407_v16 = vpop.f32.mrb[134].mxu0  ;;  %v4448_v39 = vpop.f32.mrb[134].mxu1  ;;  %v11446_v0 = vld [vmem:[#allocation26_spill] sm:$0xff] }
0x1639   :  { %v6842_v15 = vmul.f32 -1.442695, %v4451_v7  ;;  %v4408_v28 = vpop.f32.mrb[135].mxu0  ;;  %v4449_v46 = vpop.f32.mrb[135].mxu1 }
0x163a   :  { %v6843_v5 = vmul.f32 -1.442695, %v4452_v29  ;;  %v6844_v53 = vmul.f32 -1.442695, %v4454_v32 }
0x163b   :  { %7799 = vpow2.f32 %v6842_v15 }
0x163c   :  { %7801 = vpow2.f32 %v6843_v5 }
0x163d   :  { %7803 = vpow2.f32 %v6844_v53 }
0x163e   :  { %7805 = vtanh.f32 %v4453_v59  ;;  %v11445_v59 = vld [vmem:[#allocation44_spill] sm:$0xff] }
0x1645   :  { %v7800_v54 = vpop.eup %7799 }
0x1646   :  { %v7802_v57 = vpop.eup %7801  ;;  %v4458_v17 = vadd.f32 1.0, %v7800_v54 }
0x1647   :  { %v4464_v52 = vadd.f32 1.0, %v7802_v57  ;;  %v7804_v50 = vpop.eup %7803 }
0x1648   :  { %7807 = vrcp.f32 %v4458_v17  ;;  %v7806_v1 = vpop.eup %7805  ;;  %v4471_v51 = vadd.f32 1.0, %v7804_v50 }
0x1649   :  { %7809 = vrcp.f32 %v4464_v52 }
0x164a   :  { %7811 = vrcp.f32 %v4471_v51 }
0x1652   :  { %v7808_v23 = vpop.eup %7807 }
0x1653   :  { %v7810_v47 = vpop.eup %7809  ;;  %v4475_v48 = vmul.f32 %v7808_v23, %v7806_v1 }
0x1654   :  { %v4474_v45 = vmul.f32 %v7810_v47, %v10432_v44  ;;  %v7812_v63 = vpop.eup %7811  ;;  %v8078_v44 = vld [vmem:[#allocation9 + $0xac] ss:$16 sps:$4 sm:$0xff]  }
0x1656   :  { %v10502_v24 = vadd.f32 %v4475_v48, %v4474_v45 }
0x1658   :  { %7813 = vtanh.f32 %v10502_v24 }
0x1662   :  { %v7814_v60 = vpop.eup %7813 }
0x1663   :  { %v10505_v34 = vmul.f32 %v7814_v60, %v7812_v63  ;;  %v7319_v60 = vld [vmem:[#allocation11] ss:$16 sps:$4 sm:$0xff]  }
0x1665   :  { %11442 = vst [vmem:[#allocation19_spill] sm:$0xff] %v10505_v34  ;;  %v4480_v36 = vpack.c.bf16 %v10505_v34, %v10505_v34 }
0x1667   :  { %4514 = vmatmul.mubr.bf16.vlgmr.msra.gmra.mrb[136].mxu0 %v4480_v36  ;;  %4555 = vmatmul.mubr.bf16.vlgmr.msra.gmra.mrb[136].mxu1 %v4480_v36  ;;  %v7322_v36 = vld [vmem:[#allocation11 + $0x8] ss:$16 sps:$4 sm:$0xff]  }
0x1668   :  { %4594 = vmatpush1.bf16.msra.mxu0 %v10439_v40  ;;  %4635 = vmatpush1.bf16.msra.mxu1 %v10442_v27  ;;  %v8082_v40 = vld [vmem:[#allocation9 + $0xcc] ss:$16 sps:$4 sm:$0xff]   ;;  %v8083_v27 = vld [vmem:[#allocation9 + $0xc0] ss:$16 sps:$4 sm:$0xff]  }
0x1669   :  { %4595 = vmatprep.subr.bf16.mxu0 %v10445_v10  ;;  %4636 = vmatprep.subr.bf16.mxu1 %v10448_v30  ;;  %v8084_v10 = vld [vmem:[#allocation9 + $0xc8] ss:$16 sps:$4 sm:$0xff]   ;;  %v8085_v30 = vld [vmem:[#allocation9 + $0xe4] ss:$16 sps:$4 sm:$0xff]  }
0x166a   :  { %4625 = vmatprep.mubr.bf16.mxu0 %v11304_v18  ;;  %4666 = vmatprep.mubr.bf16.mxu1 %v11304_v18 }
0x166c   :  { %4596 = vmatpush1.bf16.msra.mxu0 %v10453_v55  ;;  %4637 = vmatpush1.bf16.msra.mxu1 %v10456_v2  ;;  %v8086_v55 = vld [vmem:[#allocation9 + $0xec] ss:$16 sps:$4 sm:$0xff]   ;;  %v8087_v2 = vld [vmem:[#allocation9 + $0xe0] ss:$16 sps:$4 sm:$0xff]  }
0x166d   :  { %4597 = vmatprep.subr.bf16.mxu0 %v10459_v58  ;;  %4638 = vmatprep.subr.bf16.mxu1 %v10462_v49  ;;  %v8088_v58 = vld [vmem:[#allocation9 + $0xe8] ss:$16 sps:$4 sm:$0xff]   ;;  %v7321_v49 = vld [vmem:[#allocation11 + $0x4] ss:$16 sps:$4 sm:$0xff]  }
0x1670   :  { %4598 = vmatpush1.bf16.msra.mxu0 %v10465_v31  ;;  %4639 = vmatpush1.bf16.msra.mxu1 %v10468_v33  ;;  %v7324_v31 = vld [vmem:[#allocation11 + $0xc] ss:$16 sps:$4 sm:$0xff]  }
0x1671   :  { %4599 = vmatprep.subr.bf16.mxu0 %v10471_v42  ;;  %4640 = vmatprep.subr.bf16.mxu1 %v10474_v13  ;;  %v11443_v13 = vld [vmem:[#allocation42_spill] sm:$0xff] }
0x1674   :  { %4600 = vmatpush1.bf16.msra.mxu0 %v8071_v37  ;;  %4641 = vmatpush1.bf16.msra.mxu1 %v8072_v22  ;;  %v7327_v22 = vld [vmem:[#allocation11 + $0x24] ss:$16 sps:$4 sm:$0xff]  }
0x1675   :  { %4601 = vmatprep.subr.bf16.mxu0 %v8073_v3  ;;  %4642 = vmatprep.subr.bf16.mxu1 %v8074_v62  ;;  %v7330_v3 = vld [vmem:[#allocation11 + $0x2c] ss:$16 sps:$4 sm:$0xff]   ;;  %v7328_v62 = vld [vmem:[#allocation11 + $0x28] ss:$16 sps:$4 sm:$0xff]  }
0x1678   :  { %4602 = vmatpush1.bf16.msra.mxu0 %v8075_v56  ;;  %4643 = vmatpush1.bf16.msra.mxu1 %v8076_v12  ;;  %v11448_v56 = vld [vmem:[#allocation50_spill] sm:$0xff] }
0x1679   :  { %4603 = vmatprep.subr.bf16.mxu0 %v8077_v4  ;;  %4644 = vmatprep.subr.bf16.mxu1 %v8078_v44  ;;  %v7333_v12 = vld [vmem:[#allocation11 + $0x44] ss:$16 sps:$4 sm:$0xff]   ;;  %v7336_v4 = vld [vmem:[#allocation11 + $0x4c] ss:$16 sps:$4 sm:$0xff]   ;;  %v7331_v44 = vld [vmem:[#allocation11 + $0x40] ss:$16 sps:$4 sm:$0xff]  }
0x167c   :  { %4604 = vmatpush1.bf16.msra.mxu0 %v8079_v35  ;;  %4645 = vmatpush1.bf16.msra.mxu1 %v8080_v38  ;;  %v7334_v35 = vld [vmem:[#allocation11 + $0x48] ss:$16 sps:$4 sm:$0xff]   ;;  %v7339_v38 = vld [vmem:[#allocation11 + $0x64] ss:$16 sps:$4 sm:$0xff]  }
0x167d   :  { %4605 = vmatprep.subr.bf16.mxu0 %v8081_v43  ;;  %4646 = vmatprep.subr.bf16.mxu1 %v8082_v40  ;;  %v7342_v43 = vld [vmem:[#allocation11 + $0x6c] ss:$16 sps:$4 sm:$0xff]   ;;  %v7337_v40 = vld [vmem:[#allocation11 + $0x60] ss:$16 sps:$4 sm:$0xff]  }
0x1680   :  { %4606 = vmatpush1.bf16.msra.mxu0 %v8083_v27  ;;  %4647 = vmatpush1.bf16.msra.mxu1 %v8084_v10  ;;  %v7340_v27 = vld [vmem:[#allocation11 + $0x68] ss:$16 sps:$4 sm:$0xff]   ;;  %v7345_v10 = vld [vmem:[#allocation11 + $0x84] ss:$16 sps:$4 sm:$0xff]  }
0x1681   :  { %4607 = vmatprep.subr.bf16.mxu0 %v8085_v30  ;;  %4648 = vmatprep.subr.bf16.mxu1 %v8086_v55  ;;  %v7348_v30 = vld [vmem:[#allocation11 + $0x8c] ss:$16 sps:$4 sm:$0xff]   ;;  %v7343_v55 = vld [vmem:[#allocation11 + $0x80] ss:$16 sps:$4 sm:$0xff]  }
0x1684   :  { %4608 = vmatpush1.bf16.msra.mxu0 %v8087_v2  ;;  %4649 = vmatpush1.bf16.msra.mxu1 %v8088_v58  ;;  %v7346_v2 = vld [vmem:[#allocation11 + $0x88] ss:$16 sps:$4 sm:$0xff]   ;;  %v7351_v58 = vld [vmem:[#allocation11 + $0xa4] ss:$16 sps:$4 sm:$0xff]  }
0x1685   :  { %5110 = vmatprep.subr.bf16.mxu0 %v7321_v49  ;;  %5183 = vmatprep.subr.bf16.mxu1 %v7324_v31  ;;  %v7354_v49 = vld [vmem:[#allocation11 + $0xac] ss:$16 sps:$4 sm:$0xff]   ;;  %v7349_v31 = vld [vmem:[#allocation11 + $0xa0] ss:$16 sps:$4 sm:$0xff]  }
0x173a   :  { %v4515_v33 = vpop.f32.mrb[136].mxu0  ;;  %v4556_v42 = vpop.f32.mrb[136].mxu1 }
0x173b   :  { %v4563_v26 = vadd.f32 %v4515_v33, %v11443_v13  ;;  %v4565_v19 = vadd.f32 %v4556_v42, %v11444_v21  ;;  %v4517_v7 = vpop.f32.mrb[137].mxu0  ;;  %v4558_v25 = vpop.f32.mrb[137].mxu1  ;;  %v7352_v33 = vld [vmem:[#allocation11 + $0xa8] ss:$16 sps:$4 sm:$0xff]   ;;  %v7357_v42 = vld [vmem:[#allocation11 + $0xc4] ss:$16 sps:$4 sm:$0xff]  }
0x173c   :  { %v4564_v8 = vadd.f32 %v4517_v7, %v11445_v59  ;;  %v4566_v9 = vadd.f32 %v4558_v25, %v11446_v0  ;;  %v4519_v29 = vpop.f32.mrb[138].mxu0  ;;  %v4560_v14 = vpop.f32.mrb[138].mxu1  ;;  %v7360_v13 = vld [vmem:[#allocation11 + $0xcc] ss:$16 sps:$4 sm:$0xff]   ;;  %v7358_v21 = vld [vmem:[#allocation11 + $0xc8] ss:$16 sps:$4 sm:$0xff]  }
0x173d   :  { %v6845_v32 = vmul.f32 -1.442695, %v4563_v26  ;;  %v4520_v16 = vpop.f32.mrb[139].mxu0  ;;  %v4561_v39 = vpop.f32.mrb[139].mxu1  ;;  %v7355_v26 = vld [vmem:[#allocation11 + $0xc0] ss:$16 sps:$4 sm:$0xff]  }
0x173e   :  { %v6846_v15 = vmul.f32 -1.442695, %v4564_v8  ;;  %v6847_v28 = vmul.f32 -1.442695, %v4566_v9  ;;  %v7366_v7 = vld [vmem:[#allocation11 + $0xec] ss:$16 sps:$4 sm:$0xff]  }
0x173f   :  { %7815 = vpow2.f32 %v6845_v32  ;;  %v7361_v25 = vld [vmem:[#allocation11 + $0xe0] ss:$16 sps:$4 sm:$0xff]   ;;  %v7364_v59 = vld [vmem:[#allocation11 + $0xe8] ss:$16 sps:$4 sm:$0xff]   ;;  %v7369_v8 = vld [vmem:[#allocation11 + $0x104] ss:$16 sps:$4 sm:$0xff]  }
0x1740   :  { %7817 = vpow2.f32 %v6846_v15  ;;  %v7372_v0 = vld [vmem:[#allocation11 + $0x10c] ss:$16 sps:$4 sm:$0xff]   ;;  %v7367_v9 = vld [vmem:[#allocation11 + $0x100] ss:$16 sps:$4 sm:$0xff]   ;;  %v7370_v29 = vld [vmem:[#allocation11 + $0x108] ss:$16 sps:$4 sm:$0xff]  }
0x1741   :  { %7819 = vpow2.f32 %v6847_v28  ;;  %v7375_v14 = vld [vmem:[#allocation11 + $0x124] ss:$16 sps:$4 sm:$0xff]   ;;  %v7378_v32 = vld [vmem:[#allocation11 + $0x12c] ss:$16 sps:$4 sm:$0xff]   ;;  %v7373_v16 = vld [vmem:[#allocation11 + $0x120] ss:$16 sps:$4 sm:$0xff]  }
0x1742   :  { %7821 = vtanh.f32 %v4565_v19  ;;  %v7363_v19 = vld [vmem:[#allocation11 + $0xe4] ss:$16 sps:$4 sm:$0xff]   ;;  %v7376_v39 = vld [vmem:[#allocation11 + $0x128] ss:$16 sps:$4 sm:$0xff]   ;;  %v7384_v28 = vld [vmem:[#allocation11 + $0x14c] ss:$16 sps:$4 sm:$0xff]  }
0x1743   :  { %v7381_v15 = vld [vmem:[#allocation11 + $0x144] ss:$16 sps:$4 sm:$0xff]  }
0x1749   :  { %v7816_v46 = vpop.eup %7815 }
0x174a   :  { %v7818_v5 = vpop.eup %7817  ;;  %v4570_v53 = vadd.f32 1.0, %v7816_v46  ;;  %v7379_v46 = vld [vmem:[#allocation11 + $0x140] ss:$16 sps:$4 sm:$0xff]  }
0x174b   :  { %v4576_v54 = vadd.f32 1.0, %v7818_v5  ;;  %v7820_v57 = vpop.eup %7819  ;;  %v7382_v5 = vld [vmem:[#allocation11 + $0x148] ss:$16 sps:$4 sm:$0xff]  }
0x174c   :  { %7823 = vrcp.f32 %v4570_v53  ;;  %v7822_v17 = vpop.eup %7821  ;;  %v4583_v23 = vadd.f32 1.0, %v7820_v57  ;;  %v7387_v53 = vld [vmem:[#allocation11 + $0x164] ss:$16 sps:$4 sm:$0xff]   ;;  %v7385_v57 = vld [vmem:[#allocation11 + $0x160] ss:$16 sps:$4 sm:$0xff]  }
0x174d   :  { %7825 = vrcp.f32 %v4576_v54  ;;  %v7390_v54 = vld [vmem:[#allocation11 + $0x16c] ss:$16 sps:$4 sm:$0xff]  }
0x174e   :  { %7827 = vrcp.f32 %v4583_v23  ;;  %v7394_v23 = vld [vmem:[#allocation11 + $0x188] ss:$16 sps:$4 sm:$0xff]  }
0x1756   :  { %v7824_v52 = vpop.eup %7823 }
0x1757   :  { %v7826_v50 = vpop.eup %7825  ;;  %v4587_v1 = vmul.f32 %v7824_v52, %v7822_v17  ;;  %v7388_v17 = vld [vmem:[#allocation11 + $0x168] ss:$16 sps:$4 sm:$0xff]   ;;  %v7393_v52 = vld [vmem:[#allocation11 + $0x184] ss:$16 sps:$4 sm:$0xff]  }
0x1758   :  { %v4586_v47 = vmul.f32 %v7826_v50, %v10502_v24  ;;  %v7828_v51 = vpop.eup %7827  ;;  %v7325_v24 = vld [vmem:[#allocation11 + $0x20] ss:$16 sps:$4 sm:$0xff]   ;;  %v7396_v50 = vld [vmem:[#allocation11 + $0x18c] ss:$16 sps:$4 sm:$0xff]  }
0x175a   :  { %v10528_v48 = vadd.f32 %v4587_v1, %v4586_v47  ;;  %v7391_v1 = vld [vmem:[#allocation11 + $0x180] ss:$16 sps:$4 sm:$0xff]   ;;  %v7399_v47 = vld [vmem:[#allocation11 + $0x1a4] ss:$16 sps:$4 sm:$0xff]  }
0x175c   :  { %7829 = vtanh.f32 %v10528_v48 }
0x1766   :  { %v7830_v45 = vpop.eup %7829 }
0x1767   :  { %v10531_v63 = vmul.f32 %v7830_v45, %v7828_v51  ;;  %v7402_v51 = vld [vmem:[#allocation11 + $0x1ac] ss:$16 sps:$4 sm:$0xff]   ;;  %v7397_v45 = vld [vmem:[#allocation11 + $0x1a0] ss:$16 sps:$4 sm:$0xff]  }
0x1769   :  { %11447 = vst [vmem:[#allocation20_spill] sm:$0xff] %v10531_v63  ;;  %v4592_v37 = vpack.c.bf16 %v10531_v63, %v10531_v63 }
0x176b   :  { %4626 = vmatmul.mubr.bf16.vlgmr.msra.gmra.mrb[140].mxu0 %v4592_v37  ;;  %4667 = vmatmul.mubr.bf16.vlgmr.msra.gmra.mrb[140].mxu1 %v4592_v37  ;;  %v7408_v37 = vld [vmem:[#allocation11 + $0x1cc] ss:$16 sps:$4 sm:$0xff]  }
0x176c   :  { %5111 = vmatpush1.bf16.msra.mxu0 %v7319_v60  ;;  %5184 = vmatpush1.bf16.msra.mxu1 %v7322_v36  ;;  %v7400_v60 = vld [vmem:[#allocation11 + $0x1a8] ss:$16 sps:$4 sm:$0xff]   ;;  %v7405_v36 = vld [vmem:[#allocation11 + $0x1c4] ss:$16 sps:$4 sm:$0xff]  }
0x176d   :  { %5142 = vmatprep.mubr.bf16.mxu0 %v11448_v56  ;;  %5215 = vmatprep.mubr.bf16.mxu1 %v11448_v56  ;;  %v7409_v56 = vld [vmem:[#allocation11 + $0x1e0] ss:$16 sps:$4 sm:$0xff]  }
0x176e   :  { %5112 = vmatprep.subr.bf16.mxu0 %v7327_v22  ;;  %5185 = vmatprep.subr.bf16.mxu1 %v7330_v3  ;;  %v7403_v22 = vld [vmem:[#allocation11 + $0x1c0] ss:$16 sps:$4 sm:$0xff]   ;;  %v7406_v3 = vld [vmem:[#allocation11 + $0x1c8] ss:$16 sps:$4 sm:$0xff]  }
0x1770   :  { %5113 = vmatpush1.bf16.msra.mxu0 %v7325_v24  ;;  %5186 = vmatpush1.bf16.msra.mxu1 %v7328_v62  ;;  %v7411_v24 = vld [vmem:[#allocation11 + $0x1e4] ss:$16 sps:$4 sm:$0xff]   ;;  %v7414_v62 = vld [vmem:[#allocation11 + $0x1ec] ss:$16 sps:$4 sm:$0xff]  }
0x1771   :  { %5114 = vmatprep.subr.bf16.mxu0 %v7333_v12  ;;  %5187 = vmatprep.subr.bf16.mxu1 %v7336_v4  ;;  %v7412_v12 = vld [vmem:[#allocation11 + $0x1e8] ss:$16 sps:$4 sm:$0xff]   ;;  %v10537_v4 = vld [vmem:[#allocation12 + $0x4] ss:$16 sps:$4 sm:$0xff]  }
0x1774   :  { %5115 = vmatpush1.bf16.msra.mxu0 %v7331_v44  ;;  %5188 = vmatpush1.bf16.msra.mxu1 %v7334_v35  ;;  %v10539_v44 = vld [vmem:[#allocation12 + $0xc] ss:$16 sps:$4 sm:$0xff]   ;;  %v10543_v35 = vld [vmem:[#allocation12] ss:$16 sps:$4 sm:$0xff]  }
0x1775   :  { %5116 = vmatprep.subr.bf16.mxu0 %v7339_v38  ;;  %5189 = vmatprep.subr.bf16.mxu1 %v7342_v43  ;;  %v10545_v38 = vld [vmem:[#allocation12 + $0x8] ss:$16 sps:$4 sm:$0xff]   ;;  %v10547_v43 = vld [vmem:[#allocation12 + $0x24] ss:$16 sps:$4 sm:$0xff]  }
0x1778   :  { %5117 = vmatpush1.bf16.msra.mxu0 %v7337_v40  ;;  %5190 = vmatpush1.bf16.msra.mxu1 %v7340_v27  ;;  %v10549_v40 = vld [vmem:[#allocation12 + $0x2c] ss:$16 sps:$4 sm:$0xff]  }
0x1779   :  { %5118 = vmatprep.subr.bf16.mxu0 %v7345_v10  ;;  %5191 = vmatprep.subr.bf16.mxu1 %v7348_v30  ;;  %v11449_v27 = vld [vmem:[#allocation51_spill] sm:$0xff]  ;;  %v11450_v10 = vld [vmem:[#allocation46_spill] sm:$0xff] }
0x177a   :  { %v10557_v30 = vld [vmem:[#allocation12 + $0x20] ss:$16 sps:$4 sm:$0xff]  }
0x177c   :  { %5119 = vmatpush1.bf16.msra.mxu0 %v7343_v55  ;;  %5192 = vmatpush1.bf16.msra.mxu1 %v7346_v2  ;;  %v10559_v55 = vld [vmem:[#allocation12 + $0x28] ss:$16 sps:$4 sm:$0xff]   ;;  %v10563_v2 = vld [vmem:[#allocation12 + $0x44] ss:$16 sps:$4 sm:$0xff]  }
0x177d   :  { %5120 = vmatprep.subr.bf16.mxu0 %v7351_v58  ;;  %5193 = vmatprep.subr.bf16.mxu1 %v7354_v49  ;;  %v10565_v58 = vld [vmem:[#allocation12 + $0x4c] ss:$16 sps:$4 sm:$0xff]   ;;  %v10569_v49 = vld [vmem:[#allocation12 + $0x40] ss:$16 sps:$4 sm:$0xff]  }
0x1780   :  { %5121 = vmatpush1.bf16.msra.mxu0 %v7349_v31  ;;  %5194 = vmatpush1.bf16.msra.mxu1 %v7352_v33  ;;  %v10571_v31 = vld [vmem:[#allocation12 + $0x48] ss:$16 sps:$4 sm:$0xff]   ;;  %v10575_v33 = vld [vmem:[#allocation12 + $0x64] ss:$16 sps:$4 sm:$0xff]  }
0x1781   :  { %5122 = vmatprep.subr.bf16.mxu0 %v7357_v42  ;;  %5195 = vmatprep.subr.bf16.mxu1 %v7360_v13  ;;  %v10577_v42 = vld [vmem:[#allocation12 + $0x6c] ss:$16 sps:$4 sm:$0xff]  }
0x1782   :  { %v11451_v13 = vld [vmem:[#allocation47_spill] sm:$0xff] }
0x1784   :  { %5123 = vmatpush1.bf16.msra.mxu0 %v7355_v26  ;;  %5196 = vmatpush1.bf16.msra.mxu1 %v7358_v21  ;;  %v11452_v26 = vld [vmem:[#allocation48_spill] sm:$0xff] }
0x1785   :  { %5124 = vmatprep.subr.bf16.mxu0 %v7363_v19  ;;  %5197 = vmatprep.subr.bf16.mxu1 %v7366_v7  ;;  %v10585_v21 = vld [vmem:[#allocation12 + $0x60] ss:$16 sps:$4 sm:$0xff]   ;;  %v10587_v19 = vld [vmem:[#allocation12 + $0x68] ss:$16 sps:$4 sm:$0xff]   ;;  %v10591_v7 = vld [vmem:[#allocation12 + $0x84] ss:$16 sps:$4 sm:$0xff]  }
0x1788   :  { %5125 = vmatpush1.bf16.msra.mxu0 %v7361_v25  ;;  %5198 = vmatpush1.bf16.msra.mxu1 %v7364_v59  ;;  %v10593_v25 = vld [vmem:[#allocation12 + $0x8c] ss:$16 sps:$4 sm:$0xff]   ;;  %v10597_v59 = vld [vmem:[#allocation12 + $0x80] ss:$16 sps:$4 sm:$0xff]  }
0x1789   :  { %5126 = vmatprep.subr.bf16.mxu0 %v7369_v8  ;;  %5199 = vmatprep.subr.bf16.mxu1 %v7372_v0  ;;  %v10599_v8 = vld [vmem:[#allocation12 + $0x88] ss:$16 sps:$4 sm:$0xff]   ;;  %v10603_v0 = vld [vmem:[#allocation12 + $0xa4] ss:$16 sps:$4 sm:$0xff]  }
0x178c   :  { %5127 = vmatpush1.bf16.msra.mxu0 %v7367_v9  ;;  %5200 = vmatpush1.bf16.msra.mxu1 %v7370_v29  ;;  %v10605_v9 = vld [vmem:[#allocation12 + $0xac] ss:$16 sps:$4 sm:$0xff]  }
0x178d   :  { %5128 = vmatprep.subr.bf16.mxu0 %v7375_v14  ;;  %5201 = vmatprep.subr.bf16.mxu1 %v7378_v32  ;;  %v11453_v29 = vld [vmem:[#allocation49_spill] sm:$0xff]  ;;  %v10613_v32 = vld [vmem:[#allocation12 + $0xa0] ss:$16 sps:$4 sm:$0xff]  }
0x178e   :  { %v11454_v14 = vld [vmem:[#allocation37_spill] sm:$0xff] }
0x1790   :  { %5129 = vmatpush1.bf16.msra.mxu0 %v7373_v16  ;;  %5202 = vmatpush1.bf16.msra.mxu1 %v7376_v39  ;;  %v10615_v16 = vld [vmem:[#allocation12 + $0xa8] ss:$16 sps:$4 sm:$0xff]   ;;  %v10619_v39 = vld [vmem:[#allocation12 + $0xc4] ss:$16 sps:$4 sm:$0xff]  }
0x1791   :  { %5130 = vmatprep.subr.bf16.mxu0 %v7381_v15  ;;  %5203 = vmatprep.subr.bf16.mxu1 %v7384_v28  ;;  %v10621_v15 = vld [vmem:[#allocation12 + $0xcc] ss:$16 sps:$4 sm:$0xff]   ;;  %v10625_v28 = vld [vmem:[#allocation12 + $0xc0] ss:$16 sps:$4 sm:$0xff]  }
0x1794   :  { %5131 = vmatpush1.bf16.msra.mxu0 %v7379_v46  ;;  %5204 = vmatpush1.bf16.msra.mxu1 %v7382_v5  ;;  %v10627_v46 = vld [vmem:[#allocation12 + $0xc8] ss:$16 sps:$4 sm:$0xff]   ;;  %v10631_v5 = vld [vmem:[#allocation12 + $0xe4] ss:$16 sps:$4 sm:$0xff]  }
0x1795   :  { %5132 = vmatprep.subr.bf16.mxu0 %v7387_v53  ;;  %5205 = vmatprep.subr.bf16.mxu1 %v7390_v54  ;;  %v10633_v53 = vld [vmem:[#allocation12 + $0xec] ss:$16 sps:$4 sm:$0xff]   ;;  %v11455_v54 = vld [vmem:[#allocation38_spill] sm:$0xff] }
0x1798   :  { %5133 = vmatpush1.bf16.msra.mxu0 %v7385_v57  ;;  %5206 = vmatpush1.bf16.msra.mxu1 %v7388_v17  ;;  %v10641_v57 = vld [vmem:[#allocation12 + $0xe0] ss:$16 sps:$4 sm:$0xff]   ;;  %v10643_v17 = vld [vmem:[#allocation12 + $0xe8] ss:$16 sps:$4 sm:$0xff]  }
0x1799   :  { %5134 = vmatprep.subr.bf16.mxu0 %v7393_v52  ;;  %5207 = vmatprep.subr.bf16.mxu1 %v7396_v50 }
0x179c   :  { %5135 = vmatpush1.bf16.msra.mxu0 %v7391_v1  ;;  %5208 = vmatpush1.bf16.msra.mxu1 %v7394_v23  ;;  %v11456_v1 = vld [vmem:[#allocation27_spill] sm:$0xff] }
0x179d   :  { %5136 = vmatprep.subr.bf16.mxu0 %v7399_v47  ;;  %5209 = vmatprep.subr.bf16.mxu1 %v7402_v51  ;;  %v11457_v47 = vld [vmem:[#allocation28_spill] sm:$0xff] }
0x17a0   :  { %5137 = vmatpush1.bf16.msra.mxu0 %v7397_v45  ;;  %5210 = vmatpush1.bf16.msra.mxu1 %v7400_v60 }
0x17a1   :  { %5138 = vmatprep.subr.bf16.mxu0 %v7405_v36  ;;  %5211 = vmatprep.subr.bf16.mxu1 %v7408_v37  ;;  %v11458_v36 = vld [vmem:[#allocation45_spill] sm:$0xff] }
0x17a4   :  { %5139 = vmatpush1.bf16.msra.mxu0 %v7403_v22  ;;  %5212 = vmatpush1.bf16.msra.mxu1 %v7406_v3  ;;  %v11459_v22 = vld [vmem:[#allocation52_spill] sm:$0xff] }
0x17a5   :  { %5140 = vmatprep.subr.bf16.mxu0 %v7411_v24  ;;  %5213 = vmatprep.subr.bf16.mxu1 %v7414_v62 }
0x17a8   :  { %5141 = vmatpush1.bf16.msra.mxu0 %v7409_v56  ;;  %5214 = vmatpush1.bf16.msra.mxu1 %v7412_v12 }
0x17a9   :  { %5448 = vmatprep.subr.bf16.mxu0 %v10537_v4  ;;  %5489 = vmatprep.subr.bf16.mxu1 %v10539_v44 }
0x17ab   :  { %5143 = vmatmul.mubr.bf16.vlgmr.msra.gmra.mrb[144].mxu0 %v11449_v27  ;;  %5216 = vmatmul.mubr.bf16.vlgmr.msra.gmra.mrb[144].mxu1 %v11449_v27 }
0x17ac   :  { %5152 = vmatprep.mubr.bf16.mxu0 %v11450_v10  ;;  %5225 = vmatprep.mubr.bf16.mxu1 %v11450_v10 }
0x17ad   :  { %5449 = vmatpush1.bf16.msra.mxu0 %v10543_v35  ;;  %5490 = vmatpush1.bf16.msra.mxu1 %v10545_v38 }
0x17ae   :  { %5450 = vmatprep.subr.bf16.mxu0 %v10547_v43  ;;  %5491 = vmatprep.subr.bf16.mxu1 %v10549_v40 }
0x17b1   :  { %5451 = vmatpush1.bf16.msra.mxu0 %v10557_v30  ;;  %5492 = vmatpush1.bf16.msra.mxu1 %v10559_v55 }
0x17b2   :  { %5452 = vmatprep.subr.bf16.mxu0 %v10563_v2  ;;  %5493 = vmatprep.subr.bf16.mxu1 %v10565_v58 }
0x17b3   :  { %5153 = vmatmul.mubr.bf16.gmra.mrb[148].mxu0 %v11451_v13  ;;  %5226 = vmatmul.mubr.bf16.gmra.mrb[148].mxu1 %v11451_v13 }
0x17b4   :  { %5162 = vmatprep.mubr.bf16.mxu0 %v11452_v26  ;;  %5235 = vmatprep.mubr.bf16.mxu1 %v11452_v26 }
0x17b5   :  { %5453 = vmatpush1.bf16.msra.mxu0 %v10569_v49  ;;  %5494 = vmatpush1.bf16.msra.mxu1 %v10571_v31 }
0x17b6   :  { %5454 = vmatprep.subr.bf16.mxu0 %v10575_v33  ;;  %5495 = vmatprep.subr.bf16.mxu1 %v10577_v42 }
0x17b9   :  { %5455 = vmatpush1.bf16.msra.mxu0 %v10585_v21  ;;  %5496 = vmatpush1.bf16.msra.mxu1 %v10587_v19 }
0x17ba   :  { %5456 = vmatprep.subr.bf16.mxu0 %v10591_v7  ;;  %5497 = vmatprep.subr.bf16.mxu1 %v10593_v25 }
0x17bb   :  { %5163 = vmatmul.mubr.bf16.gmra.mrb[152].mxu0 %v11453_v29  ;;  %5236 = vmatmul.mubr.bf16.gmra.mrb[152].mxu1 %v11453_v29 }
0x17bc   :  { %5172 = vmatprep.mubr.bf16.mxu0 %v11454_v14  ;;  %5245 = vmatprep.mubr.bf16.mxu1 %v11454_v14 }
0x17bd   :  { %5457 = vmatpush1.bf16.msra.mxu0 %v10597_v59  ;;  %5498 = vmatpush1.bf16.msra.mxu1 %v10599_v8 }
0x17be   :  { %5458 = vmatprep.subr.bf16.mxu0 %v10603_v0  ;;  %5499 = vmatprep.subr.bf16.mxu1 %v10605_v9 }
0x17c1   :  { %5459 = vmatpush1.bf16.msra.mxu0 %v10613_v32  ;;  %5500 = vmatpush1.bf16.msra.mxu1 %v10615_v16 }
0x17c2   :  { %5460 = vmatprep.subr.bf16.mxu0 %v10619_v39  ;;  %5501 = vmatprep.subr.bf16.mxu1 %v10621_v15 }
0x17c3   :  { %5173 = vmatmul.mubr.bf16.gmra.mrb[156].mxu0 %v11455_v54  ;;  %5246 = vmatmul.mubr.bf16.gmra.mrb[156].mxu1 %v11455_v54 }
0x17c4   :  { %5480 = vmatprep.mubr.bf16.mxu0 %v11304_v18  ;;  %5521 = vmatprep.mubr.bf16.mxu1 %v11304_v18 }
0x17c5   :  { %5461 = vmatpush1.bf16.msra.mxu0 %v10625_v28  ;;  %5502 = vmatpush1.bf16.msra.mxu1 %v10627_v46 }
0x17c6   :  { %5462 = vmatprep.subr.bf16.mxu0 %v10631_v5  ;;  %5503 = vmatprep.subr.bf16.mxu1 %v10633_v53 }
0x17c9   :  { %5463 = vmatpush1.bf16.msra.mxu0 %v10641_v57  ;;  %5504 = vmatpush1.bf16.msra.mxu1 %v10643_v17 }
0x17ca   :  { %5560 = vmatprep.subr.bf16.mxu0 %v10537_v4  ;;  %5601 = vmatprep.subr.bf16.mxu1 %v10539_v44 }
0x17cc   :  { %5481 = vmatmul.mubr.bf16.vlgmr.msra.gmra.mrb[160].mxu0 %v11304_v18  ;;  %5522 = vmatmul.mubr.bf16.vlgmr.msra.gmra.mrb[160].mxu1 %v11304_v18 }
0x17cd   :  { %5561 = vmatpush1.bf16.msra.mxu0 %v10543_v35  ;;  %5602 = vmatpush1.bf16.msra.mxu1 %v10545_v38 }
0x17ce   :  { %5562 = vmatprep.subr.bf16.mxu0 %v10547_v43  ;;  %5603 = vmatprep.subr.bf16.mxu1 %v10549_v40 }
0x17cf   :  { %5592 = vmatprep.mubr.bf16.mxu0 %v11304_v18  ;;  %5633 = vmatprep.mubr.bf16.mxu1 %v11304_v18 }
0x17d1   :  { %5563 = vmatpush1.bf16.msra.mxu0 %v10557_v30  ;;  %5604 = vmatpush1.bf16.msra.mxu1 %v10559_v55 }
0x17d2   :  { %5564 = vmatprep.subr.bf16.mxu0 %v10563_v2  ;;  %5605 = vmatprep.subr.bf16.mxu1 %v10565_v58 }
0x17d5   :  { %5565 = vmatpush1.bf16.msra.mxu0 %v10569_v49  ;;  %5606 = vmatpush1.bf16.msra.mxu1 %v10571_v31 }
0x17d6   :  { %5566 = vmatprep.subr.bf16.mxu0 %v10575_v33  ;;  %5607 = vmatprep.subr.bf16.mxu1 %v10577_v42 }
0x17d9   :  { %5567 = vmatpush1.bf16.msra.mxu0 %v10585_v21  ;;  %5608 = vmatpush1.bf16.msra.mxu1 %v10587_v19 }
0x17da   :  { %5568 = vmatprep.subr.bf16.mxu0 %v10591_v7  ;;  %5609 = vmatprep.subr.bf16.mxu1 %v10593_v25 }
0x17dd   :  { %5569 = vmatpush1.bf16.msra.mxu0 %v10597_v59  ;;  %5610 = vmatpush1.bf16.msra.mxu1 %v10599_v8 }
0x17de   :  { %5570 = vmatprep.subr.bf16.mxu0 %v10603_v0  ;;  %5611 = vmatprep.subr.bf16.mxu1 %v10605_v9 }
0x17e1   :  { %5571 = vmatpush1.bf16.msra.mxu0 %v10613_v32  ;;  %5612 = vmatpush1.bf16.msra.mxu1 %v10615_v16 }
0x17e2   :  { %5572 = vmatprep.subr.bf16.mxu0 %v10619_v39  ;;  %5613 = vmatprep.subr.bf16.mxu1 %v10621_v15 }
0x17e5   :  { %5573 = vmatpush1.bf16.msra.mxu0 %v10625_v28  ;;  %5614 = vmatpush1.bf16.msra.mxu1 %v10627_v46 }
0x17e6   :  { %5574 = vmatprep.subr.bf16.mxu0 %v10631_v5  ;;  %5615 = vmatprep.subr.bf16.mxu1 %v10633_v53 }
0x17e9   :  { %5575 = vmatpush1.bf16.msra.mxu0 %v10641_v57  ;;  %5616 = vmatpush1.bf16.msra.mxu1 %v10643_v17 }
0x17ea   :  { %5672 = vmatprep.subr.bf16.mxu0 %v10537_v4  ;;  %5713 = vmatprep.subr.bf16.mxu1 %v10539_v44 }
0x183e   :  { %v4627_v52 = vpop.f32.mrb[140].mxu0  ;;  %v4668_v50 = vpop.f32.mrb[140].mxu1 }
0x183f   :  { %v4675_v23 = vadd.f32 %v4627_v52, %v11456_v1  ;;  %v4677_v51 = vadd.f32 %v4668_v50, %v11457_v47  ;;  %v4629_v45 = vpop.f32.mrb[141].mxu0  ;;  %v4670_v60 = vpop.f32.mrb[141].mxu1 }
0x1840   :  { %v4676_v37 = vadd.f32 %v4629_v45, %v11458_v36  ;;  %v4678_v3 = vadd.f32 %v4670_v60, %v11459_v22  ;;  %v4631_v24 = vpop.f32.mrb[142].mxu0  ;;  %v4672_v62 = vpop.f32.mrb[142].mxu1 }
0x1841   :  { %v6848_v56 = vmul.f32 -1.442695, %v4675_v23  ;;  %v4632_v12 = vpop.f32.mrb[143].mxu0  ;;  %v4673_v27 = vpop.f32.mrb[143].mxu1  ;;  %v11461_v24 = vld [vmem:[#allocation24_spill] sm:$0xff] }
0x1842   :  { %v6849_v10 = vmul.f32 -1.442695, %v4676_v37  ;;  %v6850_v13 = vmul.f32 -1.442695, %v4678_v3  ;;  %v11463_v27 = vld [vmem:[#allocation25_spill] sm:$0xff] }
0x1843   :  { %7831 = vpow2.f32 %v6848_v56  ;;  %v11462_v56 = vld [vmem:[#allocation22_spill] sm:$0xff] }
0x1844   :  { %7833 = vpow2.f32 %v6849_v10 }
0x1845   :  { %7835 = vpow2.f32 %v6850_v13 }
0x1846   :  { %7837 = vtanh.f32 %v4677_v51  ;;  %v4768_v51 = vld [vmem:[%s11220_s12] sm:$0xf] }
0x1847   :  { %v10698_v62 = vrot.slane %v4768_v51, %v11461_v24  ;;  %v10701_v12 = vrot.slane %v4768_v51, %v11462_v56  ;;  %v10704_v10 = vrot.slane %v4768_v51, %v11463_v27 }
0x184d   :  { %v7832_v26 = vpop.eup %7831 }
0x184e   :  { %v7834_v29 = vpop.eup %7833  ;;  %v4682_v14 = vadd.f32 1.0, %v7832_v26 }
0x184f   :  { %v4688_v54 = vadd.f32 1.0, %v7834_v29  ;;  %v7836_v52 = vpop.eup %7835 }
0x1850   :  { %7839 = vrcp.f32 %v4682_v14  ;;  %v7838_v50 = vpop.eup %7837  ;;  %v4695_v23 = vadd.f32 1.0, %v7836_v52 }
0x1851   :  { %7841 = vrcp.f32 %v4688_v54 }
0x1852   :  { %7843 = vrcp.f32 %v4695_v23 }
0x185a   :  { %v7840_v1 = vpop.eup %7839 }
0x185b   :  { %v7842_v47 = vpop.eup %7841  ;;  %v4699_v45 = vmul.f32 %v7840_v1, %v7838_v50 }
0x185c   :  { %v4698_v60 = vmul.f32 %v7842_v47, %v10528_v48  ;;  %v7844_v37 = vpop.eup %7843  ;;  %v11464_v48 = vld [vmem:[#allocation23_spill] sm:$0xff] }
0x185d   :  { %v10707_v13 = vrot.slane %v4768_v51, %v11464_v48 }
0x185e   :  { %v4700_v36 = vadd.f32 %v4699_v45, %v4698_v60 }
0x1860   :  { %7845 = vtanh.f32 %v4700_v36 }
0x186a   :  { %v7846_v22 = vpop.eup %7845 }
0x186b   :  { %v10692_v3 = vmul.f32 %v7846_v22, %v7844_v37 }
0x186d   :  { %11460 = vst [vmem:[#allocation21_spill] sm:$0xff] %v10692_v3 }
0x187e   :  { %v5144_v26 = vpop.f32.mrb[144].mxu0  ;;  %v5217_v29 = vpop.f32.mrb[144].mxu1 }
0x187f   :  { %v10710_v14 = vadd.f32 %v5144_v26, %v10698_v62  ;;  %v10713_v54 = vadd.f32 %v5217_v29, %v10701_v12  ;;  %v5146_v52 = vpop.f32.mrb[145].mxu0  ;;  %v5219_v50 = vpop.f32.mrb[145].mxu1 }
0x1880   :  { %v10716_v1 = vadd.f32 %v5146_v52, %v10704_v10  ;;  %v10719_v47 = vadd.f32 %v5219_v50, %v10707_v13  ;;  %v5148_v45 = vpop.f32.mrb[146].mxu0  ;;  %v5221_v23 = vpop.f32.mrb[146].mxu1 }
0x1881   :  { %11465 = vst [vmem:[#allocation33_spill] sm:$0xff] %v10710_v14  ;;  %11466 = vst [vmem:[#allocation34_spill] sm:$0xff] %v10713_v54  ;;  %v10722_v60 = vadd.f32 %v5148_v45, %v10698_v62  ;;  %v10725_v36 = vadd.f32 %v5221_v23, %v10701_v12  ;;  %v5150_v37 = vpop.f32.mrb[147].mxu0  ;;  %v5223_v22 = vpop.f32.mrb[147].mxu1 }
0x1882   :  { %11467 = vst [vmem:[#allocation35_spill] sm:$0xff] %v10716_v1  ;;  %11468 = vst [vmem:[#allocation36_spill] sm:$0xff] %v10719_v47  ;;  %v10728_v51 = vadd.f32 %v5150_v37, %v10704_v10  ;;  %v10731_v56 = vadd.f32 %v5223_v22, %v10707_v13 }
0x1883   :  { %11469 = vst [vmem:[#allocation29_spill] sm:$0xff] %v10722_v60  ;;  %11470 = vst [vmem:[#allocation30_spill] sm:$0xff] %v10725_v36 }
0x1884   :  { %11471 = vst [vmem:[#allocation31_spill] sm:$0xff] %v10728_v51  ;;  %11472 = vst [vmem:[#allocation32_spill] sm:$0xff] %v10731_v56 }
0x1886   :  { %v5154_v48 = vpop.f32.mrb[148].mxu0  ;;  %v5227_v26 = vpop.f32.mrb[148].mxu1 }
0x1887   :  { %v10734_v29 = vadd.f32 %v5154_v48, %v10698_v62  ;;  %v10737_v52 = vadd.f32 %v5227_v26, %v10701_v12  ;;  %v5156_v50 = vpop.f32.mrb[149].mxu0  ;;  %v5229_v45 = vpop.f32.mrb[149].mxu1 }
0x1888   :  { %v10740_v23 = vadd.f32 %v5156_v50, %v10704_v10  ;;  %v10743_v63 = vadd.f32 %v5229_v45, %v10707_v13  ;;  %v5158_v37 = vpop.f32.mrb[150].mxu0  ;;  %v5231_v61 = vpop.f32.mrb[150].mxu1 }
0x1889   :  { %11473 = vst [vmem:[#allocation41_spill] sm:$0xff] %v10734_v29  ;;  %11474 = vst [vmem:[#allocation42_spill] sm:$0xff] %v10737_v52  ;;  %v10746_v22 = vadd.f32 %v5158_v37, %v10698_v62  ;;  %v10749_v41 = vadd.f32 %v5231_v61, %v10701_v12  ;;  %v5160_v48 = vpop.f32.mrb[151].mxu0  ;;  %v5233_v20 = vpop.f32.mrb[151].mxu1 }
0x188a   :  { %11475 = vst [vmem:[#allocation43_spill] sm:$0xff] %v10740_v23  ;;  %11476 = vst [vmem:[#allocation44_spill] sm:$0xff] %v10743_v63  ;;  %v10752_v26 = vadd.f32 %v5160_v48, %v10704_v10  ;;  %v10755_v47 = vadd.f32 %v5233_v20, %v10707_v13 }
0x188b   :  { %11477 = vst [vmem:[#allocation26_spill] sm:$0xff] %v10746_v22  ;;  %11478 = vst [vmem:[#allocation50_spill] sm:$0xff] %v10749_v41 }
0x188c   :  { %11479 = vst [vmem:[#allocation51_spill] sm:$0xff] %v10752_v26  ;;  %11480 = vst [vmem:[#allocation46_spill] sm:$0xff] %v10755_v47 }
0x188e   :  { %v5164_v50 = vpop.f32.mrb[152].mxu0  ;;  %v5237_v1 = vpop.f32.mrb[152].mxu1 }
0x188f   :  { %v10758_v45 = vadd.f32 %v5164_v50, %v10698_v62  ;;  %v10761_v54 = vadd.f32 %v5237_v1, %v10701_v12  ;;  %v5166_v37 = vpop.f32.mrb[153].mxu0  ;;  %v5239_v14 = vpop.f32.mrb[153].mxu1 }
0x1890   :  { %v10764_v61 = vadd.f32 %v5166_v37, %v10704_v10  ;;  %v10767_v56 = vadd.f32 %v5239_v14, %v10707_v13  ;;  %v5168_v48 = vpop.f32.mrb[154].mxu0  ;;  %v5241_v51 = vpop.f32.mrb[154].mxu1 }
0x1891   :  { %11481 = vst [vmem:[#allocation47_spill] sm:$0xff] %v10758_v45  ;;  %11482 = vst [vmem:[#allocation48_spill] sm:$0xff] %v10761_v54  ;;  %v10770_v20 = vadd.f32 %v5168_v48, %v10698_v62  ;;  %v10773_v36 = vadd.f32 %v5241_v51, %v10701_v12  ;;  %v5170_v50 = vpop.f32.mrb[155].mxu0  ;;  %v5243_v60 = vpop.f32.mrb[155].mxu1 }
0x1892   :  { %11483 = vst [vmem:[#allocation49_spill] sm:$0xff] %v10764_v61  ;;  %11484 = vst [vmem:[#allocation37_spill] sm:$0xff] %v10767_v56  ;;  %v10776_v1 = vadd.f32 %v5170_v50, %v10704_v10  ;;  %v10779_v3 = vadd.f32 %v5243_v60, %v10707_v13 }
0x1894   :  { %11485 = vst [vmem:[#allocation38_spill] sm:$0xff] %v10776_v1  ;;  %11486 = vst [vmem:[#allocation27_spill] sm:$0xff] %v10779_v3 }
0x1896   :  { %v5174_v37 = vpop.f32.mrb[156].mxu0  ;;  %v5247_v34 = vpop.f32.mrb[156].mxu1 }
0x1897   :  { %v10782_v14 = vadd.f32 %v5174_v37, %v10698_v62  ;;  %v10785_v6 = vadd.f32 %v5247_v34, %v10701_v12  ;;  %v5176_v48 = vpop.f32.mrb[157].mxu0  ;;  %v5249_v11 = vpop.f32.mrb[157].mxu1 }
0x1898   :  { %v10788_v51 = vadd.f32 %v5176_v48, %v10704_v10  ;;  %v10791_v27 = vadd.f32 %v5249_v11, %v10707_v13  ;;  %v5178_v50 = vpop.f32.mrb[158].mxu0  ;;  %v5251_v24 = vpop.f32.mrb[158].mxu1 }
0x1899   :  { %v5180_v60 = vpop.f32.mrb[159].mxu0  ;;  %v5253_v63 = vpop.f32.mrb[159].mxu1  ;;  %v5179_v23 = vadd.f32 %v5178_v50, %v10698_v62  ;;  %v5252_v37 = vadd.f32 %v5251_v24, %v10701_v12 }
0x189a   :  { %v5181_v52 = vadd.f32 %v5180_v60, %v10704_v10  ;;  %v5254_v34 = vadd.f32 %v5253_v63, %v10707_v13 }
0x189f   :  { %v5482_v29 = vpop.f32.mrb[160].mxu0  ;;  %v5523_v47 = vpop.f32.mrb[160].mxu1 }
0x18a0   :  { %v5530_v26 = vadd.f32 %v5482_v29, %v5179_v23  ;;  %v5532_v48 = vadd.f32 %v5523_v47, %v5252_v37  ;;  %v5484_v41 = vpop.f32.mrb[161].mxu0  ;;  %v5525_v22 = vpop.f32.mrb[161].mxu1 }
0x18a1   :  { %v5531_v11 = vadd.f32 %v5484_v41, %v5181_v52  ;;  %v5533_v56 = vadd.f32 %v5525_v22, %v5254_v34  ;;  %v5486_v61 = vpop.f32.mrb[162].mxu0  ;;  %v5527_v54 = vpop.f32.mrb[162].mxu1 }
0x18a2   :  { %v6947_v45 = vmul.f32 -1.442695, %v5530_v26  ;;  %v5487_v3 = vpop.f32.mrb[163].mxu0  ;;  %v5528_v1 = vpop.f32.mrb[163].mxu1 }
0x18a3   :  { %v6948_v62 = vmul.f32 -1.442695, %v5531_v11  ;;  %v6949_v24 = vmul.f32 -1.442695, %v5533_v56 }
0x18a4   :  { %7847 = vpow2.f32 %v6947_v45 }
0x18a5   :  { %7849 = vpow2.f32 %v6948_v62 }
0x18a6   :  { %7851 = vpow2.f32 %v6949_v24 }
0x18a7   :  { %7853 = vtanh.f32 %v5532_v48 }
0x18ae   :  { %v7848_v12 = vpop.eup %7847 }
0x18af   :  { %v7850_v10 = vpop.eup %7849  ;;  %v5537_v63 = vadd.f32 1.0, %v7848_v12 }
0x18b0   :  { %v5543_v13 = vadd.f32 1.0, %v7850_v10  ;;  %v7852_v47 = vpop.eup %7851 }
0x18b1   :  { %7855 = vrcp.f32 %v5537_v63  ;;  %v7854_v41 = vpop.eup %7853  ;;  %v5550_v23 = vadd.f32 1.0, %v7852_v47 }
0x18b2   :  { %7857 = vrcp.f32 %v5543_v13 }
0x18b3   :  { %7859 = vrcp.f32 %v5550_v23 }
0x18bb   :  { %v7856_v29 = vpop.eup %7855 }
0x18bc   :  { %v7858_v52 = vpop.eup %7857  ;;  %v5554_v54 = vmul.f32 %v7856_v29, %v7854_v41 }
0x18bd   :  { %v5553_v3 = vmul.f32 0.0, %v7858_v52  ;;  %v7860_v56 = vpop.eup %7859 }
0x18bf   :  { %v10797_v22 = vadd.f32 %v5554_v54, %v5553_v3 }
0x18c1   :  { %7861 = vtanh.f32 %v10797_v22 }
0x18cb   :  { %v7862_v26 = vpop.eup %7861 }
0x18cc   :  { %v10800_v45 = vmul.f32 %v7862_v26, %v7860_v56 }
0x18ce   :  { %v5559_v61 = vpack.c.bf16 %v10800_v45, %v10800_v45 }
0x18d0   :  { %5593 = vmatmul.mubr.bf16.vlgmr.msra.gmra.mrb[164].mxu0 %v5559_v61  ;;  %5634 = vmatmul.mubr.bf16.vlgmr.msra.gmra.mrb[164].mxu1 %v5559_v61 }
0x18d1   :  { %5673 = vmatpush1.bf16.msra.mxu0 %v10543_v35  ;;  %5714 = vmatpush1.bf16.msra.mxu1 %v10545_v38 }
0x18d2   :  { %5674 = vmatprep.subr.bf16.mxu0 %v10547_v43  ;;  %5715 = vmatprep.subr.bf16.mxu1 %v10549_v40 }
0x18d3   :  { %5704 = vmatprep.mubr.bf16.mxu0 %v11304_v18  ;;  %5745 = vmatprep.mubr.bf16.mxu1 %v11304_v18 }
0x18d5   :  { %5675 = vmatpush1.bf16.msra.mxu0 %v10557_v30  ;;  %5716 = vmatpush1.bf16.msra.mxu1 %v10559_v55 }
0x18d6   :  { %5676 = vmatprep.subr.bf16.mxu0 %v10563_v2  ;;  %5717 = vmatprep.subr.bf16.mxu1 %v10565_v58 }
0x18d9   :  { %5677 = vmatpush1.bf16.msra.mxu0 %v10569_v49  ;;  %5718 = vmatpush1.bf16.msra.mxu1 %v10571_v31 }
0x18da   :  { %5678 = vmatprep.subr.bf16.mxu0 %v10575_v33  ;;  %5719 = vmatprep.subr.bf16.mxu1 %v10577_v42 }
0x18dd   :  { %5679 = vmatpush1.bf16.msra.mxu0 %v10585_v21  ;;  %5720 = vmatpush1.bf16.msra.mxu1 %v10587_v19 }
0x18de   :  { %5680 = vmatprep.subr.bf16.mxu0 %v10591_v7  ;;  %5721 = vmatprep.subr.bf16.mxu1 %v10593_v25 }
0x18e1   :  { %5681 = vmatpush1.bf16.msra.mxu0 %v10597_v59  ;;  %5722 = vmatpush1.bf16.msra.mxu1 %v10599_v8 }
0x18e2   :  { %5682 = vmatprep.subr.bf16.mxu0 %v10603_v0  ;;  %5723 = vmatprep.subr.bf16.mxu1 %v10605_v9 }
0x18e5   :  { %5683 = vmatpush1.bf16.msra.mxu0 %v10613_v32  ;;  %5724 = vmatpush1.bf16.msra.mxu1 %v10615_v16 }
0x18e6   :  { %5684 = vmatprep.subr.bf16.mxu0 %v10619_v39  ;;  %5725 = vmatprep.subr.bf16.mxu1 %v10621_v15 }
0x18e9   :  { %5685 = vmatpush1.bf16.msra.mxu0 %v10625_v28  ;;  %5726 = vmatpush1.bf16.msra.mxu1 %v10627_v46 }
0x18ea   :  { %5686 = vmatprep.subr.bf16.mxu0 %v10631_v5  ;;  %5727 = vmatprep.subr.bf16.mxu1 %v10633_v53 }
0x18ed   :  { %5687 = vmatpush1.bf16.msra.mxu0 %v10641_v57  ;;  %5728 = vmatpush1.bf16.msra.mxu1 %v10643_v17 }
0x18ee   :  { %5784 = vmatprep.subr.bf16.mxu0 %v10537_v4  ;;  %5825 = vmatprep.subr.bf16.mxu1 %v10539_v44 }
0x19a3   :  { %v5594_v1 = vpop.f32.mrb[164].mxu0  ;;  %v5635_v50 = vpop.f32.mrb[164].mxu1 }
0x19a4   :  { %v5642_v60 = vadd.f32 %v5594_v1, %v10782_v14  ;;  %v5644_v37 = vadd.f32 %v5635_v50, %v10785_v6  ;;  %v5596_v34 = vpop.f32.mrb[165].mxu0  ;;  %v5637_v48 = vpop.f32.mrb[165].mxu1 }
0x19a5   :  { %v5643_v11 = vadd.f32 %v5596_v34, %v10788_v51  ;;  %v5645_v62 = vadd.f32 %v5637_v48, %v10791_v27  ;;  %v5598_v24 = vpop.f32.mrb[166].mxu0  ;;  %v5639_v12 = vpop.f32.mrb[166].mxu1 }
0x19a6   :  { %v6950_v10 = vmul.f32 -1.442695, %v5642_v60  ;;  %v5599_v63 = vpop.f32.mrb[167].mxu0  ;;  %v5640_v13 = vpop.f32.mrb[167].mxu1  ;;  %v11487_v12 = vld [vmem:[#allocation38_spill] sm:$0xff] }
0x19a7   :  { %v6951_v47 = vmul.f32 -1.442695, %v5643_v11  ;;  %v6952_v41 = vmul.f32 -1.442695, %v5645_v62  ;;  %v11488_v63 = vld [vmem:[#allocation27_spill] sm:$0xff] }
0x19a8   :  { %7863 = vpow2.f32 %v6950_v10 }
0x19a9   :  { %7865 = vpow2.f32 %v6951_v47 }
0x19aa   :  { %7867 = vpow2.f32 %v6952_v41 }
0x19ab   :  { %7869 = vtanh.f32 %v5644_v37 }
0x19b2   :  { %v7864_v29 = vpop.eup %7863 }
0x19b3   :  { %v7866_v52 = vpop.eup %7865  ;;  %v5649_v14 = vadd.f32 1.0, %v7864_v29 }
0x19b4   :  { %v5655_v6 = vadd.f32 1.0, %v7866_v52  ;;  %v7868_v51 = vpop.eup %7867 }
0x19b5   :  { %7871 = vrcp.f32 %v5649_v14  ;;  %v7870_v54 = vpop.eup %7869  ;;  %v5662_v56 = vadd.f32 1.0, %v7868_v51 }
0x19b6   :  { %7873 = vrcp.f32 %v5655_v6 }
0x19b7   :  { %7875 = vrcp.f32 %v5662_v56 }
0x19bf   :  { %v7872_v27 = vpop.eup %7871 }
0x19c0   :  { %v7874_v23 = vpop.eup %7873  ;;  %v5666_v3 = vmul.f32 %v7872_v27, %v7870_v54 }
0x19c1   :  { %v5665_v26 = vmul.f32 %v7874_v23, %v10797_v22  ;;  %v7876_v1 = vpop.eup %7875 }
0x19c3   :  { %v10843_v61 = vadd.f32 %v5666_v3, %v5665_v26 }
0x19c5   :  { %7877 = vtanh.f32 %v10843_v61 }
0x19cf   :  { %v7878_v50 = vpop.eup %7877 }
0x19d0   :  { %v10846_v60 = vmul.f32 %v7878_v50, %v7876_v1 }
0x19d2   :  { %v5671_v37 = vpack.c.bf16 %v10846_v60, %v10846_v60 }
0x19d4   :  { %5705 = vmatmul.mubr.bf16.vlgmr.msra.gmra.mrb[168].mxu0 %v5671_v37  ;;  %5746 = vmatmul.mubr.bf16.vlgmr.msra.gmra.mrb[168].mxu1 %v5671_v37 }
0x19d5   :  { %5785 = vmatpush1.bf16.msra.mxu0 %v10543_v35  ;;  %5826 = vmatpush1.bf16.msra.mxu1 %v10545_v38 }
0x19d6   :  { %5786 = vmatprep.subr.bf16.mxu0 %v10547_v43  ;;  %5827 = vmatprep.subr.bf16.mxu1 %v10549_v40 }
0x19d7   :  { %5816 = vmatprep.mubr.bf16.mxu0 %v11304_v18  ;;  %5857 = vmatprep.mubr.bf16.mxu1 %v11304_v18 }
0x19d9   :  { %5787 = vmatpush1.bf16.msra.mxu0 %v10557_v30  ;;  %5828 = vmatpush1.bf16.msra.mxu1 %v10559_v55 }
0x19da   :  { %5788 = vmatprep.subr.bf16.mxu0 %v10563_v2  ;;  %5829 = vmatprep.subr.bf16.mxu1 %v10565_v58 }
0x19dd   :  { %5789 = vmatpush1.bf16.msra.mxu0 %v10569_v49  ;;  %5830 = vmatpush1.bf16.msra.mxu1 %v10571_v31 }
0x19de   :  { %5790 = vmatprep.subr.bf16.mxu0 %v10575_v33  ;;  %5831 = vmatprep.subr.bf16.mxu1 %v10577_v42 }
0x19e1   :  { %5791 = vmatpush1.bf16.msra.mxu0 %v10585_v21  ;;  %5832 = vmatpush1.bf16.msra.mxu1 %v10587_v19 }
0x19e2   :  { %5792 = vmatprep.subr.bf16.mxu0 %v10591_v7  ;;  %5833 = vmatprep.subr.bf16.mxu1 %v10593_v25 }
0x19e5   :  { %5793 = vmatpush1.bf16.msra.mxu0 %v10597_v59  ;;  %5834 = vmatpush1.bf16.msra.mxu1 %v10599_v8 }
0x19e6   :  { %5794 = vmatprep.subr.bf16.mxu0 %v10603_v0  ;;  %5835 = vmatprep.subr.bf16.mxu1 %v10605_v9 }
0x19e9   :  { %5795 = vmatpush1.bf16.msra.mxu0 %v10613_v32  ;;  %5836 = vmatpush1.bf16.msra.mxu1 %v10615_v16 }
0x19ea   :  { %5796 = vmatprep.subr.bf16.mxu0 %v10619_v39  ;;  %5837 = vmatprep.subr.bf16.mxu1 %v10621_v15 }
0x19ed   :  { %5797 = vmatpush1.bf16.msra.mxu0 %v10625_v28  ;;  %5838 = vmatpush1.bf16.msra.mxu1 %v10627_v46 }
0x19ee   :  { %5798 = vmatprep.subr.bf16.mxu0 %v10631_v5  ;;  %5839 = vmatprep.subr.bf16.mxu1 %v10633_v53 }
0x19f1   :  { %5799 = vmatpush1.bf16.msra.mxu0 %v10641_v57  ;;  %5840 = vmatpush1.bf16.msra.mxu1 %v10643_v17 }
0x19f2   :  { %5896 = vmatprep.subr.bf16.mxu0 %v10537_v4  ;;  %5937 = vmatprep.subr.bf16.mxu1 %v10539_v44 }
0x1aa7   :  { %v5706_v22 = vpop.f32.mrb[168].mxu0  ;;  %v5747_v34 = vpop.f32.mrb[168].mxu1 }
0x1aa8   :  { %v5754_v48 = vadd.f32 %v5706_v22, %v10770_v20  ;;  %v5756_v11 = vadd.f32 %v5747_v34, %v10773_v36  ;;  %v5708_v62 = vpop.f32.mrb[169].mxu0  ;;  %v5749_v24 = vpop.f32.mrb[169].mxu1 }
0x1aa9   :  { %v5755_v10 = vadd.f32 %v5708_v62, %v11487_v12  ;;  %v5757_v13 = vadd.f32 %v5749_v24, %v11488_v63  ;;  %v5710_v47 = vpop.f32.mrb[170].mxu0  ;;  %v5751_v41 = vpop.f32.mrb[170].mxu1  ;;  %v11489_v12 = vld [vmem:[#allocation47_spill] sm:$0xff]  ;;  %v11490_v63 = vld [vmem:[#allocation48_spill] sm:$0xff] }
0x1aaa   :  { %v6953_v29 = vmul.f32 -1.442695, %v5754_v48  ;;  %v5711_v52 = vpop.f32.mrb[171].mxu0  ;;  %v5752_v14 = vpop.f32.mrb[171].mxu1 }
0x1aab   :  { %v6954_v6 = vmul.f32 -1.442695, %v5755_v10  ;;  %v6955_v51 = vmul.f32 -1.442695, %v5757_v13  ;;  %v11492_v14 = vld [vmem:[#allocation37_spill] sm:$0xff] }
0x1aac   :  { %7879 = vpow2.f32 %v6953_v29  ;;  %v11491_v29 = vld [vmem:[#allocation49_spill] sm:$0xff] }
0x1aad   :  { %7881 = vpow2.f32 %v6954_v6 }
0x1aae   :  { %7883 = vpow2.f32 %v6955_v51 }
0x1aaf   :  { %7885 = vtanh.f32 %v5756_v11 }
0x1ab6   :  { %v7880_v54 = vpop.eup %7879 }
0x1ab7   :  { %v7882_v27 = vpop.eup %7881  ;;  %v5761_v20 = vadd.f32 1.0, %v7880_v54 }
0x1ab8   :  { %v5767_v36 = vadd.f32 1.0, %v7882_v27  ;;  %v7884_v23 = vpop.eup %7883 }
0x1ab9   :  { %7887 = vrcp.f32 %v5761_v20  ;;  %v7886_v3 = vpop.eup %7885  ;;  %v5774_v50 = vadd.f32 1.0, %v7884_v23 }
0x1aba   :  { %7889 = vrcp.f32 %v5767_v36 }
0x1abb   :  { %7891 = vrcp.f32 %v5774_v50 }
0x1ac3   :  { %v7888_v56 = vpop.eup %7887 }
0x1ac4   :  { %v7890_v26 = vpop.eup %7889  ;;  %v5778_v1 = vmul.f32 %v7888_v56, %v7886_v3 }
0x1ac5   :  { %v5777_v37 = vmul.f32 %v7890_v26, %v10843_v61  ;;  %v7892_v34 = vpop.eup %7891 }
0x1ac7   :  { %v10889_v22 = vadd.f32 %v5778_v1, %v5777_v37 }
0x1ac9   :  { %7893 = vtanh.f32 %v10889_v22 }
0x1ad3   :  { %v7894_v48 = vpop.eup %7893 }
0x1ad4   :  { %v10892_v62 = vmul.f32 %v7894_v48, %v7892_v34 }
0x1ad6   :  { %v5783_v11 = vpack.c.bf16 %v10892_v62, %v10892_v62 }
0x1ad8   :  { %5817 = vmatmul.mubr.bf16.vlgmr.msra.gmra.mrb[172].mxu0 %v5783_v11  ;;  %5858 = vmatmul.mubr.bf16.vlgmr.msra.gmra.mrb[172].mxu1 %v5783_v11 }
0x1ad9   :  { %5897 = vmatpush1.bf16.msra.mxu0 %v10543_v35  ;;  %5938 = vmatpush1.bf16.msra.mxu1 %v10545_v38 }
0x1ada   :  { %5898 = vmatprep.subr.bf16.mxu0 %v10547_v43  ;;  %5939 = vmatprep.subr.bf16.mxu1 %v10549_v40 }
0x1adb   :  { %5928 = vmatprep.mubr.bf16.mxu0 %v11304_v18  ;;  %5969 = vmatprep.mubr.bf16.mxu1 %v11304_v18 }
0x1add   :  { %5899 = vmatpush1.bf16.msra.mxu0 %v10557_v30  ;;  %5940 = vmatpush1.bf16.msra.mxu1 %v10559_v55 }
0x1ade   :  { %5900 = vmatprep.subr.bf16.mxu0 %v10563_v2  ;;  %5941 = vmatprep.subr.bf16.mxu1 %v10565_v58 }
0x1ae1   :  { %5901 = vmatpush1.bf16.msra.mxu0 %v10569_v49  ;;  %5942 = vmatpush1.bf16.msra.mxu1 %v10571_v31 }
0x1ae2   :  { %5902 = vmatprep.subr.bf16.mxu0 %v10575_v33  ;;  %5943 = vmatprep.subr.bf16.mxu1 %v10577_v42 }
0x1ae5   :  { %5903 = vmatpush1.bf16.msra.mxu0 %v10585_v21  ;;  %5944 = vmatpush1.bf16.msra.mxu1 %v10587_v19 }
0x1ae6   :  { %5904 = vmatprep.subr.bf16.mxu0 %v10591_v7  ;;  %5945 = vmatprep.subr.bf16.mxu1 %v10593_v25 }
0x1ae9   :  { %5905 = vmatpush1.bf16.msra.mxu0 %v10597_v59  ;;  %5946 = vmatpush1.bf16.msra.mxu1 %v10599_v8 }
0x1aea   :  { %5906 = vmatprep.subr.bf16.mxu0 %v10603_v0  ;;  %5947 = vmatprep.subr.bf16.mxu1 %v10605_v9 }
0x1aed   :  { %5907 = vmatpush1.bf16.msra.mxu0 %v10613_v32  ;;  %5948 = vmatpush1.bf16.msra.mxu1 %v10615_v16 }
0x1aee   :  { %5908 = vmatprep.subr.bf16.mxu0 %v10619_v39  ;;  %5949 = vmatprep.subr.bf16.mxu1 %v10621_v15 }
0x1af1   :  { %5909 = vmatpush1.bf16.msra.mxu0 %v10625_v28  ;;  %5950 = vmatpush1.bf16.msra.mxu1 %v10627_v46 }
0x1af2   :  { %5910 = vmatprep.subr.bf16.mxu0 %v10631_v5  ;;  %5951 = vmatprep.subr.bf16.mxu1 %v10633_v53 }
0x1af5   :  { %5911 = vmatpush1.bf16.msra.mxu0 %v10641_v57  ;;  %5952 = vmatpush1.bf16.msra.mxu1 %v10643_v17 }
0x1af6   :  { %6008 = vmatprep.subr.bf16.mxu0 %v10537_v4  ;;  %6049 = vmatprep.subr.bf16.mxu1 %v10539_v44 }
0x1bab   :  { %v5818_v61 = vpop.f32.mrb[172].mxu0  ;;  %v5859_v24 = vpop.f32.mrb[172].mxu1 }
0x1bac   :  { %v5866_v10 = vadd.f32 %v5818_v61, %v11489_v12  ;;  %v5868_v13 = vadd.f32 %v5859_v24, %v11490_v63  ;;  %v5820_v47 = vpop.f32.mrb[173].mxu0  ;;  %v5861_v41 = vpop.f32.mrb[173].mxu1 }
0x1bad   :  { %v5867_v52 = vadd.f32 %v5820_v47, %v11491_v29  ;;  %v5869_v6 = vadd.f32 %v5861_v41, %v11492_v14  ;;  %v5822_v51 = vpop.f32.mrb[174].mxu0  ;;  %v5863_v54 = vpop.f32.mrb[174].mxu1 }
0x1bae   :  { %v6956_v27 = vmul.f32 -1.442695, %v5866_v10  ;;  %v5823_v20 = vpop.f32.mrb[175].mxu0  ;;  %v5864_v36 = vpop.f32.mrb[175].mxu1  ;;  %v10992_v51 = vld [vmem:[#allocation12] ss:$16 sps:$4 sm:$0xff]  }
0x1baf   :  { %v6957_v4 = vmul.f32 -1.442695, %v5867_v52  ;;  %v6958_v44 = vmul.f32 -1.442695, %v5869_v6  ;;  %v10995_v54 = vld [vmem:[#allocation12 + $0x8] ss:$16 sps:$4 sm:$0xff]  }
0x1bb0   :  { %7895 = vpow2.f32 %v6956_v27  ;;  %v10998_v27 = vld [vmem:[#allocation12 + $0x24] ss:$16 sps:$4 sm:$0xff]   ;;  %v11001_v20 = vld [vmem:[#allocation12 + $0x2c] ss:$16 sps:$4 sm:$0xff]   ;;  %v11006_v36 = vld [vmem:[#allocation12 + $0x20] ss:$16 sps:$4 sm:$0xff]  }
0x1bb1   :  { %7897 = vpow2.f32 %v6957_v4  ;;  %v11009_v4 = vld [vmem:[#allocation12 + $0x28] ss:$16 sps:$4 sm:$0xff]  }
0x1bb2   :  { %7899 = vpow2.f32 %v6958_v44  ;;  %v11012_v44 = vld [vmem:[#allocation12 + $0x44] ss:$16 sps:$4 sm:$0xff]  }
0x1bb3   :  { %7901 = vtanh.f32 %v5868_v13 }
0x1bba   :  { %v7896_v23 = vpop.eup %7895 }
0x1bbb   :  { %v7898_v3 = vpop.eup %7897  ;;  %v5873_v56 = vadd.f32 1.0, %v7896_v23  ;;  %v11015_v23 = vld [vmem:[#allocation12 + $0x4c] ss:$16 sps:$4 sm:$0xff]  }
0x1bbc   :  { %v5879_v26 = vadd.f32 1.0, %v7898_v3  ;;  %v7900_v1 = vpop.eup %7899  ;;  %v11018_v3 = vld [vmem:[#allocation12 + $0x40] ss:$16 sps:$4 sm:$0xff]  }
0x1bbd   :  { %7903 = vrcp.f32 %v5873_v56  ;;  %v7902_v50 = vpop.eup %7901  ;;  %v5886_v11 = vadd.f32 1.0, %v7900_v1  ;;  %v11021_v56 = vld [vmem:[#allocation12 + $0x48] ss:$16 sps:$4 sm:$0xff]   ;;  %v11027_v1 = vld [vmem:[#allocation12 + $0x6c] ss:$16 sps:$4 sm:$0xff]  }
0x1bbe   :  { %7905 = vrcp.f32 %v5879_v26  ;;  %v11024_v26 = vld [vmem:[#allocation12 + $0x64] ss:$16 sps:$4 sm:$0xff]  }
0x1bbf   :  { %7907 = vrcp.f32 %v5886_v11  ;;  %v11042_v11 = vld [vmem:[#allocation12 + $0x80] ss:$16 sps:$4 sm:$0xff]  }
0x1bc7   :  { %v7904_v37 = vpop.eup %7903 }
0x1bc8   :  { %v7906_v34 = vpop.eup %7905  ;;  %v5890_v48 = vmul.f32 %v7904_v37, %v7902_v50  ;;  %v11030_v50 = vld [vmem:[#allocation12 + $0x60] ss:$16 sps:$4 sm:$0xff]   ;;  %v11033_v37 = vld [vmem:[#allocation12 + $0x68] ss:$16 sps:$4 sm:$0xff]  }
0x1bc9   :  { %v5889_v61 = vmul.f32 %v7906_v34, %v10889_v22  ;;  %v7908_v12 = vpop.eup %7907  ;;  %v11036_v34 = vld [vmem:[#allocation12 + $0x84] ss:$16 sps:$4 sm:$0xff]  }
0x1bcb   :  { %v10935_v24 = vadd.f32 %v5890_v48, %v5889_v61  ;;  %v11039_v48 = vld [vmem:[#allocation12 + $0x8c] ss:$16 sps:$4 sm:$0xff]   ;;  %v11045_v61 = vld [vmem:[#allocation12 + $0x88] ss:$16 sps:$4 sm:$0xff]  }
0x1bcd   :  { %7909 = vtanh.f32 %v10935_v24 }
0x1bd7   :  { %v7910_v10 = vpop.eup %7909 }
0x1bd8   :  { %v10938_v63 = vmul.f32 %v7910_v10, %v7908_v12  ;;  %v11051_v12 = vld [vmem:[#allocation12 + $0xac] ss:$16 sps:$4 sm:$0xff]   ;;  %v11054_v10 = vld [vmem:[#allocation12 + $0xa0] ss:$16 sps:$4 sm:$0xff]  }
0x1bda   :  { %v5895_v13 = vpack.c.bf16 %v10938_v63, %v10938_v63 }
0x1bdc   :  { %5929 = vmatmul.mubr.bf16.vlgmr.msra.gmra.mrb[176].mxu0 %v5895_v13  ;;  %5970 = vmatmul.mubr.bf16.vlgmr.msra.gmra.mrb[176].mxu1 %v5895_v13  ;;  %v11057_v13 = vld [vmem:[#allocation12 + $0xa8] ss:$16 sps:$4 sm:$0xff]  }
0x1bdd   :  { %6009 = vmatpush1.bf16.msra.mxu0 %v10543_v35  ;;  %6050 = vmatpush1.bf16.msra.mxu1 %v10545_v38  ;;  %v10974_v35 = vld [vmem:[#allocation12 + $0x4] ss:$16 sps:$4 sm:$0xff]   ;;  %v10977_v38 = vld [vmem:[#allocation12 + $0xc] ss:$16 sps:$4 sm:$0xff]  }
0x1bde   :  { %6010 = vmatprep.subr.bf16.mxu0 %v10547_v43  ;;  %6051 = vmatprep.subr.bf16.mxu1 %v10549_v40 }
0x1bdf   :  { %6040 = vmatprep.mubr.bf16.mxu0 %v11304_v18  ;;  %6081 = vmatprep.mubr.bf16.mxu1 %v11304_v18 }
0x1be1   :  { %6011 = vmatpush1.bf16.msra.mxu0 %v10557_v30  ;;  %6052 = vmatpush1.bf16.msra.mxu1 %v10559_v55  ;;  %v11493_v30 = vld [vmem:[#allocation26_spill] sm:$0xff] }
0x1be2   :  { %6012 = vmatprep.subr.bf16.mxu0 %v10563_v2  ;;  %6053 = vmatprep.subr.bf16.mxu1 %v10565_v58  ;;  %v11494_v2 = vld [vmem:[#allocation50_spill] sm:$0xff] }
0x1be5   :  { %6013 = vmatpush1.bf16.msra.mxu0 %v10569_v49  ;;  %6054 = vmatpush1.bf16.msra.mxu1 %v10571_v31 }
0x1be6   :  { %6014 = vmatprep.subr.bf16.mxu0 %v10575_v33  ;;  %6055 = vmatprep.subr.bf16.mxu1 %v10577_v42  ;;  %v11495_v33 = vld [vmem:[#allocation51_spill] sm:$0xff] }
0x1be9   :  { %6015 = vmatpush1.bf16.msra.mxu0 %v10585_v21  ;;  %6056 = vmatpush1.bf16.msra.mxu1 %v10587_v19  ;;  %v11496_v21 = vld [vmem:[#allocation46_spill] sm:$0xff] }
0x1bea   :  { %6016 = vmatprep.subr.bf16.mxu0 %v10591_v7  ;;  %6057 = vmatprep.subr.bf16.mxu1 %v10593_v25 }
0x1bed   :  { %6017 = vmatpush1.bf16.msra.mxu0 %v10597_v59  ;;  %6058 = vmatpush1.bf16.msra.mxu1 %v10599_v8 }
0x1bee   :  { %6018 = vmatprep.subr.bf16.mxu0 %v10603_v0  ;;  %6059 = vmatprep.subr.bf16.mxu1 %v10605_v9 }
0x1bf1   :  { %6019 = vmatpush1.bf16.msra.mxu0 %v10613_v32  ;;  %6060 = vmatpush1.bf16.msra.mxu1 %v10615_v16 }
0x1bf2   :  { %6020 = vmatprep.subr.bf16.mxu0 %v10619_v39  ;;  %6061 = vmatprep.subr.bf16.mxu1 %v10621_v15 }
0x1bf5   :  { %6021 = vmatpush1.bf16.msra.mxu0 %v10625_v28  ;;  %6062 = vmatpush1.bf16.msra.mxu1 %v10627_v46 }
0x1bf6   :  { %6022 = vmatprep.subr.bf16.mxu0 %v10631_v5  ;;  %6063 = vmatprep.subr.bf16.mxu1 %v10633_v53 }
0x1bf9   :  { %6023 = vmatpush1.bf16.msra.mxu0 %v10641_v57  ;;  %6064 = vmatpush1.bf16.msra.mxu1 %v10643_v17 }
0x1bfa   :  { %6120 = vmatprep.subr.bf16.mxu0 %v10974_v35  ;;  %6161 = vmatprep.subr.bf16.mxu1 %v10977_v38 }
0x1caf   :  { %v5930_v43 = vpop.f32.mrb[176].mxu0  ;;  %v5971_v40 = vpop.f32.mrb[176].mxu1 }
0x1cb0   :  { %v5978_v55 = vadd.f32 %v5930_v43, %v11493_v30  ;;  %v5980_v58 = vadd.f32 %v5971_v40, %v11494_v2  ;;  %v5932_v49 = vpop.f32.mrb[177].mxu0  ;;  %v5973_v31 = vpop.f32.mrb[177].mxu1  ;;  %v11060_v43 = vld [vmem:[#allocation12 + $0xc4] ss:$16 sps:$4 sm:$0xff]   ;;  %v11063_v40 = vld [vmem:[#allocation12 + $0xcc] ss:$16 sps:$4 sm:$0xff]  }
0x1cb1   :  { %v5979_v42 = vadd.f32 %v5932_v49, %v11495_v33  ;;  %v5981_v19 = vadd.f32 %v5973_v31, %v11496_v21  ;;  %v5934_v7 = vpop.f32.mrb[178].mxu0  ;;  %v5975_v25 = vpop.f32.mrb[178].mxu1  ;;  %v11066_v30 = vld [vmem:[#allocation12 + $0xc0] ss:$16 sps:$4 sm:$0xff]   ;;  %v11072_v2 = vld [vmem:[#allocation12 + $0xe4] ss:$16 sps:$4 sm:$0xff]  }
0x1cb2   :  { %v6959_v59 = vmul.f32 -1.442695, %v5978_v55  ;;  %v5935_v8 = vpop.f32.mrb[179].mxu0  ;;  %v5976_v0 = vpop.f32.mrb[179].mxu1  ;;  %v11069_v55 = vld [vmem:[#allocation12 + $0xc8] ss:$16 sps:$4 sm:$0xff]  }
0x1cb3   :  { %v6960_v9 = vmul.f32 -1.442695, %v5979_v42  ;;  %v6961_v32 = vmul.f32 -1.442695, %v5981_v19  ;;  %v11078_v49 = vld [vmem:[#allocation12 + $0xe0] ss:$16 sps:$4 sm:$0xff]  }
0x1cb4   :  { %7911 = vpow2.f32 %v6959_v59  ;;  %v11081_v31 = vld [vmem:[#allocation12 + $0xe8] ss:$16 sps:$4 sm:$0xff]   ;;  %v11498_v7 = vld [vmem:[#allocation42_spill] sm:$0xff] }
0x1cb5   :  { %7913 = vpow2.f32 %v6960_v9  ;;  %v11497_v21 = vld [vmem:[#allocation41_spill] sm:$0xff]  ;;  %v11499_v0 = vld [vmem:[#allocation43_spill] sm:$0xff] }
0x1cb6   :  { %7915 = vpow2.f32 %v6961_v32  ;;  %v11500_v32 = vld [vmem:[#allocation44_spill] sm:$0xff] }
0x1cb7   :  { %7917 = vtanh.f32 %v5980_v58  ;;  %v11075_v58 = vld [vmem:[#allocation12 + $0xec] ss:$16 sps:$4 sm:$0xff]  }
0x1cbe   :  { %v7912_v16 = vpop.eup %7911 }
0x1cbf   :  { %v7914_v39 = vpop.eup %7913  ;;  %v5985_v15 = vadd.f32 1.0, %v7912_v16 }
0x1cc0   :  { %v5991_v28 = vadd.f32 1.0, %v7914_v39  ;;  %v7916_v46 = vpop.eup %7915 }
0x1cc1   :  { %7919 = vrcp.f32 %v5985_v15  ;;  %v7918_v5 = vpop.eup %7917  ;;  %v5998_v22 = vadd.f32 1.0, %v7916_v46 }
0x1cc2   :  { %7921 = vrcp.f32 %v5991_v28 }
0x1cc3   :  { %7923 = vrcp.f32 %v5998_v22 }
0x1ccb   :  { %v7920_v53 = vpop.eup %7919 }
0x1ccc   :  { %v7922_v57 = vpop.eup %7921  ;;  %v6002_v17 = vmul.f32 %v7920_v53, %v7918_v5 }
0x1ccd   :  { %v6001_v47 = vmul.f32 %v7922_v57, %v10935_v24  ;;  %v7924_v29 = vpop.eup %7923  ;;  %v11048_v24 = vld [vmem:[#allocation12 + $0xa4] ss:$16 sps:$4 sm:$0xff]  }
0x1ccf   :  { %v10985_v41 = vadd.f32 %v6002_v17, %v6001_v47 }
0x1cd1   :  { %7925 = vtanh.f32 %v10985_v41 }
0x1cdb   :  { %v7926_v52 = vpop.eup %7925 }
0x1cdc   :  { %v10988_v14 = vmul.f32 %v7926_v52, %v7924_v29 }
0x1cde   :  { %v6007_v6 = vpack.c.bf16 %v10988_v14, %v10988_v14 }
0x1ce0   :  { %6041 = vmatmul.mubr.bf16.vlgmr.msra.gmra.mrb[180].mxu0 %v6007_v6  ;;  %6082 = vmatmul.mubr.bf16.vlgmr.msra.gmra.mrb[180].mxu1 %v6007_v6 }
0x1ce1   :  { %6121 = vmatpush1.bf16.msra.mxu0 %v10992_v51  ;;  %6162 = vmatpush1.bf16.msra.mxu1 %v10995_v54 }
0x1ce2   :  { %6122 = vmatprep.subr.bf16.mxu0 %v10998_v27  ;;  %6163 = vmatprep.subr.bf16.mxu1 %v11001_v20 }
0x1ce3   :  { %6152 = vmatprep.mubr.bf16.mxu0 %v11304_v18  ;;  %6193 = vmatprep.mubr.bf16.mxu1 %v11304_v18 }
0x1ce5   :  { %6123 = vmatpush1.bf16.msra.mxu0 %v11006_v36  ;;  %6164 = vmatpush1.bf16.msra.mxu1 %v11009_v4 }
0x1ce6   :  { %6124 = vmatprep.subr.bf16.mxu0 %v11012_v44  ;;  %6165 = vmatprep.subr.bf16.mxu1 %v11015_v23 }
0x1ce9   :  { %6125 = vmatpush1.bf16.msra.mxu0 %v11018_v3  ;;  %6166 = vmatpush1.bf16.msra.mxu1 %v11021_v56 }
0x1cea   :  { %6126 = vmatprep.subr.bf16.mxu0 %v11024_v26  ;;  %6167 = vmatprep.subr.bf16.mxu1 %v11027_v1 }
0x1ced   :  { %6127 = vmatpush1.bf16.msra.mxu0 %v11030_v50  ;;  %6168 = vmatpush1.bf16.msra.mxu1 %v11033_v37 }
0x1cee   :  { %6128 = vmatprep.subr.bf16.mxu0 %v11036_v34  ;;  %6169 = vmatprep.subr.bf16.mxu1 %v11039_v48 }
0x1cf1   :  { %6129 = vmatpush1.bf16.msra.mxu0 %v11042_v11  ;;  %6170 = vmatpush1.bf16.msra.mxu1 %v11045_v61 }
0x1cf2   :  { %6130 = vmatprep.subr.bf16.mxu0 %v11048_v24  ;;  %6171 = vmatprep.subr.bf16.mxu1 %v11051_v12 }
0x1cf5   :  { %6131 = vmatpush1.bf16.msra.mxu0 %v11054_v10  ;;  %6172 = vmatpush1.bf16.msra.mxu1 %v11057_v13 }
0x1cf6   :  { %6132 = vmatprep.subr.bf16.mxu0 %v11060_v43  ;;  %6173 = vmatprep.subr.bf16.mxu1 %v11063_v40 }
0x1cf9   :  { %6133 = vmatpush1.bf16.msra.mxu0 %v11066_v30  ;;  %6174 = vmatpush1.bf16.msra.mxu1 %v11069_v55 }
0x1cfa   :  { %6134 = vmatprep.subr.bf16.mxu0 %v11072_v2  ;;  %6175 = vmatprep.subr.bf16.mxu1 %v11075_v58 }
0x1cfd   :  { %6135 = vmatpush1.bf16.msra.mxu0 %v11078_v49  ;;  %6176 = vmatpush1.bf16.msra.mxu1 %v11081_v31 }
0x1cfe   :  { %6232 = vmatprep.subr.bf16.mxu0 %v10974_v35  ;;  %6273 = vmatprep.subr.bf16.mxu1 %v10977_v38 }
0x1db3   :  { %v6042_v33 = vpop.f32.mrb[180].mxu0  ;;  %v6083_v42 = vpop.f32.mrb[180].mxu1 }
0x1db4   :  { %v6090_v19 = vadd.f32 %v6042_v33, %v11497_v21  ;;  %v6092_v25 = vadd.f32 %v6083_v42, %v11498_v7  ;;  %v6044_v59 = vpop.f32.mrb[181].mxu0  ;;  %v6085_v8 = vpop.f32.mrb[181].mxu1  ;;  %v6359_v7 = vld [vmem:[%s11221_s13] sm:$0x3] }
0x1db5   :  { %v6091_v9 = vadd.f32 %v6044_v59, %v11499_v0  ;;  %v6093_v16 = vadd.f32 %v6085_v8, %v11500_v32  ;;  %v6046_v39 = vpop.f32.mrb[182].mxu0  ;;  %v6087_v15 = vpop.f32.mrb[182].mxu1  ;;  %v11501_v0 = vld [vmem:[#allocation24_spill] sm:$0xff]  ;;  %v11502_v32 = vld [vmem:[#allocation25_spill] sm:$0xff] }
0x1db6   :  { %v6962_v28 = vmul.f32 -1.442695, %v6090_v19  ;;  %v6047_v46 = vpop.f32.mrb[183].mxu0  ;;  %v6088_v5 = vpop.f32.mrb[183].mxu1  ;;  %v11503_v39 = vld [vmem:[#allocation39_spill] sm:$0xff] }
0x1db7   :  { %v6963_v35 = vmul.f32 -1.442695, %v6091_v9  ;;  %v6964_v38 = vmul.f32 -1.442695, %v6093_v16  ;;  %v11100_v9 = vrot.slane %v6359_v7, %v11501_v0  ;;  %v11103_v16 = vrot.slane %v6359_v7, %v11502_v32  ;;  %v11511_v32 = vld [vmem:[#allocation33_spill] sm:$0xff] }
0x1db8   :  { %7927 = vpow2.f32 %v6962_v28 }
0x1db9   :  { %7929 = vpow2.f32 %v6963_v35  ;;  %v6375_v15 = vmul.f32 %v11100_v9, %v11503_v39  ;;  %v6378_v5 = vmul.f32 %v11103_v16, %v10988_v14  ;;  %v11504_v35 = vld [vmem:[#allocation40_spill] sm:$0xff] }
0x1dba   :  { %7931 = vpow2.f32 %v6964_v38  ;;  %v6377_v38 = vmul.f32 %v11100_v9, %v11504_v35 }
0x1dbb   :  { %7933 = vtanh.f32 %v6092_v25 }
0x1dc2   :  { %v7928_v53 = vpop.eup %7927 }
0x1dc3   :  { %v7930_v57 = vpop.eup %7929  ;;  %v6097_v17 = vadd.f32 1.0, %v7928_v53  ;;  %v6396_v53 = vadd.f32 %v6378_v5, %v6377_v38  ;;  %v11513_v5 = vld [vmem:[#allocation35_spill] sm:$0xff] }
0x1dc4   :  { %v6103_v22 = vadd.f32 1.0, %v7930_v57  ;;  %v7932_v47 = vpop.eup %7931  ;;  %v6382_v57 = vmul.f32 %v11103_v16, %v10892_v62 }
0x1dc5   :  { %7935 = vrcp.f32 %v6097_v17  ;;  %v7934_v29 = vpop.eup %7933  ;;  %v6110_v42 = vadd.f32 1.0, %v7932_v47 }
0x1dc6   :  { %7937 = vrcp.f32 %v6103_v22 }
0x1dc7   :  { %7939 = vrcp.f32 %v6110_v42 }
0x1dcf   :  { %v7936_v52 = vpop.eup %7935 }
0x1dd0   :  { %v7938_v6 = vpop.eup %7937  ;;  %v6114_v33 = vmul.f32 %v7936_v52, %v7934_v29 }
0x1dd1   :  { %v6113_v21 = vmul.f32 %v7938_v6, %v10985_v41  ;;  %v7940_v25 = vpop.eup %7939 }
0x1dd3   :  { %v11091_v19 = vadd.f32 %v6114_v33, %v6113_v21 }
0x1dd5   :  { %7941 = vtanh.f32 %v11091_v19 }
0x1ddf   :  { %v7942_v59 = vpop.eup %7941 }
0x1de0   :  { %v11097_v8 = vmul.f32 %v7942_v59, %v7940_v25 }
0x1de2   :  { %v6119_v41 = vpack.c.bf16 %v11097_v8, %v11097_v8  ;;  %v6376_v28 = vmul.f32 %v11103_v16, %v11097_v8 }
0x1de4   :  { %6153 = vmatmul.mubr.bf16.vlgmr.msra.gmra.mrb[184].mxu0 %v6119_v41  ;;  %6194 = vmatmul.mubr.bf16.vlgmr.msra.gmra.mrb[184].mxu1 %v6119_v41  ;;  %v6393_v46 = vadd.f32 %v6376_v28, %v6375_v15  ;;  %v11512_v15 = vld [vmem:[#allocation34_spill] sm:$0xff] }
0x1de5   :  { %6233 = vmatpush1.bf16.msra.mxu0 %v10992_v51  ;;  %6274 = vmatpush1.bf16.msra.mxu1 %v10995_v54  ;;  %v11505_v51 = vld [vmem:[#allocation19_spill] sm:$0xff] }
0x1de6   :  { %6394 = vadd.xlane.f32.xlu1 %v6393_v46  ;;  %6234 = vmatprep.subr.bf16.mxu0 %v10998_v27  ;;  %v6381_v54 = vmul.f32 %v11100_v9, %v11505_v51 }
0x1de7   :  { %6275 = vmatprep.subr.bf16.mxu1 %v11001_v20  ;;  %6264 = vmatprep.mubr.bf16.mxu0 %v11304_v18  ;;  %v6386_v20 = vmul.f32 %v11103_v16, %v10800_v45 }
0x1de8   :  { %6305 = vmatprep.mubr.bf16.mxu1 %v11304_v18  ;;  %v6402_v27 = vadd.f32 %v6382_v57, %v6381_v54  ;;  %v11506_v18 = vld [vmem:[#allocation21_spill] sm:$0xff] }
0x1de9   :  { %6235 = vmatpush1.bf16.msra.mxu0 %v11006_v36  ;;  %6276 = vmatpush1.bf16.msra.mxu1 %v11009_v4  ;;  %v6385_v36 = vmul.f32 %v11100_v9, %v11506_v18 }
0x1dea   :  { %6397 = vadd.xlane.f32.xlu1 %v6396_v53  ;;  %6236 = vmatprep.subr.bf16.mxu0 %v11012_v44  ;;  %v11514_v53 = vld [vmem:[#allocation36_spill] sm:$0xff] }
0x1deb   :  { %6277 = vmatprep.subr.bf16.mxu1 %v11015_v23  ;;  %v6408_v4 = vadd.f32 %v6386_v20, %v6385_v36 }
0x1ded   :  { %6237 = vmatpush1.bf16.msra.mxu0 %v11018_v3  ;;  %6278 = vmatpush1.bf16.msra.mxu1 %v11021_v56  ;;  %v11507_v3 = vld [vmem:[#allocation29_spill] sm:$0xff] }
0x1dee   :  { %6403 = vadd.xlane.f32.xlu1 %v6402_v27  ;;  %6238 = vmatprep.subr.bf16.mxu0 %v11024_v26  ;;  %v11508_v26 = vld [vmem:[#allocation30_spill] sm:$0xff] }
0x1def   :  { %6279 = vmatprep.subr.bf16.mxu1 %v11027_v1 }
0x1df1   :  { %6239 = vmatpush1.bf16.msra.mxu0 %v11030_v50  ;;  %6280 = vmatpush1.bf16.msra.mxu1 %v11033_v37 }
0x1df2   :  { %6409 = vadd.xlane.f32.xlu1 %v6408_v4  ;;  %6240 = vmatprep.subr.bf16.mxu0 %v11036_v34  ;;  %v11509_v34 = vld [vmem:[#allocation31_spill] sm:$0xff] }
0x1df3   :  { %6281 = vmatprep.subr.bf16.mxu1 %v11039_v48 }
0x1df5   :  { %6241 = vmatpush1.bf16.msra.mxu0 %v11042_v11  ;;  %6282 = vmatpush1.bf16.msra.mxu1 %v11045_v61  ;;  %v11510_v11 = vld [vmem:[#allocation32_spill] sm:$0xff] }
0x1df6   :  { %6242 = vmatprep.subr.bf16.mxu0 %v11048_v24  ;;  %6283 = vmatprep.subr.bf16.mxu1 %v11051_v12 }
0x1df9   :  { %6243 = vmatpush1.bf16.msra.mxu0 %v11054_v10  ;;  %6284 = vmatpush1.bf16.msra.mxu1 %v11057_v13 }
0x1dfa   :  { %6244 = vmatprep.subr.bf16.mxu0 %v11060_v43  ;;  %6285 = vmatprep.subr.bf16.mxu1 %v11063_v40 }
0x1dfd   :  { %6245 = vmatpush1.bf16.msra.mxu0 %v11066_v30  ;;  %6286 = vmatpush1.bf16.msra.mxu1 %v11069_v55 }
0x1dfe   :  { %6246 = vmatprep.subr.bf16.mxu0 %v11072_v2  ;;  %6287 = vmatprep.subr.bf16.mxu1 %v11075_v58 }
0x1e01   :  { %6247 = vmatpush1.bf16.msra.mxu0 %v11078_v49  ;;  %6288 = vmatpush1.bf16.msra.mxu1 %v11081_v31 }
0x1eb7   :  { %v6154_v44 = vpop.f32.mrb[184].mxu0  ;;  %v6195_v23 = vpop.f32.mrb[184].mxu1 }
0x1eb8   :  { %v6202_v56 = vadd.f32 %v6154_v44, %v11507_v3  ;;  %v6204_v1 = vadd.f32 %v6195_v23, %v11508_v26  ;;  %v6156_v50 = vpop.f32.mrb[185].mxu0  ;;  %v6197_v37 = vpop.f32.mrb[185].mxu1 }
0x1eb9   :  { %v6203_v48 = vadd.f32 %v6156_v50, %v11509_v34  ;;  %v6205_v61 = vadd.f32 %v6197_v37, %v11510_v11  ;;  %v6158_v24 = vpop.f32.mrb[186].mxu0  ;;  %v6199_v12 = vpop.f32.mrb[186].mxu1 }
0x1eba   :  { %v6965_v10 = vmul.f32 -1.442695, %v6202_v56  ;;  %v6159_v13 = vpop.f32.mrb[187].mxu0  ;;  %v6200_v43 = vpop.f32.mrb[187].mxu1 }
0x1ebb   :  { %v6966_v40 = vmul.f32 -1.442695, %v6203_v48  ;;  %v6967_v30 = vmul.f32 -1.442695, %v6205_v61 }
0x1ebc   :  { %7943 = vpow2.f32 %v6965_v10 }
0x1ebd   :  { %7945 = vpow2.f32 %v6966_v40  ;;  %v11515_v40 = vld [vmem:[#allocation53_spill] sm:$0xff] }
0x1ebe   :  { %7947 = vpow2.f32 %v6967_v30  ;;  %v6371_v30 = vmul.f32 %v11100_v9, %v11515_v40 }
0x1ebf   :  { %7949 = vtanh.f32 %v6204_v1 }
0x1ec6   :  { %v7944_v55 = vpop.eup %7943 }
0x1ec7   :  { %v7946_v2 = vpop.eup %7945  ;;  %v6209_v58 = vadd.f32 1.0, %v7944_v55 }
0x1ec8   :  { %v6215_v49 = vadd.f32 1.0, %v7946_v2  ;;  %v7948_v31 = vpop.eup %7947 }
0x1ec9   :  { %7951 = vrcp.f32 %v6209_v58  ;;  %v7950_v17 = vpop.eup %7949  ;;  %v6222_v52 = vadd.f32 1.0, %v7948_v31 }
0x1eca   :  { %7953 = vrcp.f32 %v6215_v49  ;;  %v11516_v49 = vld [vmem:[#allocation54_spill] sm:$0xff] }
0x1ecb   :  { %7955 = vrcp.f32 %v6222_v52  ;;  %v6373_v31 = vmul.f32 %v11100_v9, %v11516_v49 }
0x1ed3   :  { %v7952_v22 = vpop.eup %7951 }
0x1ed4   :  { %v7954_v47 = vpop.eup %7953  ;;  %v6226_v29 = vmul.f32 %v7952_v22, %v7950_v17  ;;  %v6380_v22 = vmul.f32 %v11103_v16, %v10938_v63 }
0x1ed5   :  { %v6225_v6 = vmul.f32 %v7954_v47, %v11091_v19  ;;  %v7956_v42 = vpop.eup %7955  ;;  %v11517_v47 = vld [vmem:[#allocation18_spill] sm:$0xff] }
0x1ed7   :  { %v6227_v33 = vadd.f32 %v6226_v29, %v6225_v6  ;;  %v6379_v29 = vmul.f32 %v11100_v9, %v11517_v47  ;;  %v6384_v6 = vmul.f32 %v11103_v16, %v10846_v60 }
0x1ed9   :  { %7957 = vtanh.f32 %v6227_v33  ;;  %v6399_v52 = vadd.f32 %v6380_v22, %v6379_v29 }
0x1ee3   :  { %v7958_v21 = vpop.eup %7957 }
0x1ee4   :  { %v11160_v7 = vmul.f32 %v7958_v21, %v7956_v42 }
0x1ee6   :  { %v6231_v25 = vpack.c.bf16 %v11160_v7, %v11160_v7  ;;  %v6374_v58 = vmul.f32 %v11103_v16, %v11160_v7 }
0x1ee8   :  { %6265 = vmatmul.mubr.bf16.vlgmr.msra.gmra.mrb[188].mxu0 %v6231_v25  ;;  %6306 = vmatmul.mubr.bf16.vlgmr.msra.gmra.mrb[188].mxu1 %v6231_v25  ;;  %v6390_v17 = vadd.f32 %v6374_v58, %v6373_v31  ;;  %v6395_v25 = vpop.xlane.xlu1 %6394 }
0x1fbb   :  { %v6266_v59 = vpop.f32.mrb[188].mxu0  ;;  %v6307_v0 = vpop.f32.mrb[188].mxu1 }
0x1fbc   :  { %v6314_v41 = vadd.f32 %v6266_v59, %v11511_v32  ;;  %v6316_v28 = vadd.f32 %v6307_v0, %v11512_v15  ;;  %v6268_v46 = vpop.f32.mrb[189].mxu0  ;;  %v6309_v19 = vpop.f32.mrb[189].mxu1  ;;  %v6971_v32 = vld [vmem:[#allocation3] ss:$0 sm:$0xff] }
0x1fbd   :  { %v6315_v38 = vadd.f32 %v6268_v46, %v11513_v5  ;;  %v6317_v57 = vadd.f32 %v6309_v19, %v11514_v53  ;;  %v6270_v54 = vpop.f32.mrb[190].mxu0  ;;  %v6311_v27 = vpop.f32.mrb[190].mxu1  ;;  %v6420_v46 = vadd.f32 %v6971_v32, %v6395_v25 }
0x1fbe   :  { %v6968_v20 = vmul.f32 -1.442695, %v6314_v41  ;;  %v6271_v36 = vpop.f32.mrb[191].mxu0  ;;  %v6312_v4 = vpop.f32.mrb[191].mxu1 }
0x1fbf   :  { %v6969_v44 = vmul.f32 -1.442695, %v6315_v38  ;;  %v6970_v23 = vmul.f32 -1.442695, %v6317_v57  ;;  %v6398_v0 = vpop.xlane.xlu1 %6397 }
0x1fc0   :  { %7959 = vpow2.f32 %v6968_v20  ;;  %v6421_v53 = vadd.f32 %v6971_v32, %v6398_v0 }
0x1fc1   :  { %7961 = vpow2.f32 %v6969_v44 }
0x1fc2   :  { %7963 = vpow2.f32 %v6970_v23 }
0x1fc3   :  { %7965 = vtanh.f32 %v6316_v28  ;;  %v6404_v5 = vpop.xlane.xlu1 %6403 }
0x1fc4   :  { %v6423_v20 = vadd.f32 %v6971_v32, %v6404_v5 }
0x1fc7   :  { %v6410_v36 = vpop.xlane.xlu1 %6409 }
0x1fc8   :  { %v6425_v23 = vadd.f32 %v6971_v32, %v6410_v36 }
0x1fca   :  { %v7960_v3 = vpop.eup %7959 }
0x1fcb   :  { %v7962_v56 = vpop.eup %7961  ;;  %v6321_v26 = vadd.f32 1.0, %v7960_v3 }
0x1fcc   :  { %v6327_v1 = vadd.f32 1.0, %v7962_v56  ;;  %v7964_v50 = vpop.eup %7963 }
0x1fcd   :  { %7967 = vrcp.f32 %v6321_v26  ;;  %v7966_v37 = vpop.eup %7965  ;;  %v6334_v61 = vadd.f32 1.0, %v7964_v50 }
0x1fce   :  { %7969 = vrcp.f32 %v6327_v1 }
0x1fcf   :  { %7971 = vrcp.f32 %v6334_v61 }
0x1fd7   :  { %v7968_v34 = vpop.eup %7967 }
0x1fd8   :  { %v7970_v48 = vpop.eup %7969  ;;  %v6338_v11 = vmul.f32 %v7968_v34, %v7966_v37 }
0x1fd9   :  { %v6337_v24 = vmul.f32 %v7970_v48, %v6227_v33  ;;  %v7972_v10 = vpop.eup %7971  ;;  %v11518_v33 = vld [vmem:[#allocation20_spill] sm:$0xff] }
0x1fda   :  { %v6383_v42 = vmul.f32 %v11100_v9, %v11518_v33 }
0x1fdb   :  { %v6339_v12 = vadd.f32 %v6338_v11, %v6337_v24 }
0x1fdc   :  { %v6405_v21 = vadd.f32 %v6384_v6, %v6383_v42 }
0x1fdd   :  { %7973 = vtanh.f32 %v6339_v12 }
0x1fe7   :  { %v7974_v13 = vpop.eup %7973 }
0x1fe8   :  { %v11168_v43 = vmul.f32 %v7974_v13, %v7972_v10 }
0x1fea   :  { %v6372_v55 = vmul.f32 %v11103_v16, %v11168_v43 }
0x1fec   :  { %v6387_v2 = vadd.f32 %v6372_v55, %v6371_v30 }
0x1fee   :  { %6388 = vadd.xlane.f32.xlu0 %v6387_v2 }
0x1ff2   :  { %6391 = vadd.xlane.f32.xlu0 %v6390_v17 }
0x1ff6   :  { %6400 = vadd.xlane.f32.xlu0 %v6399_v52 }
0x1ffa   :  { %6406 = vadd.xlane.f32.xlu0 %v6405_v21 }
0x207b   :  { %v6389_v59 = vpop.xlane.xlu0 %6388 }
0x207c   :  { %v6418_v15 = vadd.f32 %v6971_v32, %v6389_v59 }
0x207f   :  { %v6392_v41 = vpop.xlane.xlu0 %6391 }
0x2080   :  { %v6419_v28 = vadd.f32 %v6971_v32, %v6392_v41 }
0x2082   :  { %v6426_v19 = vmax.f32 %v6418_v15, %v6419_v28 }
0x2083   :  { %v6401_v38 = vpop.xlane.xlu0 %6400 }
0x2084   :  { %v6427_v57 = vmax.f32 %v6426_v19, %v6420_v46  ;;  %v6422_v54 = vadd.f32 %v6971_v32, %v6401_v38 }
0x2086   :  { %v6428_v16 = vmax.f32 %v6427_v57, %v6421_v53 }
0x2087   :  { %v6407_v27 = vpop.xlane.xlu0 %6406 }
0x2088   :  { %v6429_v9 = vmax.f32 %v6428_v16, %v6422_v54  ;;  %v6424_v44 = vadd.f32 %v6971_v32, %v6407_v27 }
0x208a   :  { %v6430_v4 = vmax.f32 %v6429_v9, %v6423_v20 }
0x208c   :  { %v6431_v3 = vmax.f32 %v6430_v4, %v6424_v44 }
0x208e   :  { %v6432_v56 = vmax.f32 %v6431_v3, %v6425_v23 }
0x2090   :  { %v6433_v26 = vsub.f32 %v6418_v15, %v6432_v56  ;;  %v6446_v1 = vsub.f32 %v6419_v28, %v6432_v56  ;;  %v6459_v50 = vsub.f32 %v6420_v46, %v6432_v56  ;;  %v6472_v37 = vsub.f32 %v6421_v53, %v6432_v56 }
0x2091   :  { %v6485_v61 = vsub.f32 %v6422_v54, %v6432_v56  ;;  %v6498_v12 = vsub.f32 %v6423_v20, %v6432_v56  ;;  %v6511_v13 = vsub.f32 %v6424_v44, %v6432_v56  ;;  %v6524_v55 = vsub.f32 %v6425_v23, %v6432_v56 }
0x2092   :  { %v6434_v34 = vmul.f32 1.442695, %v6433_v26  ;;  %v6447_v48 = vmul.f32 1.442695, %v6446_v1  ;;  %v6460_v11 = vmul.f32 1.442695, %v6459_v50 }
0x2093   :  { %v6473_v24 = vmul.f32 1.442695, %v6472_v37  ;;  %v6486_v10 = vmul.f32 1.442695, %v6485_v61  ;;  %v6499_v30 = vmul.f32 1.442695, %v6498_v12 }
0x2094   :  { %7975 = vpow2.f32 %v6434_v34  ;;  %v6512_v2 = vmul.f32 1.442695, %v6511_v13  ;;  %v6525_v31 = vmul.f32 1.442695, %v6524_v55 }
0x2095   :  { %7977 = vpow2.f32 %v6447_v48 }
0x2096   :  { %7979 = vpow2.f32 %v6460_v11 }
0x2097   :  { %7981 = vpow2.f32 %v6473_v24 }
0x2098   :  { %7983 = vpow2.f32 %v6486_v10 }
0x2099   :  { %7985 = vpow2.f32 %v6499_v30 }
0x209a   :  { %7987 = vpow2.f32 %v6512_v2 }
0x209b   :  { %7989 = vpow2.f32 %v6525_v31 }
0x209e   :  { %v7976_v58 = vpop.eup %7975 }
0x209f   :  { %v7978_v17 = vpop.eup %7977  ;;  %6439 = vperm.xlu0 %6981, %v7976_v58  }
0x20a0   :  { %v6449_v22 = vadd.f32 %v7978_v17, %v7976_v58  ;;  %6452 = vperm.xlu1 %6982, %v7978_v17   ;;  %v7980_v29 = vpop.eup %7979 }
0x20a1   :  { %v7982_v6 = vpop.eup %7981 }
0x20a2   :  { %v6462_v52 = vadd.f32 %v7980_v29, %v6449_v22  ;;  %v7984_v21 = vpop.eup %7983 }
0x20a3   :  { %v7986_v59 = vpop.eup %7985 }
0x20a4   :  { %v6475_v42 = vadd.f32 %v7982_v6, %v6462_v52  ;;  %6465 = vperm.xlu1 %6982, %v7980_v29   ;;  %v7988_v32 = vpop.eup %7987 }
0x20a5   :  { %v7990_v15 = vpop.eup %7989 }
0x20a6   :  { %v6488_v25 = vadd.f32 %v7984_v21, %v6475_v42 }
0x20a8   :  { %v6501_v0 = vadd.f32 %v7986_v59, %v6488_v25  ;;  %6478 = vperm.xlu1 %6982, %v7982_v6  }
0x20aa   :  { %v6514_v41 = vadd.f32 %v7988_v32, %v6501_v0 }
0x20ac   :  { %6491 = vperm.xlu1 %6982, %v7984_v21   ;;  %v6527_v28 = vadd.f32 %v7990_v15, %v6514_v41 }
0x20ae   :  { %7991 = vrcp.f32 %v6527_v28 }
0x20b0   :  { %6504 = vperm.xlu1 %6982, %v7986_v59  }
0x20b4   :  { %6517 = vperm.xlu1 %6982, %v7988_v32  }
0x20b8   :  { %6530 = vperm.xlu1 %6982, %v7990_v15   ;;  %v7992_v46 = vpop.eup %7991 }
0x20bc   :  { %6540 = vperm.xlu1 %6982, %v7992_v46  }
0x211e   :  { %v6440_v38 = vpop.permute.xlu0 %6439 }
0x211f   :  { %v6453_v19 = vpop.permute.xlu1 %6452  ;;  %v6442_v54 = vmul.f32 %v6440_v38, %v11515_v40  ;;  %v6443_v27 = vmul.f32 %v6440_v38, %v11168_v43 }
0x2120   :  { %v6455_v57 = vmul.f32 %v6453_v19, %v11516_v49  ;;  %v6456_v16 = vmul.f32 %v6453_v19, %v11160_v7 }
0x2122   :  { %v6457_v4 = vadd.f32 %v6455_v57, %v6442_v54  ;;  %v6458_v44 = vadd.f32 %v6456_v16, %v6443_v27 }
0x2123   :  { %v6466_v5 = vpop.permute.xlu1 %6465 }
0x2124   :  { %v6468_v9 = vmul.f32 %v6466_v5, %v11503_v39  ;;  %v6469_v36 = vmul.f32 %v6466_v5, %v11097_v8 }
0x2126   :  { %v6470_v26 = vadd.f32 %v6468_v9, %v6457_v4  ;;  %v6471_v49 = vadd.f32 %v6469_v36, %v6458_v44 }
0x2127   :  { %v6479_v53 = vpop.permute.xlu1 %6478 }
0x2128   :  { %v6481_v23 = vmul.f32 %v6479_v53, %v11504_v35  ;;  %v6482_v3 = vmul.f32 %v6479_v53, %v10988_v14 }
0x212a   :  { %v6483_v1 = vadd.f32 %v6481_v23, %v6470_v26  ;;  %v6484_v43 = vadd.f32 %v6482_v3, %v6471_v49 }
0x212b   :  { %v6492_v20 = vpop.permute.xlu1 %6491 }
0x212c   :  { %v6494_v7 = vmul.f32 %v6492_v20, %v11517_v47  ;;  %v6495_v40 = vmul.f32 %v6492_v20, %v10938_v63 }
0x212e   :  { %v6496_v37 = vadd.f32 %v6494_v7, %v6483_v1  ;;  %v6497_v34 = vadd.f32 %v6495_v40, %v6484_v43 }
0x212f   :  { %v6505_v56 = vpop.permute.xlu1 %6504 }
0x2130   :  { %v6507_v50 = vmul.f32 %v6505_v56, %v11505_v51  ;;  %v6508_v39 = vmul.f32 %v6505_v56, %v10892_v62 }
0x2132   :  { %v6509_v48 = vadd.f32 %v6507_v50, %v6496_v37  ;;  %v6510_v11 = vadd.f32 %v6508_v39, %v6497_v34 }
0x2133   :  { %v6518_v8 = vpop.permute.xlu1 %6517 }
0x2134   :  { %v6520_v35 = vmul.f32 %v6518_v8, %v11518_v33  ;;  %v6521_v14 = vmul.f32 %v6518_v8, %v10846_v60 }
0x2136   :  { %v6522_v24 = vadd.f32 %v6520_v35, %v6509_v48  ;;  %v6523_v47 = vadd.f32 %v6521_v14, %v6510_v11 }
0x2137   :  { %v6531_v61 = vpop.permute.xlu1 %6530 }
0x2138   :  { %v6533_v63 = vmul.f32 %v6531_v61, %v11506_v18  ;;  %v6534_v12 = vmul.f32 %v6531_v61, %v10800_v45 }
0x213a   :  { %v6535_v10 = vadd.f32 %v6533_v63, %v6522_v24  ;;  %v6536_v51 = vadd.f32 %v6534_v12, %v6523_v47 }
0x213b   :  { %v6541_v13 = vpop.permute.xlu1 %6540 }
0x213c   :  { %v6543_v62 = vmul.f32 %v6541_v13, %v6535_v10  ;;  %v6544_v30 = vmul.f32 %v6541_v13, %v6536_v51 }
0x213e   :  { %6545 = vst [vmem:[%s11223_s15] sm:$0xff] %v6543_v62  ;;  %6546 = vst [vmem:[%s11223_s15 + $0x8] sm:$0xff] %v6544_v30 }
0x213f   :  { %6551 = vsyncpa [#allocation5], 1 }
0x2140   :  { %6552 = vsyncpa [#allocation7], 1 }
0x2141   :  { %6553 = vsyncpa [#allocation10], 1 }
0x2142   :  { %6554 = vsyncpa [#allocation13], 1 }

</bundles_post_ra>
